<compile_context>
chip_gen: v5e
topology: v5e:2x2
jax: 0.10.0
libtpu: 0.0.40
codegen_flags: <defaults>
</compile_context>

<pallas_src>
import functools

import jax
import jax.numpy as jnp
from jax.experimental import pallas as pl
from jax.experimental.pallas import tpu as pltpu

LN_EPS = 1e-5
NEG_INF = -1e30
VMEM_LIMIT = 32 * 1024 * 1024       # safe on v5e (16 MiB scoped default) and within v7x's 64 MiB
_SQRT_2_OVER_PI = 0.7978845608028654


def _gelu(x):
    return 0.5 * x * (1.0 + jnp.tanh(_SQRT_2_OVER_PI * (x + 0.044715 * x * x * x)))


def _ln_core(x):
    mu = jnp.mean(x, axis=-1, keepdims=True)
    xc = x - mu
    var = jnp.mean(xc * xc, axis=-1, keepdims=True)
    return xc * jax.lax.rsqrt(var + LN_EPS)


def _cp():
    return pltpu.CompilerParams(dimension_semantics=("parallel",),
                                vmem_limit_bytes=VMEM_LIMIT)


# ------------------------------- in-kernel building blocks -------------------------------

def _mha_proj(q, k, v, mask, wo, scale, num_heads, bias_fn=None):
    """Masked multi-head attention fused with the output projection.

    Heads are accumulated directly through per-head row-slices of Wo, so the merged (Lq, C)
    attention output is never materialized via a lane-dim concatenate.  `mask` (True = masked)
    broadcasts against the (Lq, Lk) logits.  The post-softmax masked_fill is kept so fully
    masked rows come out exactly zero (matches torch NaN -> masked_fill semantics).
    """
    c = q.shape[-1]
    d = c // num_heads
    acc = jnp.zeros((q.shape[0], wo.shape[-1]), jnp.float32)
    for g in range(num_heads):
        qg = q[:, g * d:(g + 1) * d]
        kg = k[:, g * d:(g + 1) * d]
        vg = v[:, g * d:(g + 1) * d]
        logits = jax.lax.dot_general(qg.astype(jnp.bfloat16), kg.astype(jnp.bfloat16),
                                     (((1,), (1,)), ((), ())),
                                     preferred_element_type=jnp.float32)
        if bias_fn is not None:
            # ViP AnyAttention order: rel-pos bias added BEFORE `attn *= self.scale`.
            logits = logits + bias_fn(qg)
        logits = logits * scale
        logits = jnp.where(mask, NEG_INF, logits)
        m = jnp.max(logits, axis=-1, keepdims=True)
        e = jnp.exp(logits - m)
        p = e * pl.reciprocal(jnp.sum(e, axis=-1, keepdims=True), approx=True)
        p = jnp.where(mask, 0.0, p)
        ctx = jnp.dot(p.astype(jnp.bfloat16), vg.astype(jnp.bfloat16),
                      preferred_element_type=jnp.float32)
        acc = acc + jnp.dot(ctx.astype(jnp.bfloat16), wo[g * d:(g + 1) * d, :],
                            preferred_element_type=jnp.float32)
    return acc


def _ffn(x, w1, b1, w2, b2, with_norm):
    # For ffn1/ffn2 the LayerNorm affine is pre-folded into w1/b1, only the LN core runs here.
    xn = _ln_core(x) if with_norm else x
    h = _gelu(jnp.dot(xn.astype(jnp.bfloat16), w1, preferred_element_type=jnp.float32) + b1)
    return jnp.dot(h.astype(jnp.bfloat16), w2, preferred_element_type=jnp.float32) + b2


# ------------------------------- Pallas kernels -------------------------------

def _encoder_kernel(parts_ref, feats_ref, qpos_ref, kmask_ref,
                    wq_ref, bq_ref, wkv_ref, bkv_ref, wo_ref, bo_ref,
                    rg_ref, rb_ref, wr_ref, w1_ref, b1_ref, w2_ref, b2_ref,
                    o_ref, *, num_heads, scale):
    parts = parts_ref[0].astype(jnp.float32)                 # (N, C)
    feats = feats_ref[0].astype(jnp.float32)                 # (L, C)
    qpos = qpos_ref[0].astype(jnp.float32)                   # (N, C)
    kmask = kmask_ref[0] > 0.5                               # (1, L) key mask
    c = parts.shape[-1]

    # LN affines pre-folded into the projection weights; k and v share one LN + one wide matmul.
    q = jnp.dot(_ln_core(parts + qpos).astype(jnp.bfloat16), wq_ref[...],
                preferred_element_type=jnp.float32) + bq_ref[...]
    kv = jnp.dot(_ln_core(feats).astype(jnp.bfloat16), wkv_ref[...],
                 preferred_element_type=jnp.float32) + bkv_ref[...]

    attn = _mha_proj(q, kv[:, :c], kv[:, c:], kmask, wo_ref[...], scale, num_heads)
    p1 = parts + attn + bo_ref[...]

    # SimpleReasoning: x + Conv1d(LN(x))  -> token-mixing (N, N) matmul, no bias.
    t = _ln_core(p1) * rg_ref[...] + rb_ref[...]
    p2 = p1 + jnp.dot(wr_ref[...], t.astype(jnp.bfloat16), preferred_element_type=jnp.float32)

    # enc_ffn (Mlp without norm) + residual.
    p3 = p2 + _ffn(p2, w1_ref[...], b1_ref[...], w2_ref[...], b2_ref[...], with_norm=False)
    o_ref[0] = p3.astype(o_ref.dtype)


def _dec1_kernel(x_ref, parts_ref, kpos_ref, qmask_ref,
                 wq_ref, bq_ref, wk_ref, bk_ref, wv_ref, bv_ref, wo_ref, bo_ref,
                 w1_ref, b1_ref, w2_ref, b2_ref, o_ref, *, num_heads, scale):
    x = x_ref[0].astype(jnp.float32)                         # (L, C)
    parts = parts_ref[0].astype(jnp.float32)                 # (N, C)
    kpos = kpos_ref[0].astype(jnp.float32)                   # (N, C)
    qmask = qmask_ref[0] > 0.5                               # (L, 1) query mask

    q = jnp.dot(_ln_core(x).astype(jnp.bfloat16), wq_ref[...],
                preferred_element_type=jnp.float32) + bq_ref[...]
    k = jnp.dot(_ln_core(parts + kpos).astype(jnp.bfloat16), wk_ref[...],
                preferred_element_type=jnp.float32) + bk_ref[...]
    v = jnp.dot(_ln_core(parts).astype(jnp.bfloat16), wv_ref[...],
                preferred_element_type=jnp.float32) + bv_ref[...]

    attn = _mha_proj(q, k, v, qmask, wo_ref[...], scale, num_heads)
    out1 = x + attn + bo_ref[...]
    out2 = out1 + _ffn(out1, w1_ref[...], b1_ref[...], w2_ref[...], b2_ref[...], with_norm=True)
    o_ref[0] = out2.astype(o_ref.dtype)


def _dec2_kernel(x_ref, km_ref, rm_ref, ahw_ref,
                 wqkv_ref, bqkv_ref, wo_ref, bo_ref,
                 w1_ref, b1_ref, w2_ref, b2_ref,
                 o_ref, attn_scr, *, num_patches, patch_tokens, num_heads, scale):
    x = x_ref[0].astype(jnp.float32)                         # (L, C), L = P * K
    km = km_ref[0] > 0.5                                     # (P, K) per-patch key mask
    rm = rm_ref[0] > 0.5                                     # (L, 1) row (token) mask
    ahw = ahw_ref[...].astype(jnp.float32)                   # (K, K, d) rel-pos key table
    c = x.shape[-1]
    k_tok = patch_tokens

    # q/k/v all read the same tensor: one LN core + one wide (C, 3C) matmul.
    qkv = jnp.dot(_ln_core(x).astype(jnp.bfloat16), wqkv_ref[...],
                  preferred_element_type=jnp.float32) + bqkv_ref[...]
    q = qkv[:, :c]
    k = qkv[:, c:2 * c]
    v = qkv[:, 2 * c:]
    wo = wo_ref[...]

    def rel_bias(qg):
        # bias[q, k] = <q_first_half, rel_h[k_h-q_h]> + <q_second_half, rel_w[k_w-q_w]>
        # built as a VPU broadcast-multiply + lane reduce (no MXU, no one-hot inputs).
        return jnp.sum(qg[:, None, :] * ahw, axis=-1)

    # All patches of this batch element handled inside one grid step; per-patch projected
    # outputs are written into a VMEM scratch so the FFN runs once on the full (L, C) slab.
    for p in range(num_patches):
        r0 = p * k_tok
        acc = _mha_proj(q[r0:r0 + k_tok, :], k[r0:r0 + k_tok, :], v[r0:r0 + k_tok, :],
                        km[p:p + 1, :], wo, scale, num_heads, bias_fn=rel_bias)
        attn_scr[r0:r0 + k_tok, :] = acc

    attn = attn_scr[...] + bo_ref[...]
    attn = jnp.where(rm, 0.0, attn)                          # masked_fill(local_mask, 0)
    out1 = x + attn
    out2 = out1 + _ffn(out1, w1_ref[...], b1_ref[...], w2_ref[...], b2_ref[...], with_norm=True)
    o_ref[0] = out2.astype(o_ref.dtype)


# ------------------------------- kernel wrappers -------------------------------

def _const(shape):
    return pl.BlockSpec(shape, lambda i, _n=len(shape): (0,) * _n)


def _per_b(shape):
    return pl.BlockSpec((1,) + shape, lambda i: (i, 0, 0))


def encoder_fused(parts, feats, qpos_full, kmask, w, *, num_heads, scale):
    b, n, c = parts.shape
    l = feats.shape[1]
    hid = w['w1'].shape[1]
    return pl.pallas_call(
        functools.partial(_encoder_kernel, num_heads=num_heads, scale=scale),
        out_shape=jax.ShapeDtypeStruct((b, n, c), jnp.float32),
        grid=(b,),
        in_specs=[_per_b((n, c)), _per_b((l, c)), _per_b((n, c)), _per_b((1, l)),
                  _const((c, c)), _const((1, c)),
                  _const((c, 2 * c)), _const((1, 2 * c)),
                  _const((c, c)), _const((1, c)),
                  _const((1, c)), _const((1, c)), _const((n, n)),
                  _const((c, hid)), _const((1, hid)), _const((hid, c)), _const((1, c))],
        out_specs=_per_b((n, c)),
        compiler_params=_cp(),
    )(parts, feats, qpos_full, kmask,
      w['wq'], w['bq'], w['wkv'], w['bkv'], w['wo'], w['bo'],
      w['rg'], w['rb'], w['wr'], w['w1'], w['b1'], w['w2'], w['b2'])


def dec_stage1(x, parts, kpos_full, qmask, w, *, num_heads, scale):
    b, l, c = x.shape
    n = parts.shape[1]
    hid = w['w1'].shape[1]
    return pl.pallas_call(
        functools.partial(_dec1_kernel, num_heads=num_heads, scale=scale),
        out_shape=jax.ShapeDtypeStruct((b, l, c), jnp.float32),
        grid=(b,),
        in_specs=[_per_b((l, c)), _per_b((n, c)), _per_b((n, c)), _per_b((l, 1)),
                  _const((c, c)), _const((1, c)),
                  _const((c, c)), _const((1, c)),
                  _const((c, c)), _const((1, c)),
                  _const((c, c)), _const((1, c)),
                  _const((c, hid)), _const((1, hid)), _const((hid, c)), _const((1, c))],
        out_specs=_per_b((l, c)),
        compiler_params=_cp(),
    )(x, parts, kpos_full, qmask,
      w['wq'], w['bq'], w['wk'], w['bk'], w['wv'], w['bv'], w['wo'], w['bo'],
      w['w1'], w['b1'], w['w2'], w['b2'])


def dec_stage2(x, km, rm, w, *, num_patches, patch_tokens, num_heads, scale):
    b, l, c = x.shape
    hid = w['w1'].shape[1]
    kk, _, d = w['ahw'].shape
    return pl.pallas_call(
        functools.partial(_dec2_kernel, num_patches=num_patches, patch_tokens=patch_tokens,
                          num_heads=num_heads, scale=scale),
        out_shape=jax.ShapeDtypeStruct((b, l, c), jnp.float32),
        grid=(b,),
        in_specs=[_per_b((l, c)), _per_b((num_patches, patch_tokens)), _per_b((l, 1)),
                  _const((kk, kk, d)),
                  _const((c, 3 * c)), _const((1, 3 * c)),
                  _const((c, c)), _const((1, c)),
                  _const((c, hid)), _const((1, hid)), _const((hid, c)), _const((1, c))],
        out_specs=_per_b((l, c)),
        scratch_shapes=[pltpu.VMEM((l, c), jnp.float32)],
        compiler_params=_cp(),
    )(x, km, rm, w['ahw'],
      w['wqkv'], w['bqkv'], w['wo'], w['bo'], w['w1'], w['b1'], w['w2'], w['b2'])


# ------------------------------- one-time weight preparation (outside jit) -------------------------------

def fold_ln(gamma, beta, w, b=None):
    # (gamma * xn + beta) @ W + b  ==  xn @ (diag(gamma) W) + (beta @ W + b)
    wf = gamma.reshape(-1, 1) * w
    bf = beta.reshape(1, -1) @ w
    if b is not None:
        bf = bf + b
    return wf, bf


def rel_pos_table(rel_emb_h, rel_emb_w, h, w):
    """AHW[q, k, :] = concat(rel_emb_h[k_h - q_h + h-1], rel_emb_w[k_w - q_w + w-1]).

    First half of the head dim pairs with the h table, second half with w (FullRelPos order).
    Used in-kernel as bias[q, k] = sum_c q_head[q, c] * AHW[q, k, c].
    """
    kk = h * w
    qh = jnp.arange(kk) // w
    qw = jnp.arange(kk) % w
    ih = qh[None, :] - qh[:, None] + (h - 1)                 # [query, key] -> k_h - q_h + (h-1)
    iw = qw[None, :] - qw[:, None] + (w - 1)
    return jnp.concatenate([rel_emb_h[ih], rel_emb_w[iw]], axis=-1).astype(jnp.float32)


def prepare_params(p, *, num_heads, patch_side):
    """Fold LayerNorms into projection weights, pack q/k/v, cast MXU operands to bf16 and build
    the rel-pos table.  Runs once, eagerly — nothing here re-executes inside the jitted forward."""
    bf = lambda a: a.astype(jnp.bfloat16)

    def attn_fold(pa):
        wq, bq = fold_ln(pa['nq_g'], pa['nq_b'], pa['wq'])
        wk, bk = fold_ln(pa['nk_g'], pa['nk_b'], pa['wk'])
        wv, bv = fold_ln(pa['nv_g'], pa['nv_b'], pa['wv'])
        return wq, bq, wk, bk, wv, bv

    prep = {}
    # --- encoder: enc_attn + SimpleReasoning + enc_ffn ---
    wq, bq, wk, bk, wv, bv = attn_fold(p['enc_attn'])
    prep['enc'] = dict(
        wq=bf(wq), bq=bq,
        wkv=bf(jnp.concatenate([wk, wv], axis=1)), bkv=jnp.concatenate([bk, bv], axis=1),
        wo=bf(p['enc_attn']['wo']), bo=p['enc_attn']['bo'],
        rg=p['reason']['n_g'], rb=p['reason']['n_b'], wr=bf(p['reason']['w']),
        w1=bf(p['enc_ffn']['w1']), b1=p['enc_ffn']['b1'],
        w2=bf(p['enc_ffn']['w2']), b2=p['enc_ffn']['b2'])
    # --- decoder stage 1: attn1 + ffn1 (ffn LN folded into fc1) ---
    wq, bq, wk, bk, wv, bv = attn_fold(p['attn1'])
    w1, b1 = fold_ln(p['ffn1']['n_g'], p['ffn1']['n_b'], p['ffn1']['w1'], p['ffn1']['b1'])
    prep['dec1'] = dict(
        wq=bf(wq), bq=bq, wk=bf(wk), bk=bk, wv=bf(wv), bv=bv,
        wo=bf(p['attn1']['wo']), bo=p['attn1']['bo'],
        w1=bf(w1), b1=b1, w2=bf(p['ffn1']['w2']), b2=p['ffn1']['b2'])
    # --- decoder stage 2: attn2 (q=k=v input -> one wide QKV) + rel-pos + ffn2 ---
    wq, bq, wk, bk, wv, bv = attn_fold(p['attn2'])
    w1, b1 = fold_ln(p['ffn2']['n_g'], p['ffn2']['n_b'], p['ffn2']['w1'], p['ffn2']['b1'])
    prep['dec2'] = dict(
        wqkv=bf(jnp.concatenate([wq, wk, wv], axis=1)),
        bqkv=jnp.concatenate([bq, bk, bv], axis=1),
        wo=bf(p['attn2']['wo']), bo=p['attn2']['bo'],
        w1=bf(w1), b1=b1, w2=bf(p['ffn2']['w2']), b2=p['ffn2']['b2'],
        ahw=rel_pos_table(p['rel_emb_h'], p['rel_emb_w'], patch_side, patch_side))
    return prep


# ------------------------------- jitted forward (3 pallas_calls) -------------------------------

def vip_block_forward(prep, x, parts, part_qpos, part_kpos, mask, *,
                      num_heads, num_enc_heads, patch_side):
    b, P, K, c = x.shape
    l = P * K
    x_flat = x.reshape(b, l, c)                              # 'b p k c -> b (p k) c'

    # ---- Encoder: parts <- enc_attn + SimpleReasoning + enc_ffn ----
    qpos_full = jnp.tile(part_qpos[:, :, 0, :], (1, 1, num_enc_heads))   # apply_pos over heads
    kmask = mask.reshape(b, 1, l)                                        # mask.view(B,1,1,L)
    parts_out = encoder_fused(parts, x_flat, qpos_full, kmask, prep['enc'],
                              num_heads=num_enc_heads, scale=(c // num_enc_heads) ** -0.5)

    # ---- Decoder stage 1: attn1 (query mask) + ffn1 ----
    kpos_full = jnp.tile(part_kpos[:, :, 0, :], (1, 1, num_heads))
    tok_mask = mask.reshape(b, l, 1)                                     # 'b h w -> b (h w) 1 1'
    out = dec_stage1(x_flat, parts_out, kpos_full, tok_mask, prep['dec1'],
                     num_heads=num_heads, scale=(c // num_heads) ** -0.5)

    # ---- Decoder stage 2: local attn2 (rel-pos, per-patch key mask, row mask) + ffn2 ----
    km = mask.reshape(b, P, K)                                           # '(b p) 1 1 k'
    feats = dec_stage2(out, km, tok_mask, prep['dec2'],
                       num_patches=P, patch_tokens=K,
                       num_heads=num_heads, scale=(c // num_heads) ** -0.5)
    return feats.reshape(b, P, K, c), parts_out, part_qpos, mask


# ------------------------------- deterministic params -------------------------------

def init_params(key, c, n_parts, num_heads, ffn_exp, patch_side):
    keys = iter(jax.random.split(key, 64))

    def w(shape, std=0.02):
        return std * jax.random.normal(next(keys), shape, jnp.float32)

    def attn_params():
        return dict(nq_g=jnp.ones((1, c)), nq_b=jnp.zeros((1, c)),
                    nk_g=jnp.ones((1, c)), nk_b=jnp.zeros((1, c)),
                    nv_g=jnp.ones((1, c)), nv_b=jnp.zeros((1, c)),
                    wq=w((c, c)), wk=w((c, c)), wv=w((c, c)),
                    wo=w((c, c)), bo=jnp.zeros((1, c)))

    def mlp_params(hidden, with_norm):
        d = dict(w1=w((c, hidden)), b1=jnp.zeros((1, hidden)),
                 w2=w((hidden, c)), b2=jnp.zeros((1, c)))
        if with_norm:
            d.update(n_g=jnp.ones((1, c)), n_b=jnp.zeros((1, c)))
        return d

    head_dim = c // num_heads
    rel_std = head_dim ** -0.5
    return dict(
        enc_attn=attn_params(),
        reason=dict(n_g=jnp.ones((1, c)), n_b=jnp.zeros((1, c)), w=w((n_parts, n_parts))),
        enc_ffn=mlp_params(c, with_norm=False),
        attn1=attn_params(),
        attn2=attn_params(),
        rel_emb_w=w((2 * patch_side - 1, head_dim // 2), std=rel_std),
        rel_emb_h=w((2 * patch_side - 1, head_dim // 2), std=rel_std),
        ffn1=mlp_params(c * ffn_exp, with_norm=True),
        ffn2=mlp_params(c * ffn_exp, with_norm=True),
    )


# ------------------------------- main -------------------------------

if __name__ == "__main__":
    B, C = 2, 256
    patch_side = 2                       # tokens per patch K = patch_side^2
    K = patch_side * patch_side
    P = 4                                # patch_num
    N = 8                                # num_parts
    num_heads, num_enc_heads, ffn_exp = 2, 2, 2

    key = jax.random.PRNGKey(0)
    kp, k1, k2, k3, k4 = jax.random.split(key, 5)
    params = init_params(kp, C, N, num_heads, ffn_exp, patch_side)
    prep = prepare_params(params, num_heads=num_heads, patch_side=patch_side)

    x = jax.random.normal(k1, (B, P, K, C), jnp.float32)
    parts = jax.random.normal(k2, (B, N, C), jnp.float32)
    part_qpos = 0.02 * jax.random.normal(k3, (B, N, 1, C // num_enc_heads), jnp.float32)
    part_kpos = 0.02 * jax.random.normal(k4, (B, N, 1, C // num_heads), jnp.float32)
    mask = jnp.zeros((B, 1, P, K), jnp.float32)       # mask==1 means "masked out"

    fwd = jax.jit(functools.partial(vip_block_forward,
                                    num_heads=num_heads,
                                    num_enc_heads=num_enc_heads,
                                    patch_side=patch_side))
    feats, parts_out, qpos_out, mask_out = fwd(prep, x, parts, part_qpos, part_kpos, mask)
    jax.block_until_ready((feats, parts_out, qpos_out, mask_out))

    assert feats.shape == (B, P, K, C)
    assert parts_out.shape == (B, N, C)
    assert qpos_out.shape == part_qpos.shape
    assert mask_out.shape == mask.shape
    assert bool(jnp.all(jnp.isfinite(feats))) and bool(jnp.all(jnp.isfinite(parts_out)))
    print("KERNEL_OK")
</pallas_src>

<mosaic_0001>
module attributes {stable_mosaic.version = 11 : i64} {
  func.func @_encoder_kernel(%arg0: i32, %arg1: memref<1x8x256xf32, #tpu.memory_space<vmem>>, %arg2: memref<1x16x256xf32, #tpu.memory_space<vmem>>, %arg3: memref<1x8x256xf32, #tpu.memory_space<vmem>>, %arg4: memref<1x1x16xf32, #tpu.memory_space<vmem>>, %arg5: memref<256x256xbf16, #tpu.memory_space<vmem>>, %arg6: memref<1x256xf32, #tpu.memory_space<vmem>>, %arg7: memref<256x512xbf16, #tpu.memory_space<vmem>>, %arg8: memref<1x512xf32, #tpu.memory_space<vmem>>, %arg9: memref<256x256xbf16, #tpu.memory_space<vmem>>, %arg10: memref<1x256xf32, #tpu.memory_space<vmem>>, %arg11: memref<1x256xf32, #tpu.memory_space<vmem>>, %arg12: memref<1x256xf32, #tpu.memory_space<vmem>>, %arg13: memref<8x8xbf16, #tpu.memory_space<vmem>>, %arg14: memref<256x256xbf16, #tpu.memory_space<vmem>>, %arg15: memref<1x256xf32, #tpu.memory_space<vmem>>, %arg16: memref<256x256xbf16, #tpu.memory_space<vmem>>, %arg17: memref<1x256xf32, #tpu.memory_space<vmem>>, %arg18: memref<1x8x256xf32, #tpu.memory_space<vmem>>) attributes {dimension_semantics = [#tpu.dimension_semantics<parallel>], iteration_bounds = array<i64: 2>, scalar_prefetch = 0 : i64, scratch_operands = 0 : i64, tpu.core_type = #tpu.core_type<tc>, window_params = [{transform_indices = @transform_0, window_bounds = array<i64: 1, 8, 256>}, {transform_indices = @transform_1, window_bounds = array<i64: 1, 16, 256>}, {transform_indices = @transform_2, window_bounds = array<i64: 1, 8, 256>}, {transform_indices = @transform_3, window_bounds = array<i64: 1, 1, 16>}, {pipeline_mode = #tpu.pipeline_mode<synchronous>, transform_indices = @transform_4, window_bounds = array<i64: 256, 256>}, {pipeline_mode = #tpu.pipeline_mode<synchronous>, transform_indices = @transform_5, window_bounds = array<i64: 1, 256>}, {pipeline_mode = #tpu.pipeline_mode<synchronous>, transform_indices = @transform_6, window_bounds = array<i64: 256, 512>}, {pipeline_mode = #tpu.pipeline_mode<synchronous>, transform_indices = @transform_7, window_bounds = array<i64: 1, 512>}, {pipeline_mode = #tpu.pipeline_mode<synchronous>, transform_indices = @transform_8, window_bounds = array<i64: 256, 256>}, {pipeline_mode = #tpu.pipeline_mode<synchronous>, transform_indices = @transform_9, window_bounds = array<i64: 1, 256>}, {pipeline_mode = #tpu.pipeline_mode<synchronous>, transform_indices = @transform_10, window_bounds = array<i64: 1, 256>}, {pipeline_mode = #tpu.pipeline_mode<synchronous>, transform_indices = @transform_11, window_bounds = array<i64: 1, 256>}, {pipeline_mode = #tpu.pipeline_mode<synchronous>, transform_indices = @transform_12, window_bounds = array<i64: 8, 8>}, {pipeline_mode = #tpu.pipeline_mode<synchronous>, transform_indices = @transform_13, window_bounds = array<i64: 256, 256>}, {pipeline_mode = #tpu.pipeline_mode<synchronous>, transform_indices = @transform_14, window_bounds = array<i64: 1, 256>}, {pipeline_mode = #tpu.pipeline_mode<synchronous>, transform_indices = @transform_15, window_bounds = array<i64: 256, 256>}, {pipeline_mode = #tpu.pipeline_mode<synchronous>, transform_indices = @transform_16, window_bounds = array<i64: 1, 256>}, {transform_indices = @transform_17, window_bounds = array<i64: 1, 8, 256>}]} {
    %c0 = arith.constant 0 : index
    %c0_0 = arith.constant 0 : index
    %c0_1 = arith.constant 0 : index
    %0 = vector.load %arg1[%c0, %c0_0, %c0_1] : memref<1x8x256xf32, #tpu.memory_space<vmem>>, vector<1x8x256xf32>
    %1 = vector.shape_cast %0 : vector<1x8x256xf32> to vector<8x256xf32>
    %c0_2 = arith.constant 0 : index
    %c0_3 = arith.constant 0 : index
    %c0_4 = arith.constant 0 : index
    %2 = vector.load %arg2[%c0_2, %c0_3, %c0_4] : memref<1x16x256xf32, #tpu.memory_space<vmem>>, vector<1x16x256xf32>
    %3 = vector.shape_cast %2 : vector<1x16x256xf32> to vector<16x256xf32>
    %c0_5 = arith.constant 0 : index
    %c0_6 = arith.constant 0 : index
    %c0_7 = arith.constant 0 : index
    %4 = vector.load %arg3[%c0_5, %c0_6, %c0_7] : memref<1x8x256xf32, #tpu.memory_space<vmem>>, vector<1x8x256xf32>
    %5 = vector.shape_cast %4 : vector<1x8x256xf32> to vector<8x256xf32>
    %c0_8 = arith.constant 0 : index
    %c0_9 = arith.constant 0 : index
    %c0_10 = arith.constant 0 : index
    %6 = vector.load %arg4[%c0_8, %c0_9, %c0_10] : memref<1x1x16xf32, #tpu.memory_space<vmem>>, vector<1x1x16xf32>
    %7 = vector.shape_cast %6 : vector<1x1x16xf32> to vector<1x16xf32>
    %cst = arith.constant 5.000000e-01 : f32
    %8 = vector.broadcast %cst : f32 to vector<1x16xf32>
    %9 = arith.cmpf ogt, %7, %8 : vector<1x16xf32>
    %10 = arith.addf %1, %5 : vector<8x256xf32>
    %cst_11 = arith.constant dense<0.000000e+00> : vector<8xf32>
    %11 = vector.multi_reduction <add>, %10, %cst_11 [1] : vector<8x256xf32> to vector<8xf32>
    %12 = vector.shape_cast %11 : vector<8xf32> to vector<8x1xf32>
    %cst_12 = arith.constant 2.560000e+02 : f32
    %13 = vector.broadcast %cst_12 : f32 to vector<8x1xf32>
    %14 = arith.divf %12, %13 : vector<8x1xf32>
    %15 = vector.broadcast %14 : vector<8x1xf32> to vector<8x256xf32>
    %16 = arith.subf %10, %15 : vector<8x256xf32>
    %17 = arith.mulf %16, %16 : vector<8x256xf32>
    %cst_13 = arith.constant dense<0.000000e+00> : vector<8xf32>
    %18 = vector.multi_reduction <add>, %17, %cst_13 [1] : vector<8x256xf32> to vector<8xf32>
    %19 = vector.shape_cast %18 : vector<8xf32> to vector<8x1xf32>
    %cst_14 = arith.constant 2.560000e+02 : f32
    %20 = vector.broadcast %cst_14 : f32 to vector<8x1xf32>
    %21 = arith.divf %19, %20 : vector<8x1xf32>
    %cst_15 = arith.constant 9.99999974E-6 : f32
    %22 = vector.broadcast %cst_15 : f32 to vector<8x1xf32>
    %23 = arith.addf %21, %22 : vector<8x1xf32>
    %24 = math.rsqrt %23 : vector<8x1xf32>
    %25 = vector.broadcast %24 : vector<8x1xf32> to vector<8x256xf32>
    %26 = arith.mulf %16, %25 : vector<8x256xf32>
    %27 = arith.truncf %26 : vector<8x256xf32> to vector<8x256xbf16>
    %c0_16 = arith.constant 0 : index
    %c0_17 = arith.constant 0 : index
    %28 = vector.load %arg5[%c0_16, %c0_17] : memref<256x256xbf16, #tpu.memory_space<vmem>>, vector<256x256xbf16>
    %cst_18 = arith.constant dense<0.000000e+00> : vector<8x256xf32>
    %29 = tpu.matmul %27, %28, %cst_18 {dimension_numbers = #tpu.dot_dimension_numbers<[1], [0], [0], [1], [0, 0, 1, 1], [], []>} : vector<8x256xbf16>, vector<256x256xbf16>, vector<8x256xf32> -> vector<8x256xf32>
    %c0_19 = arith.constant 0 : index
    %c0_20 = arith.constant 0 : index
    %30 = vector.load %arg6[%c0_19, %c0_20] : memref<1x256xf32, #tpu.memory_space<vmem>>, vector<1x256xf32>
    %31 = vector.broadcast %30 : vector<1x256xf32> to vector<8x256xf32>
    %32 = arith.addf %29, %31 : vector<8x256xf32>
    %cst_21 = arith.constant dense<0.000000e+00> : vector<16xf32>
    %33 = vector.multi_reduction <add>, %3, %cst_21 [1] : vector<16x256xf32> to vector<16xf32>
    %34 = vector.shape_cast %33 : vector<16xf32> to vector<16x1xf32>
    %cst_22 = arith.constant 2.560000e+02 : f32
    %35 = vector.broadcast %cst_22 : f32 to vector<16x1xf32>
    %36 = arith.divf %34, %35 : vector<16x1xf32>
    %37 = vector.broadcast %36 : vector<16x1xf32> to vector<16x256xf32>
    %38 = arith.subf %3, %37 : vector<16x256xf32>
    %39 = arith.mulf %38, %38 : vector<16x256xf32>
    %cst_23 = arith.constant dense<0.000000e+00> : vector<16xf32>
    %40 = vector.multi_reduction <add>, %39, %cst_23 [1] : vector<16x256xf32> to vector<16xf32>
    %41 = vector.shape_cast %40 : vector<16xf32> to vector<16x1xf32>
    %cst_24 = arith.constant 2.560000e+02 : f32
    %42 = vector.broadcast %cst_24 : f32 to vector<16x1xf32>
    %43 = arith.divf %41, %42 : vector<16x1xf32>
    %cst_25 = arith.constant 9.99999974E-6 : f32
    %44 = vector.broadcast %cst_25 : f32 to vector<16x1xf32>
    %45 = arith.addf %43, %44 : vector<16x1xf32>
    %46 = math.rsqrt %45 : vector<16x1xf32>
    %47 = vector.broadcast %46 : vector<16x1xf32> to vector<16x256xf32>
    %48 = arith.mulf %38, %47 : vector<16x256xf32>
    %49 = arith.truncf %48 : vector<16x256xf32> to vector<16x256xbf16>
    %c0_26 = arith.constant 0 : index
    %c0_27 = arith.constant 0 : index
    %50 = vector.load %arg7[%c0_26, %c0_27] : memref<256x512xbf16, #tpu.memory_space<vmem>>, vector<256x512xbf16>
    %cst_28 = arith.constant dense<0.000000e+00> : vector<16x512xf32>
    %51 = tpu.matmul %49, %50, %cst_28 {dimension_numbers = #tpu.dot_dimension_numbers<[1], [0], [0], [1], [0, 0, 1, 1], [], []>} : vector<16x256xbf16>, vector<256x512xbf16>, vector<16x512xf32> -> vector<16x512xf32>
    %c0_29 = arith.constant 0 : index
    %c0_30 = arith.constant 0 : index
    %52 = vector.load %arg8[%c0_29, %c0_30] : memref<1x512xf32, #tpu.memory_space<vmem>>, vector<1x512xf32>
    %53 = vector.broadcast %52 : vector<1x512xf32> to vector<16x512xf32>
    %54 = arith.addf %51, %53 : vector<16x512xf32>
    %55 = vector.extract_strided_slice %54 {offsets = [0, 0], sizes = [16, 256], strides = [1, 1]} : vector<16x512xf32> to vector<16x256xf32>
    %56 = vector.extract_strided_slice %54 {offsets = [0, 256], sizes = [16, 256], strides = [1, 1]} : vector<16x512xf32> to vector<16x256xf32>
    %c0_31 = arith.constant 0 : index
    %c0_32 = arith.constant 0 : index
    %57 = vector.load %arg9[%c0_31, %c0_32] : memref<256x256xbf16, #tpu.memory_space<vmem>>, vector<256x256xbf16>
    %cst_33 = arith.constant 0.000000e+00 : f32
    %58 = vector.broadcast %cst_33 : f32 to vector<8x256xf32>
    %59 = vector.extract_strided_slice %32 {offsets = [0, 0], sizes = [8, 128], strides = [1, 1]} : vector<8x256xf32> to vector<8x128xf32>
    %60 = vector.extract_strided_slice %55 {offsets = [0, 0], sizes = [16, 128], strides = [1, 1]} : vector<16x256xf32> to vector<16x128xf32>
    %61 = vector.extract_strided_slice %56 {offsets = [0, 0], sizes = [16, 128], strides = [1, 1]} : vector<16x256xf32> to vector<16x128xf32>
    %62 = arith.truncf %59 : vector<8x128xf32> to vector<8x128xbf16>
    %63 = arith.truncf %60 : vector<16x128xf32> to vector<16x128xbf16>
    %cst_34 = arith.constant dense<0.000000e+00> : vector<8x16xf32>
    %64 = tpu.matmul %62, %63, %cst_34 {dimension_numbers = #tpu.dot_dimension_numbers<[1], [1], [0], [0], [0, 0, 1, 0], [], []>} : vector<8x128xbf16>, vector<16x128xbf16>, vector<8x16xf32> -> vector<8x16xf32>
    %cst_35 = arith.constant 0.0883883461 : f32
    %65 = vector.broadcast %cst_35 : f32 to vector<8x16xf32>
    %66 = arith.mulf %64, %65 : vector<8x16xf32>
    %cst_36 = arith.constant -1.000000e+30 : f32
    %67 = vector.shape_cast %9 : vector<1x16xi1> to vector<1x16xi1>
    %68 = vector.broadcast %67 : vector<1x16xi1> to vector<8x16xi1>
    %69 = vector.broadcast %cst_36 : f32 to vector<8x16xf32>
    %70 = arith.select %68, %69, %66 : vector<8x16xi1>, vector<8x16xf32>
    %cst_37 = arith.constant dense<0xFF800000> : vector<8xf32>
    %71 = vector.multi_reduction <maximumf>, %70, %cst_37 [1] : vector<8x16xf32> to vector<8xf32>
    %72 = vector.shape_cast %71 : vector<8xf32> to vector<8x1xf32>
    %73 = vector.broadcast %72 : vector<8x1xf32> to vector<8x16xf32>
    %74 = arith.subf %70, %73 : vector<8x16xf32>
    %75 = math.exp %74 : vector<8x16xf32>
    %cst_38 = arith.constant dense<0.000000e+00> : vector<8xf32>
    %76 = vector.multi_reduction <add>, %75, %cst_38 [1] : vector<8x16xf32> to vector<8xf32>
    %77 = vector.shape_cast %76 : vector<8xf32> to vector<8x1xf32>
    %78 = tpu.reciprocal %77 {approx = true} : vector<8x1xf32> -> vector<8x1xf32>
    %79 = vector.broadcast %78 : vector<8x1xf32> to vector<8x16xf32>
    %80 = arith.mulf %75, %79 : vector<8x16xf32>
    %cst_39 = arith.constant 0.000000e+00 : f32
    %81 = vector.shape_cast %9 : vector<1x16xi1> to vector<1x16xi1>
    %82 = vector.broadcast %81 : vector<1x16xi1> to vector<8x16xi1>
    %83 = vector.broadcast %cst_39 : f32 to vector<8x16xf32>
    %84 = arith.select %82, %83, %80 : vector<8x16xi1>, vector<8x16xf32>
    %85 = arith.truncf %84 : vector<8x16xf32> to vector<8x16xbf16>
    %86 = arith.truncf %61 : vector<16x128xf32> to vector<16x128xbf16>
    %cst_40 = arith.constant dense<0.000000e+00> : vector<8x128xf32>
    %87 = tpu.matmul %85, %86, %cst_40 {dimension_numbers = #tpu.dot_dimension_numbers<[1], [0], [0], [1], [0, 0, 1, 1], [], []>} : vector<8x16xbf16>, vector<16x128xbf16>, vector<8x128xf32> -> vector<8x128xf32>
    %88 = arith.truncf %87 : vector<8x128xf32> to vector<8x128xbf16>
    %89 = vector.extract_strided_slice %57 {offsets = [0, 0], sizes = [128, 256], strides = [1, 1]} : vector<256x256xbf16> to vector<128x256xbf16>
    %cst_41 = arith.constant dense<0.000000e+00> : vector<8x256xf32>
    %90 = tpu.matmul %88, %89, %cst_41 {dimension_numbers = #tpu.dot_dimension_numbers<[1], [0], [0], [1], [0, 0, 1, 1], [], []>} : vector<8x128xbf16>, vector<128x256xbf16>, vector<8x256xf32> -> vector<8x256xf32>
    %91 = arith.addf %58, %90 : vector<8x256xf32>
    %92 = vector.extract_strided_slice %32 {offsets = [0, 128], sizes = [8, 128], strides = [1, 1]} : vector<8x256xf32> to vector<8x128xf32>
    %93 = vector.extract_strided_slice %55 {offsets = [0, 128], sizes = [16, 128], strides = [1, 1]} : vector<16x256xf32> to vector<16x128xf32>
    %94 = vector.extract_strided_slice %56 {offsets = [0, 128], sizes = [16, 128], strides = [1, 1]} : vector<16x256xf32> to vector<16x128xf32>
    %95 = arith.truncf %92 : vector<8x128xf32> to vector<8x128xbf16>
    %96 = arith.truncf %93 : vector<16x128xf32> to vector<16x128xbf16>
    %cst_42 = arith.constant dense<0.000000e+00> : vector<8x16xf32>
    %97 = tpu.matmul %95, %96, %cst_42 {dimension_numbers = #tpu.dot_dimension_numbers<[1], [1], [0], [0], [0, 0, 1, 0], [], []>} : vector<8x128xbf16>, vector<16x128xbf16>, vector<8x16xf32> -> vector<8x16xf32>
    %cst_43 = arith.constant 0.0883883461 : f32
    %98 = vector.broadcast %cst_43 : f32 to vector<8x16xf32>
    %99 = arith.mulf %97, %98 : vector<8x16xf32>
    %cst_44 = arith.constant -1.000000e+30 : f32
    %100 = vector.shape_cast %9 : vector<1x16xi1> to vector<1x16xi1>
    %101 = vector.broadcast %100 : vector<1x16xi1> to vector<8x16xi1>
    %102 = vector.broadcast %cst_44 : f32 to vector<8x16xf32>
    %103 = arith.select %101, %102, %99 : vector<8x16xi1>, vector<8x16xf32>
    %cst_45 = arith.constant dense<0xFF800000> : vector<8xf32>
    %104 = vector.multi_reduction <maximumf>, %103, %cst_45 [1] : vector<8x16xf32> to vector<8xf32>
    %105 = vector.shape_cast %104 : vector<8xf32> to vector<8x1xf32>
    %106 = vector.broadcast %105 : vector<8x1xf32> to vector<8x16xf32>
    %107 = arith.subf %103, %106 : vector<8x16xf32>
    %108 = math.exp %107 : vector<8x16xf32>
    %cst_46 = arith.constant dense<0.000000e+00> : vector<8xf32>
    %109 = vector.multi_reduction <add>, %108, %cst_46 [1] : vector<8x16xf32> to vector<8xf32>
    %110 = vector.shape_cast %109 : vector<8xf32> to vector<8x1xf32>
    %111 = tpu.reciprocal %110 {approx = true} : vector<8x1xf32> -> vector<8x1xf32>
    %112 = vector.broadcast %111 : vector<8x1xf32> to vector<8x16xf32>
    %113 = arith.mulf %108, %112 : vector<8x16xf32>
    %cst_47 = arith.constant 0.000000e+00 : f32
    %114 = vector.shape_cast %9 : vector<1x16xi1> to vector<1x16xi1>
    %115 = vector.broadcast %114 : vector<1x16xi1> to vector<8x16xi1>
    %116 = vector.broadcast %cst_47 : f32 to vector<8x16xf32>
    %117 = arith.select %115, %116, %113 : vector<8x16xi1>, vector<8x16xf32>
    %118 = arith.truncf %117 : vector<8x16xf32> to vector<8x16xbf16>
    %119 = arith.truncf %94 : vector<16x128xf32> to vector<16x128xbf16>
    %cst_48 = arith.constant dense<0.000000e+00> : vector<8x128xf32>
    %120 = tpu.matmul %118, %119, %cst_48 {dimension_numbers = #tpu.dot_dimension_numbers<[1], [0], [0], [1], [0, 0, 1, 1], [], []>} : vector<8x16xbf16>, vector<16x128xbf16>, vector<8x128xf32> -> vector<8x128xf32>
    %121 = arith.truncf %120 : vector<8x128xf32> to vector<8x128xbf16>
    %122 = vector.extract_strided_slice %57 {offsets = [128, 0], sizes = [128, 256], strides = [1, 1]} : vector<256x256xbf16> to vector<128x256xbf16>
    %cst_49 = arith.constant dense<0.000000e+00> : vector<8x256xf32>
    %123 = tpu.matmul %121, %122, %cst_49 {dimension_numbers = #tpu.dot_dimension_numbers<[1], [0], [0], [1], [0, 0, 1, 1], [], []>} : vector<8x128xbf16>, vector<128x256xbf16>, vector<8x256xf32> -> vector<8x256xf32>
    %124 = arith.addf %91, %123 : vector<8x256xf32>
    %125 = arith.addf %1, %124 : vector<8x256xf32>
    %c0_50 = arith.constant 0 : index
    %c0_51 = arith.constant 0 : index
    %126 = vector.load %arg10[%c0_50, %c0_51] : memref<1x256xf32, #tpu.memory_space<vmem>>, vector<1x256xf32>
    %127 = vector.broadcast %126 : vector<1x256xf32> to vector<8x256xf32>
    %128 = arith.addf %125, %127 : vector<8x256xf32>
    %cst_52 = arith.constant dense<0.000000e+00> : vector<8xf32>
    %129 = vector.multi_reduction <add>, %128, %cst_52 [1] : vector<8x256xf32> to vector<8xf32>
    %130 = vector.shape_cast %129 : vector<8xf32> to vector<8x1xf32>
    %cst_53 = arith.constant 2.560000e+02 : f32
    %131 = vector.broadcast %cst_53 : f32 to vector<8x1xf32>
    %132 = arith.divf %130, %131 : vector<8x1xf32>
    %133 = vector.broadcast %132 : vector<8x1xf32> to vector<8x256xf32>
    %134 = arith.subf %128, %133 : vector<8x256xf32>
    %135 = arith.mulf %134, %134 : vector<8x256xf32>
    %cst_54 = arith.constant dense<0.000000e+00> : vector<8xf32>
    %136 = vector.multi_reduction <add>, %135, %cst_54 [1] : vector<8x256xf32> to vector<8xf32>
    %137 = vector.shape_cast %136 : vector<8xf32> to vector<8x1xf32>
    %cst_55 = arith.constant 2.560000e+02 : f32
    %138 = vector.broadcast %cst_55 : f32 to vector<8x1xf32>
    %139 = arith.divf %137, %138 : vector<8x1xf32>
    %cst_56 = arith.constant 9.99999974E-6 : f32
    %140 = vector.broadcast %cst_56 : f32 to vector<8x1xf32>
    %141 = arith.addf %139, %140 : vector<8x1xf32>
    %142 = math.rsqrt %141 : vector<8x1xf32>
    %143 = vector.broadcast %142 : vector<8x1xf32> to vector<8x256xf32>
    %144 = arith.mulf %134, %143 : vector<8x256xf32>
    %c0_57 = arith.constant 0 : index
    %c0_58 = arith.constant 0 : index
    %145 = vector.load %arg11[%c0_57, %c0_58] : memref<1x256xf32, #tpu.memory_space<vmem>>, vector<1x256xf32>
    %146 = vector.broadcast %145 : vector<1x256xf32> to vector<8x256xf32>
    %147 = arith.mulf %144, %146 : vector<8x256xf32>
    %c0_59 = arith.constant 0 : index
    %c0_60 = arith.constant 0 : index
    %148 = vector.load %arg12[%c0_59, %c0_60] : memref<1x256xf32, #tpu.memory_space<vmem>>, vector<1x256xf32>
    %149 = vector.broadcast %148 : vector<1x256xf32> to vector<8x256xf32>
    %150 = arith.addf %147, %149 : vector<8x256xf32>
    %c0_61 = arith.constant 0 : index
    %c0_62 = arith.constant 0 : index
    %151 = vector.load %arg13[%c0_61, %c0_62] : memref<8x8xbf16, #tpu.memory_space<vmem>>, vector<8x8xbf16>
    %152 = arith.truncf %150 : vector<8x256xf32> to vector<8x256xbf16>
    %cst_63 = arith.constant dense<0.000000e+00> : vector<8x256xf32>
    %153 = tpu.matmul %151, %152, %cst_63 {dimension_numbers = #tpu.dot_dimension_numbers<[1], [0], [0], [1], [0, 0, 1, 1], [], []>} : vector<8x8xbf16>, vector<8x256xbf16>, vector<8x256xf32> -> vector<8x256xf32>
    %154 = arith.addf %128, %153 : vector<8x256xf32>
    %c0_64 = arith.constant 0 : index
    %c0_65 = arith.constant 0 : index
    %155 = vector.load %arg14[%c0_64, %c0_65] : memref<256x256xbf16, #tpu.memory_space<vmem>>, vector<256x256xbf16>
    %c0_66 = arith.constant 0 : index
    %c0_67 = arith.constant 0 : index
    %156 = vector.load %arg15[%c0_66, %c0_67] : memref<1x256xf32, #tpu.memory_space<vmem>>, vector<1x256xf32>
    %c0_68 = arith.constant 0 : index
    %c0_69 = arith.constant 0 : index
    %157 = vector.load %arg16[%c0_68, %c0_69] : memref<256x256xbf16, #tpu.memory_space<vmem>>, vector<256x256xbf16>
    %c0_70 = arith.constant 0 : index
    %c0_71 = arith.constant 0 : index
    %158 = vector.load %arg17[%c0_70, %c0_71] : memref<1x256xf32, #tpu.memory_space<vmem>>, vector<1x256xf32>
    %159 = arith.truncf %154 : vector<8x256xf32> to vector<8x256xbf16>
    %cst_72 = arith.constant dense<0.000000e+00> : vector<8x256xf32>
    %160 = tpu.matmul %159, %155, %cst_72 {dimension_numbers = #tpu.dot_dimension_numbers<[1], [0], [0], [1], [0, 0, 1, 1], [], []>} : vector<8x256xbf16>, vector<256x256xbf16>, vector<8x256xf32> -> vector<8x256xf32>
    %161 = vector.broadcast %156 : vector<1x256xf32> to vector<8x256xf32>
    %162 = arith.addf %160, %161 : vector<8x256xf32>
    %cst_73 = arith.constant 5.000000e-01 : f32
    %163 = vector.broadcast %cst_73 : f32 to vector<8x256xf32>
    %164 = arith.mulf %163, %162 : vector<8x256xf32>
    %cst_74 = arith.constant 4.471500e-02 : f32
    %165 = vector.broadcast %cst_74 : f32 to vector<8x256xf32>
    %166 = arith.mulf %165, %162 : vector<8x256xf32>
    %167 = arith.mulf %166, %162 : vector<8x256xf32>
    %168 = arith.mulf %167, %162 : vector<8x256xf32>
    %169 = arith.addf %162, %168 : vector<8x256xf32>
    %cst_75 = arith.constant 0.797884583 : f32
    %170 = vector.broadcast %cst_75 : f32 to vector<8x256xf32>
    %171 = arith.mulf %170, %169 : vector<8x256xf32>
    %172 = math.tanh %171 : vector<8x256xf32>
    %cst_76 = arith.constant 1.000000e+00 : f32
    %173 = vector.broadcast %cst_76 : f32 to vector<8x256xf32>
    %174 = arith.addf %173, %172 : vector<8x256xf32>
    %175 = arith.mulf %164, %174 : vector<8x256xf32>
    %176 = arith.truncf %175 : vector<8x256xf32> to vector<8x256xbf16>
    %cst_77 = arith.constant dense<0.000000e+00> : vector<8x256xf32>
    %177 = tpu.matmul %176, %157, %cst_77 {dimension_numbers = #tpu.dot_dimension_numbers<[1], [0], [0], [1], [0, 0, 1, 1], [], []>} : vector<8x256xbf16>, vector<256x256xbf16>, vector<8x256xf32> -> vector<8x256xf32>
    %178 = vector.broadcast %158 : vector<1x256xf32> to vector<8x256xf32>
    %179 = arith.addf %177, %178 : vector<8x256xf32>
    %180 = arith.addf %154, %179 : vector<8x256xf32>
    %c0_78 = arith.constant 0 : index
    %c0_79 = arith.constant 0 : index
    %c0_80 = arith.constant 0 : index
    %181 = vector.load %arg18[%c0_78, %c0_79, %c0_80] : memref<1x8x256xf32, #tpu.memory_space<vmem>>, vector<1x8x256xf32>
    %182 = vector.shape_cast %181 : vector<1x8x256xf32> to vector<8x256xf32>
    %183 = vector.shape_cast %180 : vector<8x256xf32> to vector<1x8x256xf32>
    tpu.vector_store %arg18[%c0_78, %c0_79, %c0_80], %183 {strides = array<i32>} : memref<1x8x256xf32, #tpu.memory_space<vmem>>, vector<1x8x256xf32>,
    return
  }
  func.func @transform_0(%arg0: i32) -> (i32, i32, i32) {
    %c0_i32 = arith.constant 0 : i32
    %c0_i32_0 = arith.constant 0 : i32
    %c0_i32_1 = arith.constant 0 : i32
    return %arg0, %c0_i32, %c0_i32_0 : i32, i32, i32
  }
  func.func @transform_1(%arg0: i32) -> (i32, i32, i32) {
    %c0_i32 = arith.constant 0 : i32
    %c0_i32_0 = arith.constant 0 : i32
    %c0_i32_1 = arith.constant 0 : i32
    return %arg0, %c0_i32, %c0_i32_0 : i32, i32, i32
  }
  func.func @transform_2(%arg0: i32) -> (i32, i32, i32) {
    %c0_i32 = arith.constant 0 : i32
    %c0_i32_0 = arith.constant 0 : i32
    %c0_i32_1 = arith.constant 0 : i32
    return %arg0, %c0_i32, %c0_i32_0 : i32, i32, i32
  }
  func.func @transform_3(%arg0: i32) -> (i32, i32, i32) {
    %c0_i32 = arith.constant 0 : i32
    %c0_i32_0 = arith.constant 0 : i32
    %c0_i32_1 = arith.constant 0 : i32
    return %arg0, %c0_i32, %c0_i32_0 : i32, i32, i32
  }
  func.func @transform_4(%arg0: i32) -> (i32, i32) {
    %c0_i32 = arith.constant 0 : i32
    %c0_i32_0 = arith.constant 0 : i32
    %c0_i32_1 = arith.constant 0 : i32
    return %c0_i32, %c0_i32_0 : i32, i32
  }
  func.func @transform_5(%arg0: i32) -> (i32, i32) {
    %c0_i32 = arith.constant 0 : i32
    %c0_i32_0 = arith.constant 0 : i32
    %c0_i32_1 = arith.constant 0 : i32
    return %c0_i32, %c0_i32_0 : i32, i32
  }
  func.func @transform_6(%arg0: i32) -> (i32, i32) {
    %c0_i32 = arith.constant 0 : i32
    %c0_i32_0 = arith.constant 0 : i32
    %c0_i32_1 = arith.constant 0 : i32
    return %c0_i32, %c0_i32_0 : i32, i32
  }
  func.func @transform_7(%arg0: i32) -> (i32, i32) {
    %c0_i32 = arith.constant 0 : i32
    %c0_i32_0 = arith.constant 0 : i32
    %c0_i32_1 = arith.constant 0 : i32
    return %c0_i32, %c0_i32_0 : i32, i32
  }
  func.func @transform_8(%arg0: i32) -> (i32, i32) {
    %c0_i32 = arith.constant 0 : i32
    %c0_i32_0 = arith.constant 0 : i32
    %c0_i32_1 = arith.constant 0 : i32
    return %c0_i32, %c0_i32_0 : i32, i32
  }
  func.func @transform_9(%arg0: i32) -> (i32, i32) {
    %c0_i32 = arith.constant 0 : i32
    %c0_i32_0 = arith.constant 0 : i32
    %c0_i32_1 = arith.constant 0 : i32
    return %c0_i32, %c0_i32_0 : i32, i32
  }
  func.func @transform_10(%arg0: i32) -> (i32, i32) {
    %c0_i32 = arith.constant 0 : i32
    %c0_i32_0 = arith.constant 0 : i32
    %c0_i32_1 = arith.constant 0 : i32
    return %c0_i32, %c0_i32_0 : i32, i32
  }
  func.func @transform_11(%arg0: i32) -> (i32, i32) {
    %c0_i32 = arith.constant 0 : i32
    %c0_i32_0 = arith.constant 0 : i32
    %c0_i32_1 = arith.constant 0 : i32
    return %c0_i32, %c0_i32_0 : i32, i32
  }
  func.func @transform_12(%arg0: i32) -> (i32, i32) {
    %c0_i32 = arith.constant 0 : i32
    %c0_i32_0 = arith.constant 0 : i32
    %c0_i32_1 = arith.constant 0 : i32
    return %c0_i32, %c0_i32_0 : i32, i32
  }
  func.func @transform_13(%arg0: i32) -> (i32, i32) {
    %c0_i32 = arith.constant 0 : i32
    %c0_i32_0 = arith.constant 0 : i32
    %c0_i32_1 = arith.constant 0 : i32
    return %c0_i32, %c0_i32_0 : i32, i32
  }
  func.func @transform_14(%arg0: i32) -> (i32, i32) {
    %c0_i32 = arith.constant 0 : i32
    %c0_i32_0 = arith.constant 0 : i32
    %c0_i32_1 = arith.constant 0 : i32
    return %c0_i32, %c0_i32_0 : i32, i32
  }
  func.func @transform_15(%arg0: i32) -> (i32, i32) {
    %c0_i32 = arith.constant 0 : i32
    %c0_i32_0 = arith.constant 0 : i32
    %c0_i32_1 = arith.constant 0 : i32
    return %c0_i32, %c0_i32_0 : i32, i32
  }
  func.func @transform_16(%arg0: i32) -> (i32, i32) {
    %c0_i32 = arith.constant 0 : i32
    %c0_i32_0 = arith.constant 0 : i32
    %c0_i32_1 = arith.constant 0 : i32
    return %c0_i32, %c0_i32_0 : i32, i32
  }
  func.func @transform_17(%arg0: i32) -> (i32, i32, i32) {
    %c0_i32 = arith.constant 0 : i32
    %c0_i32_0 = arith.constant 0 : i32
    %c0_i32_1 = arith.constant 0 : i32
    return %arg0, %c0_i32, %c0_i32_0 : i32, i32, i32
  }
}

module attributes {stable_mosaic.version = 11 : i64} {
  func.func @_dec1_kernel(%arg0: i32, %arg1: memref<1x16x256xf32, #tpu.memory_space<vmem>>, %arg2: memref<1x8x256xf32, #tpu.memory_space<vmem>>, %arg3: memref<1x8x256xf32, #tpu.memory_space<vmem>>, %arg4: memref<1x16x1xf32, #tpu.memory_space<vmem>>, %arg5: memref<256x256xbf16, #tpu.memory_space<vmem>>, %arg6: memref<1x256xf32, #tpu.memory_space<vmem>>, %arg7: memref<256x256xbf16, #tpu.memory_space<vmem>>, %arg8: memref<1x256xf32, #tpu.memory_space<vmem>>, %arg9: memref<256x256xbf16, #tpu.memory_space<vmem>>, %arg10: memref<1x256xf32, #tpu.memory_space<vmem>>, %arg11: memref<256x256xbf16, #tpu.memory_space<vmem>>, %arg12: memref<1x256xf32, #tpu.memory_space<vmem>>, %arg13: memref<256x512xbf16, #tpu.memory_space<vmem>>, %arg14: memref<1x512xf32, #tpu.memory_space<vmem>>, %arg15: memref<512x256xbf16, #tpu.memory_space<vmem>>, %arg16: memref<1x256xf32, #tpu.memory_space<vmem>>, %arg17: memref<1x16x256xf32, #tpu.memory_space<vmem>>) attributes {dimension_semantics = [#tpu.dimension_semantics<parallel>], iteration_bounds = array<i64: 2>, scalar_prefetch = 0 : i64, scratch_operands = 0 : i64, tpu.core_type = #tpu.core_type<tc>, window_params = [{transform_indices = @transform_0, window_bounds = array<i64: 1, 16, 256>}, {transform_indices = @transform_1, window_bounds = array<i64: 1, 8, 256>}, {transform_indices = @transform_2, window_bounds = array<i64: 1, 8, 256>}, {transform_indices = @transform_3, window_bounds = array<i64: 1, 16, 1>}, {pipeline_mode = #tpu.pipeline_mode<synchronous>, transform_indices = @transform_4, window_bounds = array<i64: 256, 256>}, {pipeline_mode = #tpu.pipeline_mode<synchronous>, transform_indices = @transform_5, window_bounds = array<i64: 1, 256>}, {pipeline_mode = #tpu.pipeline_mode<synchronous>, transform_indices = @transform_6, window_bounds = array<i64: 256, 256>}, {pipeline_mode = #tpu.pipeline_mode<synchronous>, transform_indices = @transform_7, window_bounds = array<i64: 1, 256>}, {pipeline_mode = #tpu.pipeline_mode<synchronous>, transform_indices = @transform_8, window_bounds = array<i64: 256, 256>}, {pipeline_mode = #tpu.pipeline_mode<synchronous>, transform_indices = @transform_9, window_bounds = array<i64: 1, 256>}, {pipeline_mode = #tpu.pipeline_mode<synchronous>, transform_indices = @transform_10, window_bounds = array<i64: 256, 256>}, {pipeline_mode = #tpu.pipeline_mode<synchronous>, transform_indices = @transform_11, window_bounds = array<i64: 1, 256>}, {pipeline_mode = #tpu.pipeline_mode<synchronous>, transform_indices = @transform_12, window_bounds = array<i64: 256, 512>}, {pipeline_mode = #tpu.pipeline_mode<synchronous>, transform_indices = @transform_13, window_bounds = array<i64: 1, 512>}, {pipeline_mode = #tpu.pipeline_mode<synchronous>, transform_indices = @transform_14, window_bounds = array<i64: 512, 256>}, {pipeline_mode = #tpu.pipeline_mode<synchronous>, transform_indices = @transform_15, window_bounds = array<i64: 1, 256>}, {transform_indices = @transform_16, window_bounds = array<i64: 1, 16, 256>}]} {
    %c0 = arith.constant 0 : index
    %c0_0 = arith.constant 0 : index
    %c0_1 = arith.constant 0 : index
    %0 = vector.load %arg1[%c0, %c0_0, %c0_1] : memref<1x16x256xf32, #tpu.memory_space<vmem>>, vector<1x16x256xf32>
    %1 = vector.shape_cast %0 : vector<1x16x256xf32> to vector<16x256xf32>
    %c0_2 = arith.constant 0 : index
    %c0_3 = arith.constant 0 : index
    %c0_4 = arith.constant 0 : index
    %2 = vector.load %arg2[%c0_2, %c0_3, %c0_4] : memref<1x8x256xf32, #tpu.memory_space<vmem>>, vector<1x8x256xf32>
    %3 = vector.shape_cast %2 : vector<1x8x256xf32> to vector<8x256xf32>
    %c0_5 = arith.constant 0 : index
    %c0_6 = arith.constant 0 : index
    %c0_7 = arith.constant 0 : index
    %4 = vector.load %arg3[%c0_5, %c0_6, %c0_7] : memref<1x8x256xf32, #tpu.memory_space<vmem>>, vector<1x8x256xf32>
    %5 = vector.shape_cast %4 : vector<1x8x256xf32> to vector<8x256xf32>
    %c0_8 = arith.constant 0 : index
    %c0_9 = arith.constant 0 : index
    %c0_10 = arith.constant 0 : index
    %6 = vector.load %arg4[%c0_8, %c0_9, %c0_10] : memref<1x16x1xf32, #tpu.memory_space<vmem>>, vector<1x16x1xf32>
    %7 = vector.shape_cast %6 : vector<1x16x1xf32> to vector<16x1xf32>
    %cst = arith.constant 5.000000e-01 : f32
    %8 = vector.broadcast %cst : f32 to vector<16x1xf32>
    %9 = arith.cmpf ogt, %7, %8 : vector<16x1xf32>
    %cst_11 = arith.constant dense<0.000000e+00> : vector<16xf32>
    %10 = vector.multi_reduction <add>, %1, %cst_11 [1] : vector<16x256xf32> to vector<16xf32>
    %11 = vector.shape_cast %10 : vector<16xf32> to vector<16x1xf32>
    %cst_12 = arith.constant 2.560000e+02 : f32
    %12 = vector.broadcast %cst_12 : f32 to vector<16x1xf32>
    %13 = arith.divf %11, %12 : vector<16x1xf32>
    %14 = vector.broadcast %13 : vector<16x1xf32> to vector<16x256xf32>
    %15 = arith.subf %1, %14 : vector<16x256xf32>
    %16 = arith.mulf %15, %15 : vector<16x256xf32>
    %cst_13 = arith.constant dense<0.000000e+00> : vector<16xf32>
    %17 = vector.multi_reduction <add>, %16, %cst_13 [1] : vector<16x256xf32> to vector<16xf32>
    %18 = vector.shape_cast %17 : vector<16xf32> to vector<16x1xf32>
    %cst_14 = arith.constant 2.560000e+02 : f32
    %19 = vector.broadcast %cst_14 : f32 to vector<16x1xf32>
    %20 = arith.divf %18, %19 : vector<16x1xf32>
    %cst_15 = arith.constant 9.99999974E-6 : f32
    %21 = vector.broadcast %cst_15 : f32 to vector<16x1xf32>
    %22 = arith.addf %20, %21 : vector<16x1xf32>
    %23 = math.rsqrt %22 : vector<16x1xf32>
    %24 = vector.broadcast %23 : vector<16x1xf32> to vector<16x256xf32>
    %25 = arith.mulf %15, %24 : vector<16x256xf32>
    %26 = arith.truncf %25 : vector<16x256xf32> to vector<16x256xbf16>
    %c0_16 = arith.constant 0 : index
    %c0_17 = arith.constant 0 : index
    %27 = vector.load %arg5[%c0_16, %c0_17] : memref<256x256xbf16, #tpu.memory_space<vmem>>, vector<256x256xbf16>
    %cst_18 = arith.constant dense<0.000000e+00> : vector<16x256xf32>
    %28 = tpu.matmul %26, %27, %cst_18 {dimension_numbers = #tpu.dot_dimension_numbers<[1], [0], [0], [1], [0, 0, 1, 1], [], []>} : vector<16x256xbf16>, vector<256x256xbf16>, vector<16x256xf32> -> vector<16x256xf32>
    %c0_19 = arith.constant 0 : index
    %c0_20 = arith.constant 0 : index
    %29 = vector.load %arg6[%c0_19, %c0_20] : memref<1x256xf32, #tpu.memory_space<vmem>>, vector<1x256xf32>
    %30 = vector.broadcast %29 : vector<1x256xf32> to vector<16x256xf32>
    %31 = arith.addf %28, %30 : vector<16x256xf32>
    %32 = arith.addf %3, %5 : vector<8x256xf32>
    %cst_21 = arith.constant dense<0.000000e+00> : vector<8xf32>
    %33 = vector.multi_reduction <add>, %32, %cst_21 [1] : vector<8x256xf32> to vector<8xf32>
    %34 = vector.shape_cast %33 : vector<8xf32> to vector<8x1xf32>
    %cst_22 = arith.constant 2.560000e+02 : f32
    %35 = vector.broadcast %cst_22 : f32 to vector<8x1xf32>
    %36 = arith.divf %34, %35 : vector<8x1xf32>
    %37 = vector.broadcast %36 : vector<8x1xf32> to vector<8x256xf32>
    %38 = arith.subf %32, %37 : vector<8x256xf32>
    %39 = arith.mulf %38, %38 : vector<8x256xf32>
    %cst_23 = arith.constant dense<0.000000e+00> : vector<8xf32>
    %40 = vector.multi_reduction <add>, %39, %cst_23 [1] : vector<8x256xf32> to vector<8xf32>
    %41 = vector.shape_cast %40 : vector<8xf32> to vector<8x1xf32>
    %cst_24 = arith.constant 2.560000e+02 : f32
    %42 = vector.broadcast %cst_24 : f32 to vector<8x1xf32>
    %43 = arith.divf %41, %42 : vector<8x1xf32>
    %cst_25 = arith.constant 9.99999974E-6 : f32
    %44 = vector.broadcast %cst_25 : f32 to vector<8x1xf32>
    %45 = arith.addf %43, %44 : vector<8x1xf32>
    %46 = math.rsqrt %45 : vector<8x1xf32>
    %47 = vector.broadcast %46 : vector<8x1xf32> to vector<8x256xf32>
    %48 = arith.mulf %38, %47 : vector<8x256xf32>
    %49 = arith.truncf %48 : vector<8x256xf32> to vector<8x256xbf16>
    %c0_26 = arith.constant 0 : index
    %c0_27 = arith.constant 0 : index
    %50 = vector.load %arg7[%c0_26, %c0_27] : memref<256x256xbf16, #tpu.memory_space<vmem>>, vector<256x256xbf16>
    %cst_28 = arith.constant dense<0.000000e+00> : vector<8x256xf32>
    %51 = tpu.matmul %49, %50, %cst_28 {dimension_numbers = #tpu.dot_dimension_numbers<[1], [0], [0], [1], [0, 0, 1, 1], [], []>} : vector<8x256xbf16>, vector<256x256xbf16>, vector<8x256xf32> -> vector<8x256xf32>
    %c0_29 = arith.constant 0 : index
    %c0_30 = arith.constant 0 : index
    %52 = vector.load %arg8[%c0_29, %c0_30] : memref<1x256xf32, #tpu.memory_space<vmem>>, vector<1x256xf32>
    %53 = vector.broadcast %52 : vector<1x256xf32> to vector<8x256xf32>
    %54 = arith.addf %51, %53 : vector<8x256xf32>
    %cst_31 = arith.constant dense<0.000000e+00> : vector<8xf32>
    %55 = vector.multi_reduction <add>, %3, %cst_31 [1] : vector<8x256xf32> to vector<8xf32>
    %56 = vector.shape_cast %55 : vector<8xf32> to vector<8x1xf32>
    %cst_32 = arith.constant 2.560000e+02 : f32
    %57 = vector.broadcast %cst_32 : f32 to vector<8x1xf32>
    %58 = arith.divf %56, %57 : vector<8x1xf32>
    %59 = vector.broadcast %58 : vector<8x1xf32> to vector<8x256xf32>
    %60 = arith.subf %3, %59 : vector<8x256xf32>
    %61 = arith.mulf %60, %60 : vector<8x256xf32>
    %cst_33 = arith.constant dense<0.000000e+00> : vector<8xf32>
    %62 = vector.multi_reduction <add>, %61, %cst_33 [1] : vector<8x256xf32> to vector<8xf32>
    %63 = vector.shape_cast %62 : vector<8xf32> to vector<8x1xf32>
    %cst_34 = arith.constant 2.560000e+02 : f32
    %64 = vector.broadcast %cst_34 : f32 to vector<8x1xf32>
    %65 = arith.divf %63, %64 : vector<8x1xf32>
    %cst_35 = arith.constant 9.99999974E-6 : f32
    %66 = vector.broadcast %cst_35 : f32 to vector<8x1xf32>
    %67 = arith.addf %65, %66 : vector<8x1xf32>
    %68 = math.rsqrt %67 : vector<8x1xf32>
    %69 = vector.broadcast %68 : vector<8x1xf32> to vector<8x256xf32>
    %70 = arith.mulf %60, %69 : vector<8x256xf32>
    %71 = arith.truncf %70 : vector<8x256xf32> to vector<8x256xbf16>
    %c0_36 = arith.constant 0 : index
    %c0_37 = arith.constant 0 : index
    %72 = vector.load %arg9[%c0_36, %c0_37] : memref<256x256xbf16, #tpu.memory_space<vmem>>, vector<256x256xbf16>
    %cst_38 = arith.constant dense<0.000000e+00> : vector<8x256xf32>
    %73 = tpu.matmul %71, %72, %cst_38 {dimension_numbers = #tpu.dot_dimension_numbers<[1], [0], [0], [1], [0, 0, 1, 1], [], []>} : vector<8x256xbf16>, vector<256x256xbf16>, vector<8x256xf32> -> vector<8x256xf32>
    %c0_39 = arith.constant 0 : index
    %c0_40 = arith.constant 0 : index
    %74 = vector.load %arg10[%c0_39, %c0_40] : memref<1x256xf32, #tpu.memory_space<vmem>>, vector<1x256xf32>
    %75 = vector.broadcast %74 : vector<1x256xf32> to vector<8x256xf32>
    %76 = arith.addf %73, %75 : vector<8x256xf32>
    %c0_41 = arith.constant 0 : index
    %c0_42 = arith.constant 0 : index
    %77 = vector.load %arg11[%c0_41, %c0_42] : memref<256x256xbf16, #tpu.memory_space<vmem>>, vector<256x256xbf16>
    %cst_43 = arith.constant 0.000000e+00 : f32
    %78 = vector.broadcast %cst_43 : f32 to vector<16x256xf32>
    %79 = vector.extract_strided_slice %31 {offsets = [0, 0], sizes = [16, 128], strides = [1, 1]} : vector<16x256xf32> to vector<16x128xf32>
    %80 = vector.extract_strided_slice %54 {offsets = [0, 0], sizes = [8, 128], strides = [1, 1]} : vector<8x256xf32> to vector<8x128xf32>
    %81 = vector.extract_strided_slice %76 {offsets = [0, 0], sizes = [8, 128], strides = [1, 1]} : vector<8x256xf32> to vector<8x128xf32>
    %82 = arith.truncf %79 : vector<16x128xf32> to vector<16x128xbf16>
    %83 = arith.truncf %80 : vector<8x128xf32> to vector<8x128xbf16>
    %cst_44 = arith.constant dense<0.000000e+00> : vector<16x8xf32>
    %84 = tpu.matmul %82, %83, %cst_44 {dimension_numbers = #tpu.dot_dimension_numbers<[1], [1], [0], [0], [0, 0, 1, 0], [], []>} : vector<16x128xbf16>, vector<8x128xbf16>, vector<16x8xf32> -> vector<16x8xf32>
    %cst_45 = arith.constant 0.0883883461 : f32
    %85 = vector.broadcast %cst_45 : f32 to vector<16x8xf32>
    %86 = arith.mulf %84, %85 : vector<16x8xf32>
    %cst_46 = arith.constant -1.000000e+30 : f32
    %87 = vector.shape_cast %9 : vector<16x1xi1> to vector<16x1xi1>
    %88 = vector.broadcast %87 : vector<16x1xi1> to vector<16x8xi1>
    %89 = vector.broadcast %cst_46 : f32 to vector<16x8xf32>
    %90 = arith.select %88, %89, %86 : vector<16x8xi1>, vector<16x8xf32>
    %cst_47 = arith.constant dense<0xFF800000> : vector<16xf32>
    %91 = vector.multi_reduction <maximumf>, %90, %cst_47 [1] : vector<16x8xf32> to vector<16xf32>
    %92 = vector.shape_cast %91 : vector<16xf32> to vector<16x1xf32>
    %93 = vector.broadcast %92 : vector<16x1xf32> to vector<16x8xf32>
    %94 = arith.subf %90, %93 : vector<16x8xf32>
    %95 = math.exp %94 : vector<16x8xf32>
    %cst_48 = arith.constant dense<0.000000e+00> : vector<16xf32>
    %96 = vector.multi_reduction <add>, %95, %cst_48 [1] : vector<16x8xf32> to vector<16xf32>
    %97 = vector.shape_cast %96 : vector<16xf32> to vector<16x1xf32>
    %98 = tpu.reciprocal %97 {approx = true} : vector<16x1xf32> -> vector<16x1xf32>
    %99 = vector.broadcast %98 : vector<16x1xf32> to vector<16x8xf32>
    %100 = arith.mulf %95, %99 : vector<16x8xf32>
    %cst_49 = arith.constant 0.000000e+00 : f32
    %101 = vector.shape_cast %9 : vector<16x1xi1> to vector<16x1xi1>
    %102 = vector.broadcast %101 : vector<16x1xi1> to vector<16x8xi1>
    %103 = vector.broadcast %cst_49 : f32 to vector<16x8xf32>
    %104 = arith.select %102, %103, %100 : vector<16x8xi1>, vector<16x8xf32>
    %105 = arith.truncf %104 : vector<16x8xf32> to vector<16x8xbf16>
    %106 = arith.truncf %81 : vector<8x128xf32> to vector<8x128xbf16>
    %cst_50 = arith.constant dense<0.000000e+00> : vector<16x128xf32>
    %107 = tpu.matmul %105, %106, %cst_50 {dimension_numbers = #tpu.dot_dimension_numbers<[1], [0], [0], [1], [0, 0, 1, 1], [], []>} : vector<16x8xbf16>, vector<8x128xbf16>, vector<16x128xf32> -> vector<16x128xf32>
    %108 = arith.truncf %107 : vector<16x128xf32> to vector<16x128xbf16>
    %109 = vector.extract_strided_slice %77 {offsets = [0, 0], sizes = [128, 256], strides = [1, 1]} : vector<256x256xbf16> to vector<128x256xbf16>
    %cst_51 = arith.constant dense<0.000000e+00> : vector<16x256xf32>
    %110 = tpu.matmul %108, %109, %cst_51 {dimension_numbers = #tpu.dot_dimension_numbers<[1], [0], [0], [1], [0, 0, 1, 1], [], []>} : vector<16x128xbf16>, vector<128x256xbf16>, vector<16x256xf32> -> vector<16x256xf32>
    %111 = arith.addf %78, %110 : vector<16x256xf32>
    %112 = vector.extract_strided_slice %31 {offsets = [0, 128], sizes = [16, 128], strides = [1, 1]} : vector<16x256xf32> to vector<16x128xf32>
    %113 = vector.extract_strided_slice %54 {offsets = [0, 128], sizes = [8, 128], strides = [1, 1]} : vector<8x256xf32> to vector<8x128xf32>
    %114 = vector.extract_strided_slice %76 {offsets = [0, 128], sizes = [8, 128], strides = [1, 1]} : vector<8x256xf32> to vector<8x128xf32>
    %115 = arith.truncf %112 : vector<16x128xf32> to vector<16x128xbf16>
    %116 = arith.truncf %113 : vector<8x128xf32> to vector<8x128xbf16>
    %cst_52 = arith.constant dense<0.000000e+00> : vector<16x8xf32>
    %117 = tpu.matmul %115, %116, %cst_52 {dimension_numbers = #tpu.dot_dimension_numbers<[1], [1], [0], [0], [0, 0, 1, 0], [], []>} : vector<16x128xbf16>, vector<8x128xbf16>, vector<16x8xf32> -> vector<16x8xf32>
    %cst_53 = arith.constant 0.0883883461 : f32
    %118 = vector.broadcast %cst_53 : f32 to vector<16x8xf32>
    %119 = arith.mulf %117, %118 : vector<16x8xf32>
    %cst_54 = arith.constant -1.000000e+30 : f32
    %120 = vector.shape_cast %9 : vector<16x1xi1> to vector<16x1xi1>
    %121 = vector.broadcast %120 : vector<16x1xi1> to vector<16x8xi1>
    %122 = vector.broadcast %cst_54 : f32 to vector<16x8xf32>
    %123 = arith.select %121, %122, %119 : vector<16x8xi1>, vector<16x8xf32>
    %cst_55 = arith.constant dense<0xFF800000> : vector<16xf32>
    %124 = vector.multi_reduction <maximumf>, %123, %cst_55 [1] : vector<16x8xf32> to vector<16xf32>
    %125 = vector.shape_cast %124 : vector<16xf32> to vector<16x1xf32>
    %126 = vector.broadcast %125 : vector<16x1xf32> to vector<16x8xf32>
    %127 = arith.subf %123, %126 : vector<16x8xf32>
    %128 = math.exp %127 : vector<16x8xf32>
    %cst_56 = arith.constant dense<0.000000e+00> : vector<16xf32>
    %129 = vector.multi_reduction <add>, %128, %cst_56 [1] : vector<16x8xf32> to vector<16xf32>
    %130 = vector.shape_cast %129 : vector<16xf32> to vector<16x1xf32>
    %131 = tpu.reciprocal %130 {approx = true} : vector<16x1xf32> -> vector<16x1xf32>
    %132 = vector.broadcast %131 : vector<16x1xf32> to vector<16x8xf32>
    %133 = arith.mulf %128, %132 : vector<16x8xf32>
    %cst_57 = arith.constant 0.000000e+00 : f32
    %134 = vector.shape_cast %9 : vector<16x1xi1> to vector<16x1xi1>
    %135 = vector.broadcast %134 : vector<16x1xi1> to vector<16x8xi1>
    %136 = vector.broadcast %cst_57 : f32 to vector<16x8xf32>
    %137 = arith.select %135, %136, %133 : vector<16x8xi1>, vector<16x8xf32>
    %138 = arith.truncf %137 : vector<16x8xf32> to vector<16x8xbf16>
    %139 = arith.truncf %114 : vector<8x128xf32> to vector<8x128xbf16>
    %cst_58 = arith.constant dense<0.000000e+00> : vector<16x128xf32>
    %140 = tpu.matmul %138, %139, %cst_58 {dimension_numbers = #tpu.dot_dimension_numbers<[1], [0], [0], [1], [0, 0, 1, 1], [], []>} : vector<16x8xbf16>, vector<8x128xbf16>, vector<16x128xf32> -> vector<16x128xf32>
    %141 = arith.truncf %140 : vector<16x128xf32> to vector<16x128xbf16>
    %142 = vector.extract_strided_slice %77 {offsets = [128, 0], sizes = [128, 256], strides = [1, 1]} : vector<256x256xbf16> to vector<128x256xbf16>
    %cst_59 = arith.constant dense<0.000000e+00> : vector<16x256xf32>
    %143 = tpu.matmul %141, %142, %cst_59 {dimension_numbers = #tpu.dot_dimension_numbers<[1], [0], [0], [1], [0, 0, 1, 1], [], []>} : vector<16x128xbf16>, vector<128x256xbf16>, vector<16x256xf32> -> vector<16x256xf32>
    %144 = arith.addf %111, %143 : vector<16x256xf32>
    %145 = arith.addf %1, %144 : vector<16x256xf32>
    %c0_60 = arith.constant 0 : index
    %c0_61 = arith.constant 0 : index
    %146 = vector.load %arg12[%c0_60, %c0_61] : memref<1x256xf32, #tpu.memory_space<vmem>>, vector<1x256xf32>
    %147 = vector.broadcast %146 : vector<1x256xf32> to vector<16x256xf32>
    %148 = arith.addf %145, %147 : vector<16x256xf32>
    %c0_62 = arith.constant 0 : index
    %c0_63 = arith.constant 0 : index
    %149 = vector.load %arg13[%c0_62, %c0_63] : memref<256x512xbf16, #tpu.memory_space<vmem>>, vector<256x512xbf16>
    %c0_64 = arith.constant 0 : index
    %c0_65 = arith.constant 0 : index
    %150 = vector.load %arg14[%c0_64, %c0_65] : memref<1x512xf32, #tpu.memory_space<vmem>>, vector<1x512xf32>
    %c0_66 = arith.constant 0 : index
    %c0_67 = arith.constant 0 : index
    %151 = vector.load %arg15[%c0_66, %c0_67] : memref<512x256xbf16, #tpu.memory_space<vmem>>, vector<512x256xbf16>
    %c0_68 = arith.constant 0 : index
    %c0_69 = arith.constant 0 : index
    %152 = vector.load %arg16[%c0_68, %c0_69] : memref<1x256xf32, #tpu.memory_space<vmem>>, vector<1x256xf32>
    %cst_70 = arith.constant dense<0.000000e+00> : vector<16xf32>
    %153 = vector.multi_reduction <add>, %148, %cst_70 [1] : vector<16x256xf32> to vector<16xf32>
    %154 = vector.shape_cast %153 : vector<16xf32> to vector<16x1xf32>
    %cst_71 = arith.constant 2.560000e+02 : f32
    %155 = vector.broadcast %cst_71 : f32 to vector<16x1xf32>
    %156 = arith.divf %154, %155 : vector<16x1xf32>
    %157 = vector.broadcast %156 : vector<16x1xf32> to vector<16x256xf32>
    %158 = arith.subf %148, %157 : vector<16x256xf32>
    %159 = arith.mulf %158, %158 : vector<16x256xf32>
    %cst_72 = arith.constant dense<0.000000e+00> : vector<16xf32>
    %160 = vector.multi_reduction <add>, %159, %cst_72 [1] : vector<16x256xf32> to vector<16xf32>
    %161 = vector.shape_cast %160 : vector<16xf32> to vector<16x1xf32>
    %cst_73 = arith.constant 2.560000e+02 : f32
    %162 = vector.broadcast %cst_73 : f32 to vector<16x1xf32>
    %163 = arith.divf %161, %162 : vector<16x1xf32>
    %cst_74 = arith.constant 9.99999974E-6 : f32
    %164 = vector.broadcast %cst_74 : f32 to vector<16x1xf32>
    %165 = arith.addf %163, %164 : vector<16x1xf32>
    %166 = math.rsqrt %165 : vector<16x1xf32>
    %167 = vector.broadcast %166 : vector<16x1xf32> to vector<16x256xf32>
    %168 = arith.mulf %158, %167 : vector<16x256xf32>
    %169 = arith.truncf %168 : vector<16x256xf32> to vector<16x256xbf16>
    %cst_75 = arith.constant dense<0.000000e+00> : vector<16x512xf32>
    %170 = tpu.matmul %169, %149, %cst_75 {dimension_numbers = #tpu.dot_dimension_numbers<[1], [0], [0], [1], [0, 0, 1, 1], [], []>} : vector<16x256xbf16>, vector<256x512xbf16>, vector<16x512xf32> -> vector<16x512xf32>
    %171 = vector.broadcast %150 : vector<1x512xf32> to vector<16x512xf32>
    %172 = arith.addf %170, %171 : vector<16x512xf32>
    %cst_76 = arith.constant 5.000000e-01 : f32
    %173 = vector.broadcast %cst_76 : f32 to vector<16x512xf32>
    %174 = arith.mulf %173, %172 : vector<16x512xf32>
    %cst_77 = arith.constant 4.471500e-02 : f32
    %175 = vector.broadcast %cst_77 : f32 to vector<16x512xf32>
    %176 = arith.mulf %175, %172 : vector<16x512xf32>
    %177 = arith.mulf %176, %172 : vector<16x512xf32>
    %178 = arith.mulf %177, %172 : vector<16x512xf32>
    %179 = arith.addf %172, %178 : vector<16x512xf32>
    %cst_78 = arith.constant 0.797884583 : f32
    %180 = vector.broadcast %cst_78 : f32 to vector<16x512xf32>
    %181 = arith.mulf %180, %179 : vector<16x512xf32>
    %182 = math.tanh %181 : vector<16x512xf32>
    %cst_79 = arith.constant 1.000000e+00 : f32
    %183 = vector.broadcast %cst_79 : f32 to vector<16x512xf32>
    %184 = arith.addf %183, %182 : vector<16x512xf32>
    %185 = arith.mulf %174, %184 : vector<16x512xf32>
    %186 = arith.truncf %185 : vector<16x512xf32> to vector<16x512xbf16>
    %cst_80 = arith.constant dense<0.000000e+00> : vector<16x256xf32>
    %187 = tpu.matmul %186, %151, %cst_80 {dimension_numbers = #tpu.dot_dimension_numbers<[1], [0], [0], [1], [0, 0, 1, 1], [], []>} : vector<16x512xbf16>, vector<512x256xbf16>, vector<16x256xf32> -> vector<16x256xf32>
    %188 = vector.broadcast %152 : vector<1x256xf32> to vector<16x256xf32>
    %189 = arith.addf %187, %188 : vector<16x256xf32>
    %190 = arith.addf %148, %189 : vector<16x256xf32>
    %c0_81 = arith.constant 0 : index
    %c0_82 = arith.constant 0 : index
    %c0_83 = arith.constant 0 : index
    %191 = vector.load %arg17[%c0_81, %c0_82, %c0_83] : memref<1x16x256xf32, #tpu.memory_space<vmem>>, vector<1x16x256xf32>
    %192 = vector.shape_cast %191 : vector<1x16x256xf32> to vector<16x256xf32>
    %193 = vector.shape_cast %190 : vector<16x256xf32> to vector<1x16x256xf32>
    tpu.vector_store %arg17[%c0_81, %c0_82, %c0_83], %193 {strides = array<i32>} : memref<1x16x256xf32, #tpu.memory_space<vmem>>, vector<1x16x256xf32>,
    return
  }
  func.func @transform_0(%arg0: i32) -> (i32, i32, i32) {
    %c0_i32 = arith.constant 0 : i32
    %c0_i32_0 = arith.constant 0 : i32
    %c0_i32_1 = arith.constant 0 : i32
    return %arg0, %c0_i32, %c0_i32_0 : i32, i32, i32
  }
  func.func @transform_1(%arg0: i32) -> (i32, i32, i32) {
    %c0_i32 = arith.constant 0 : i32
    %c0_i32_0 = arith.constant 0 : i32
    %c0_i32_1 = arith.constant 0 : i32
    return %arg0, %c0_i32, %c0_i32_0 : i32, i32, i32
  }
  func.func @transform_2(%arg0: i32) -> (i32, i32, i32) {
    %c0_i32 = arith.constant 0 : i32
    %c0_i32_0 = arith.constant 0 : i32
    %c0_i32_1 = arith.constant 0 : i32
    return %arg0, %c0_i32, %c0_i32_0 : i32, i32, i32
  }
  func.func @transform_3(%arg0: i32) -> (i32, i32, i32) {
    %c0_i32 = arith.constant 0 : i32
    %c0_i32_0 = arith.constant 0 : i32
    %c0_i32_1 = arith.constant 0 : i32
    return %arg0, %c0_i32, %c0_i32_0 : i32, i32, i32
  }
  func.func @transform_4(%arg0: i32) -> (i32, i32) {
    %c0_i32 = arith.constant 0 : i32
    %c0_i32_0 = arith.constant 0 : i32
    %c0_i32_1 = arith.constant 0 : i32
    return %c0_i32, %c0_i32_0 : i32, i32
  }
  func.func @transform_5(%arg0: i32) -> (i32, i32) {
    %c0_i32 = arith.constant 0 : i32
    %c0_i32_0 = arith.constant 0 : i32
    %c0_i32_1 = arith.constant 0 : i32
    return %c0_i32, %c0_i32_0 : i32, i32
  }
  func.func @transform_6(%arg0: i32) -> (i32, i32) {
    %c0_i32 = arith.constant 0 : i32
    %c0_i32_0 = arith.constant 0 : i32
    %c0_i32_1 = arith.constant 0 : i32
    return %c0_i32, %c0_i32_0 : i32, i32
  }
  func.func @transform_7(%arg0: i32) -> (i32, i32) {
    %c0_i32 = arith.constant 0 : i32
    %c0_i32_0 = arith.constant 0 : i32
    %c0_i32_1 = arith.constant 0 : i32
    return %c0_i32, %c0_i32_0 : i32, i32
  }
  func.func @transform_8(%arg0: i32) -> (i32, i32) {
    %c0_i32 = arith.constant 0 : i32
    %c0_i32_0 = arith.constant 0 : i32
    %c0_i32_1 = arith.constant 0 : i32
    return %c0_i32, %c0_i32_0 : i32, i32
  }
  func.func @transform_9(%arg0: i32) -> (i32, i32) {
    %c0_i32 = arith.constant 0 : i32
    %c0_i32_0 = arith.constant 0 : i32
    %c0_i32_1 = arith.constant 0 : i32
    return %c0_i32, %c0_i32_0 : i32, i32
  }
  func.func @transform_10(%arg0: i32) -> (i32, i32) {
    %c0_i32 = arith.constant 0 : i32
    %c0_i32_0 = arith.constant 0 : i32
    %c0_i32_1 = arith.constant 0 : i32
    return %c0_i32, %c0_i32_0 : i32, i32
  }
  func.func @transform_11(%arg0: i32) -> (i32, i32) {
    %c0_i32 = arith.constant 0 : i32
    %c0_i32_0 = arith.constant 0 : i32
    %c0_i32_1 = arith.constant 0 : i32
    return %c0_i32, %c0_i32_0 : i32, i32
  }
  func.func @transform_12(%arg0: i32) -> (i32, i32) {
    %c0_i32 = arith.constant 0 : i32
    %c0_i32_0 = arith.constant 0 : i32
    %c0_i32_1 = arith.constant 0 : i32
    return %c0_i32, %c0_i32_0 : i32, i32
  }
  func.func @transform_13(%arg0: i32) -> (i32, i32) {
    %c0_i32 = arith.constant 0 : i32
    %c0_i32_0 = arith.constant 0 : i32
    %c0_i32_1 = arith.constant 0 : i32
    return %c0_i32, %c0_i32_0 : i32, i32
  }
  func.func @transform_14(%arg0: i32) -> (i32, i32) {
    %c0_i32 = arith.constant 0 : i32
    %c0_i32_0 = arith.constant 0 : i32
    %c0_i32_1 = arith.constant 0 : i32
    return %c0_i32, %c0_i32_0 : i32, i32
  }
  func.func @transform_15(%arg0: i32) -> (i32, i32) {
    %c0_i32 = arith.constant 0 : i32
    %c0_i32_0 = arith.constant 0 : i32
    %c0_i32_1 = arith.constant 0 : i32
    return %c0_i32, %c0_i32_0 : i32, i32
  }
  func.func @transform_16(%arg0: i32) -> (i32, i32, i32) {
    %c0_i32 = arith.constant 0 : i32
    %c0_i32_0 = arith.constant 0 : i32
    %c0_i32_1 = arith.constant 0 : i32
    return %arg0, %c0_i32, %c0_i32_0 : i32, i32, i32
  }
}

module attributes {stable_mosaic.version = 11 : i64} {
  func.func @_dec2_kernel(%arg0: i32, %arg1: memref<1x16x256xf32, #tpu.memory_space<vmem>>, %arg2: memref<1x4x4xf32, #tpu.memory_space<vmem>>, %arg3: memref<1x16x1xf32, #tpu.memory_space<vmem>>, %arg4: memref<4x4x128xf32, #tpu.memory_space<vmem>>, %arg5: memref<256x768xbf16, #tpu.memory_space<vmem>>, %arg6: memref<1x768xf32, #tpu.memory_space<vmem>>, %arg7: memref<256x256xbf16, #tpu.memory_space<vmem>>, %arg8: memref<1x256xf32, #tpu.memory_space<vmem>>, %arg9: memref<256x512xbf16, #tpu.memory_space<vmem>>, %arg10: memref<1x512xf32, #tpu.memory_space<vmem>>, %arg11: memref<512x256xbf16, #tpu.memory_space<vmem>>, %arg12: memref<1x256xf32, #tpu.memory_space<vmem>>, %arg13: memref<1x16x256xf32, #tpu.memory_space<vmem>>, %arg14: memref<16x256xf32, #tpu.memory_space<vmem>>) attributes {dimension_semantics = [#tpu.dimension_semantics<parallel>], iteration_bounds = array<i64: 2>, scalar_prefetch = 0 : i64, scratch_operands = 1 : i64, tpu.core_type = #tpu.core_type<tc>, window_params = [{transform_indices = @transform_0, window_bounds = array<i64: 1, 16, 256>}, {transform_indices = @transform_1, window_bounds = array<i64: 1, 4, 4>}, {transform_indices = @transform_2, window_bounds = array<i64: 1, 16, 1>}, {pipeline_mode = #tpu.pipeline_mode<synchronous>, transform_indices = @transform_3, window_bounds = array<i64: 4, 4, 128>}, {pipeline_mode = #tpu.pipeline_mode<synchronous>, transform_indices = @transform_4, window_bounds = array<i64: 256, 768>}, {pipeline_mode = #tpu.pipeline_mode<synchronous>, transform_indices = @transform_5, window_bounds = array<i64: 1, 768>}, {pipeline_mode = #tpu.pipeline_mode<synchronous>, transform_indices = @transform_6, window_bounds = array<i64: 256, 256>}, {pipeline_mode = #tpu.pipeline_mode<synchronous>, transform_indices = @transform_7, window_bounds = array<i64: 1, 256>}, {pipeline_mode = #tpu.pipeline_mode<synchronous>, transform_indices = @transform_8, window_bounds = array<i64: 256, 512>}, {pipeline_mode = #tpu.pipeline_mode<synchronous>, transform_indices = @transform_9, window_bounds = array<i64: 1, 512>}, {pipeline_mode = #tpu.pipeline_mode<synchronous>, transform_indices = @transform_10, window_bounds = array<i64: 512, 256>}, {pipeline_mode = #tpu.pipeline_mode<synchronous>, transform_indices = @transform_11, window_bounds = array<i64: 1, 256>}, {transform_indices = @transform_12, window_bounds = array<i64: 1, 16, 256>}]} {
    %c0 = arith.constant 0 : index
    %c0_0 = arith.constant 0 : index
    %c0_1 = arith.constant 0 : index
    %0 = vector.load %arg1[%c0, %c0_0, %c0_1] : memref<1x16x256xf32, #tpu.memory_space<vmem>>, vector<1x16x256xf32>
    %1 = vector.shape_cast %0 : vector<1x16x256xf32> to vector<16x256xf32>
    %c0_2 = arith.constant 0 : index
    %c0_3 = arith.constant 0 : index
    %c0_4 = arith.constant 0 : index
    %2 = vector.load %arg2[%c0_2, %c0_3, %c0_4] : memref<1x4x4xf32, #tpu.memory_space<vmem>>, vector<1x4x4xf32>
    %3 = vector.shape_cast %2 : vector<1x4x4xf32> to vector<4x4xf32>
    %cst = arith.constant 5.000000e-01 : f32
    %4 = vector.broadcast %cst : f32 to vector<4x4xf32>
    %5 = arith.cmpf ogt, %3, %4 : vector<4x4xf32>
    %c0_5 = arith.constant 0 : index
    %c0_6 = arith.constant 0 : index
    %c0_7 = arith.constant 0 : index
    %6 = vector.load %arg3[%c0_5, %c0_6, %c0_7] : memref<1x16x1xf32, #tpu.memory_space<vmem>>, vector<1x16x1xf32>
    %7 = vector.shape_cast %6 : vector<1x16x1xf32> to vector<16x1xf32>
    %cst_8 = arith.constant 5.000000e-01 : f32
    %8 = vector.broadcast %cst_8 : f32 to vector<16x1xf32>
    %9 = arith.cmpf ogt, %7, %8 : vector<16x1xf32>
    %c0_9 = arith.constant 0 : index
    %c0_10 = arith.constant 0 : index
    %c0_11 = arith.constant 0 : index
    %10 = vector.load %arg4[%c0_9, %c0_10, %c0_11] : memref<4x4x128xf32, #tpu.memory_space<vmem>>, vector<4x4x128xf32>
    %cst_12 = arith.constant dense<0.000000e+00> : vector<16xf32>
    %11 = vector.multi_reduction <add>, %1, %cst_12 [1] : vector<16x256xf32> to vector<16xf32>
    %12 = vector.shape_cast %11 : vector<16xf32> to vector<16x1xf32>
    %cst_13 = arith.constant 2.560000e+02 : f32
    %13 = vector.broadcast %cst_13 : f32 to vector<16x1xf32>
    %14 = arith.divf %12, %13 : vector<16x1xf32>
    %15 = vector.broadcast %14 : vector<16x1xf32> to vector<16x256xf32>
    %16 = arith.subf %1, %15 : vector<16x256xf32>
    %17 = arith.mulf %16, %16 : vector<16x256xf32>
    %cst_14 = arith.constant dense<0.000000e+00> : vector<16xf32>
    %18 = vector.multi_reduction <add>, %17, %cst_14 [1] : vector<16x256xf32> to vector<16xf32>
    %19 = vector.shape_cast %18 : vector<16xf32> to vector<16x1xf32>
    %cst_15 = arith.constant 2.560000e+02 : f32
    %20 = vector.broadcast %cst_15 : f32 to vector<16x1xf32>
    %21 = arith.divf %19, %20 : vector<16x1xf32>
    %cst_16 = arith.constant 9.99999974E-6 : f32
    %22 = vector.broadcast %cst_16 : f32 to vector<16x1xf32>
    %23 = arith.addf %21, %22 : vector<16x1xf32>
    %24 = math.rsqrt %23 : vector<16x1xf32>
    %25 = vector.broadcast %24 : vector<16x1xf32> to vector<16x256xf32>
    %26 = arith.mulf %16, %25 : vector<16x256xf32>
    %27 = arith.truncf %26 : vector<16x256xf32> to vector<16x256xbf16>
    %c0_17 = arith.constant 0 : index
    %c0_18 = arith.constant 0 : index
    %28 = vector.load %arg5[%c0_17, %c0_18] : memref<256x768xbf16, #tpu.memory_space<vmem>>, vector<256x768xbf16>
    %cst_19 = arith.constant dense<0.000000e+00> : vector<16x768xf32>
    %29 = tpu.matmul %27, %28, %cst_19 {dimension_numbers = #tpu.dot_dimension_numbers<[1], [0], [0], [1], [0, 0, 1, 1], [], []>} : vector<16x256xbf16>, vector<256x768xbf16>, vector<16x768xf32> -> vector<16x768xf32>
    %c0_20 = arith.constant 0 : index
    %c0_21 = arith.constant 0 : index
    %30 = vector.load %arg6[%c0_20, %c0_21] : memref<1x768xf32, #tpu.memory_space<vmem>>, vector<1x768xf32>
    %31 = vector.broadcast %30 : vector<1x768xf32> to vector<16x768xf32>
    %32 = arith.addf %29, %31 : vector<16x768xf32>
    %33 = vector.extract_strided_slice %32 {offsets = [0, 0], sizes = [16, 256], strides = [1, 1]} : vector<16x768xf32> to vector<16x256xf32>
    %34 = vector.extract_strided_slice %32 {offsets = [0, 256], sizes = [16, 256], strides = [1, 1]} : vector<16x768xf32> to vector<16x256xf32>
    %35 = vector.extract_strided_slice %32 {offsets = [0, 512], sizes = [16, 256], strides = [1, 1]} : vector<16x768xf32> to vector<16x256xf32>
    %c0_22 = arith.constant 0 : index
    %c0_23 = arith.constant 0 : index
    %36 = vector.load %arg7[%c0_22, %c0_23] : memref<256x256xbf16, #tpu.memory_space<vmem>>, vector<256x256xbf16>
    %37 = vector.extract_strided_slice %33 {offsets = [0, 0], sizes = [4, 256], strides = [1, 1]} : vector<16x256xf32> to vector<4x256xf32>
    %38 = vector.extract_strided_slice %34 {offsets = [0, 0], sizes = [4, 256], strides = [1, 1]} : vector<16x256xf32> to vector<4x256xf32>
    %39 = vector.extract_strided_slice %35 {offsets = [0, 0], sizes = [4, 256], strides = [1, 1]} : vector<16x256xf32> to vector<4x256xf32>
    %40 = vector.extract_strided_slice %5 {offsets = [0, 0], sizes = [1, 4], strides = [1, 1]} : vector<4x4xi1> to vector<1x4xi1>
    %cst_24 = arith.constant 0.000000e+00 : f32
    %41 = vector.broadcast %cst_24 : f32 to vector<4x256xf32>
    %42 = vector.extract_strided_slice %37 {offsets = [0, 0], sizes = [4, 128], strides = [1, 1]} : vector<4x256xf32> to vector<4x128xf32>
    %43 = vector.extract_strided_slice %38 {offsets = [0, 0], sizes = [4, 128], strides = [1, 1]} : vector<4x256xf32> to vector<4x128xf32>
    %44 = vector.extract_strided_slice %39 {offsets = [0, 0], sizes = [4, 128], strides = [1, 1]} : vector<4x256xf32> to vector<4x128xf32>
    %45 = arith.truncf %42 : vector<4x128xf32> to vector<4x128xbf16>
    %46 = arith.truncf %43 : vector<4x128xf32> to vector<4x128xbf16>
    %cst_25 = arith.constant dense<0.000000e+00> : vector<4x4xf32>
    %47 = tpu.matmul %45, %46, %cst_25 {dimension_numbers = #tpu.dot_dimension_numbers<[1], [1], [0], [0], [0, 0, 1, 0], [], []>} : vector<4x128xbf16>, vector<4x128xbf16>, vector<4x4xf32> -> vector<4x4xf32>
    %48 = vector.shape_cast %42 : vector<4x128xf32> to vector<4x1x128xf32>
    %49 = vector.broadcast %48 : vector<4x1x128xf32> to vector<4x4x128xf32>
    %50 = arith.mulf %49, %10 : vector<4x4x128xf32>
    %cst_26 = arith.constant dense<0.000000e+00> : vector<4x4xf32>
    %51 = vector.multi_reduction <add>, %50, %cst_26 [2] : vector<4x4x128xf32> to vector<4x4xf32>
    %52 = arith.addf %47, %51 : vector<4x4xf32>
    %cst_27 = arith.constant 0.0883883461 : f32
    %53 = vector.broadcast %cst_27 : f32 to vector<4x4xf32>
    %54 = arith.mulf %52, %53 : vector<4x4xf32>
    %cst_28 = arith.constant -1.000000e+30 : f32
    %55 = vector.shape_cast %40 : vector<1x4xi1> to vector<1x4xi1>
    %56 = vector.broadcast %55 : vector<1x4xi1> to vector<4x4xi1>
    %57 = vector.broadcast %cst_28 : f32 to vector<4x4xf32>
    %58 = arith.select %56, %57, %54 : vector<4x4xi1>, vector<4x4xf32>
    %cst_29 = arith.constant dense<0xFF800000> : vector<4xf32>
    %59 = vector.multi_reduction <maximumf>, %58, %cst_29 [1] : vector<4x4xf32> to vector<4xf32>
    %60 = vector.shape_cast %59 : vector<4xf32> to vector<4x1xf32>
    %61 = vector.broadcast %60 : vector<4x1xf32> to vector<4x4xf32>
    %62 = arith.subf %58, %61 : vector<4x4xf32>
    %63 = math.exp %62 : vector<4x4xf32>
    %cst_30 = arith.constant dense<0.000000e+00> : vector<4xf32>
    %64 = vector.multi_reduction <add>, %63, %cst_30 [1] : vector<4x4xf32> to vector<4xf32>
    %65 = vector.shape_cast %64 : vector<4xf32> to vector<4x1xf32>
    %66 = tpu.reciprocal %65 {approx = true} : vector<4x1xf32> -> vector<4x1xf32>
    %67 = vector.broadcast %66 : vector<4x1xf32> to vector<4x4xf32>
    %68 = arith.mulf %63, %67 : vector<4x4xf32>
    %cst_31 = arith.constant 0.000000e+00 : f32
    %69 = vector.shape_cast %40 : vector<1x4xi1> to vector<1x4xi1>
    %70 = vector.broadcast %69 : vector<1x4xi1> to vector<4x4xi1>
    %71 = vector.broadcast %cst_31 : f32 to vector<4x4xf32>
    %72 = arith.select %70, %71, %68 : vector<4x4xi1>, vector<4x4xf32>
    %73 = arith.truncf %72 : vector<4x4xf32> to vector<4x4xbf16>
    %74 = arith.truncf %44 : vector<4x128xf32> to vector<4x128xbf16>
    %cst_32 = arith.constant dense<0.000000e+00> : vector<4x128xf32>
    %75 = tpu.matmul %73, %74, %cst_32 {dimension_numbers = #tpu.dot_dimension_numbers<[1], [0], [0], [1], [0, 0, 1, 1], [], []>} : vector<4x4xbf16>, vector<4x128xbf16>, vector<4x128xf32> -> vector<4x128xf32>
    %76 = arith.truncf %75 : vector<4x128xf32> to vector<4x128xbf16>
    %77 = vector.extract_strided_slice %36 {offsets = [0, 0], sizes = [128, 256], strides = [1, 1]} : vector<256x256xbf16> to vector<128x256xbf16>
    %cst_33 = arith.constant dense<0.000000e+00> : vector<4x256xf32>
    %78 = tpu.matmul %76, %77, %cst_33 {dimension_numbers = #tpu.dot_dimension_numbers<[1], [0], [0], [1], [0, 0, 1, 1], [], []>} : vector<4x128xbf16>, vector<128x256xbf16>, vector<4x256xf32> -> vector<4x256xf32>
    %79 = arith.addf %41, %78 : vector<4x256xf32>
    %80 = vector.extract_strided_slice %37 {offsets = [0, 128], sizes = [4, 128], strides = [1, 1]} : vector<4x256xf32> to vector<4x128xf32>
    %81 = vector.extract_strided_slice %38 {offsets = [0, 128], sizes = [4, 128], strides = [1, 1]} : vector<4x256xf32> to vector<4x128xf32>
    %82 = vector.extract_strided_slice %39 {offsets = [0, 128], sizes = [4, 128], strides = [1, 1]} : vector<4x256xf32> to vector<4x128xf32>
    %83 = arith.truncf %80 : vector<4x128xf32> to vector<4x128xbf16>
    %84 = arith.truncf %81 : vector<4x128xf32> to vector<4x128xbf16>
    %cst_34 = arith.constant dense<0.000000e+00> : vector<4x4xf32>
    %85 = tpu.matmul %83, %84, %cst_34 {dimension_numbers = #tpu.dot_dimension_numbers<[1], [1], [0], [0], [0, 0, 1, 0], [], []>} : vector<4x128xbf16>, vector<4x128xbf16>, vector<4x4xf32> -> vector<4x4xf32>
    %86 = vector.shape_cast %80 : vector<4x128xf32> to vector<4x1x128xf32>
    %87 = vector.broadcast %86 : vector<4x1x128xf32> to vector<4x4x128xf32>
    %88 = arith.mulf %87, %10 : vector<4x4x128xf32>
    %cst_35 = arith.constant dense<0.000000e+00> : vector<4x4xf32>
    %89 = vector.multi_reduction <add>, %88, %cst_35 [2] : vector<4x4x128xf32> to vector<4x4xf32>
    %90 = arith.addf %85, %89 : vector<4x4xf32>
    %cst_36 = arith.constant 0.0883883461 : f32
    %91 = vector.broadcast %cst_36 : f32 to vector<4x4xf32>
    %92 = arith.mulf %90, %91 : vector<4x4xf32>
    %cst_37 = arith.constant -1.000000e+30 : f32
    %93 = vector.shape_cast %40 : vector<1x4xi1> to vector<1x4xi1>
    %94 = vector.broadcast %93 : vector<1x4xi1> to vector<4x4xi1>
    %95 = vector.broadcast %cst_37 : f32 to vector<4x4xf32>
    %96 = arith.select %94, %95, %92 : vector<4x4xi1>, vector<4x4xf32>
    %cst_38 = arith.constant dense<0xFF800000> : vector<4xf32>
    %97 = vector.multi_reduction <maximumf>, %96, %cst_38 [1] : vector<4x4xf32> to vector<4xf32>
    %98 = vector.shape_cast %97 : vector<4xf32> to vector<4x1xf32>
    %99 = vector.broadcast %98 : vector<4x1xf32> to vector<4x4xf32>
    %100 = arith.subf %96, %99 : vector<4x4xf32>
    %101 = math.exp %100 : vector<4x4xf32>
    %cst_39 = arith.constant dense<0.000000e+00> : vector<4xf32>
    %102 = vector.multi_reduction <add>, %101, %cst_39 [1] : vector<4x4xf32> to vector<4xf32>
    %103 = vector.shape_cast %102 : vector<4xf32> to vector<4x1xf32>
    %104 = tpu.reciprocal %103 {approx = true} : vector<4x1xf32> -> vector<4x1xf32>
    %105 = vector.broadcast %104 : vector<4x1xf32> to vector<4x4xf32>
    %106 = arith.mulf %101, %105 : vector<4x4xf32>
    %cst_40 = arith.constant 0.000000e+00 : f32
    %107 = vector.shape_cast %40 : vector<1x4xi1> to vector<1x4xi1>
    %108 = vector.broadcast %107 : vector<1x4xi1> to vector<4x4xi1>
    %109 = vector.broadcast %cst_40 : f32 to vector<4x4xf32>
    %110 = arith.select %108, %109, %106 : vector<4x4xi1>, vector<4x4xf32>
    %111 = arith.truncf %110 : vector<4x4xf32> to vector<4x4xbf16>
    %112 = arith.truncf %82 : vector<4x128xf32> to vector<4x128xbf16>
    %cst_41 = arith.constant dense<0.000000e+00> : vector<4x128xf32>
    %113 = tpu.matmul %111, %112, %cst_41 {dimension_numbers = #tpu.dot_dimension_numbers<[1], [0], [0], [1], [0, 0, 1, 1], [], []>} : vector<4x4xbf16>, vector<4x128xbf16>, vector<4x128xf32> -> vector<4x128xf32>
    %114 = arith.truncf %113 : vector<4x128xf32> to vector<4x128xbf16>
    %115 = vector.extract_strided_slice %36 {offsets = [128, 0], sizes = [128, 256], strides = [1, 1]} : vector<256x256xbf16> to vector<128x256xbf16>
    %cst_42 = arith.constant dense<0.000000e+00> : vector<4x256xf32>
    %116 = tpu.matmul %114, %115, %cst_42 {dimension_numbers = #tpu.dot_dimension_numbers<[1], [0], [0], [1], [0, 0, 1, 1], [], []>} : vector<4x128xbf16>, vector<128x256xbf16>, vector<4x256xf32> -> vector<4x256xf32>
    %117 = arith.addf %79, %116 : vector<4x256xf32>
    %c0_43 = arith.constant 0 : index
    %c0_44 = arith.constant 0 : index
    %118 = vector.load %arg14[%c0_43, %c0_44] : memref<16x256xf32, #tpu.memory_space<vmem>>, vector<4x256xf32>
    tpu.vector_store %arg14[%c0_43, %c0_44], %117 {strides = array<i32>} : memref<16x256xf32, #tpu.memory_space<vmem>>, vector<4x256xf32>,
    %119 = vector.extract_strided_slice %33 {offsets = [4, 0], sizes = [4, 256], strides = [1, 1]} : vector<16x256xf32> to vector<4x256xf32>
    %120 = vector.extract_strided_slice %34 {offsets = [4, 0], sizes = [4, 256], strides = [1, 1]} : vector<16x256xf32> to vector<4x256xf32>
    %121 = vector.extract_strided_slice %35 {offsets = [4, 0], sizes = [4, 256], strides = [1, 1]} : vector<16x256xf32> to vector<4x256xf32>
    %122 = vector.extract_strided_slice %5 {offsets = [1, 0], sizes = [1, 4], strides = [1, 1]} : vector<4x4xi1> to vector<1x4xi1>
    %cst_45 = arith.constant 0.000000e+00 : f32
    %123 = vector.broadcast %cst_45 : f32 to vector<4x256xf32>
    %124 = vector.extract_strided_slice %119 {offsets = [0, 0], sizes = [4, 128], strides = [1, 1]} : vector<4x256xf32> to vector<4x128xf32>
    %125 = vector.extract_strided_slice %120 {offsets = [0, 0], sizes = [4, 128], strides = [1, 1]} : vector<4x256xf32> to vector<4x128xf32>
    %126 = vector.extract_strided_slice %121 {offsets = [0, 0], sizes = [4, 128], strides = [1, 1]} : vector<4x256xf32> to vector<4x128xf32>
    %127 = arith.truncf %124 : vector<4x128xf32> to vector<4x128xbf16>
    %128 = arith.truncf %125 : vector<4x128xf32> to vector<4x128xbf16>
    %cst_46 = arith.constant dense<0.000000e+00> : vector<4x4xf32>
    %129 = tpu.matmul %127, %128, %cst_46 {dimension_numbers = #tpu.dot_dimension_numbers<[1], [1], [0], [0], [0, 0, 1, 0], [], []>} : vector<4x128xbf16>, vector<4x128xbf16>, vector<4x4xf32> -> vector<4x4xf32>
    %130 = vector.shape_cast %124 : vector<4x128xf32> to vector<4x1x128xf32>
    %131 = vector.broadcast %130 : vector<4x1x128xf32> to vector<4x4x128xf32>
    %132 = arith.mulf %131, %10 : vector<4x4x128xf32>
    %cst_47 = arith.constant dense<0.000000e+00> : vector<4x4xf32>
    %133 = vector.multi_reduction <add>, %132, %cst_47 [2] : vector<4x4x128xf32> to vector<4x4xf32>
    %134 = arith.addf %129, %133 : vector<4x4xf32>
    %cst_48 = arith.constant 0.0883883461 : f32
    %135 = vector.broadcast %cst_48 : f32 to vector<4x4xf32>
    %136 = arith.mulf %134, %135 : vector<4x4xf32>
    %cst_49 = arith.constant -1.000000e+30 : f32
    %137 = vector.shape_cast %122 : vector<1x4xi1> to vector<1x4xi1>
    %138 = vector.broadcast %137 : vector<1x4xi1> to vector<4x4xi1>
    %139 = vector.broadcast %cst_49 : f32 to vector<4x4xf32>
    %140 = arith.select %138, %139, %136 : vector<4x4xi1>, vector<4x4xf32>
    %cst_50 = arith.constant dense<0xFF800000> : vector<4xf32>
    %141 = vector.multi_reduction <maximumf>, %140, %cst_50 [1] : vector<4x4xf32> to vector<4xf32>
    %142 = vector.shape_cast %141 : vector<4xf32> to vector<4x1xf32>
    %143 = vector.broadcast %142 : vector<4x1xf32> to vector<4x4xf32>
    %144 = arith.subf %140, %143 : vector<4x4xf32>
    %145 = math.exp %144 : vector<4x4xf32>
    %cst_51 = arith.constant dense<0.000000e+00> : vector<4xf32>
    %146 = vector.multi_reduction <add>, %145, %cst_51 [1] : vector<4x4xf32> to vector<4xf32>
    %147 = vector.shape_cast %146 : vector<4xf32> to vector<4x1xf32>
    %148 = tpu.reciprocal %147 {approx = true} : vector<4x1xf32> -> vector<4x1xf32>
    %149 = vector.broadcast %148 : vector<4x1xf32> to vector<4x4xf32>
    %150 = arith.mulf %145, %149 : vector<4x4xf32>
    %cst_52 = arith.constant 0.000000e+00 : f32
    %151 = vector.shape_cast %122 : vector<1x4xi1> to vector<1x4xi1>
    %152 = vector.broadcast %151 : vector<1x4xi1> to vector<4x4xi1>
    %153 = vector.broadcast %cst_52 : f32 to vector<4x4xf32>
    %154 = arith.select %152, %153, %150 : vector<4x4xi1>, vector<4x4xf32>
    %155 = arith.truncf %154 : vector<4x4xf32> to vector<4x4xbf16>
    %156 = arith.truncf %126 : vector<4x128xf32> to vector<4x128xbf16>
    %cst_53 = arith.constant dense<0.000000e+00> : vector<4x128xf32>
    %157 = tpu.matmul %155, %156, %cst_53 {dimension_numbers = #tpu.dot_dimension_numbers<[1], [0], [0], [1], [0, 0, 1, 1], [], []>} : vector<4x4xbf16>, vector<4x128xbf16>, vector<4x128xf32> -> vector<4x128xf32>
    %158 = arith.truncf %157 : vector<4x128xf32> to vector<4x128xbf16>
    %159 = vector.extract_strided_slice %36 {offsets = [0, 0], sizes = [128, 256], strides = [1, 1]} : vector<256x256xbf16> to vector<128x256xbf16>
    %cst_54 = arith.constant dense<0.000000e+00> : vector<4x256xf32>
    %160 = tpu.matmul %158, %159, %cst_54 {dimension_numbers = #tpu.dot_dimension_numbers<[1], [0], [0], [1], [0, 0, 1, 1], [], []>} : vector<4x128xbf16>, vector<128x256xbf16>, vector<4x256xf32> -> vector<4x256xf32>
    %161 = arith.addf %123, %160 : vector<4x256xf32>
    %162 = vector.extract_strided_slice %119 {offsets = [0, 128], sizes = [4, 128], strides = [1, 1]} : vector<4x256xf32> to vector<4x128xf32>
    %163 = vector.extract_strided_slice %120 {offsets = [0, 128], sizes = [4, 128], strides = [1, 1]} : vector<4x256xf32> to vector<4x128xf32>
    %164 = vector.extract_strided_slice %121 {offsets = [0, 128], sizes = [4, 128], strides = [1, 1]} : vector<4x256xf32> to vector<4x128xf32>
    %165 = arith.truncf %162 : vector<4x128xf32> to vector<4x128xbf16>
    %166 = arith.truncf %163 : vector<4x128xf32> to vector<4x128xbf16>
    %cst_55 = arith.constant dense<0.000000e+00> : vector<4x4xf32>
    %167 = tpu.matmul %165, %166, %cst_55 {dimension_numbers = #tpu.dot_dimension_numbers<[1], [1], [0], [0], [0, 0, 1, 0], [], []>} : vector<4x128xbf16>, vector<4x128xbf16>, vector<4x4xf32> -> vector<4x4xf32>
    %168 = vector.shape_cast %162 : vector<4x128xf32> to vector<4x1x128xf32>
    %169 = vector.broadcast %168 : vector<4x1x128xf32> to vector<4x4x128xf32>
    %170 = arith.mulf %169, %10 : vector<4x4x128xf32>
    %cst_56 = arith.constant dense<0.000000e+00> : vector<4x4xf32>
    %171 = vector.multi_reduction <add>, %170, %cst_56 [2] : vector<4x4x128xf32> to vector<4x4xf32>
    %172 = arith.addf %167, %171 : vector<4x4xf32>
    %cst_57 = arith.constant 0.0883883461 : f32
    %173 = vector.broadcast %cst_57 : f32 to vector<4x4xf32>
    %174 = arith.mulf %172, %173 : vector<4x4xf32>
    %cst_58 = arith.constant -1.000000e+30 : f32
    %175 = vector.shape_cast %122 : vector<1x4xi1> to vector<1x4xi1>
    %176 = vector.broadcast %175 : vector<1x4xi1> to vector<4x4xi1>
    %177 = vector.broadcast %cst_58 : f32 to vector<4x4xf32>
    %178 = arith.select %176, %177, %174 : vector<4x4xi1>, vector<4x4xf32>
    %cst_59 = arith.constant dense<0xFF800000> : vector<4xf32>
    %179 = vector.multi_reduction <maximumf>, %178, %cst_59 [1] : vector<4x4xf32> to vector<4xf32>
    %180 = vector.shape_cast %179 : vector<4xf32> to vector<4x1xf32>
    %181 = vector.broadcast %180 : vector<4x1xf32> to vector<4x4xf32>
    %182 = arith.subf %178, %181 : vector<4x4xf32>
    %183 = math.exp %182 : vector<4x4xf32>
    %cst_60 = arith.constant dense<0.000000e+00> : vector<4xf32>
    %184 = vector.multi_reduction <add>, %183, %cst_60 [1] : vector<4x4xf32> to vector<4xf32>
    %185 = vector.shape_cast %184 : vector<4xf32> to vector<4x1xf32>
    %186 = tpu.reciprocal %185 {approx = true} : vector<4x1xf32> -> vector<4x1xf32>
    %187 = vector.broadcast %186 : vector<4x1xf32> to vector<4x4xf32>
    %188 = arith.mulf %183, %187 : vector<4x4xf32>
    %cst_61 = arith.constant 0.000000e+00 : f32
    %189 = vector.shape_cast %122 : vector<1x4xi1> to vector<1x4xi1>
    %190 = vector.broadcast %189 : vector<1x4xi1> to vector<4x4xi1>
    %191 = vector.broadcast %cst_61 : f32 to vector<4x4xf32>
    %192 = arith.select %190, %191, %188 : vector<4x4xi1>, vector<4x4xf32>
    %193 = arith.truncf %192 : vector<4x4xf32> to vector<4x4xbf16>
    %194 = arith.truncf %164 : vector<4x128xf32> to vector<4x128xbf16>
    %cst_62 = arith.constant dense<0.000000e+00> : vector<4x128xf32>
    %195 = tpu.matmul %193, %194, %cst_62 {dimension_numbers = #tpu.dot_dimension_numbers<[1], [0], [0], [1], [0, 0, 1, 1], [], []>} : vector<4x4xbf16>, vector<4x128xbf16>, vector<4x128xf32> -> vector<4x128xf32>
    %196 = arith.truncf %195 : vector<4x128xf32> to vector<4x128xbf16>
    %197 = vector.extract_strided_slice %36 {offsets = [128, 0], sizes = [128, 256], strides = [1, 1]} : vector<256x256xbf16> to vector<128x256xbf16>
    %cst_63 = arith.constant dense<0.000000e+00> : vector<4x256xf32>
    %198 = tpu.matmul %196, %197, %cst_63 {dimension_numbers = #tpu.dot_dimension_numbers<[1], [0], [0], [1], [0, 0, 1, 1], [], []>} : vector<4x128xbf16>, vector<128x256xbf16>, vector<4x256xf32> -> vector<4x256xf32>
    %199 = arith.addf %161, %198 : vector<4x256xf32>
    %c4 = arith.constant 4 : index
    %c0_64 = arith.constant 0 : index
    %200 = vector.load %arg14[%c4, %c0_64] : memref<16x256xf32, #tpu.memory_space<vmem>>, vector<4x256xf32>
    tpu.vector_store %arg14[%c4, %c0_64], %199 {strides = array<i32>} : memref<16x256xf32, #tpu.memory_space<vmem>>, vector<4x256xf32>,
    %201 = vector.extract_strided_slice %33 {offsets = [8, 0], sizes = [4, 256], strides = [1, 1]} : vector<16x256xf32> to vector<4x256xf32>
    %202 = vector.extract_strided_slice %34 {offsets = [8, 0], sizes = [4, 256], strides = [1, 1]} : vector<16x256xf32> to vector<4x256xf32>
    %203 = vector.extract_strided_slice %35 {offsets = [8, 0], sizes = [4, 256], strides = [1, 1]} : vector<16x256xf32> to vector<4x256xf32>
    %204 = vector.extract_strided_slice %5 {offsets = [2, 0], sizes = [1, 4], strides = [1, 1]} : vector<4x4xi1> to vector<1x4xi1>
    %cst_65 = arith.constant 0.000000e+00 : f32
    %205 = vector.broadcast %cst_65 : f32 to vector<4x256xf32>
    %206 = vector.extract_strided_slice %201 {offsets = [0, 0], sizes = [4, 128], strides = [1, 1]} : vector<4x256xf32> to vector<4x128xf32>
    %207 = vector.extract_strided_slice %202 {offsets = [0, 0], sizes = [4, 128], strides = [1, 1]} : vector<4x256xf32> to vector<4x128xf32>
    %208 = vector.extract_strided_slice %203 {offsets = [0, 0], sizes = [4, 128], strides = [1, 1]} : vector<4x256xf32> to vector<4x128xf32>
    %209 = arith.truncf %206 : vector<4x128xf32> to vector<4x128xbf16>
    %210 = arith.truncf %207 : vector<4x128xf32> to vector<4x128xbf16>
    %cst_66 = arith.constant dense<0.000000e+00> : vector<4x4xf32>
    %211 = tpu.matmul %209, %210, %cst_66 {dimension_numbers = #tpu.dot_dimension_numbers<[1], [1], [0], [0], [0, 0, 1, 0], [], []>} : vector<4x128xbf16>, vector<4x128xbf16>, vector<4x4xf32> -> vector<4x4xf32>
    %212 = vector.shape_cast %206 : vector<4x128xf32> to vector<4x1x128xf32>
    %213 = vector.broadcast %212 : vector<4x1x128xf32> to vector<4x4x128xf32>
    %214 = arith.mulf %213, %10 : vector<4x4x128xf32>
    %cst_67 = arith.constant dense<0.000000e+00> : vector<4x4xf32>
    %215 = vector.multi_reduction <add>, %214, %cst_67 [2] : vector<4x4x128xf32> to vector<4x4xf32>
    %216 = arith.addf %211, %215 : vector<4x4xf32>
    %cst_68 = arith.constant 0.0883883461 : f32
    %217 = vector.broadcast %cst_68 : f32 to vector<4x4xf32>
    %218 = arith.mulf %216, %217 : vector<4x4xf32>
    %cst_69 = arith.constant -1.000000e+30 : f32
    %219 = vector.shape_cast %204 : vector<1x4xi1> to vector<1x4xi1>
    %220 = vector.broadcast %219 : vector<1x4xi1> to vector<4x4xi1>
    %221 = vector.broadcast %cst_69 : f32 to vector<4x4xf32>
    %222 = arith.select %220, %221, %218 : vector<4x4xi1>, vector<4x4xf32>
    %cst_70 = arith.constant dense<0xFF800000> : vector<4xf32>
    %223 = vector.multi_reduction <maximumf>, %222, %cst_70 [1] : vector<4x4xf32> to vector<4xf32>
    %224 = vector.shape_cast %223 : vector<4xf32> to vector<4x1xf32>
    %225 = vector.broadcast %224 : vector<4x1xf32> to vector<4x4xf32>
    %226 = arith.subf %222, %225 : vector<4x4xf32>
    %227 = math.exp %226 : vector<4x4xf32>
    %cst_71 = arith.constant dense<0.000000e+00> : vector<4xf32>
    %228 = vector.multi_reduction <add>, %227, %cst_71 [1] : vector<4x4xf32> to vector<4xf32>
    %229 = vector.shape_cast %228 : vector<4xf32> to vector<4x1xf32>
    %230 = tpu.reciprocal %229 {approx = true} : vector<4x1xf32> -> vector<4x1xf32>
    %231 = vector.broadcast %230 : vector<4x1xf32> to vector<4x4xf32>
    %232 = arith.mulf %227, %231 : vector<4x4xf32>
    %cst_72 = arith.constant 0.000000e+00 : f32
    %233 = vector.shape_cast %204 : vector<1x4xi1> to vector<1x4xi1>
    %234 = vector.broadcast %233 : vector<1x4xi1> to vector<4x4xi1>
    %235 = vector.broadcast %cst_72 : f32 to vector<4x4xf32>
    %236 = arith.select %234, %235, %232 : vector<4x4xi1>, vector<4x4xf32>
    %237 = arith.truncf %236 : vector<4x4xf32> to vector<4x4xbf16>
    %238 = arith.truncf %208 : vector<4x128xf32> to vector<4x128xbf16>
    %cst_73 = arith.constant dense<0.000000e+00> : vector<4x128xf32>
    %239 = tpu.matmul %237, %238, %cst_73 {dimension_numbers = #tpu.dot_dimension_numbers<[1], [0], [0], [1], [0, 0, 1, 1], [], []>} : vector<4x4xbf16>, vector<4x128xbf16>, vector<4x128xf32> -> vector<4x128xf32>
    %240 = arith.truncf %239 : vector<4x128xf32> to vector<4x128xbf16>
    %241 = vector.extract_strided_slice %36 {offsets = [0, 0], sizes = [128, 256], strides = [1, 1]} : vector<256x256xbf16> to vector<128x256xbf16>
    %cst_74 = arith.constant dense<0.000000e+00> : vector<4x256xf32>
    %242 = tpu.matmul %240, %241, %cst_74 {dimension_numbers = #tpu.dot_dimension_numbers<[1], [0], [0], [1], [0, 0, 1, 1], [], []>} : vector<4x128xbf16>, vector<128x256xbf16>, vector<4x256xf32> -> vector<4x256xf32>
    %243 = arith.addf %205, %242 : vector<4x256xf32>
    %244 = vector.extract_strided_slice %201 {offsets = [0, 128], sizes = [4, 128], strides = [1, 1]} : vector<4x256xf32> to vector<4x128xf32>
    %245 = vector.extract_strided_slice %202 {offsets = [0, 128], sizes = [4, 128], strides = [1, 1]} : vector<4x256xf32> to vector<4x128xf32>
    %246 = vector.extract_strided_slice %203 {offsets = [0, 128], sizes = [4, 128], strides = [1, 1]} : vector<4x256xf32> to vector<4x128xf32>
    %247 = arith.truncf %244 : vector<4x128xf32> to vector<4x128xbf16>
    %248 = arith.truncf %245 : vector<4x128xf32> to vector<4x128xbf16>
    %cst_75 = arith.constant dense<0.000000e+00> : vector<4x4xf32>
    %249 = tpu.matmul %247, %248, %cst_75 {dimension_numbers = #tpu.dot_dimension_numbers<[1], [1], [0], [0], [0, 0, 1, 0], [], []>} : vector<4x128xbf16>, vector<4x128xbf16>, vector<4x4xf32> -> vector<4x4xf32>
    %250 = vector.shape_cast %244 : vector<4x128xf32> to vector<4x1x128xf32>
    %251 = vector.broadcast %250 : vector<4x1x128xf32> to vector<4x4x128xf32>
    %252 = arith.mulf %251, %10 : vector<4x4x128xf32>
    %cst_76 = arith.constant dense<0.000000e+00> : vector<4x4xf32>
    %253 = vector.multi_reduction <add>, %252, %cst_76 [2] : vector<4x4x128xf32> to vector<4x4xf32>
    %254 = arith.addf %249, %253 : vector<4x4xf32>
    %cst_77 = arith.constant 0.0883883461 : f32
    %255 = vector.broadcast %cst_77 : f32 to vector<4x4xf32>
    %256 = arith.mulf %254, %255 : vector<4x4xf32>
    %cst_78 = arith.constant -1.000000e+30 : f32
    %257 = vector.shape_cast %204 : vector<1x4xi1> to vector<1x4xi1>
    %258 = vector.broadcast %257 : vector<1x4xi1> to vector<4x4xi1>
    %259 = vector.broadcast %cst_78 : f32 to vector<4x4xf32>
    %260 = arith.select %258, %259, %256 : vector<4x4xi1>, vector<4x4xf32>
    %cst_79 = arith.constant dense<0xFF800000> : vector<4xf32>
    %261 = vector.multi_reduction <maximumf>, %260, %cst_79 [1] : vector<4x4xf32> to vector<4xf32>
    %262 = vector.shape_cast %261 : vector<4xf32> to vector<4x1xf32>
    %263 = vector.broadcast %262 : vector<4x1xf32> to vector<4x4xf32>
    %264 = arith.subf %260, %263 : vector<4x4xf32>
    %265 = math.exp %264 : vector<4x4xf32>
    %cst_80 = arith.constant dense<0.000000e+00> : vector<4xf32>
    %266 = vector.multi_reduction <add>, %265, %cst_80 [1] : vector<4x4xf32> to vector<4xf32>
    %267 = vector.shape_cast %266 : vector<4xf32> to vector<4x1xf32>
    %268 = tpu.reciprocal %267 {approx = true} : vector<4x1xf32> -> vector<4x1xf32>
    %269 = vector.broadcast %268 : vector<4x1xf32> to vector<4x4xf32>
    %270 = arith.mulf %265, %269 : vector<4x4xf32>
    %cst_81 = arith.constant 0.000000e+00 : f32
    %271 = vector.shape_cast %204 : vector<1x4xi1> to vector<1x4xi1>
    %272 = vector.broadcast %271 : vector<1x4xi1> to vector<4x4xi1>
    %273 = vector.broadcast %cst_81 : f32 to vector<4x4xf32>
    %274 = arith.select %272, %273, %270 : vector<4x4xi1>, vector<4x4xf32>
    %275 = arith.truncf %274 : vector<4x4xf32> to vector<4x4xbf16>
    %276 = arith.truncf %246 : vector<4x128xf32> to vector<4x128xbf16>
    %cst_82 = arith.constant dense<0.000000e+00> : vector<4x128xf32>
    %277 = tpu.matmul %275, %276, %cst_82 {dimension_numbers = #tpu.dot_dimension_numbers<[1], [0], [0], [1], [0, 0, 1, 1], [], []>} : vector<4x4xbf16>, vector<4x128xbf16>, vector<4x128xf32> -> vector<4x128xf32>
    %278 = arith.truncf %277 : vector<4x128xf32> to vector<4x128xbf16>
    %279 = vector.extract_strided_slice %36 {offsets = [128, 0], sizes = [128, 256], strides = [1, 1]} : vector<256x256xbf16> to vector<128x256xbf16>
    %cst_83 = arith.constant dense<0.000000e+00> : vector<4x256xf32>
    %280 = tpu.matmul %278, %279, %cst_83 {dimension_numbers = #tpu.dot_dimension_numbers<[1], [0], [0], [1], [0, 0, 1, 1], [], []>} : vector<4x128xbf16>, vector<128x256xbf16>, vector<4x256xf32> -> vector<4x256xf32>
    %281 = arith.addf %243, %280 : vector<4x256xf32>
    %c8 = arith.constant 8 : index
    %c0_84 = arith.constant 0 : index
    %282 = vector.load %arg14[%c8, %c0_84] : memref<16x256xf32, #tpu.memory_space<vmem>>, vector<4x256xf32>
    tpu.vector_store %arg14[%c8, %c0_84], %281 {strides = array<i32>} : memref<16x256xf32, #tpu.memory_space<vmem>>, vector<4x256xf32>,
    %283 = vector.extract_strided_slice %33 {offsets = [12, 0], sizes = [4, 256], strides = [1, 1]} : vector<16x256xf32> to vector<4x256xf32>
    %284 = vector.extract_strided_slice %34 {offsets = [12, 0], sizes = [4, 256], strides = [1, 1]} : vector<16x256xf32> to vector<4x256xf32>
    %285 = vector.extract_strided_slice %35 {offsets = [12, 0], sizes = [4, 256], strides = [1, 1]} : vector<16x256xf32> to vector<4x256xf32>
    %286 = vector.extract_strided_slice %5 {offsets = [3, 0], sizes = [1, 4], strides = [1, 1]} : vector<4x4xi1> to vector<1x4xi1>
    %cst_85 = arith.constant 0.000000e+00 : f32
    %287 = vector.broadcast %cst_85 : f32 to vector<4x256xf32>
    %288 = vector.extract_strided_slice %283 {offsets = [0, 0], sizes = [4, 128], strides = [1, 1]} : vector<4x256xf32> to vector<4x128xf32>
    %289 = vector.extract_strided_slice %284 {offsets = [0, 0], sizes = [4, 128], strides = [1, 1]} : vector<4x256xf32> to vector<4x128xf32>
    %290 = vector.extract_strided_slice %285 {offsets = [0, 0], sizes = [4, 128], strides = [1, 1]} : vector<4x256xf32> to vector<4x128xf32>
    %291 = arith.truncf %288 : vector<4x128xf32> to vector<4x128xbf16>
    %292 = arith.truncf %289 : vector<4x128xf32> to vector<4x128xbf16>
    %cst_86 = arith.constant dense<0.000000e+00> : vector<4x4xf32>
    %293 = tpu.matmul %291, %292, %cst_86 {dimension_numbers = #tpu.dot_dimension_numbers<[1], [1], [0], [0], [0, 0, 1, 0], [], []>} : vector<4x128xbf16>, vector<4x128xbf16>, vector<4x4xf32> -> vector<4x4xf32>
    %294 = vector.shape_cast %288 : vector<4x128xf32> to vector<4x1x128xf32>
    %295 = vector.broadcast %294 : vector<4x1x128xf32> to vector<4x4x128xf32>
    %296 = arith.mulf %295, %10 : vector<4x4x128xf32>
    %cst_87 = arith.constant dense<0.000000e+00> : vector<4x4xf32>
    %297 = vector.multi_reduction <add>, %296, %cst_87 [2] : vector<4x4x128xf32> to vector<4x4xf32>
    %298 = arith.addf %293, %297 : vector<4x4xf32>
    %cst_88 = arith.constant 0.0883883461 : f32
    %299 = vector.broadcast %cst_88 : f32 to vector<4x4xf32>
    %300 = arith.mulf %298, %299 : vector<4x4xf32>
    %cst_89 = arith.constant -1.000000e+30 : f32
    %301 = vector.shape_cast %286 : vector<1x4xi1> to vector<1x4xi1>
    %302 = vector.broadcast %301 : vector<1x4xi1> to vector<4x4xi1>
    %303 = vector.broadcast %cst_89 : f32 to vector<4x4xf32>
    %304 = arith.select %302, %303, %300 : vector<4x4xi1>, vector<4x4xf32>
    %cst_90 = arith.constant dense<0xFF800000> : vector<4xf32>
    %305 = vector.multi_reduction <maximumf>, %304, %cst_90 [1] : vector<4x4xf32> to vector<4xf32>
    %306 = vector.shape_cast %305 : vector<4xf32> to vector<4x1xf32>
    %307 = vector.broadcast %306 : vector<4x1xf32> to vector<4x4xf32>
    %308 = arith.subf %304, %307 : vector<4x4xf32>
    %309 = math.exp %308 : vector<4x4xf32>
    %cst_91 = arith.constant dense<0.000000e+00> : vector<4xf32>
    %310 = vector.multi_reduction <add>, %309, %cst_91 [1] : vector<4x4xf32> to vector<4xf32>
    %311 = vector.shape_cast %310 : vector<4xf32> to vector<4x1xf32>
    %312 = tpu.reciprocal %311 {approx = true} : vector<4x1xf32> -> vector<4x1xf32>
    %313 = vector.broadcast %312 : vector<4x1xf32> to vector<4x4xf32>
    %314 = arith.mulf %309, %313 : vector<4x4xf32>
    %cst_92 = arith.constant 0.000000e+00 : f32
    %315 = vector.shape_cast %286 : vector<1x4xi1> to vector<1x4xi1>
    %316 = vector.broadcast %315 : vector<1x4xi1> to vector<4x4xi1>
    %317 = vector.broadcast %cst_92 : f32 to vector<4x4xf32>
    %318 = arith.select %316, %317, %314 : vector<4x4xi1>, vector<4x4xf32>
    %319 = arith.truncf %318 : vector<4x4xf32> to vector<4x4xbf16>
    %320 = arith.truncf %290 : vector<4x128xf32> to vector<4x128xbf16>
    %cst_93 = arith.constant dense<0.000000e+00> : vector<4x128xf32>
    %321 = tpu.matmul %319, %320, %cst_93 {dimension_numbers = #tpu.dot_dimension_numbers<[1], [0], [0], [1], [0, 0, 1, 1], [], []>} : vector<4x4xbf16>, vector<4x128xbf16>, vector<4x128xf32> -> vector<4x128xf32>
    %322 = arith.truncf %321 : vector<4x128xf32> to vector<4x128xbf16>
    %323 = vector.extract_strided_slice %36 {offsets = [0, 0], sizes = [128, 256], strides = [1, 1]} : vector<256x256xbf16> to vector<128x256xbf16>
    %cst_94 = arith.constant dense<0.000000e+00> : vector<4x256xf32>
    %324 = tpu.matmul %322, %323, %cst_94 {dimension_numbers = #tpu.dot_dimension_numbers<[1], [0], [0], [1], [0, 0, 1, 1], [], []>} : vector<4x128xbf16>, vector<128x256xbf16>, vector<4x256xf32> -> vector<4x256xf32>
    %325 = arith.addf %287, %324 : vector<4x256xf32>
    %326 = vector.extract_strided_slice %283 {offsets = [0, 128], sizes = [4, 128], strides = [1, 1]} : vector<4x256xf32> to vector<4x128xf32>
    %327 = vector.extract_strided_slice %284 {offsets = [0, 128], sizes = [4, 128], strides = [1, 1]} : vector<4x256xf32> to vector<4x128xf32>
    %328 = vector.extract_strided_slice %285 {offsets = [0, 128], sizes = [4, 128], strides = [1, 1]} : vector<4x256xf32> to vector<4x128xf32>
    %329 = arith.truncf %326 : vector<4x128xf32> to vector<4x128xbf16>
    %330 = arith.truncf %327 : vector<4x128xf32> to vector<4x128xbf16>
    %cst_95 = arith.constant dense<0.000000e+00> : vector<4x4xf32>
    %331 = tpu.matmul %329, %330, %cst_95 {dimension_numbers = #tpu.dot_dimension_numbers<[1], [1], [0], [0], [0, 0, 1, 0], [], []>} : vector<4x128xbf16>, vector<4x128xbf16>, vector<4x4xf32> -> vector<4x4xf32>
    %332 = vector.shape_cast %326 : vector<4x128xf32> to vector<4x1x128xf32>
    %333 = vector.broadcast %332 : vector<4x1x128xf32> to vector<4x4x128xf32>
    %334 = arith.mulf %333, %10 : vector<4x4x128xf32>
    %cst_96 = arith.constant dense<0.000000e+00> : vector<4x4xf32>
    %335 = vector.multi_reduction <add>, %334, %cst_96 [2] : vector<4x4x128xf32> to vector<4x4xf32>
    %336 = arith.addf %331, %335 : vector<4x4xf32>
    %cst_97 = arith.constant 0.0883883461 : f32
    %337 = vector.broadcast %cst_97 : f32 to vector<4x4xf32>
    %338 = arith.mulf %336, %337 : vector<4x4xf32>
    %cst_98 = arith.constant -1.000000e+30 : f32
    %339 = vector.shape_cast %286 : vector<1x4xi1> to vector<1x4xi1>
    %340 = vector.broadcast %339 : vector<1x4xi1> to vector<4x4xi1>
    %341 = vector.broadcast %cst_98 : f32 to vector<4x4xf32>
    %342 = arith.select %340, %341, %338 : vector<4x4xi1>, vector<4x4xf32>
    %cst_99 = arith.constant dense<0xFF800000> : vector<4xf32>
    %343 = vector.multi_reduction <maximumf>, %342, %cst_99 [1] : vector<4x4xf32> to vector<4xf32>
    %344 = vector.shape_cast %343 : vector<4xf32> to vector<4x1xf32>
    %345 = vector.broadcast %344 : vector<4x1xf32> to vector<4x4xf32>
    %346 = arith.subf %342, %345 : vector<4x4xf32>
    %347 = math.exp %346 : vector<4x4xf32>
    %cst_100 = arith.constant dense<0.000000e+00> : vector<4xf32>
    %348 = vector.multi_reduction <add>, %347, %cst_100 [1] : vector<4x4xf32> to vector<4xf32>
    %349 = vector.shape_cast %348 : vector<4xf32> to vector<4x1xf32>
    %350 = tpu.reciprocal %349 {approx = true} : vector<4x1xf32> -> vector<4x1xf32>
    %351 = vector.broadcast %350 : vector<4x1xf32> to vector<4x4xf32>
    %352 = arith.mulf %347, %351 : vector<4x4xf32>
    %cst_101 = arith.constant 0.000000e+00 : f32
    %353 = vector.shape_cast %286 : vector<1x4xi1> to vector<1x4xi1>
    %354 = vector.broadcast %353 : vector<1x4xi1> to vector<4x4xi1>
    %355 = vector.broadcast %cst_101 : f32 to vector<4x4xf32>
    %356 = arith.select %354, %355, %352 : vector<4x4xi1>, vector<4x4xf32>
    %357 = arith.truncf %356 : vector<4x4xf32> to vector<4x4xbf16>
    %358 = arith.truncf %328 : vector<4x128xf32> to vector<4x128xbf16>
    %cst_102 = arith.constant dense<0.000000e+00> : vector<4x128xf32>
    %359 = tpu.matmul %357, %358, %cst_102 {dimension_numbers = #tpu.dot_dimension_numbers<[1], [0], [0], [1], [0, 0, 1, 1], [], []>} : vector<4x4xbf16>, vector<4x128xbf16>, vector<4x128xf32> -> vector<4x128xf32>
    %360 = arith.truncf %359 : vector<4x128xf32> to vector<4x128xbf16>
    %361 = vector.extract_strided_slice %36 {offsets = [128, 0], sizes = [128, 256], strides = [1, 1]} : vector<256x256xbf16> to vector<128x256xbf16>
    %cst_103 = arith.constant dense<0.000000e+00> : vector<4x256xf32>
    %362 = tpu.matmul %360, %361, %cst_103 {dimension_numbers = #tpu.dot_dimension_numbers<[1], [0], [0], [1], [0, 0, 1, 1], [], []>} : vector<4x128xbf16>, vector<128x256xbf16>, vector<4x256xf32> -> vector<4x256xf32>
    %363 = arith.addf %325, %362 : vector<4x256xf32>
    %c12 = arith.constant 12 : index
    %c0_104 = arith.constant 0 : index
    %364 = vector.load %arg14[%c12, %c0_104] : memref<16x256xf32, #tpu.memory_space<vmem>>, vector<4x256xf32>
    tpu.vector_store %arg14[%c12, %c0_104], %363 {strides = array<i32>} : memref<16x256xf32, #tpu.memory_space<vmem>>, vector<4x256xf32>,
    %c0_105 = arith.constant 0 : index
    %c0_106 = arith.constant 0 : index
    %365 = vector.load %arg14[%c0_105, %c0_106] : memref<16x256xf32, #tpu.memory_space<vmem>>, vector<16x256xf32>
    %c0_107 = arith.constant 0 : index
    %c0_108 = arith.constant 0 : index
    %366 = vector.load %arg8[%c0_107, %c0_108] : memref<1x256xf32, #tpu.memory_space<vmem>>, vector<1x256xf32>
    %367 = vector.broadcast %366 : vector<1x256xf32> to vector<16x256xf32>
    %368 = arith.addf %365, %367 : vector<16x256xf32>
    %cst_109 = arith.constant 0.000000e+00 : f32
    %369 = vector.shape_cast %9 : vector<16x1xi1> to vector<16x1xi1>
    %370 = vector.broadcast %369 : vector<16x1xi1> to vector<16x256xi1>
    %371 = vector.broadcast %cst_109 : f32 to vector<16x256xf32>
    %372 = arith.select %370, %371, %368 : vector<16x256xi1>, vector<16x256xf32>
    %373 = arith.addf %1, %372 : vector<16x256xf32>
    %c0_110 = arith.constant 0 : index
    %c0_111 = arith.constant 0 : index
    %374 = vector.load %arg9[%c0_110, %c0_111] : memref<256x512xbf16, #tpu.memory_space<vmem>>, vector<256x512xbf16>
    %c0_112 = arith.constant 0 : index
    %c0_113 = arith.constant 0 : index
    %375 = vector.load %arg10[%c0_112, %c0_113] : memref<1x512xf32, #tpu.memory_space<vmem>>, vector<1x512xf32>
    %c0_114 = arith.constant 0 : index
    %c0_115 = arith.constant 0 : index
    %376 = vector.load %arg11[%c0_114, %c0_115] : memref<512x256xbf16, #tpu.memory_space<vmem>>, vector<512x256xbf16>
    %c0_116 = arith.constant 0 : index
    %c0_117 = arith.constant 0 : index
    %377 = vector.load %arg12[%c0_116, %c0_117] : memref<1x256xf32, #tpu.memory_space<vmem>>, vector<1x256xf32>
    %cst_118 = arith.constant dense<0.000000e+00> : vector<16xf32>
    %378 = vector.multi_reduction <add>, %373, %cst_118 [1] : vector<16x256xf32> to vector<16xf32>
    %379 = vector.shape_cast %378 : vector<16xf32> to vector<16x1xf32>
    %cst_119 = arith.constant 2.560000e+02 : f32
    %380 = vector.broadcast %cst_119 : f32 to vector<16x1xf32>
    %381 = arith.divf %379, %380 : vector<16x1xf32>
    %382 = vector.broadcast %381 : vector<16x1xf32> to vector<16x256xf32>
    %383 = arith.subf %373, %382 : vector<16x256xf32>
    %384 = arith.mulf %383, %383 : vector<16x256xf32>
    %cst_120 = arith.constant dense<0.000000e+00> : vector<16xf32>
    %385 = vector.multi_reduction <add>, %384, %cst_120 [1] : vector<16x256xf32> to vector<16xf32>
    %386 = vector.shape_cast %385 : vector<16xf32> to vector<16x1xf32>
    %cst_121 = arith.constant 2.560000e+02 : f32
    %387 = vector.broadcast %cst_121 : f32 to vector<16x1xf32>
    %388 = arith.divf %386, %387 : vector<16x1xf32>
    %cst_122 = arith.constant 9.99999974E-6 : f32
    %389 = vector.broadcast %cst_122 : f32 to vector<16x1xf32>
    %390 = arith.addf %388, %389 : vector<16x1xf32>
    %391 = math.rsqrt %390 : vector<16x1xf32>
    %392 = vector.broadcast %391 : vector<16x1xf32> to vector<16x256xf32>
    %393 = arith.mulf %383, %392 : vector<16x256xf32>
    %394 = arith.truncf %393 : vector<16x256xf32> to vector<16x256xbf16>
    %cst_123 = arith.constant dense<0.000000e+00> : vector<16x512xf32>
    %395 = tpu.matmul %394, %374, %cst_123 {dimension_numbers = #tpu.dot_dimension_numbers<[1], [0], [0], [1], [0, 0, 1, 1], [], []>} : vector<16x256xbf16>, vector<256x512xbf16>, vector<16x512xf32> -> vector<16x512xf32>
    %396 = vector.broadcast %375 : vector<1x512xf32> to vector<16x512xf32>
    %397 = arith.addf %395, %396 : vector<16x512xf32>
    %cst_124 = arith.constant 5.000000e-01 : f32
    %398 = vector.broadcast %cst_124 : f32 to vector<16x512xf32>
    %399 = arith.mulf %398, %397 : vector<16x512xf32>
    %cst_125 = arith.constant 4.471500e-02 : f32
    %400 = vector.broadcast %cst_125 : f32 to vector<16x512xf32>
    %401 = arith.mulf %400, %397 : vector<16x512xf32>
    %402 = arith.mulf %401, %397 : vector<16x512xf32>
    %403 = arith.mulf %402, %397 : vector<16x512xf32>
    %404 = arith.addf %397, %403 : vector<16x512xf32>
    %cst_126 = arith.constant 0.797884583 : f32
    %405 = vector.broadcast %cst_126 : f32 to vector<16x512xf32>
    %406 = arith.mulf %405, %404 : vector<16x512xf32>
    %407 = math.tanh %406 : vector<16x512xf32>
    %cst_127 = arith.constant 1.000000e+00 : f32
    %408 = vector.broadcast %cst_127 : f32 to vector<16x512xf32>
    %409 = arith.addf %408, %407 : vector<16x512xf32>
    %410 = arith.mulf %399, %409 : vector<16x512xf32>
    %411 = arith.truncf %410 : vector<16x512xf32> to vector<16x512xbf16>
    %cst_128 = arith.constant dense<0.000000e+00> : vector<16x256xf32>
    %412 = tpu.matmul %411, %376, %cst_128 {dimension_numbers = #tpu.dot_dimension_numbers<[1], [0], [0], [1], [0, 0, 1, 1], [], []>} : vector<16x512xbf16>, vector<512x256xbf16>, vector<16x256xf32> -> vector<16x256xf32>
    %413 = vector.broadcast %377 : vector<1x256xf32> to vector<16x256xf32>
    %414 = arith.addf %412, %413 : vector<16x256xf32>
    %415 = arith.addf %373, %414 : vector<16x256xf32>
    %c0_129 = arith.constant 0 : index
    %c0_130 = arith.constant 0 : index
    %c0_131 = arith.constant 0 : index
    %416 = vector.load %arg13[%c0_129, %c0_130, %c0_131] : memref<1x16x256xf32, #tpu.memory_space<vmem>>, vector<1x16x256xf32>
    %417 = vector.shape_cast %416 : vector<1x16x256xf32> to vector<16x256xf32>
    %418 = vector.shape_cast %415 : vector<16x256xf32> to vector<1x16x256xf32>
    tpu.vector_store %arg13[%c0_129, %c0_130, %c0_131], %418 {strides = array<i32>} : memref<1x16x256xf32, #tpu.memory_space<vmem>>, vector<1x16x256xf32>,
    return
  }
  func.func @transform_0(%arg0: i32) -> (i32, i32, i32) {
    %c0_i32 = arith.constant 0 : i32
    %c0_i32_0 = arith.constant 0 : i32
    %c0_i32_1 = arith.constant 0 : i32
    return %arg0, %c0_i32, %c0_i32_0 : i32, i32, i32
  }
  func.func @transform_1(%arg0: i32) -> (i32, i32, i32) {
    %c0_i32 = arith.constant 0 : i32
    %c0_i32_0 = arith.constant 0 : i32
    %c0_i32_1 = arith.constant 0 : i32
    return %arg0, %c0_i32, %c0_i32_0 : i32, i32, i32
  }
  func.func @transform_2(%arg0: i32) -> (i32, i32, i32) {
    %c0_i32 = arith.constant 0 : i32
    %c0_i32_0 = arith.constant 0 : i32
    %c0_i32_1 = arith.constant 0 : i32
    return %arg0, %c0_i32, %c0_i32_0 : i32, i32, i32
  }
  func.func @transform_3(%arg0: i32) -> (i32, i32, i32) {
    %c0_i32 = arith.constant 0 : i32
    %c0_i32_0 = arith.constant 0 : i32
    %c0_i32_1 = arith.constant 0 : i32
    %c0_i32_2 = arith.constant 0 : i32
    return %c0_i32, %c0_i32_0, %c0_i32_1 : i32, i32, i32
  }
  func.func @transform_4(%arg0: i32) -> (i32, i32) {
    %c0_i32 = arith.constant 0 : i32
    %c0_i32_0 = arith.constant 0 : i32
    %c0_i32_1 = arith.constant 0 : i32
    return %c0_i32, %c0_i32_0 : i32, i32
  }
  func.func @transform_5(%arg0: i32) -> (i32, i32) {
    %c0_i32 = arith.constant 0 : i32
    %c0_i32_0 = arith.constant 0 : i32
    %c0_i32_1 = arith.constant 0 : i32
    return %c0_i32, %c0_i32_0 : i32, i32
  }
  func.func @transform_6(%arg0: i32) -> (i32, i32) {
    %c0_i32 = arith.constant 0 : i32
    %c0_i32_0 = arith.constant 0 : i32
    %c0_i32_1 = arith.constant 0 : i32
    return %c0_i32, %c0_i32_0 : i32, i32
  }
  func.func @transform_7(%arg0: i32) -> (i32, i32) {
    %c0_i32 = arith.constant 0 : i32
    %c0_i32_0 = arith.constant 0 : i32
    %c0_i32_1 = arith.constant 0 : i32
    return %c0_i32, %c0_i32_0 : i32, i32
  }
  func.func @transform_8(%arg0: i32) -> (i32, i32) {
    %c0_i32 = arith.constant 0 : i32
    %c0_i32_0 = arith.constant 0 : i32
    %c0_i32_1 = arith.constant 0 : i32
    return %c0_i32, %c0_i32_0 : i32, i32
  }
  func.func @transform_9(%arg0: i32) -> (i32, i32) {
    %c0_i32 = arith.constant 0 : i32
    %c0_i32_0 = arith.constant 0 : i32
    %c0_i32_1 = arith.constant 0 : i32
    return %c0_i32, %c0_i32_0 : i32, i32
  }
  func.func @transform_10(%arg0: i32) -> (i32, i32) {
    %c0_i32 = arith.constant 0 : i32
    %c0_i32_0 = arith.constant 0 : i32
    %c0_i32_1 = arith.constant 0 : i32
    return %c0_i32, %c0_i32_0 : i32, i32
  }
  func.func @transform_11(%arg0: i32) -> (i32, i32) {
    %c0_i32 = arith.constant 0 : i32
    %c0_i32_0 = arith.constant 0 : i32
    %c0_i32_1 = arith.constant 0 : i32
    return %c0_i32, %c0_i32_0 : i32, i32
  }
  func.func @transform_12(%arg0: i32) -> (i32, i32, i32) {
    %c0_i32 = arith.constant 0 : i32
    %c0_i32_0 = arith.constant 0 : i32
    %c0_i32_1 = arith.constant 0 : i32
    return %arg0, %c0_i32, %c0_i32_0 : i32, i32, i32
  }
}

</mosaic_0001>

<bundles_post_ra>
// kernel: vip_block_forward.3
= control target key start
LH: loop header
LB: loop body
LE: loop exit
PB: predicated region body
PF: predicated region fallthrough
CT: control target
= control target key end

     0   :  { %s4269_s0 = inlined_call_operand.vmem [shape: f32[2,8,256], index: 0, kind: input, shape index: {}]   ;;  %s4270_s1 = inlined_call_operand.vmem [shape: f32[2,16,256], index: 1, kind: input, shape index: {}]   ;;  %s4271_s2 = inlined_call_operand.vmem [shape: f32[2,8,256], index: 2, kind: input, shape index: {}]   ;;  %s4272_s3 = inlined_call_operand.vmem [shape: f32[2,1,16], index: 3, kind: input, shape index: {}]   ;;  %s4273_s4 = inlined_call_operand.hbm [shape: bf16[256,256], index: 4, kind: input, shape index: {}]   ;;  %s4274_s5 = inlined_call_operand.vmem [shape: f32[1,256], index: 5, kind: input, shape index: {}]   ;;  %s4275_s6 = inlined_call_operand.hbm [shape: bf16[256,512], index: 6, kind: input, shape index: {}]   ;;  %s4276_s7 = inlined_call_operand.vmem [shape: f32[1,512], index: 7, kind: input, shape index: {}]   ;;  %s4277_s8 = inlined_call_operand.hbm [shape: bf16[256,256], index: 8, kind: input, shape index: {}]   ;;  %s4278_s9 = inlined_call_operand.vmem [shape: f32[1,256], index: 9, kind: input, shape index: {}]   ;;  %s4279_s10 = inlined_call_operand.vmem [shape: f32[1,256], index: 10, kind: input, shape index: {}]   ;;  %s4280_s11 = inlined_call_operand.vmem [shape: f32[1,256], index: 11, kind: input, shape index: {}]   ;;  %s4281_s12 = inlined_call_operand.vmem [shape: bf16[8,8], index: 12, kind: input, shape index: {}]   ;;  %s4282_s13 = inlined_call_operand.hbm [shape: bf16[256,256], index: 13, kind: input, shape index: {}]   ;;  %s4283_s14 = inlined_call_operand.vmem [shape: f32[1,256], index: 14, kind: input, shape index: {}]   ;;  %s4284_s15 = inlined_call_operand.hbm [shape: bf16[256,256], index: 15, kind: input, shape index: {}]   ;;  %s4285_s16 = inlined_call_operand.vmem [shape: f32[1,256], index: 16, kind: input, shape index: {}]   ;;  %s4286_s17 = inlined_call_operand.vmem [shape: f32[2,8,256], index: 17, kind: output, shape index: {}]  }
   0x1   :  { %4288 = sst [smem:[#allocation14_spill]] %s4269_s0 }
   0x2   :  { %4289 = sst [smem:[#allocation15_spill]] %s4270_s1 }
   0x3   :  { %4290 = sst [smem:[#allocation16_spill]] %s4275_s6 }
   0x4   :  { %4291 = sst [smem:[#allocation17_spill]] %s4282_s13 }
   0x5   :  { %4292 = sst [smem:[#allocation18_spill]] %s4285_s16 }
   0x6   :  { %4293 = sst [smem:[#allocation19_spill]] %s4286_s17 }
   0x7   :  { %22 = vsyncpa [#allocation3], 0 }
   0x8   :  { %23 = vsyncpa [#allocation5], 0 }
   0x9   :  { %24 = vsyncpa [#allocation8], 0  ;;  %s3995_s24 = smov 0  }
   0xa LB: > { %4294 = sst [smem:[#allocation13_spill]] %s3892_s24  ;;  %s4004_s28 = sadd.s32 4294967295, %s3892_s24   ;;  %s3892_s24 = sphi %s3995_s24, %s30_s24  }
   0xb   : > { %s4295_s6 = sld [smem:[#allocation16_spill]]  ;;  %p2644_p0 = scmp.ge.s32.totalorder %s3892_s24, 1 }
   0xc   : > { %p438_p1 = scmp.lt.s32.totalorder %s3892_s24, 3  ;;  %p3671_p2 = scmp.eq.s32.totalorder %s4004_s28, 0 }
   0xd   : > { %s3894_s0 = smov [#allocation4]   ;;  %s4298_s13 = sld [smem:[#allocation17_spill]] }
   0xe   : > { %p4009_p3 = pnand %p2644_p0, %p438_p1  ;;  %s468_s30 = sshll.u32 %s3894_s0, 4  ;;  %s469_s30 = int_to_ptr.vmem [resolvable:$true] %s468_s30 }
   0xf   : > { %s3895_s21 = smov [#allocation7]   ;;  %s3896_s23 = smov 256  }
  0x10   : > { %p3655_p4 = pneg %p4009_p3  ;;  %s511_s22 = sshll.u32 %s3895_s21, 4  ;;  %s512_s22 = int_to_ptr.vmem [resolvable:$true] %s511_s22 }
  0x11   : > { %s466_s27 = sshll.u32 %s4295_s6, 4  ;;  %s3897_s25 = smov 16   ;;  %s467_s27 = int_to_ptr.hbm [resolvable:$true] %s466_s27 }
  0x12   : > { %p4017_p5 = pnand %p3671_p2, %p3655_p4  ;;  %s449_s6 = sshll.u32 %s4273_s4, 4  ;;  %s450_s6 = int_to_ptr.hbm [resolvable:$true] %s449_s6 }
  0x13   : > { %s509_s20 = sshll.u32 %s4298_s13, 4  ;;  %s3898_s24 = smov 128   ;;  %s510_s20 = int_to_ptr.hbm [resolvable:$true] %s509_s20 }
  0x14   : > { %3661 = dma.hbm_to_vmem [thread:$0]  (!%p4017_p5), %s467_s27, 8192, %s469_s30, [#allocation5], %s3896_s23, %s3896_s23, %s3897_s25  }
  0x15   : > { %s3899_s17 = smov 8   ;;  %s3900_s19 = smov [#allocation2]  }
  0x16   : > { %3667 = dma.hbm_to_vmem [thread:$0]  (!%p4017_p5), %s510_s20, 4096, %s512_s22, [#allocation8], %s3898_s24, %s3898_s24, %s3899_s17  }
  0x17   : > { %s451_s1 = sshll.u32 %s3900_s19, 4  ;;  %s483_s16 = sshll.u32 %s4277_s8, 4  ;;  %s452_s1 = int_to_ptr.vmem [resolvable:$true] %s451_s1  ;;  %s484_s16 = int_to_ptr.hbm [resolvable:$true] %s483_s16 }
  0x18   : > { %3658 = dma.hbm_to_vmem [thread:$0]  (!%p4017_p5), %s450_s6, 4096, %s452_s1, [#allocation3], %s3898_s24, %s3898_s24, %s3899_s17  }
  0x19   : > { %s526_s23 = sshll.u32 %s4284_s15, 4  ;;  %s3901_s25 = smov [#allocation6]   ;;  %s527_s23 = int_to_ptr.hbm [resolvable:$true] %s526_s23 }
  0x1a   : > { %s485_s26 = sshll.u32 %s3901_s25, 4  ;;  %s3902_s20 = smov [#allocation9]   ;;  %s486_s26 = int_to_ptr.vmem [resolvable:$true] %s485_s26 }
  0x1b   : > { %3664 = dma.hbm_to_vmem [thread:$0]  (!%p4017_p5), %s484_s16, 4096, %s486_s26, [#allocation5], %s3898_s24, %s3898_s24, %s3899_s17  }
  0x1c   : > { %s528_s22 = sshll.u32 %s3902_s20, 4  ;;  %577 = sbr.rel (%p4009_p3) target bundleno = 1849 (0x739), region = 88  ;;  %s529_s22 = int_to_ptr.vmem [resolvable:$true] %s528_s22 }
  0x1d   : > { %3670 = dma.hbm_to_vmem [thread:$0]  (!%p4017_p5), %s527_s23, 4096, %s529_s22, [#allocation8], %s3898_s24, %s3898_s24, %s3899_s17  }
  0x21   : > { %3879 = dma.done.wait (%p3671_p2), [#allocation3], 4096  }
  0x22   : > { %3881 = vsyncadd (%p3671_p2), [#allocation3], 4294963200 }
  0x23   : > { %3883 = dma.done.wait (%p3671_p2), [#allocation5], 12288  }
  0x24   : > { %3885 = vsyncadd (%p3671_p2), [#allocation5], 4294955008 }
  0x25   : > { %3887 = dma.done.wait (%p3671_p2), [#allocation8], 8192  }
  0x26   : > { %3889 = vsyncadd (%p3671_p2), [#allocation8], 4294959104  ;;  %p663_p6 = scmp.lt.s32.totalorder %s4004_s28, 1  ;;  %s4299_s24 = sld [smem:[#allocation14_spill]]  ;;  %v3903_v13 = vmov 256.0   ;;  %vm1593_vm12 = vcmask 130048  }
  0x27   : > { %s4300_s27 = sld [smem:[#allocation15_spill]]  ;;  %3700 = vrcp.f32 %v3903_v13  ;;  %v2723_v18 = vld [vmem:[#allocation2 + $0x70] sm:$0xf]  ;;  %v3458_v19 = vld [vmem:[#allocation2 + $0x74] sm:$0xf0] }
  0x28   : > { %s4307_s28 = smov (!%p663_p6, %s4004_s28), 1  ;;  %v2787_v20 = vld [vmem:[#allocation2 + $0xf0] sm:$0xf]  ;;  %v2724_v22 = vor.u32 %v3458_v19, %v2723_v18  ;;  %v3474_v23 = vld [vmem:[#allocation2 + $0xf4] sm:$0xf0]  ;;  %s4303_s25 = sld [smem:[#allocation18_spill]] }
  0x29   : > { %s4062_s6 = sshll.u32 %s4307_s28, 4  ;;  %s3440_s13 = sshll.u32 %s4307_s28, 5  ;;  %v3457_v24 = vld [vmem:[#allocation2 + $0x74] sm:$0xf]  ;;  %v2725_v25 = vld [vmem:[#allocation2 + $0x78] sm:$0xf0]  ;;  %v2788_v26 = vor.u32 %v3474_v23, %v2787_v20 }
  0x2a   : > { %s677_s19 = scalar_lea.vmem %s4271_s2, %s4062_s6  ;;  %v2728_v27 = vor.u32 %v3457_v24, %v2725_v25  ;;  %v3473_v28 = vld [vmem:[#allocation2 + $0xf4] sm:$0xf]  ;;  %v2789_v29 = vld [vmem:[#allocation2 + $0xf8] sm:$0xf0]  ;;  %v2715_v30 = vld [vmem:[#allocation2 + $0x60] sm:$0xf]  ;;  %931 = vmatpush.bf16.msra.mxu0 %v2724_v22  ;;  %s680_s16 = scalar_lea.vmem %s4272_s3, %s4307_s28 }
  0x2b   : > { %v693_v2 = vld [vmem:[%s677_s19] sm:$0xff]  ;;  %v694_v3 = vld [vmem:[%s677_s19 + $0x8] sm:$0xff]  ;;  %v2792_v31 = vor.u32 %v3473_v28, %v2789_v29  ;;  %944 = vmatpush.bf16.msra.mxu1 %v2788_v26  ;;  %v2707_v43 = vld [vmem:[#allocation2 + $0x50] sm:$0xf]  ;;  %s4304_s22 = sld [smem:[#allocation19_spill]] }
  0x2c   : > { %s4069_s29 = scalar_lea.vmem %s4299_s24, %s4062_s6  ;;  %v3456_v32 = vld [vmem:[#allocation2 + $0x64] sm:$0xf0]  ;;  %v2779_v33 = vld [vmem:[#allocation2 + $0xe0] sm:$0xf]  ;;  %957 = vmatpush.bf16.msra.mxu2 %v2728_v27  ;;  %v3455_v37 = vld [vmem:[#allocation2 + $0x64] sm:$0xf] }
  0x2d   : > { %v687_v0 = vld [vmem:[%s4069_s29] sm:$0xff]  ;;  %v688_v1 = vld [vmem:[%s4069_s29 + $0x8] sm:$0xff]  ;;  %s672_s30 = scalar_lea.vmem %s4300_s27, %s3440_s13  ;;  %v3701_v14 = vpop.eup %3700  ;;  %v2716_v35 = vor.u32 %v3456_v32, %v2715_v30  ;;  %970 = vmatpush.bf16.msra.mxu3 %v2792_v31  ;;  %v3454_v44 = vld [vmem:[#allocation2 + $0x54] sm:$0xf0] }
  0x2e   : > { %v4077_v4 = vadd.f32 %v693_v2, %v687_v0  ;;  %v4082_v5 = vadd.f32 %v694_v3, %v688_v1  ;;  %v4084_v6 = vld [vmem:[%s672_s30 + $0x10] sm:$0xff]  ;;  %v4086_v7 = vld [vmem:[%s672_s30 + $0x18] sm:$0xff]  ;;  %v4092_v10 = vld [vmem:[%s672_s30] sm:$0xff]  ;;  %v703_v15 = vmul.f32 256.0, %v3701_v14  ;;  %vm707_vm0 = vweird.f32 %v3701_v14 }
  0x2f   : > { %v986_v8 = vadd.f32 %v4086_v7, %v4084_v6  ;;  %v4094_v11 = vld [vmem:[%s672_s30 + $0x8] sm:$0xff]  ;;  %v3471_v39 = vld [vmem:[#allocation2 + $0xe4] sm:$0xf]  ;;  %v2771_v46 = vld [vmem:[#allocation2 + $0xd0] sm:$0xf]  ;;  %932 = vmatpush.bf16.msra.mxu0 %v2716_v35  ;;  %v2708_v50 = vor.u32 %v3454_v44, %v2707_v43 }
  0x30   : > { %v699_v9 = vadd.f32 %v4082_v5, %v4077_v4  ;;  %v983_v12 = vadd.f32 %v4094_v11, %v4092_v10  ;;  %v704_v16 = vsub.f32 1.0, %v703_v15  ;;  %v3472_v34 = vld [vmem:[#allocation2 + $0xe4] sm:$0xf0]  ;;  %v2717_v38 = vld [vmem:[#allocation2 + $0x68] sm:$0xf0] }
  0x31   : > { %987 = vadd.xlane.f32.xlu1 %v986_v8  ;;  %v2780_v36 = vor.u32 %v3472_v34, %v2779_v33  ;;  %v2720_v41 = vor.u32 %v3455_v37, %v2717_v38  ;;  %v2781_v42 = vld [vmem:[#allocation2 + $0xe8] sm:$0xf0]  ;;  %v3470_v47 = vld [vmem:[#allocation2 + $0xd4] sm:$0xf0]  ;;  %v3453_v48 = vld [vmem:[#allocation2 + $0x54] sm:$0xf]  ;;  %s685_s13 = scalar_lea.vmem %s4304_s22, %s4062_s6 }
  0x32   : > { %700 = vadd.xlane.f32.xlu0 %v699_v9  ;;  %v705_v17 = vmul.f32 %v3701_v14, %v704_v16  ;;  %v2784_v45 = vor.u32 %v3471_v39, %v2781_v42  ;;  %v2709_v51 = vld [vmem:[#allocation2 + $0x58] sm:$0xf0]  ;;  %v3469_v52 = vld [vmem:[#allocation2 + $0xd4] sm:$0xf]  ;;  %v2772_v55 = vor.u32 %v3470_v47, %v2771_v46  ;;  %v2699_v57 = vld [vmem:[#allocation2 + $0x40] sm:$0xf] }
  0x33   : > { %v2773_v53 = vld [vmem:[#allocation2 + $0xd8] sm:$0xf0]  ;;  %945 = vmatpush.bf16.msra.mxu1 %v2780_v36  ;;  %958 = vmatpush.bf16.msra.mxu2 %v2720_v41  ;;  %v2712_v56 = vor.u32 %v3453_v48, %v2709_v51  ;;  %v3452_v58 = vld [vmem:[#allocation2 + $0x44] sm:$0xf0]  ;;  %v2763_v60 = vld [vmem:[#allocation2 + $0xc0] sm:$0xf] }
  0x34   : > { %v706_v21 = vadd.f32 %v3701_v14, %v705_v17  ;;  %971 = vmatpush.bf16.msra.mxu3 %v2784_v45  ;;  %v2776_v59 = vor.u32 %v3469_v52, %v2773_v53  ;;  %v3468_v61 = vld [vmem:[#allocation2 + $0xc4] sm:$0xf0]  ;;  %v3451_v62 = vld [vmem:[#allocation2 + $0x44] sm:$0xf]  ;;  %v2701_v1 = vld [vmem:[#allocation2 + $0x48] sm:$0xf0]  ;;  %933 = vmatpush.bf16.msra.mxu0 %v2708_v50  ;;  %v2700_v8 = vor.u32 %v3452_v58, %v2699_v57 }
  0x35   : > { %v3467_v2 = vld [vmem:[#allocation2 + $0xc4] sm:$0xf]  ;;  %v2765_v3 = vld [vmem:[#allocation2 + $0xc8] sm:$0xf0]  ;;  %v3450_v15 = vld [vmem:[#allocation2 + $0x34] sm:$0xf0] }
  0x36   : > { %v4099_v40 = vsel %vm707_vm0, %v3701_v14, %v706_v21  ;;  %v2764_v14 = vor.u32 %v3468_v61, %v2763_v60  ;;  %v2768_v16 = vor.u32 %v3467_v2, %v2765_v3  ;;  %v2755_v17 = vld [vmem:[#allocation2 + $0xb0] sm:$0xf]  ;;  %v3466_v18 = vld [vmem:[#allocation2 + $0xb4] sm:$0xf0]  ;;  %v3449_v19 = vld [vmem:[#allocation2 + $0x34] sm:$0xf] }
  0x37   : > { %946 = vmatpush.bf16.msra.mxu1 %v2772_v55  ;;  %959 = vmatpush.bf16.msra.mxu2 %v2712_v56  ;;  %v2693_v21 = vld [vmem:[#allocation2 + $0x38] sm:$0xf0]  ;;  %v3465_v22 = vld [vmem:[#allocation2 + $0xb4] sm:$0xf]  ;;  %v2756_v28 = vor.u32 %v3466_v18, %v2755_v17  ;;  %v2683_v29 = vld [vmem:[#allocation2 + $0x20] sm:$0xf] }
  0x38   : > { %972 = vmatpush.bf16.msra.mxu3 %v2776_v59  ;;  %v2757_v23 = vld [vmem:[#allocation2 + $0xb8] sm:$0xf0]  ;;  %934 = vmatpush.bf16.msra.mxu0 %v2700_v8  ;;  %v3448_v30 = vld [vmem:[#allocation2 + $0x24] sm:$0xf0]  ;;  %v2696_v31 = vor.u32 %v3449_v19, %v2693_v21  ;;  %v2747_v33 = vld [vmem:[#allocation2 + $0xa0] sm:$0xf] }
  0x39   : > { %v2760_v32 = vor.u32 %v3465_v22, %v2757_v23  ;;  %v3464_v34 = vld [vmem:[#allocation2 + $0xa4] sm:$0xf0]  ;;  %v3447_v35 = vld [vmem:[#allocation2 + $0x24] sm:$0xf]  ;;  %v2685_v38 = vld [vmem:[#allocation2 + $0x28] sm:$0xf0]  ;;  %v2684_v43 = vor.u32 %v3448_v30, %v2683_v29 }
  0x3a   : > { %984 = vadd.xlane.f32.xlu0 %v983_v12  ;;  %v3463_v39 = vld [vmem:[#allocation2 + $0xa4] sm:$0xf]  ;;  %v2749_v41 = vld [vmem:[#allocation2 + $0xa8] sm:$0xf0]  ;;  %v2675_v46 = vld [vmem:[#allocation2 + $0x10] sm:$0xf]  ;;  %v2688_v48 = vor.u32 %v3447_v35, %v2685_v38 }
  0x3b   : > { %947 = vmatpush.bf16.msra.mxu1 %v2764_v14  ;;  %v3446_v47 = vld [vmem:[#allocation2 + $0x14] sm:$0xf0]  ;;  %v3445_v51 = vld [vmem:[#allocation2 + $0x14] sm:$0xf]  ;;  %v2667_v56 = vld [vmem:[#allocation2] sm:$0xf] }
  0x3c   : > { %973 = vmatpush.bf16.msra.mxu3 %v2768_v16  ;;  %v3462_v50 = vld [vmem:[#allocation2 + $0x94] sm:$0xf0]  ;;  %v3461_v53 = vld [vmem:[#allocation2 + $0x94] sm:$0xf]  ;;  %v2676_v55 = vor.u32 %v3446_v47, %v2675_v46  ;;  %v3444_v60 = vld [vmem:[#allocation2 + $0x4] sm:$0xf0] }
  0x3d   : > { %v2731_v61 = vld [vmem:[#allocation2 + $0x80] sm:$0xf]  ;;  %v3443_v3 = vld [vmem:[#allocation2 + $0x4] sm:$0xf]  ;;  %v2669_v8 = vld [vmem:[#allocation2 + $0x8] sm:$0xf0] }
  0x3e   : > { %v3505_v14 = vld [vmem:[#allocation4 + $0xec] sm:$0xf0]  ;;  %v3503_v16 = vld [vmem:[#allocation4 + $0xe4] sm:$0xf]  ;;  %v2909_v19 = vld [vmem:[#allocation4 + $0xf0] sm:$0xf0]  ;;  %v2672_v22 = vor.u32 %v3443_v3, %v2669_v8 }
  0x3f   : > { %948 = vmatpush.bf16.msra.mxu1 %v2756_v28  ;;  %v3037_v21 = vld [vmem:[#allocation4 + $0x1f0] sm:$0xf0]  ;;  %v2891_v28 = vld [vmem:[#allocation4 + $0xc0] sm:$0xf]  ;;  %v3501_v29 = vld [vmem:[#allocation4 + $0xcc] sm:$0xf0] }
  0x40   : > { %974 = vmatpush.bf16.msra.mxu3 %v2760_v32  ;;  %v3019_v30 = vld [vmem:[#allocation4 + $0x1c0] sm:$0xf]  ;;  %v3533_v32 = vld [vmem:[#allocation4 + $0x1cc] sm:$0xf0]  ;;  %vm1943_vm0 = vcmask 1043456  }
  0x41   : > { %v3020_v35 = vor.u32 %v3533_v32, %v3019_v30  ;;  %v3529_v47 = vld [vmem:[#allocation4 + $0x1ac] sm:$0xf0]  ;;  %v2843_v3 = vld [vmem:[#allocation4 + $0x60] sm:$0xf] }
  0x42   : > { %v3489_v8 = vld [vmem:[#allocation4 + $0x6c] sm:$0xf0] }
  0x43   : > { %v3481_v32 = vld [vmem:[#allocation4 + $0x2c] sm:$0xf0] }
  0xa4   : > { %v988_v13 = vpop.xlane.xlu1 %987 }
  0xa5   : > { %v701_v49 = vpop.xlane.xlu0 %700  ;;  %v990_v25 = vmul.f32 %v988_v13, %v4099_v40  ;;  %v2907_v13 = vld [vmem:[#allocation4 + $0xe0] sm:$0xf] }
  0xa6   : > { %v709_v54 = vmul.f32 %v4099_v40, %v701_v49  ;;  %v2739_v49 = vld [vmem:[#allocation2 + $0x90] sm:$0xf] }
  0xa7   : > { %v4121_v42 = vsub.f32 %v4084_v6, %v990_v25  ;;  %v4124_v44 = vsub.f32 %v4086_v7, %v990_v25  ;;  %v2752_v6 = vor.u32 %v3463_v39, %v2749_v41  ;;  %v2677_v7 = vld [vmem:[#allocation2 + $0x18] sm:$0xf0]  ;;  %v2740_v59 = vor.u32 %v3462_v50, %v2739_v49  ;;  %v3531_v39 = vld [vmem:[#allocation4 + $0x1c4] sm:$0xf]  ;;  %v3021_v41 = vld [vmem:[#allocation4 + $0x1d0] sm:$0xf0] }
  0xa8   : > { %v4103_v63 = vsub.f32 %v4077_v4, %v709_v54  ;;  %v4106_v0 = vsub.f32 %v4082_v5, %v709_v54  ;;  %v2691_v4 = vld [vmem:[#allocation2 + $0x30] sm:$0xf]  ;;  %v2704_v5 = vor.u32 %v3451_v62, %v2701_v1  ;;  %v2741_v54 = vld [vmem:[#allocation2 + $0x98] sm:$0xf0]  ;;  %v3460_v62 = vld [vmem:[#allocation2 + $0x84] sm:$0xf0]  ;;  %v2680_v1 = vor.u32 %v3445_v51, %v2677_v7 }
  0xa9   : > { %v2692_v26 = vor.u32 %v3450_v15, %v2691_v4  ;;  %v997_v57 = vmul.f32 %v4121_v42, %v4121_v42  ;;  %v998_v58 = vmul.f32 %v4124_v44, %v4124_v44  ;;  %975 = vmatpush.bf16.msra.mxu3 %v2752_v6  ;;  %v2744_v2 = vor.u32 %v3461_v53, %v2741_v54  ;;  %v3035_v15 = vld [vmem:[#allocation4 + $0x1e0] sm:$0xf]  ;;  %v2877_v6 = vld [vmem:[#allocation4 + $0xb0] sm:$0xf0]  ;;  %v3527_v51 = vld [vmem:[#allocation4 + $0x1a4] sm:$0xf] }
  0xaa   : > { %v712_v9 = vmul.f32 %v4103_v63, %v4103_v63  ;;  %v713_v12 = vmul.f32 %v4106_v0, %v4106_v0  ;;  %960 = vmatpush.bf16.msra.mxu2 %v2704_v5  ;;  %v2668_v4 = vor.u32 %v3444_v60, %v2667_v56  ;;  %v3537_v5 = vld [vmem:[#allocation4 + $0x1ec] sm:$0xf0]  ;;  %v2732_v18 = vor.u32 %v3460_v62, %v2731_v61  ;;  %v2859_v53 = vld [vmem:[#allocation4 + $0x80] sm:$0xf]  ;;  %v3523_v62 = vld [vmem:[#allocation4 + $0x184] sm:$0xf] }
  0xab   : > { %935 = vmatpush.bf16.msra.mxu0 %v2692_v26  ;;  %v1002_v17 = vadd.f32 %v998_v58, %v997_v57  ;;  %v3036_v25 = vor.u32 %v3537_v5, %v3035_v15  ;;  %v2912_v26 = vor.u32 %v3503_v16, %v2909_v19  ;;  %v3493_v54 = vld [vmem:[#allocation4 + $0x8c] sm:$0xf0]  ;;  %v3491_v58 = vld [vmem:[#allocation4 + $0x84] sm:$0xf]  ;;  %v2827_v19 = vld [vmem:[#allocation4 + $0x40] sm:$0xf] }
  0xac   : > { %v714_v20 = vadd.f32 %v713_v12, %v712_v9  ;;  %v3459_v9 = vld [vmem:[#allocation2 + $0x84] sm:$0xf]  ;;  %v2733_v12 = vld [vmem:[#allocation2 + $0x88] sm:$0xf0]  ;;  %v2860_v56 = vor.u32 %v3493_v54, %v2859_v53  ;;  %v3525_v57 = vld [vmem:[#allocation4 + $0x18c] sm:$0xf0] }
  0xad   : > { %v985_v24 = vpop.xlane.xlu0 %984  ;;  %976 = vmatpush.bf16.msra.mxu3 %v2744_v2  ;;  %v2736_v23 = vor.u32 %v3459_v9, %v2733_v12  ;;  %v2971_v9 = vld [vmem:[#allocation4 + $0x160] sm:$0xf]  ;;  %v2844_v12 = vor.u32 %v3489_v8, %v2843_v3  ;;  %v3519_v16 = vld [vmem:[#allocation4 + $0x164] sm:$0xf]  ;;  %v2925_v54 = vld [vmem:[#allocation4 + $0x110] sm:$0xf0] }
  0xae   : > { %v989_v27 = vmul.f32 %v985_v24, %v4099_v40  ;;  %715 = vadd.xlane.f32.xlu1 %v714_v20  ;;  %961 = vmatpush.bf16.msra.mxu2 %v2696_v31  ;;  %v3535_v20 = vld [vmem:[#allocation4 + $0x1e4] sm:$0xf]  ;;  %v2908_v24 = vor.u32 %v3505_v14, %v2907_v13  ;;  %v2892_v31 = vor.u32 %v3501_v29, %v2891_v28  ;;  %v3521_v13 = vld [vmem:[#allocation4 + $0x16c] sm:$0xf0]  ;;  %v2957_v29 = vld [vmem:[#allocation4 + $0x150] sm:$0xf0] }
  0xaf   : > { %936 = vmatpush.bf16.msra.mxu0 %v2684_v43  ;;  %v3024_v43 = vor.u32 %v3531_v39, %v3021_v41  ;;  %v3487_v14 = vld [vmem:[#allocation4 + $0x64] sm:$0xf]  ;;  %v2972_v15 = vor.u32 %v3521_v13, %v2971_v9  ;;  %v2813_v39 = vld [vmem:[#allocation4 + $0x30] sm:$0xf0] }
  0xb0   : > { %v4115_v36 = vsub.f32 %v4092_v10, %v989_v27  ;;  %v4118_v37 = vsub.f32 %v4094_v11, %v989_v27  ;;  %v2748_v11 = vor.u32 %v3464_v34, %v2747_v33  ;;  %v3040_v27 = vor.u32 %v3535_v20, %v3037_v21  ;;  %v3499_v33 = vld [vmem:[#allocation4 + $0xc4] sm:$0xf]  ;;  %v2893_v34 = vld [vmem:[#allocation4 + $0xd0] sm:$0xf0]  ;;  %v3485_v20 = vld [vmem:[#allocation4 + $0x4c] sm:$0xf0] }
  0xb1   : > { %977 = vmatpush.bf16.msra.mxu3 %v2736_v23  ;;  %v2896_v38 = vor.u32 %v3499_v33, %v2893_v34  ;;  %v2955_v21 = vld [vmem:[#allocation4 + $0x140] sm:$0xf]  ;;  %v3517_v23 = vld [vmem:[#allocation4 + $0x14c] sm:$0xf0]  ;;  %v3515_v28 = vld [vmem:[#allocation4 + $0x144] sm:$0xf] }
  0xb2   : > { %v995_v45 = vmul.f32 %v4115_v36, %v4115_v36  ;;  %v996_v10 = vmul.f32 %v4118_v37, %v4118_v37  ;;  %949 = vmatpush.bf16.msra.mxu1 %v2748_v11  ;;  %962 = vmatpush.bf16.msra.mxu2 %v2688_v48  ;;  %v3003_v11 = vld [vmem:[#allocation4 + $0x1a0] sm:$0xf]  ;;  %v3495_v48 = vld [vmem:[#allocation4 + $0xa4] sm:$0xf]  ;;  %v2960_v30 = vor.u32 %v3515_v28, %v2957_v29 }
  0xb3   : > { %937 = vmatpush.bf16.msra.mxu0 %v2676_v55  ;;  %v3004_v49 = vor.u32 %v3529_v47, %v3003_v11  ;;  %v2880_v50 = vor.u32 %v3495_v48, %v2877_v6  ;;  %v2987_v55 = vld [vmem:[#allocation4 + $0x180] sm:$0xf]  ;;  %v3477_v47 = vld [vmem:[#allocation4 + $0xc] sm:$0xf0]  ;;  %v3507_v53 = vld [vmem:[#allocation4 + $0x104] sm:$0xf] }
  0xb4   : > { %v999_v52 = vadd.f32 %v996_v10, %v995_v45  ;;  %v2875_v45 = vld [vmem:[#allocation4 + $0xa0] sm:$0xf]  ;;  %v3497_v10 = vld [vmem:[#allocation4 + $0xac] sm:$0xf0]  ;;  %v2988_v60 = vor.u32 %v3525_v57, %v2987_v55  ;;  %v2928_v55 = vor.u32 %v3507_v53, %v2925_v54  ;;  %v3496_v53 = vld [vmem:[#allocation4 + $0xac] sm:$0xf] }
  0xb5   : > { %1471 = vmatpush.bf16.msrb.mxu3 %v3040_v27  ;;  %v2876_v46 = vor.u32 %v3497_v10, %v2875_v45  ;;  %v2939_v33 = vld [vmem:[#allocation4 + $0x120] sm:$0xf]  ;;  %v3511_v45 = vld [vmem:[#allocation4 + $0x124] sm:$0xf]  ;;  %v2941_v10 = vld [vmem:[#allocation4 + $0x130] sm:$0xf0] }
  0xb6   : > { %1000 = vadd.xlane.f32.xlu2 %v999_v52  ;;  %950 = vmatpush.bf16.msra.mxu1 %v2740_v59  ;;  %v3005_v52 = vld [vmem:[#allocation4 + $0x1b0] sm:$0xf0]  ;;  %v2944_v11 = vor.u32 %v3511_v45, %v2941_v10  ;;  %v2923_v48 = vld [vmem:[#allocation4 + $0x100] sm:$0xf]  ;;  %v3029_v45 = vld [vmem:[#allocation4 + $0x1d8] sm:$0xf0] }
  0xb7   : > { %963 = vmatpush.bf16.msra.mxu2 %v2680_v1  ;;  %938 = vmatpush.bf16.msra.mxu0 %v2668_v4  ;;  %v3008_v7 = vor.u32 %v3527_v51, %v3005_v52  ;;  %v2861_v59 = vld [vmem:[#allocation4 + $0x90] sm:$0xf0]  ;;  %v2885_v54 = vld [vmem:[#allocation4 + $0xb8] sm:$0xf0] }
  0xb8   : > { %v2864_v61 = vor.u32 %v3491_v58, %v2861_v59  ;;  %v2989_v1 = vld [vmem:[#allocation4 + $0x190] sm:$0xf0] }
  0xb9   : > { %1472 = vmatpush.bf16.msrb.mxu3 %v3024_v43  ;;  %v2992_v2 = vor.u32 %v3523_v62, %v2989_v1  ;;  %v2845_v4 = vld [vmem:[#allocation4 + $0x70] sm:$0xf0] }
  0xba   : > { %951 = vmatpush.bf16.msra.mxu1 %v2732_v18  ;;  %v2848_v5 = vor.u32 %v3487_v14, %v2845_v4  ;;  %v2797_v51 = vld [vmem:[#allocation4 + $0x10] sm:$0xf0] }
  0xbb   : > { %964 = vmatpush.bf16.msra.mxu2 %v2672_v22  ;;  %1429 = vmatpush.bf16.msrb.mxu0 %v2908_v24  ;;  %v2828_v22 = vor.u32 %v3485_v20, %v2827_v19  ;;  %v3483_v24 = vld [vmem:[#allocation4 + $0x44] sm:$0xf]  ;;  %v3043_v19 = vld [vmem:[#allocation4 + $0x1e8] sm:$0xf]  ;;  %v3538_v20 = vld [vmem:[#allocation4 + $0x1f4] sm:$0xf0] }
  0xbd   : > { %1473 = vmatpush.bf16.msrb.mxu3 %v3008_v7 }
  0xbe   : > { %1003 = vadd.xlane.f32.xlu2 %v1002_v17  ;;  %1443 = vmatpush.bf16.msrb.mxu1 %v3036_v25  ;;  %v2973_v17 = vld [vmem:[#allocation4 + $0x170] sm:$0xf0] }
  0xbf   : > { %1457 = vmatpush.bf16.msrb.mxu2 %v2912_v26  ;;  %1430 = vmatpush.bf16.msrb.mxu0 %v2892_v31  ;;  %v2976_v18 = vor.u32 %v3519_v16, %v2973_v17  ;;  %v2829_v25 = vld [vmem:[#allocation4 + $0x50] sm:$0xf0]  ;;  %v2956_v26 = vor.u32 %v3517_v23, %v2955_v21  ;;  %v2811_v31 = vld [vmem:[#allocation4 + $0x20] sm:$0xf]  ;;  %v3506_v16 = vld [vmem:[#allocation4 + $0xf4] sm:$0xf0] }
  0xc0   : > { %v2832_v27 = vor.u32 %v3483_v24, %v2829_v25  ;;  %v2812_v34 = vor.u32 %v3481_v32, %v2811_v31  ;;  %v3504_v21 = vld [vmem:[#allocation4 + $0xec] sm:$0xf]  ;;  %v2917_v24 = vld [vmem:[#allocation4 + $0xf8] sm:$0xf0]  ;;  %v3044_v31 = vor.u32 %v3538_v20, %v3043_v19  ;;  %v2899_v32 = vld [vmem:[#allocation4 + $0xc8] sm:$0xf] }
  0xc1   : > { %1474 = vmatpush.bf16.msrb.mxu3 %v2992_v2  ;;  %v3536_v25 = vld [vmem:[#allocation4 + $0x1ec] sm:$0xf]  ;;  %v2851_v20 = vld [vmem:[#allocation4 + $0x68] sm:$0xf] }
  0xc2   : > { %1444 = vmatpush.bf16.msrb.mxu1 %v3020_v35  ;;  %v3513_v35 = vld [vmem:[#allocation4 + $0x12c] sm:$0xf0] }
  0xc3   : > { %1458 = vmatpush.bf16.msrb.mxu2 %v2896_v38  ;;  %1431 = vmatpush.bf16.msrb.mxu0 %v2876_v46  ;;  %v3479_v38 = vld [vmem:[#allocation4 + $0x24] sm:$0xf]  ;;  %v2940_v41 = vor.u32 %v3513_v35, %v2939_v33  ;;  %v2795_v46 = vld [vmem:[#allocation4] sm:$0xf]  ;;  %v3502_v33 = vld [vmem:[#allocation4 + $0xd4] sm:$0xf0] }
  0xc4   : > { %v2816_v43 = vor.u32 %v3479_v38, %v2813_v39  ;;  %v2796_v6 = vor.u32 %v3477_v47, %v2795_v46  ;;  %v3027_v38 = vld [vmem:[#allocation4 + $0x1c8] sm:$0xf]  ;;  %v3534_v39 = vld [vmem:[#allocation4 + $0x1d4] sm:$0xf0]  ;;  %v2900_v46 = vor.u32 %v3502_v33, %v2899_v32  ;;  %v2981_v32 = vld [vmem:[#allocation4 + $0x178] sm:$0xf0] }
  0xc5   : > { %1475 = vmatpush.bf16.msrb.mxu3 %v2976_v18  ;;  %v3028_v47 = vor.u32 %v3534_v39, %v3027_v38  ;;  %v2835_v39 = vld [vmem:[#allocation4 + $0x48] sm:$0xf] }
  0xc6   : > { %1445 = vmatpush.bf16.msrb.mxu1 %v3004_v49  ;;  %v3509_v49 = vld [vmem:[#allocation4 + $0x10c] sm:$0xf0] }
  0xc7   : > { %1459 = vmatpush.bf16.msrb.mxu2 %v2880_v50  ;;  %1432 = vmatpush.bf16.msrb.mxu0 %v2860_v56  ;;  %v3475_v50 = vld [vmem:[#allocation4 + $0x4] sm:$0xf]  ;;  %v2924_v52 = vor.u32 %v3509_v49, %v2923_v48  ;;  %v2883_v48 = vld [vmem:[#allocation4 + $0xa8] sm:$0xf] }
  0xc8   : > { %v2800_v7 = vor.u32 %v3475_v50, %v2797_v51  ;;  %v3011_v49 = vld [vmem:[#allocation4 + $0x1a8] sm:$0xf] }
  0xc9   : > { %1476 = vmatpush.bf16.msrb.mxu3 %v2960_v30 }
  0xca   : > { %1446 = vmatpush.bf16.msrb.mxu1 %v2988_v60 }
  0xcb   : > { %1460 = vmatpush.bf16.msrb.mxu2 %v2864_v61  ;;  %1433 = vmatpush.bf16.msrb.mxu0 %v2844_v12 }
  0xcd   : > { %1477 = vmatpush.bf16.msrb.mxu3 %v2944_v11 }
  0xce   : > { %1447 = vmatpush.bf16.msrb.mxu1 %v2972_v15 }
  0xcf   : > { %1461 = vmatpush.bf16.msrb.mxu2 %v2848_v5  ;;  %1434 = vmatpush.bf16.msrb.mxu0 %v2828_v22  ;;  %v2915_v5 = vld [vmem:[#allocation4 + $0xe8] sm:$0xf] }
  0xd0   : > { %v2916_v30 = vor.u32 %v3506_v16, %v2915_v5  ;;  %v3524_v5 = vld [vmem:[#allocation4 + $0x18c] sm:$0xf]  ;;  %v2997_v16 = vld [vmem:[#allocation4 + $0x198] sm:$0xf0] }
  0xd1   : > { %1478 = vmatpush.bf16.msrb.mxu3 %v2928_v55  ;;  %v3528_v55 = vld [vmem:[#allocation4 + $0x1ac] sm:$0xf] }
  0xd2   : > { %1448 = vmatpush.bf16.msrb.mxu1 %v2956_v26  ;;  %v3045_v26 = vld [vmem:[#allocation4 + $0x1f8] sm:$0xf0] }
  0xd3   : > { %1462 = vmatpush.bf16.msrb.mxu2 %v2832_v27  ;;  %1435 = vmatpush.bf16.msrb.mxu0 %v2812_v34  ;;  %v2920_v34 = vor.u32 %v3504_v21, %v2917_v24  ;;  %v3048_v35 = vor.u32 %v3536_v25, %v3045_v26  ;;  %v3490_v21 = vld [vmem:[#allocation4 + $0x74] sm:$0xf0]  ;;  %v3000_v24 = vor.u32 %v3524_v5, %v2997_v16  ;;  %v2979_v25 = vld [vmem:[#allocation4 + $0x168] sm:$0xf] }
  0xd4   : > { %v3522_v26 = vld [vmem:[#allocation4 + $0x174] sm:$0xf0]  ;;  %v2852_v33 = vor.u32 %v3490_v21, %v2851_v20 }
  0xd5   : > { %v2980_v38 = vor.u32 %v3522_v26, %v2979_v25  ;;  %v765_v26 = vld [vmem:[%s4274_s5] sm:$0x3] }
  0xd6   : > { %1449 = vmatpush.bf16.msrb.mxu1 %v2940_v41  ;;  %v3500_v41 = vld [vmem:[#allocation4 + $0xcc] sm:$0xf] }
  0xd7   : > { %1463 = vmatpush.bf16.msrb.mxu2 %v2816_v43  ;;  %1436 = vmatpush.bf16.msrb.mxu0 %v2796_v6  ;;  %v3498_v6 = vld [vmem:[#allocation4 + $0xb4] sm:$0xf0] }
  0xda   : > { %1450 = vmatpush.bf16.msrb.mxu1 %v2924_v52 }
  0xdb   : > { %1464 = vmatpush.bf16.msrb.mxu2 %v2800_v7  ;;  %v3530_v7 = vld [vmem:[#allocation4 + $0x1b4] sm:$0xf0] }
 0x121   : > { %v716_v56 = vpop.xlane.xlu1 %715 }
 0x122   : > { %v717_v57 = vmul.f32 %v716_v56, %v4099_v40  ;;  %v3013_v56 = vld [vmem:[#allocation4 + $0x1b8] sm:$0xf0] }
 0x124   : > { %v718_v58 = vadd.f32 1e-05, %v717_v57 }
 0x126   : > { %3702 = vrsqrt.f32 %v718_v58  ;;  %vm725_vm2 = vweird.f32 %v718_v58 }
 0x129   : > { %v1001_v59 = vpop.xlane.xlu2 %1000 }
 0x12a   : > { %v1005_v60 = vmul.f32 %v1001_v59, %v4099_v40  ;;  %v2867_v59 = vld [vmem:[#allocation4 + $0x88] sm:$0xf] }
 0x12c   : > { %v3703_v61 = vpop.eup %3702  ;;  %v4136_v62 = vadd.f32 1e-05, %v1005_v60  ;;  %v2884_v60 = vor.u32 %v3498_v6, %v2883_v48 }
 0x12d   : > { %v720_v1 = vmul.f32 %v3703_v61, %v718_v58  ;;  %vm726_vm1 = vweird.f32 %v3703_v61 }
 0x12e   : > { %3704 = vrsqrt.f32 %v4136_v62  ;;  %vm727_vm3 = vmor %vm725_vm2, %vm726_vm1  ;;  %vm1015_vm5 = vweird.f32 %v4136_v62  ;;  %vm1939_vm1 = vcmask 64512  }
 0x12f   : > { %v721_v2 = vmul.f32 %v3703_v61, %v720_v1  ;;  %v2888_v1 = vor.u32 %v3496_v53, %v2885_v54  ;;  %v2949_v53 = vld [vmem:[#allocation4 + $0x138] sm:$0xf0] }
 0x131   : > { %v722_v3 = vmul.f32 0.5, %v721_v2  ;;  %v1004_v8 = vpop.xlane.xlu2 %1003  ;;  %v3494_v2 = vld [vmem:[#allocation4 + $0x94] sm:$0xf0] }
 0x132   : > { %v1006_v9 = vmul.f32 %v1004_v8, %v4099_v40  ;;  %v3526_v8 = vld [vmem:[#allocation4 + $0x194] sm:$0xf0] }
 0x133   : > { %v723_v12 = vsub.f32 1.5, %v722_v3  ;;  %v2995_v3 = vld [vmem:[#allocation4 + $0x188] sm:$0xf] }
 0x134   : > { %v4140_v13 = vpop.eup %3704  ;;  %v4142_v14 = vadd.f32 1e-05, %v1006_v9  ;;  %v2996_v19 = vor.u32 %v3526_v8, %v2995_v3  ;;  %v3508_v3 = vld [vmem:[#allocation4 + $0x10c] sm:$0xf]  ;;  %v2933_v8 = vld [vmem:[#allocation4 + $0x118] sm:$0xf0] }
 0x135   : > { %v1010_v4 = vmul.f32 %v4140_v13, %v4136_v62  ;;  %v724_v15 = vmul.f32 %v3703_v61, %v723_v12  ;;  %vm1016_vm4 = vweird.f32 %v4140_v13  ;;  %v3016_v12 = vor.u32 %v3528_v55, %v3013_v56  ;;  %v2803_v56 = vld [vmem:[#allocation4 + $0x8] sm:$0xf] }
 0x136   : > { %3706 = vrsqrt.f32 %v4142_v14  ;;  %vm1017_vm7 = vmor %vm1015_vm5, %vm1016_vm4  ;;  %vm1025_vm8 = vweird.f32 %v4142_v14  ;;  %v2868_v62 = vor.u32 %v3494_v2, %v2867_v59  ;;  %v2805_v2 = vld [vmem:[#allocation4 + $0x18] sm:$0xf0] }
 0x137   : > { %v1011_v17 = vmul.f32 %v4140_v13, %v1010_v4  ;;  %v728_v18 = vsel %vm727_vm3, %v3703_v61, %v724_v15  ;;  %v3012_v61 = vor.u32 %v3530_v7, %v3011_v49  ;;  %v3492_v4 = vld [vmem:[#allocation4 + $0x8c] sm:$0xf]  ;;  %v2869_v15 = vld [vmem:[#allocation4 + $0x98] sm:$0xf0]  ;;  %v2947_v49 = vld [vmem:[#allocation4 + $0x128] sm:$0xf] }
 0x138   : > { %v729_v22 = vmul.f32 %v728_v18, %v4103_v63  ;;  %v730_v23 = vmul.f32 %v728_v18, %v4106_v0  ;;  %v2901_v63 = vld [vmem:[#allocation4 + $0xd8] sm:$0xf0]  ;;  %v3532_v0 = vld [vmem:[#allocation4 + $0x1cc] sm:$0xf] }
 0x139   : > { %v1012_v27 = vmul.f32 0.5, %v1011_v17  ;;  %v2904_v51 = vor.u32 %v3500_v41, %v2901_v63  ;;  %v3032_v52 = vor.u32 %v3532_v0, %v3029_v45  ;;  %v3486_v41 = vld [vmem:[#allocation4 + $0x54] sm:$0xf0]  ;;  %v2837_v63 = vld [vmem:[#allocation4 + $0x58] sm:$0xf0] }
 0x13a   : > { %v731_v28 = vpack.c.bf16 %v729_v22, %v729_v22  ;;  %v732_v29 = vpack.c.bf16 %v730_v23, %v730_v23  ;;  %v2872_v23 = vor.u32 %v3492_v4, %v2869_v15  ;;  %v3516_v0 = vld [vmem:[#allocation4 + $0x14c] sm:$0xf]  ;;  %v2965_v45 = vld [vmem:[#allocation4 + $0x158] sm:$0xf0]  ;;  %v2936_v15 = vor.u32 %v3508_v3, %v2933_v8  ;;  %v695_v8 = vld [vmem:[%s680_s16] sm:$0x1] }
 0x13b   : > { %v1013_v10 = vsub.f32 1.5, %v1012_v27  ;;  %v3488_v27 = vld [vmem:[#allocation4 + $0x6c] sm:$0xf]  ;;  %v2968_v6 = vor.u32 %v3516_v0, %v2965_v45  ;;  %vm696_vm10 = vcmp.gt.f32.partialorder %v695_v8, 0.5 }
 0x13c   : > { %v3707_v43 = vpop.eup %3706  ;;  %939 = vmatmul.bf16.vlgmr.msra.gmra.mxu0 %v731_v28  ;;  %952 = vmatmul.bf16.vlgmr.msra.gmra.mxu1 %v732_v29  ;;  %v3512_v7 = vld [vmem:[#allocation4 + $0x12c] sm:$0xf] }
 0x13d   : > { %v1020_v11 = vmul.f32 %v3707_v43, %v4142_v14  ;;  %965 = vmatmul.bf16.vlgmr.msra.gmra.mxu2 %v731_v28  ;;  %978 = vmatmul.bf16.vlgmr.msra.gmra.mxu3 %v732_v29  ;;  %v1014_v57 = vmul.f32 %v4140_v13, %v1013_v10  ;;  %vm1026_vm6 = vweird.f32 %v3707_v43  ;;  %v2836_v10 = vor.u32 %v3486_v41, %v2835_v39 }
 0x13e   : > { %1485 = vmatpush.bf16.msra.mxu0 %v2916_v30  ;;  %1499 = vmatpush.bf16.msra.mxu1 %v3044_v31  ;;  %vm1027_vm9 = vmor %vm1025_vm8, %vm1026_vm6  ;;  %v2853_v30 = vld [vmem:[#allocation4 + $0x78] sm:$0xf0]  ;;  %v3520_v31 = vld [vmem:[#allocation4 + $0x16c] sm:$0xf]  ;;  %v2952_v59 = vor.u32 %v3512_v7, %v2949_v53  ;;  %v768_v41 = vperm.slane %v765_v26, 1 }
 0x13f   : > { %v1021_v50 = vmul.f32 %v3707_v43, %v1020_v11  ;;  %1513 = vmatpush.bf16.msra.mxu2 %v2920_v34  ;;  %1527 = vmatpush.bf16.msra.mxu3 %v3048_v35  ;;  %v1018_v17 = vsel %vm1017_vm7, %v4140_v13, %v1014_v57  ;;  %v3478_v57 = vld [vmem:[#allocation4 + $0x14] sm:$0xf0] }
 0x140   : > { %v1029_v13 = vmul.f32 %v1018_v17, %v4115_v36  ;;  %v1030_v14 = vmul.f32 %v1018_v17, %v4118_v37  ;;  %v2856_v36 = vor.u32 %v3488_v27, %v2853_v30  ;;  %v2963_v37 = vld [vmem:[#allocation4 + $0x148] sm:$0xf] }
 0x141   : > { %v1022_v58 = vmul.f32 0.5, %v1021_v50  ;;  %v3514_v50 = vld [vmem:[#allocation4 + $0x134] sm:$0xf0] }
 0x142   : > { %1486 = vmatpush.bf16.msra.mxu0 %v2900_v46  ;;  %1500 = vmatpush.bf16.msra.mxu1 %v3028_v47  ;;  %v2819_v46 = vld [vmem:[#allocation4 + $0x28] sm:$0xf]  ;;  %v3482_v47 = vld [vmem:[#allocation4 + $0x34] sm:$0xf0]  ;;  %v2948_v55 = vor.u32 %v3514_v50, %v2947_v49 }
 0x143   : > { %v1023_v9 = vsub.f32 1.5, %v1022_v58  ;;  %1514 = vmatpush.bf16.msra.mxu2 %v2904_v51  ;;  %1528 = vmatpush.bf16.msra.mxu3 %v3032_v52  ;;  %v3480_v51 = vld [vmem:[#allocation4 + $0x2c] sm:$0xf]  ;;  %v2821_v52 = vld [vmem:[#allocation4 + $0x38] sm:$0xf0]  ;;  %v2820_v54 = vor.u32 %v3482_v47, %v2819_v46 }
 0x144   : > { %v2824_v58 = vor.u32 %v3480_v51, %v2821_v52 }
 0x145   : > { %v1024_v18 = vmul.f32 %v3707_v43, %v1023_v9  ;;  %v2804_v9 = vor.u32 %v3478_v57, %v2803_v56 }
 0x146   : > { %1487 = vmatpush.bf16.msra.mxu0 %v2884_v60  ;;  %1501 = vmatpush.bf16.msra.mxu1 %v3012_v61  ;;  %v2931_v60 = vld [vmem:[#allocation4 + $0x108] sm:$0xf]  ;;  %v3510_v61 = vld [vmem:[#allocation4 + $0x114] sm:$0xf0] }
 0x147   : > { %v1028_v22 = vsel %vm1027_vm9, %v3707_v43, %v1024_v18  ;;  %1515 = vmatpush.bf16.msra.mxu2 %v2888_v1  ;;  %1529 = vmatpush.bf16.msra.mxu3 %v3016_v12  ;;  %v3518_v43 = vld [vmem:[#allocation4 + $0x154] sm:$0xf0]  ;;  %v3476_v1 = vld [vmem:[#allocation4 + $0xc] sm:$0xf]  ;;  %v2932_v12 = vor.u32 %v3510_v61, %v2931_v60 }
 0x148   : > { %v1031_v28 = vmul.f32 %v1028_v22, %v4121_v42  ;;  %v1032_v29 = vmul.f32 %v1028_v22, %v4124_v44  ;;  %v2984_v42 = vor.u32 %v3520_v31, %v2981_v32  ;;  %v3484_v44 = vld [vmem:[#allocation4 + $0x4c] sm:$0xf]  ;;  %v2964_v11 = vor.u32 %v3518_v43, %v2963_v37  ;;  %v1099_v22 = vld [vmem:[%s4276_s7] sm:$0xf] }
 0x149   : > { %v2840_v48 = vor.u32 %v3484_v44, %v2837_v63  ;;  %v2808_v4 = vor.u32 %v3476_v1, %v2805_v2  ;;  %v1101_v25 = vperm.slane %v1099_v22, 0  ;;  %v1102_v32 = vperm.slane %v1099_v22, 1 }
 0x14a   : > { %1488 = vmatpush.bf16.msra.mxu0 %v2868_v62  ;;  %1502 = vmatpush.bf16.msra.mxu1 %v2996_v19  ;;  %v4162_v34 = vpack.c.bf16 %v1031_v28, %v1029_v13  ;;  %v4164_v35 = vpack.c.bf16 %v1032_v29, %v1030_v14  ;;  %v767_v14 = vperm.slane %v765_v26, 0  ;;  %v1103_v47 = vperm.slane %v1099_v22, 2 }
 0x14b   : > { %1516 = vmatpush.bf16.msra.mxu2 %v2872_v23  ;;  %1530 = vmatpush.bf16.msra.mxu3 %v3000_v24  ;;  %v1104_v53 = vperm.slane %v1099_v22, 3 }
 0x14c   : > { %1437 = vmatmul.bf16.vlgmr.msrb.gmra.mxu0 %v4162_v34  ;;  %1451 = vmatmul.bf16.vlgmr.msrb.gmra.mxu1 %v4164_v35 }
 0x14d   : > { %1465 = vmatmul.bf16.vlgmr.msrb.gmra.mxu2 %v4162_v34  ;;  %1479 = vmatmul.bf16.vlgmr.msrb.gmra.mxu3 %v4164_v35 }
 0x14e   : > { %1489 = vmatpush.bf16.msra.mxu0 %v2852_v33  ;;  %1503 = vmatpush.bf16.msra.mxu1 %v2980_v38 }
 0x14f   : > { %1517 = vmatpush.bf16.msra.mxu2 %v2856_v36  ;;  %1531 = vmatpush.bf16.msra.mxu3 %v2984_v42 }
 0x152   : > { %1490 = vmatpush.bf16.msra.mxu0 %v2836_v10  ;;  %1504 = vmatpush.bf16.msra.mxu1 %v2964_v11 }
 0x153   : > { %1518 = vmatpush.bf16.msra.mxu2 %v2840_v48  ;;  %1532 = vmatpush.bf16.msra.mxu3 %v2968_v6 }
 0x156   : > { %1491 = vmatpush.bf16.msra.mxu0 %v2820_v54  ;;  %1505 = vmatpush.bf16.msra.mxu1 %v2948_v55 }
 0x157   : > { %1519 = vmatpush.bf16.msra.mxu2 %v2824_v58  ;;  %1533 = vmatpush.bf16.msra.mxu3 %v2952_v59 }
 0x15a   : > { %1492 = vmatpush.bf16.msra.mxu0 %v2804_v9  ;;  %1506 = vmatpush.bf16.msra.mxu1 %v2932_v12  ;;  %v3904_v9 = vmov 0  }
 0x15b   : > { %1520 = vmatpush.bf16.msra.mxu2 %v2808_v4  ;;  %1534 = vmatpush.bf16.msra.mxu3 %v2936_v15  ;;  %v1589_v12 = vsel %vm696_vm10, 1, %v3904_v9  ;;  %v3093_v9 = vld [vmem:[#allocation6 + $0xd0] sm:$0xf] }
 0x15c   : > { %v1590_v4 = vperm.slane %v1589_v12, 0  ;;  %v3566_v12 = vld [vmem:[#allocation6 + $0xd4] sm:$0xf0] }
 0x15d   : > { %1493 = vmatmul.bf16.vlgmr.msra.gmra.mxu0 %v4162_v34  ;;  %1507 = vmatmul.bf16.vlgmr.msra.gmra.mxu1 %v4164_v35 }
 0x15e   : > { %1521 = vmatmul.bf16.vlgmr.msra.gmra.mxu2 %v4162_v34  ;;  %1535 = vmatmul.bf16.vlgmr.msra.gmra.mxu3 %v4164_v35  ;;  %vm4184_vm11 = vcmp.eq.s32.totalorder %v1590_v4, 1  ;;  %v3565_v4 = vld [vmem:[#allocation6 + $0xd4] sm:$0xf] }
 0x1b9   : > { %v940_v5 = vpop.f32.mrf.mxu0  ;;  %v953_v16 = vpop.f32.mrf.mxu1 }
 0x1ba   : > { %v941_v35 = vadd.f32 %v940_v5, %v767_v14  ;;  %v3562_v5 = vld [vmem:[#allocation6 + $0xb4] sm:$0xf0] }
 0x1bc   : > { %v954_v37 = vadd.f32 %v953_v16, %v941_v35 }
 0x1be   : > { %v1573_v11 = vpack.c.bf16 %v954_v37, %v954_v37  ;;  %v3167_v37 = vld [vmem:[#allocation6 + $0x68] sm:$0xf0] }
 0x1c0   : > { %v966_v17 = vpop.f32.mrf.mxu2  ;;  %v979_v18 = vpop.f32.mrf.mxu3 }
 0x1c1   : > { %v942_v62 = vpop.f32.mrf.mxu0  ;;  %v955_v19 = vpop.f32.mrf.mxu1  ;;  %v967_v10 = vadd.f32 %v966_v17, %v768_v41  ;;  %v3552_v41 = vld [vmem:[#allocation6 + $0x64] sm:$0xf0] }
 0x1c3   : > { %v980_v48 = vadd.f32 %v979_v18, %v967_v10  ;;  %v3159_v10 = vld [vmem:[#allocation6 + $0x58] sm:$0xf0] }
 0x1c5   : > { %v1625_v7 = vpack.c.bf16 %v980_v48, %v980_v48  ;;  %v3570_v48 = vld [vmem:[#allocation6 + $0xf4] sm:$0xf0] }
 0x1c8   : > { %v968_v20 = vpop.f32.mrf.mxu2  ;;  %v981_v21 = vpop.f32.mrf.mxu3 }
 0x1c9   : > { %v1438_v23 = vpop.f32.mrf.mxu0  ;;  %v1452_v24 = vpop.f32.mrf.mxu1 }
 0x1ca   : > { %v1439_v27 = vadd.f32 %v1438_v23, %v1101_v25 }
 0x1cc   : > { %v1453_v33 = vadd.f32 %v1452_v24, %v1439_v27 }
 0x1d0   : > { %v1466_v13 = vpop.f32.mrf.mxu2  ;;  %v1480_v28 = vpop.f32.mrf.mxu3 }
 0x1d1   : > { %v1440_v29 = vpop.f32.mrf.mxu0  ;;  %v1454_v30 = vpop.f32.mrf.mxu1  ;;  %v1467_v39 = vadd.f32 %v1466_v13, %v1102_v32 }
 0x1d2   : > { %v1441_v31 = vadd.f32 %v1440_v29, %v1101_v25 }
 0x1d3   : > { %v1481_v0 = vadd.f32 %v1480_v28, %v1467_v39  ;;  %v3165_v39 = vld [vmem:[#allocation6 + $0x60] sm:$0xf] }
 0x1d4   : > { %v1455_v34 = vadd.f32 %v1454_v30, %v1441_v31 }
 0x1d6   : > { %v1574_v38 = vpack.c.bf16 %v1455_v34, %v1453_v33  ;;  %v3554_v33 = vld [vmem:[#allocation6 + $0x74] sm:$0xf0]  ;;  %v3553_v34 = vld [vmem:[#allocation6 + $0x74] sm:$0xf] }
 0x1d8   : > { %v1468_v36 = vpop.f32.mrf.mxu2  ;;  %v1482_v42 = vpop.f32.mrf.mxu3  ;;  %1582 = vmatpush.bf16.xpose.msrb.mxu0 %v1574_v38  ;;  %v3175_v38 = vld [vmem:[#allocation6 + $0x78] sm:$0xf0] }
 0x1d9   : > { %v1469_v43 = vadd.f32 %v1468_v36, %v1102_v32  ;;  %v3173_v32 = vld [vmem:[#allocation6 + $0x70] sm:$0xf]  ;;  %v3178_v36 = vor.u32 %v3553_v34, %v3175_v38  ;;  %v3127_v34 = vld [vmem:[#allocation6 + $0x18] sm:$0xf0] }
 0x1da   : > { %v1494_v44 = vpop.f32.mrf.mxu0  ;;  %v1508_v63 = vpop.f32.mrf.mxu1  ;;  %v3174_v35 = vor.u32 %v3554_v33, %v3173_v32  ;;  %v3542_v32 = vld [vmem:[#allocation6 + $0x14] sm:$0xf0]  ;;  %v3541_v33 = vld [vmem:[#allocation6 + $0x14] sm:$0xf] }
 0x1db   : > { %v1483_v45 = vadd.f32 %v1482_v42, %v1469_v43  ;;  %v1495_v6 = vadd.f32 %v1494_v44, %v1103_v47  ;;  %v3551_v42 = vld [vmem:[#allocation6 + $0x64] sm:$0xf]  ;;  %v3166_v43 = vor.u32 %v3552_v41, %v3165_v39  ;;  %v3130_v38 = vor.u32 %v3541_v33, %v3127_v34  ;;  %v3723_v33 = vld [vmem:[%s4069_s29 + $0x8] sm:$0xff] }
 0x1dc   : > { %v3170_v44 = vor.u32 %v3551_v42, %v3167_v37  ;;  %v3117_v37 = vld [vmem:[#allocation6] sm:$0xf] }
 0x1dd   : > { %v1626_v46 = vpack.c.bf16 %v1483_v45, %v1481_v0  ;;  %v1509_v55 = vadd.f32 %v1508_v63, %v1495_v6  ;;  %v3157_v63 = vld [vmem:[#allocation6 + $0x50] sm:$0xf]  ;;  %v3550_v0 = vld [vmem:[#allocation6 + $0x54] sm:$0xf0]  ;;  %v3549_v45 = vld [vmem:[#allocation6 + $0x54] sm:$0xf] }
 0x1de   : > { %v3569_v6 = vld [vmem:[#allocation6 + $0xf4] sm:$0xf] }
 0x1df   : > { %1634 = vmatpush.bf16.xpose.msrb.mxu2 %v1626_v46  ;;  %1583 = vmatmul.bf16.vlgmr.msrb.gmra.mxu0 %v1573_v11  ;;  %v3109_v46 = vld [vmem:[#allocation6 + $0xf0] sm:$0xf] }
 0x1e1   : > { %v1522_v49 = vpop.f32.mrf.mxu2  ;;  %v1536_v50 = vpop.f32.mrf.mxu3 }
 0x1e2   : > { %v1496_v51 = vpop.f32.mrf.mxu0  ;;  %v1510_v54 = vpop.f32.mrf.mxu1  ;;  %v1523_v58 = vadd.f32 %v1522_v49, %v1104_v53  ;;  %v3111_v49 = vld [vmem:[#allocation6 + $0xf8] sm:$0xf0] }
 0x1e3   : > { %v1497_v52 = vadd.f32 %v1496_v51, %v1103_v47  ;;  %v3158_v47 = vor.u32 %v3550_v0, %v3157_v63  ;;  %v3149_v51 = vld [vmem:[#allocation6 + $0x40] sm:$0xf]  ;;  %v3119_v0 = vld [vmem:[#allocation6 + $0x8] sm:$0xf0] }
 0x1e4   : > { %v1537_v1 = vadd.f32 %v1536_v50, %v1523_v58  ;;  %v3162_v50 = vor.u32 %v3549_v45, %v3159_v10  ;;  %v3085_v10 = vld [vmem:[#allocation6 + $0xc0] sm:$0xf] }
 0x1e5   : > { %v1511_v56 = vadd.f32 %v1510_v54, %v1497_v52  ;;  %v3548_v52 = vld [vmem:[#allocation6 + $0x44] sm:$0xf0]  ;;  %v3114_v54 = vor.u32 %v3569_v6, %v3111_v49  ;;  %v3077_v6 = vld [vmem:[#allocation6 + $0xb0] sm:$0xf]  ;;  %v3561_v49 = vld [vmem:[#allocation6 + $0xb4] sm:$0xf] }
 0x1e6   : > { %1635 = vmatmul.bf16.vlgmr.msrb.gmra.mxu2 %v1625_v7  ;;  %v3547_v7 = vld [vmem:[#allocation6 + $0x44] sm:$0xf] }
 0x1e7   : > { %v1607_v57 = vpack.c.bf16 %v1511_v56, %v1509_v55  ;;  %1859 = vmatpush.bf16.msra.mxu2 %v3174_v35  ;;  %v3151_v55 = vld [vmem:[#allocation6 + $0x48] sm:$0xf0]  ;;  %v3101_v56 = vld [vmem:[#allocation6 + $0xe0] sm:$0xf] }
 0x1e8   : > { %v3154_v8 = vor.u32 %v3547_v7, %v3151_v55  ;;  %v3069_v7 = vld [vmem:[#allocation6 + $0xa0] sm:$0xf] }
 0x1e9   : > { %v1524_v59 = vpop.f32.mrf.mxu2  ;;  %1618 = vmatpush.bf16.msrb.mxu1 %v1607_v57  ;;  %v1538_v61 = vpop.f32.mrf.mxu3  ;;  %v3568_v57 = vld [vmem:[#allocation6 + $0xe4] sm:$0xf0] }
 0x1ea   : > { %v1525_v60 = vadd.f32 %v1524_v59, %v1104_v53  ;;  %v3110_v53 = vor.u32 %v3570_v48, %v3109_v46  ;;  %v3102_v58 = vor.u32 %v3568_v57, %v3101_v56  ;;  %v3567_v59 = vld [vmem:[#allocation6 + $0xe4] sm:$0xf]  ;;  %v3071_v56 = vld [vmem:[#allocation6 + $0xa8] sm:$0xf0]  ;;  %v3061_v57 = vld [vmem:[#allocation6 + $0x90] sm:$0xf] }
 0x1eb   : > { %1860 = vmatpush.bf16.msra.mxu2 %v3166_v43  ;;  %v3540_v43 = vld [vmem:[#allocation6 + $0x4] sm:$0xf0]  ;;  %v3563_v46 = vld [vmem:[#allocation6 + $0xc4] sm:$0xf] }
 0x1ec   : > { %v1539_v2 = vadd.f32 %v1538_v61, %v1525_v60  ;;  %1753 = vmatpush.bf16.msra.mxu0 %v3110_v53  ;;  %v3103_v60 = vld [vmem:[#allocation6 + $0xe8] sm:$0xf0]  ;;  %v3150_v61 = vor.u32 %v3548_v52, %v3149_v51  ;;  %v3118_v63 = vor.u32 %v3540_v43, %v3117_v37  ;;  %v3079_v51 = vld [vmem:[#allocation6 + $0xb8] sm:$0xf0]  ;;  %v3560_v53 = vld [vmem:[#allocation6 + $0xa4] sm:$0xf0] }
 0x1ed   : > { %1766 = vmatpush.bf16.msra.mxu1 %v3114_v54  ;;  %v3082_v52 = vor.u32 %v3561_v49, %v3079_v51  ;;  %v3559_v54 = vld [vmem:[#allocation6 + $0xa4] sm:$0xf]  ;;  %v3070_v55 = vor.u32 %v3560_v53, %v3069_v7  ;;  %v3584_v51 = vld [vmem:[#allocation7 + $0x64] sm:$0xf0] }
 0x1ee   : > { %v1655_v3 = vpack.c.bf16 %v1539_v2, %v1537_v1  ;;  %v3141_v1 = vld [vmem:[#allocation6 + $0x30] sm:$0xf]  ;;  %v3546_v2 = vld [vmem:[#allocation6 + $0x34] sm:$0xf0]  ;;  %v3600_v53 = vld [vmem:[#allocation7 + $0xe4] sm:$0xf0] }
 0x1ef   : > { %1861 = vmatpush.bf16.msra.mxu2 %v3158_v47 }
 0x1f0   : > { %1666 = vmatpush.bf16.msrb.mxu3 %v1655_v3  ;;  %v3106_v3 = vor.u32 %v3567_v59, %v3103_v60  ;;  %1754 = vmatpush.bf16.msra.mxu0 %v3102_v58  ;;  %v3558_v58 = vld [vmem:[#allocation6 + $0x94] sm:$0xf0]  ;;  %v3074_v59 = vor.u32 %v3559_v54, %v3071_v56  ;;  %v3557_v60 = vld [vmem:[#allocation6 + $0x94] sm:$0xf] }
 0x1f1   : > { %v3582_v56 = vld [vmem:[#allocation7 + $0x54] sm:$0xf0] }
 0x1f2   : > { %1767 = vmatpush.bf16.msra.mxu1 %v3106_v3  ;;  %v3053_v3 = vld [vmem:[#allocation6 + $0x80] sm:$0xf] }
 0x1f3   : > { %1862 = vmatpush.bf16.msra.mxu2 %v3150_v61  ;;  %v3063_v61 = vld [vmem:[#allocation6 + $0x98] sm:$0xf0] }
 0x1f4   : > { %1872 = vmatpush.bf16.msra.mxu3 %v3178_v36 }
 0x1f8   : > { %1873 = vmatpush.bf16.msra.mxu3 %v3170_v44  ;;  %v3539_v44 = vld [vmem:[#allocation6 + $0x4] sm:$0xf] }
 0x1f9   : > { %v3122_v45 = vor.u32 %v3539_v44, %v3119_v0 }
 0x1fc   : > { %1874 = vmatpush.bf16.msra.mxu3 %v3162_v50  ;;  %v3078_v50 = vor.u32 %v3562_v5, %v3077_v6  ;;  %v3303_v6 = vld [vmem:[#allocation7 + $0xf0] sm:$0xf]  ;;  %v3602_v5 = vld [vmem:[#allocation7 + $0xf4] sm:$0xf0] }
 0x1fd   : > { %v3304_v49 = vor.u32 %v3602_v5, %v3303_v6 }
 0x200   : > { %1875 = vmatpush.bf16.msra.mxu3 %v3154_v8  ;;  %v3556_v8 = vld [vmem:[#allocation6 + $0x84] sm:$0xf0] }
 0x25c   : > { %v1584_v15 = vpop.f32.mrf.mxu0 }
 0x25d   : > { %v1588_v16 = vmul.f32 0.088388346, %v1584_v15 }
 0x25f   : > { %v1592_v17 = vsel %vm4184_vm11, -1e+30, %v1588_v16  ;;  %v3545_v16 = vld [vmem:[#allocation6 + $0x34] sm:$0xf] }
 0x260   : > { %v1594_v18 = vsel %vm1593_vm12, %v1592_v17, -inf }
 0x261   : > { %1595 = vmax.xlane.f32.xlu0 %v1594_v18  ;;  %v3095_v18 = vld [vmem:[#allocation6 + $0xd8] sm:$0xf0] }
 0x264   : > { %v1586_v62 = vpop.f32.mrf.mxu0 }
 0x269   : > { %v1636_v19 = vpop.f32.mrf.mxu2 }
 0x26a   : > { %v1640_v20 = vmul.f32 0.088388346, %v1636_v19  ;;  %v3094_v19 = vor.u32 %v3566_v12, %v3093_v9  ;;  %v3555_v9 = vld [vmem:[#allocation6 + $0x84] sm:$0xf]  ;;  %v3054_v12 = vor.u32 %v3556_v8, %v3053_v3  ;;  %v3279_v3 = vld [vmem:[#allocation7 + $0xc0] sm:$0xf] }
 0x26b   : > { %v3596_v8 = vld [vmem:[#allocation7 + $0xc4] sm:$0xf0] }
 0x26c   : > { %v1641_v21 = vsel %vm4184_vm11, -1e+30, %v1640_v20  ;;  %v3098_v20 = vor.u32 %v3565_v4, %v3095_v18  ;;  %1755 = vmatpush.bf16.msra.mxu0 %v3094_v19  ;;  %v3055_v4 = vld [vmem:[#allocation6 + $0x88] sm:$0xf0] }
 0x26d   : > { %v1642_v22 = vsel %vm1593_vm12, %v1641_v21, -inf }
 0x26e   : > { %1643 = vmax.xlane.f32.xlu1 %v1642_v22  ;;  %1768 = vmatpush.bf16.msra.mxu1 %v3098_v20 }
 0x271   : > { %v1638_v23 = vpop.f32.mrf.mxu2 }
 0x2d4   : > { %v1596_v24 = vpop.xlane.xlu0 %1595 }
 0x2d5   : > { %v1597_v25 = vsub.f32 %v1592_v17, %v1596_v24  ;;  %v3143_v17 = vld [vmem:[#allocation6 + $0x38] sm:$0xf0]  ;;  %v3133_v24 = vld [vmem:[#allocation6 + $0x20] sm:$0xf] }
 0x2d6   : > { %v3146_v23 = vor.u32 %v3545_v16, %v3143_v17 }
 0x2d7   : > { %v1598_v26 = vmul.f32 1.442695, %v1597_v25  ;;  %v3544_v25 = vld [vmem:[#allocation6 + $0x24] sm:$0xf0] }
 0x2d8   : > { %1876 = vmatpush.bf16.msra.mxu3 %v3146_v23 }
 0x2d9   : > { %3708 = vpow2.f32 %v1598_v26 }
 0x2df   : > { %v4194_v27 = vpop.eup %3708 }
 0x2e0   : > { %v1600_v13 = vsel %vm1593_vm12, %v4194_v27, 0.0 }
 0x2e1   : > { %v1644_v28 = vpop.xlane.xlu1 %1643  ;;  %1601 = vadd.xlane.f32.xlu2 %v1600_v13  ;;  %v3543_v13 = vld [vmem:[#allocation6 + $0x24] sm:$0xf] }
 0x2e2   : > { %v1645_v14 = vsub.f32 %v1641_v21, %v1644_v28  ;;  %v3142_v21 = vor.u32 %v3546_v2, %v3141_v1  ;;  %v3135_v28 = vld [vmem:[#allocation6 + $0x28] sm:$0xf0]  ;;  %v3062_v1 = vor.u32 %v3558_v58, %v3061_v57  ;;  %v3066_v2 = vor.u32 %v3557_v60, %v3063_v61  ;;  %v3287_v57 = vld [vmem:[#allocation7 + $0xd0] sm:$0xf]  ;;  %v3215_v61 = vld [vmem:[#allocation7 + $0x40] sm:$0xf] }
 0x2e4   : > { %v1646_v29 = vmul.f32 1.442695, %v1645_v14  ;;  %1863 = vmatpush.bf16.msra.mxu2 %v3142_v21 }
 0x2e6   : > { %3710 = vpow2.f32 %v1646_v29  ;;  %v3138_v29 = vor.u32 %v3543_v13, %v3135_v28 }
 0x2e8   : > { %1877 = vmatpush.bf16.msra.mxu3 %v3138_v29 }
 0x2ec   : > { %v4198_v30 = vpop.eup %3710  ;;  %1878 = vmatpush.bf16.msra.mxu3 %v3130_v38 }
 0x2ed   : > { %v1648_v31 = vsel %vm1593_vm12, %v4198_v30, 0.0 }
 0x2ee   : > { %1649 = vadd.xlane.f32.xlu0 %v1648_v31  ;;  %v3125_v31 = vld [vmem:[#allocation6 + $0x10] sm:$0xf] }
 0x2ef   : > { %v3126_v35 = vor.u32 %v3542_v32, %v3125_v31  ;;  %v3722_v31 = vld [vmem:[%s4069_s29] sm:$0xff] }
 0x2f0   : > { %1879 = vmatpush.bf16.msra.mxu3 %v3122_v45 }
 0x354   : > { %v1602_v11 = vpop.xlane.xlu2 %1601 }
 0x355   : > { %3712 = vrcp.f32 %v1602_v11  ;;  %v3564_v11 = vld [vmem:[#allocation6 + $0xc4] sm:$0xf0] }
 0x356   : > { %v3086_v47 = vor.u32 %v3564_v11, %v3085_v10 }
 0x358   : > { %1756 = vmatpush.bf16.msra.mxu0 %v3086_v47  ;;  %v3239_v47 = vld [vmem:[#allocation7 + $0x70] sm:$0xf] }
 0x35b   : > { %v3713_v15 = vpop.eup %3712 }
 0x35c   : > { %v1604_v62 = vmul.f32 %v3713_v15, %v4194_v27  ;;  %v3134_v27 = vor.u32 %v3544_v25, %v3133_v24  ;;  %1757 = vmatpush.bf16.msra.mxu0 %v3078_v50  ;;  %v3058_v15 = vor.u32 %v3555_v9, %v3055_v4  ;;  %v1887_v25 = vld [vmem:[%s4278_s9] sm:$0x3]  ;;  %v3280_v4 = vor.u32 %v3596_v8, %v3279_v3  ;;  %v3579_v3 = vld [vmem:[#allocation7 + $0x44] sm:$0xf]  ;;  %v3217_v8 = vld [vmem:[#allocation7 + $0x48] sm:$0xf0] }
 0x35d   : > { %v1890_v29 = vperm.slane %v1887_v25, 1  ;;  %v3231_v50 = vld [vmem:[#allocation7 + $0x60] sm:$0xf] }
 0x35e   : > { %v1605_v22 = vsel %vm4184_vm11, 0.0, %v1604_v62  ;;  %1864 = vmatpush.bf16.msra.mxu2 %v3134_v27  ;;  %v3232_v7 = vor.u32 %v3584_v51, %v3231_v50  ;;  %v3583_v51 = vld [vmem:[#allocation7 + $0x64] sm:$0xf] }
 0x35f   : > { %v1606_v26 = vpack.c.bf16 %v1605_v22, %v1605_v22 }
 0x360   : > { %1758 = vmatpush.bf16.msra.mxu0 %v3070_v55  ;;  %v3223_v55 = vld [vmem:[#allocation7 + $0x50] sm:$0xf] }
 0x361   : > { %v1650_v14 = vpop.xlane.xlu0 %1649  ;;  %3049 = vmatmul.msk.bf16.vlgmr.msrb.gmra.mxu1 %vm1593_vm12, %v1606_v26  ;;  %v3224_v58 = vor.u32 %v3582_v56, %v3223_v55  ;;  %v1936_v56 = vld [vmem:[%s4281_s12] sm:$0xf] }
 0x362   : > { %3714 = vrcp.f32 %v1650_v14  ;;  %1865 = vmatpush.bf16.msra.mxu2 %v3126_v35  ;;  %v1889_v14 = vperm.slane %v1887_v25, 0  ;;  %v3576_v25 = vld [vmem:[#allocation7 + $0x24] sm:$0xf0] }
 0x364   : > { %1759 = vmatpush.bf16.msra.mxu0 %v3062_v1  ;;  %v3580_v1 = vld [vmem:[#allocation7 + $0x44] sm:$0xf0] }
 0x366   : > { %1866 = vmatpush.bf16.msra.mxu2 %v3118_v63 }
 0x368   : > { %v3715_v39 = vpop.eup %3714  ;;  %1760 = vmatpush.bf16.msra.mxu0 %v3054_v12  ;;  %v3216_v12 = vor.u32 %v3580_v1, %v3215_v61  ;;  %v3289_v61 = vld [vmem:[#allocation7 + $0xd8] sm:$0xf0] }
 0x369   : > { %v1652_v41 = vmul.f32 %v3715_v39, %v4198_v30  ;;  %v3087_v30 = vld [vmem:[#allocation6 + $0xc8] sm:$0xf0] }
 0x36a   : > { %v3090_v48 = vor.u32 %v3563_v46, %v3087_v30  ;;  %v3586_v30 = vld [vmem:[#allocation7 + $0x74] sm:$0xf0] }
 0x36b   : > { %v1653_v36 = vsel %vm4184_vm11, 0.0, %v1652_v41 }
 0x36c   : > { %v1654_v42 = vpack.c.bf16 %v1653_v36, %v1653_v36  ;;  %1769 = vmatpush.bf16.msra.mxu1 %v3090_v48  ;;  %v3240_v48 = vor.u32 %v3586_v30, %v3239_v47  ;;  %v3305_v47 = vld [vmem:[#allocation7 + $0xf8] sm:$0xf0] }
 0x36e   : > { %3050 = vmatmul.msk.bf16.vlgmr.msrb.gmra.mxu3 %vm1593_vm12, %v1654_v42  ;;  %2211 = vmatpush.bf16.msrb.mxu2 %v3240_v48 }
 0x36f   : > { %2224 = vmatpush.bf16.msrb.mxu3 %v3304_v49 }
 0x370   : > { %1770 = vmatpush.bf16.msra.mxu1 %v3082_v52  ;;  %v3295_v52 = vld [vmem:[#allocation7 + $0xe0] sm:$0xf] }
 0x371   : > { %v3296_v54 = vor.u32 %v3600_v53, %v3295_v52  ;;  %v3233_v52 = vld [vmem:[#allocation7 + $0x68] sm:$0xf0] }
 0x372   : > { %2212 = vmatpush.bf16.msrb.mxu2 %v3232_v7  ;;  %v3599_v7 = vld [vmem:[#allocation7 + $0xe4] sm:$0xf]  ;;  %v3297_v53 = vld [vmem:[#allocation7 + $0xe8] sm:$0xf0] }
 0x373   : > { %2225 = vmatpush.bf16.msrb.mxu3 %v3296_v54 }
 0x374   : > { %1771 = vmatpush.bf16.msra.mxu1 %v3074_v59 }
 0x376   : > { %2213 = vmatpush.bf16.msrb.mxu2 %v3224_v58  ;;  %v3581_v58 = vld [vmem:[#allocation7 + $0x54] sm:$0xf] }
 0x378   : > { %1772 = vmatpush.bf16.msra.mxu1 %v3066_v2 }
 0x37a   : > { %2214 = vmatpush.bf16.msrb.mxu2 %v3216_v12  ;;  %v3281_v12 = vld [vmem:[#allocation7 + $0xc8] sm:$0xf0] }
 0x37c   : > { %1773 = vmatpush.bf16.msra.mxu1 %v3058_v15  ;;  %v3207_v15 = vld [vmem:[#allocation7 + $0x30] sm:$0xf] }
 0x3de   : > { %v1620_v16 = vpop.f32.mrf.mxu1 }
 0x3df   : > { %v1624_v17 = vpack.c.bf16 %v1620_v16, %v1620_v16  ;;  %v3578_v16 = vld [vmem:[#allocation7 + $0x34] sm:$0xf0] }
 0x3e1   : > { %1867 = vmatmul.bf16.vlgmr.msra.gmra.mxu2 %v1624_v17  ;;  %1880 = vmatmul.bf16.vlgmr.msra.gmra.mxu3 %v1624_v17 }
 0x3e6   : > { %v1622_v18 = vpop.f32.mrf.mxu1 }
 0x3e7   : > { %v3271_v18 = vld [vmem:[#allocation7 + $0xb0] sm:$0xf] }
 0x3f1   : > { %v1668_v62 = vpop.f32.mrf.mxu3 }
 0x3f2   : > { %v1672_v19 = vpack.c.bf16 %v1668_v62, %v1668_v62  ;;  %v3594_v62 = vld [vmem:[#allocation7 + $0xb4] sm:$0xf0] }
 0x3f4   : > { %1761 = vmatmul.bf16.vlgmr.msra.gmra.mxu0 %v1672_v19  ;;  %1774 = vmatmul.bf16.vlgmr.msra.gmra.mxu1 %v1672_v19 }
 0x3f9   : > { %v1670_v20 = vpop.f32.mrf.mxu3 }
 0x3fa   : > { %v1920_v20 = vld [vmem:[%s4279_s10] sm:$0x3] }
 0x464   : > { %v1868_v21 = vpop.f32.mrf.mxu2  ;;  %v1881_v22 = vpop.f32.mrf.mxu3 }
 0x46c   : > { %v1870_v23 = vpop.f32.mrf.mxu2  ;;  %v1883_v24 = vpop.f32.mrf.mxu3 }
 0x46d   : > { %v3272_v23 = vor.u32 %v3594_v62, %v3271_v18  ;;  %v3199_v24 = vld [vmem:[#allocation7 + $0x20] sm:$0xf]  ;;  %v3593_v18 = vld [vmem:[#allocation7 + $0xb4] sm:$0xf]  ;;  %v3273_v62 = vld [vmem:[#allocation7 + $0xb8] sm:$0xf0] }
 0x471   : > { %v1762_v26 = vpop.f32.mrf.mxu0  ;;  %v1775_v13 = vpop.f32.mrf.mxu1 }
 0x472   : > { %v1869_v28 = vadd.f32 %v1868_v21, %v1762_v26  ;;  %v1882_v27 = vadd.f32 %v1881_v22, %v1775_v13  ;;  %v3208_v21 = vor.u32 %v3578_v16, %v3207_v15  ;;  %v1928_v22 = vld [vmem:[%s4280_s11] sm:$0x3]  ;;  %v3577_v16 = vld [vmem:[#allocation7 + $0x34] sm:$0xf] }
 0x473   : > { %v3263_v13 = vld [vmem:[#allocation7 + $0xa0] sm:$0xf] }
 0x474   : > { %v1885_v32 = vadd.f32 %v3722_v31, %v1869_v28  ;;  %v1886_v34 = vadd.f32 %v3723_v33, %v1882_v27  ;;  %v3592_v28 = vld [vmem:[#allocation7 + $0xa4] sm:$0xf0]  ;;  %v1923_v27 = vperm.slane %v1920_v20, 1  ;;  %v1930_v31 = vperm.slane %v1928_v22, 0  ;;  %2215 = vmatpush.bf16.msrb.mxu2 %v3208_v21  ;;  %v3575_v21 = vld [vmem:[#allocation7 + $0x24] sm:$0xf] }
 0x476   : > { %v4215_v35 = vadd.f32 %v1889_v14, %v1885_v32  ;;  %v4217_v38 = vadd.f32 %v1890_v29, %v1886_v34  ;;  %v1922_v14 = vperm.slane %v1920_v20, 0  ;;  %v3200_v32 = vor.u32 %v3576_v25, %v3199_v24  ;;  %v3265_v24 = vld [vmem:[#allocation7 + $0xa8] sm:$0xf0] }
 0x477   : > { %v3276_v20 = vor.u32 %v3593_v18, %v3273_v62  ;;  %v3361_v18 = vld [vmem:[#allocation9 + $0x68] sm:$0xf0] }
 0x478   : > { %v1895_v39 = vadd.f32 %v4217_v38, %v4215_v35  ;;  %2216 = vmatpush.bf16.msrb.mxu2 %v3200_v32  ;;  %v3183_v32 = vld [vmem:[#allocation7] sm:$0xf] }
 0x479   : > { %v1764_v41 = vpop.f32.mrf.mxu0  ;;  %v1777_v36 = vpop.f32.mrf.mxu1 }
 0x47a   : > { %1896 = vadd.xlane.f32.xlu1 %v1895_v39  ;;  %v1931_v39 = vperm.slane %v1928_v22, 1  ;;  %v3264_v41 = vor.u32 %v3592_v28, %v3263_v13  ;;  %v3191_v36 = vld [vmem:[#allocation7 + $0x10] sm:$0xf]  ;;  %v3201_v22 = vld [vmem:[#allocation7 + $0x28] sm:$0xf0] }
 0x47b   : > { %v3204_v25 = vor.u32 %v3575_v21, %v3201_v22  ;;  %v3573_v13 = vld [vmem:[#allocation7 + $0x14] sm:$0xf]  ;;  %v3193_v28 = vld [vmem:[#allocation7 + $0x18] sm:$0xf0]  ;;  %v3627_v21 = vld [vmem:[#allocation9 + $0xc4] sm:$0xf] }
 0x4ed   : > { %v1897_v42 = vpop.xlane.xlu1 %1896 }
 0x4ee   : > { %v1898_v37 = vmul.f32 %v1897_v42, %v4099_v40  ;;  %v3574_v42 = vld [vmem:[#allocation7 + $0x14] sm:$0xf0] }
 0x4ef   : > { %v3192_v30 = vor.u32 %v3574_v42, %v3191_v36  ;;  %v3571_v36 = vld [vmem:[#allocation7 + $0x4] sm:$0xf]  ;;  %v3185_v42 = vld [vmem:[#allocation7 + $0x8] sm:$0xf0] }
 0x4f0   : > { %v4223_v43 = vsub.f32 %v4215_v35, %v1898_v37  ;;  %v4226_v44 = vsub.f32 %v4217_v38, %v1898_v37  ;;  %v3255_v37 = vld [vmem:[#allocation7 + $0x90] sm:$0xf] }
 0x4f1   : > { %2217 = vmatpush.bf16.msrb.mxu2 %v3192_v30 }
 0x4f2   : > { %v1901_v63 = vmul.f32 %v4223_v43, %v4223_v43  ;;  %v1902_v0 = vmul.f32 %v4226_v44, %v4226_v44 }
 0x4f4   : > { %v1903_v45 = vadd.f32 %v1902_v0, %v1901_v63  ;;  %v3590_v63 = vld [vmem:[#allocation7 + $0x94] sm:$0xf0] }
 0x4f6   : > { %1904 = vadd.xlane.f32.xlu2 %v1903_v45 }
 0x569   : > { %v1905_v10 = vpop.xlane.xlu2 %1904 }
 0x56a   : > { %v1906_v11 = vmul.f32 %v1905_v10, %v4099_v40  ;;  %v3598_v40 = vld [vmem:[#allocation7 + $0xd4] sm:$0xf0]  ;;  %v3585_v10 = vld [vmem:[#allocation7 + $0x74] sm:$0xf] }
 0x56b   : > { %v3288_v60 = vor.u32 %v3598_v40, %v3287_v57  ;;  %v3236_v57 = vor.u32 %v3583_v51, %v3233_v52  ;;  %v3300_v40 = vor.u32 %v3599_v7, %v3297_v53  ;;  %v3423_v53 = vld [vmem:[#allocation9 + $0xe0] sm:$0xf] }
 0x56c   : > { %v1907_v46 = vadd.f32 1e-05, %v1906_v11  ;;  %v3241_v11 = vld [vmem:[#allocation7 + $0x78] sm:$0xf0] }
 0x56d   : > { %2226 = vmatpush.bf16.msrb.mxu3 %v3288_v60  ;;  %v3244_v49 = vor.u32 %v3585_v10, %v3241_v11  ;;  %v3597_v60 = vld [vmem:[#allocation7 + $0xd4] sm:$0xf]  ;;  %v3431_v11 = vld [vmem:[#allocation9 + $0xf0] sm:$0xf] }
 0x56e   : > { %3716 = vrsqrt.f32 %v1907_v46  ;;  %vm1914_vm14 = vweird.f32 %v1907_v46 }
 0x571   : > { %2227 = vmatpush.bf16.msrb.mxu3 %v3280_v4  ;;  %v3220_v4 = vor.u32 %v3579_v3, %v3217_v8  ;;  %v3629_v3 = vld [vmem:[#allocation9 + $0xd4] sm:$0xf] }
 0x574   : > { %v3717_v59 = vpop.eup %3716 }
 0x575   : > { %v1909_v2 = vmul.f32 %v3717_v59, %v1907_v46  ;;  %vm1915_vm13 = vweird.f32 %v3717_v59  ;;  %2228 = vmatpush.bf16.msrb.mxu3 %v3272_v23  ;;  %v3601_v46 = vld [vmem:[#allocation7 + $0xf4] sm:$0xf]  ;;  %v3591_v23 = vld [vmem:[#allocation7 + $0xa4] sm:$0xf] }
 0x576   : > { %vm1916_vm15 = vmor %vm1914_vm14, %vm1915_vm13  ;;  %v3308_v50 = vor.u32 %v3601_v46, %v3305_v47  ;;  %v3634_v46 = vld [vmem:[#allocation9 + $0xf4] sm:$0xf0]  ;;  %v3633_v47 = vld [vmem:[#allocation9 + $0xf4] sm:$0xf] }
 0x577   : > { %v1910_v9 = vmul.f32 %v3717_v59, %v1909_v2  ;;  %v3292_v2 = vor.u32 %v3597_v60, %v3289_v61  ;;  %v3432_v30 = vor.u32 %v3634_v46, %v3431_v11  ;;  %v3369_v60 = vld [vmem:[#allocation9 + $0x78] sm:$0xf0]  ;;  %v3623_v11 = vld [vmem:[#allocation9 + $0xa4] sm:$0xf] }
 0x579   : > { %v1911_v17 = vmul.f32 0.5, %v1910_v9  ;;  %2229 = vmatpush.bf16.msrb.mxu3 %v3264_v41  ;;  %v3595_v9 = vld [vmem:[#allocation7 + $0xc4] sm:$0xf]  ;;  %v3588_v41 = vld [vmem:[#allocation7 + $0x84] sm:$0xf0] }
 0x57a   : > { %v3284_v15 = vor.u32 %v3595_v9, %v3281_v12  ;;  %v3417_v9 = vld [vmem:[#allocation9 + $0xd8] sm:$0xf0] }
 0x57b   : > { %v1912_v19 = vsub.f32 1.5, %v1911_v17  ;;  %v3209_v17 = vld [vmem:[#allocation7 + $0x38] sm:$0xf0]  ;;  %v3420_v12 = vor.u32 %v3629_v3, %v3417_v9  ;;  %v3319_v3 = vld [vmem:[#allocation9 + $0x10] sm:$0xf] }
 0x57c   : > { %v3606_v9 = vld [vmem:[#allocation9 + $0x14] sm:$0xf0] }
 0x57d   : > { %v1913_v26 = vmul.f32 %v3717_v59, %v1912_v19  ;;  %v3212_v19 = vor.u32 %v3577_v16, %v3209_v17  ;;  %v3615_v16 = vld [vmem:[#allocation9 + $0x64] sm:$0xf] }
 0x57e   : > { %v3364_v62 = vor.u32 %v3615_v16, %v3361_v18  ;;  %v3320_v16 = vor.u32 %v3606_v9, %v3319_v3  ;;  %v2010_v18 = vld [vmem:[%s4283_s14] sm:$0x3] }
 0x57f   : > { %v1917_v29 = vsel %vm1916_vm15, %v3717_v59, %v1913_v26  ;;  %v3225_v59 = vld [vmem:[#allocation7 + $0x58] sm:$0xf0]  ;;  %v3268_v26 = vor.u32 %v3591_v23, %v3265_v24  ;;  %v3409_v23 = vld [vmem:[#allocation9 + $0xc8] sm:$0xf0] }
 0x580   : > { %v1918_v33 = vmul.f32 %v1917_v29, %v4223_v43  ;;  %v1919_v34 = vmul.f32 %v1917_v29, %v4226_v44  ;;  %v3256_v43 = vor.u32 %v3590_v63, %v3255_v37  ;;  %v3228_v1 = vor.u32 %v3581_v58, %v3225_v59  ;;  %v3617_v58 = vld [vmem:[#allocation9 + $0x74] sm:$0xf] }
 0x581   : > { %v3196_v29 = vor.u32 %v3573_v13, %v3193_v28  ;;  %v3188_v63 = vor.u32 %v3571_v36, %v3185_v42  ;;  %v3372_v61 = vor.u32 %v3617_v58, %v3369_v60  ;;  %v3412_v24 = vor.u32 %v3627_v21, %v3409_v23  ;;  %v3613_v13 = vld [vmem:[#allocation9 + $0x54] sm:$0xf]  ;;  %v3612_v36 = vld [vmem:[#allocation9 + $0x44] sm:$0xf0]  ;;  %v3611_v42 = vld [vmem:[#allocation9 + $0x44] sm:$0xf] }
 0x582   : > { %v1926_v0 = vmul.f32 %v1922_v14, %v1918_v33  ;;  %v1927_v45 = vmul.f32 %v1923_v27, %v1919_v34  ;;  %2230 = vmatpush.bf16.msrb.mxu3 %v3256_v43  ;;  %v3589_v14 = vld [vmem:[#allocation7 + $0x94] sm:$0xf]  ;;  %v3257_v27 = vld [vmem:[#allocation7 + $0x98] sm:$0xf0]  ;;  %v3572_v33 = vld [vmem:[#allocation7 + $0x4] sm:$0xf0] }
 0x583   : > { %v3247_v34 = vld [vmem:[#allocation7 + $0x80] sm:$0xf]  ;;  %v3329_v58 = vld [vmem:[#allocation9 + $0x28] sm:$0xf0]  ;;  %v3620_v60 = vld [vmem:[#allocation9 + $0x84] sm:$0xf0] }
 0x584   : > { %v1934_v48 = vadd.f32 %v1930_v31, %v1926_v0  ;;  %v1935_v6 = vadd.f32 %v1931_v39, %v1927_v45  ;;  %v3260_v31 = vor.u32 %v3589_v14, %v3257_v27  ;;  %v3184_v39 = vor.u32 %v3572_v33, %v3183_v32  ;;  %v3587_v0 = vld [vmem:[#allocation7 + $0x84] sm:$0xf]  ;;  %v3249_v45 = vld [vmem:[#allocation7 + $0x88] sm:$0xf0]  ;;  %v3353_v14 = vld [vmem:[#allocation9 + $0x58] sm:$0xf0] }
 0x585   : > { %v3248_v37 = vor.u32 %v3588_v41, %v3247_v34  ;;  %v3252_v10 = vor.u32 %v3587_v0, %v3249_v45  ;;  %v3356_v27 = vor.u32 %v3613_v13, %v3353_v14  ;;  %v3625_v32 = vld [vmem:[#allocation9 + $0xb4] sm:$0xf]  ;;  %v3401_v34 = vld [vmem:[#allocation9 + $0xb8] sm:$0xf0]  ;;  %v3343_v41 = vld [vmem:[#allocation9 + $0x40] sm:$0xf] }
 0x586   : > { %v1937_v44 = vpack.c.bf16 %v1934_v48, %v1934_v48  ;;  %v1938_v5 = vpack.c.bf16 %v1935_v6, %v1935_v6  ;;  %2218 = vmatpush.bf16.msrb.mxu2 %v3184_v39  ;;  %v3433_v48 = vld [vmem:[#allocation9 + $0xf8] sm:$0xf0]  ;;  %v3404_v39 = vor.u32 %v3625_v32, %v3401_v34  ;;  %v3391_v45 = vld [vmem:[#allocation9 + $0xa0] sm:$0xf]  ;;  %v2048_v21 = vperm.slane %v2010_v18, 1 }
 0x587   : > { %2231 = vmatpush.bf16.msrb.mxu3 %v3248_v37  ;;  %v3436_v6 = vor.u32 %v3633_v47, %v3433_v48  ;;  %v3344_v37 = vor.u32 %v3612_v36, %v3343_v41  ;;  %v3393_v47 = vld [vmem:[#allocation9 + $0xa8] sm:$0xf0]  ;;  %v3610_v48 = vld [vmem:[#allocation9 + $0x34] sm:$0xf0] }
 0x588   : > { %v1945_v54 = vsel %vm1943_vm0, %v1937_v44, 0  ;;  %v1948_v55 = vsel %vm1943_vm0, %v1938_v5, 0  ;;  %v3313_v23 = vld [vmem:[#allocation9 + $0x8] sm:$0xf0] }
 0x589   : > { %1957 = vmatpush.bf16.msrb.mxu0 %v1945_v54  ;;  %1970 = vmatpush.bf16.msrb.mxu1 %v1948_v55  ;;  %v3632_v54 = vld [vmem:[#allocation9 + $0xe4] sm:$0xf0]  ;;  %v3631_v55 = vld [vmem:[#allocation9 + $0xe4] sm:$0xf] }
 0x58b   : > { %2461 = vmatpush.bf16.msra.mxu3 %v3432_v30  ;;  %v3335_v30 = vld [vmem:[#allocation9 + $0x30] sm:$0xf] }
 0x58c   : > { %3179 = vmatmul.msk.bf16.vlgmr.msrb.gmra.mxu0 %vm1939_vm1, %v1936_v56  ;;  %3180 = vmatmul.msk.bf16.vlgmr.msrb.gmra.mxu1 %vm1939_vm1, %v1936_v56  ;;  %v3425_v56 = vld [vmem:[#allocation9 + $0xe8] sm:$0xf0] }
 0x58d   : > { %2237 = vmatpush.bf16.msra.mxu0 %v3244_v49  ;;  %2250 = vmatpush.bf16.msra.mxu1 %v3308_v50 }
 0x591   : > { %2238 = vmatpush.bf16.msra.mxu0 %v3236_v57  ;;  %2251 = vmatpush.bf16.msra.mxu1 %v3300_v40  ;;  %v3428_v57 = vor.u32 %v3631_v55, %v3425_v56  ;;  %v3618_v40 = vld [vmem:[#allocation9 + $0x74] sm:$0xf0]  ;;  %v3327_v56 = vld [vmem:[#allocation9 + $0x20] sm:$0xf] }
 0x595   : > { %2239 = vmatpush.bf16.msra.mxu0 %v3228_v1  ;;  %2252 = vmatpush.bf16.msra.mxu1 %v3292_v2  ;;  %v3415_v1 = vld [vmem:[#allocation9 + $0xd0] sm:$0xf]  ;;  %v3630_v2 = vld [vmem:[#allocation9 + $0xd4] sm:$0xf0] }
 0x596   : > { %v3416_v8 = vor.u32 %v3630_v2, %v3415_v1  ;;  %v3619_v1 = vld [vmem:[#allocation9 + $0x84] sm:$0xf]  ;;  %v3377_v2 = vld [vmem:[#allocation9 + $0x88] sm:$0xf0] }
 0x599   : > { %2240 = vmatpush.bf16.msra.mxu0 %v3220_v4  ;;  %2253 = vmatpush.bf16.msra.mxu1 %v3284_v15  ;;  %v3359_v4 = vld [vmem:[#allocation9 + $0x60] sm:$0xf]  ;;  %v3616_v15 = vld [vmem:[#allocation9 + $0x64] sm:$0xf0] }
 0x59a   : > { %v3360_v17 = vor.u32 %v3616_v15, %v3359_v4  ;;  %v3321_v4 = vld [vmem:[#allocation9 + $0x18] sm:$0xf0]  ;;  %v3380_v15 = vor.u32 %v3619_v1, %v3377_v2 }
 0x59d   : > { %2241 = vmatpush.bf16.msra.mxu0 %v3212_v19  ;;  %2254 = vmatpush.bf16.msra.mxu1 %v3276_v20  ;;  %v3407_v19 = vld [vmem:[#allocation9 + $0xc0] sm:$0xf]  ;;  %v3628_v20 = vld [vmem:[#allocation9 + $0xc4] sm:$0xf0] }
 0x59e   : > { %v3408_v22 = vor.u32 %v3628_v20, %v3407_v19  ;;  %v3604_v19 = vld [vmem:[#allocation9 + $0x4] sm:$0xf0]  ;;  %v3603_v20 = vld [vmem:[#allocation9 + $0x4] sm:$0xf] }
 0x5a1   : > { %2242 = vmatpush.bf16.msra.mxu0 %v3204_v25  ;;  %2255 = vmatpush.bf16.msra.mxu1 %v3268_v26  ;;  %v3351_v25 = vld [vmem:[#allocation9 + $0x50] sm:$0xf]  ;;  %v3614_v26 = vld [vmem:[#allocation9 + $0x54] sm:$0xf0] }
 0x5a2   : > { %v3352_v28 = vor.u32 %v3614_v26, %v3351_v25 }
 0x5a5   : > { %2243 = vmatpush.bf16.msra.mxu0 %v3196_v29  ;;  %2256 = vmatpush.bf16.msra.mxu1 %v3260_v31  ;;  %v3399_v29 = vld [vmem:[#allocation9 + $0xb0] sm:$0xf]  ;;  %v3626_v31 = vld [vmem:[#allocation9 + $0xb4] sm:$0xf0] }
 0x5a6   : > { %v3400_v33 = vor.u32 %v3626_v31, %v3399_v29 }
 0x5a9   : > { %2244 = vmatpush.bf16.msra.mxu0 %v3188_v63  ;;  %2257 = vmatpush.bf16.msra.mxu1 %v3252_v10  ;;  %v3345_v63 = vld [vmem:[#allocation9 + $0x48] sm:$0xf0]  ;;  %v3624_v10 = vld [vmem:[#allocation9 + $0xa4] sm:$0xf0] }
 0x5aa   : > { %v3348_v0 = vor.u32 %v3611_v42, %v3345_v63  ;;  %v3392_v46 = vor.u32 %v3624_v10, %v3391_v45 }
 0x5ad   : > { %2487 = vmatpush.bf16.msrb.mxu1 %v3436_v6  ;;  %2474 = vmatpush.bf16.msrb.mxu0 %v3372_v61  ;;  %v3396_v6 = vor.u32 %v3623_v11, %v3393_v47 }
 0x5b1   : > { %2488 = vmatpush.bf16.msrb.mxu1 %v3428_v57  ;;  %2475 = vmatpush.bf16.msrb.mxu0 %v3364_v62  ;;  %v3608_v57 = vld [vmem:[#allocation9 + $0x24] sm:$0xf0]  ;;  %v3311_v62 = vld [vmem:[#allocation9] sm:$0xf] }
 0x5b5   : > { %2489 = vmatpush.bf16.msrb.mxu1 %v3420_v12  ;;  %2476 = vmatpush.bf16.msrb.mxu0 %v3356_v27  ;;  %v3605_v12 = vld [vmem:[#allocation9 + $0x14] sm:$0xf] }
 0x5b9   : > { %2490 = vmatpush.bf16.msrb.mxu1 %v3412_v24  ;;  %2477 = vmatpush.bf16.msrb.mxu0 %v3348_v0  ;;  %v3316_v24 = vor.u32 %v3603_v20, %v3313_v23 }
 0x5bd   : > { %2491 = vmatpush.bf16.msrb.mxu1 %v3404_v39 }
 0x5c1   : > { %2492 = vmatpush.bf16.msrb.mxu1 %v3396_v6 }
 0x609   : > { %v1959_v43 = vpop.f32.mrf.mxu0  ;;  %v1972_v44 = vpop.f32.mrf.mxu1 }
 0x60a   : > { %v4245_v5 = vadd.f32 %v1959_v43, %v4215_v35  ;;  %v4248_v49 = vadd.f32 %v1972_v44, %v4217_v38  ;;  %v3424_v35 = vor.u32 %v3632_v54, %v3423_v53  ;;  %v3367_v38 = vld [vmem:[#allocation9 + $0x70] sm:$0xf]  ;;  %v3336_v43 = vor.u32 %v3610_v48, %v3335_v30  ;;  %v3609_v44 = vld [vmem:[#allocation9 + $0x34] sm:$0xf]  ;;  %v3385_v54 = vld [vmem:[#allocation9 + $0x98] sm:$0xf0] }
 0x60b   : > { %v3368_v59 = vor.u32 %v3618_v40, %v3367_v38  ;;  %v3621_v53 = vld [vmem:[#allocation9 + $0x94] sm:$0xf]  ;;  %v3607_v38 = vld [vmem:[#allocation9 + $0x24] sm:$0xf]  ;;  %v3328_v40 = vor.u32 %v3608_v57, %v3327_v56 }
 0x60c   : > { %v2044_v50 = vpack.c.bf16 %v4245_v5, %v4245_v5  ;;  %v2045_v51 = vpack.c.bf16 %v4248_v49, %v4248_v49  ;;  %2462 = vmatpush.bf16.msra.mxu3 %v3424_v35  ;;  %v3388_v35 = vor.u32 %v3621_v53, %v3385_v54  ;;  %v3332_v61 = vor.u32 %v3607_v38, %v3329_v58  ;;  %v2043_v54 = vld [vmem:[%s4303_s25] sm:$0x3] }
 0x60d   : > { %2448 = vmatpush.bf16.msra.mxu2 %v3368_v59  ;;  %v3375_v59 = vld [vmem:[#allocation9 + $0x80] sm:$0xf] }
 0x60e   : > { %2219 = vmatmul.bf16.vlgmr.msrb.gmra.mxu2 %v2044_v50  ;;  %2232 = vmatmul.bf16.vlgmr.msrb.gmra.mxu3 %v2045_v51 }
 0x60f   : > { %2245 = vmatmul.bf16.vlgmr.msra.gmra.mxu0 %v2044_v50  ;;  %2258 = vmatmul.bf16.vlgmr.msra.gmra.mxu1 %v2045_v51  ;;  %v3337_v50 = vld [vmem:[#allocation9 + $0x38] sm:$0xf0]  ;;  %v3383_v51 = vld [vmem:[#allocation9 + $0x90] sm:$0xf] }
 0x610   : > { %2463 = vmatpush.bf16.msra.mxu3 %v3416_v8  ;;  %v3376_v8 = vor.u32 %v3620_v60, %v3375_v59  ;;  %2493 = vmatpush.bf16.msrb.mxu1 %v3388_v35  ;;  %v2285_v35 = vperm.slane %v2043_v54, 1  ;;  %v2284_v59 = vperm.slane %v2043_v54, 0 }
 0x611   : > { %v1961_v52 = vpop.f32.mrf.mxu0  ;;  %v1974_v7 = vpop.f32.mrf.mxu1  ;;  %2449 = vmatpush.bf16.msra.mxu2 %v3360_v17  ;;  %v3324_v17 = vor.u32 %v3605_v12, %v3321_v4 }
 0x612   : > { %v3340_v52 = vor.u32 %v3609_v44, %v3337_v50  ;;  %v3622_v7 = vld [vmem:[#allocation9 + $0x94] sm:$0xf0] }
 0x613   : > { %v3384_v55 = vor.u32 %v3622_v7, %v3383_v51 }
 0x614   : > { %2464 = vmatpush.bf16.msra.mxu3 %v3408_v22  ;;  %2478 = vmatpush.bf16.msrb.mxu0 %v3340_v52  ;;  %v3312_v22 = vor.u32 %v3604_v19, %v3311_v62 }
 0x615   : > { %2450 = vmatpush.bf16.msra.mxu2 %v3352_v28  ;;  %2494 = vmatpush.bf16.msrb.mxu1 %v3380_v15  ;;  %v2047_v28 = vperm.slane %v2010_v18, 0 }
 0x618   : > { %2465 = vmatpush.bf16.msra.mxu3 %v3400_v33  ;;  %2479 = vmatpush.bf16.msrb.mxu0 %v3332_v61 }
 0x619   : > { %2451 = vmatpush.bf16.msra.mxu2 %v3344_v37 }
 0x61c   : > { %2466 = vmatpush.bf16.msra.mxu3 %v3392_v46  ;;  %2480 = vmatpush.bf16.msrb.mxu0 %v3324_v17 }
 0x61d   : > { %2452 = vmatpush.bf16.msra.mxu2 %v3336_v43 }
 0x620   : > { %2467 = vmatpush.bf16.msra.mxu3 %v3384_v55  ;;  %2481 = vmatpush.bf16.msrb.mxu0 %v3316_v24 }
 0x621   : > { %2453 = vmatpush.bf16.msra.mxu2 %v3328_v40 }
 0x624   : > { %2468 = vmatpush.bf16.msra.mxu3 %v3376_v8 }
 0x625   : > { %2454 = vmatpush.bf16.msra.mxu2 %v3320_v16 }
 0x629   : > { %2455 = vmatpush.bf16.msra.mxu2 %v3312_v22 }
 0x68c   : > { %v2246_v25 = vpop.f32.mrf.mxu0  ;;  %v2259_v26 = vpop.f32.mrf.mxu1 }
 0x68d   : > { %v2247_v13 = vadd.f32 %v2246_v25, %v2048_v21 }
 0x68f   : > { %v2260_v14 = vadd.f32 %v2259_v26, %v2247_v13 }
 0x691   : > { %v2266_v27 = vmul.f32 0.044715, %v2260_v14  ;;  %v2220_v29 = vpop.f32.mrf.mxu2  ;;  %v2233_v31 = vpop.f32.mrf.mxu3  ;;  %v2264_v48 = vmul.f32 0.5, %v2260_v14 }
 0x692   : > { %v2221_v32 = vadd.f32 %v2220_v29, %v2047_v28 }
 0x693   : > { %v2268_v33 = vmul.f32 %v2266_v27, %v2260_v14 }
 0x694   : > { %v2234_v34 = vadd.f32 %v2233_v31, %v2221_v32  ;;  %v2248_v39 = vpop.f32.mrf.mxu0  ;;  %v2261_v41 = vpop.f32.mrf.mxu1 }
 0x695   : > { %v2270_v36 = vmul.f32 %v2268_v33, %v2260_v14 }
 0x696   : > { %v2265_v42 = vmul.f32 0.044715, %v2234_v34  ;;  %v2263_v51 = vmul.f32 0.5, %v2234_v34 }
 0x697   : > { %v2272_v37 = vadd.f32 %v2270_v36, %v2260_v14 }
 0x698   : > { %v2267_v63 = vmul.f32 %v2265_v42, %v2234_v34 }
 0x699   : > { %v2222_v0 = vpop.f32.mrf.mxu2  ;;  %v2235_v45 = vpop.f32.mrf.mxu3  ;;  %v2274_v10 = vmul.f32 0.7978846, %v2272_v37 }
 0x69a   : > { %v2269_v11 = vmul.f32 %v2267_v63, %v2234_v34 }
 0x69b   : > { %3718 = vtanh.f32 %v2274_v10 }
 0x69c   : > { %v2271_v46 = vadd.f32 %v2269_v11, %v2234_v34 }
 0x69e   : > { %v2273_v47 = vmul.f32 0.7978846, %v2271_v46 }
 0x6a0   : > { %3720 = vtanh.f32 %v2273_v47 }
 0x6a1   : > { %v3719_v30 = vpop.eup %3718 }
 0x6a2   : > { %v2278_v6 = vadd.f32 1.0, %v3719_v30 }
 0x6a4   : > { %v2280_v43 = vmul.f32 %v2278_v6, %v2264_v48 }
 0x6a6   : > { %v3721_v44 = vpop.eup %3720  ;;  %v2282_v50 = vpack.c.bf16 %v2280_v43, %v2280_v43 }
 0x6a7   : > { %v2277_v52 = vadd.f32 1.0, %v3721_v44 }
 0x6a8   : > { %2469 = vmatmul.bf16.vlgmr.msra.gmra.mxu3 %v2282_v50  ;;  %2495 = vmatmul.bf16.vlgmr.msrb.gmra.mxu1 %v2282_v50 }
 0x6a9   : > { %v2279_v7 = vmul.f32 %v2277_v52, %v2263_v51 }
 0x6ab   : > { %v2281_v53 = vpack.c.bf16 %v2279_v7, %v2279_v7 }
 0x6ad   : > { %2456 = vmatmul.bf16.vlgmr.msra.gmra.mxu2 %v2281_v53  ;;  %2482 = vmatmul.bf16.vlgmr.msrb.gmra.mxu0 %v2281_v53 }
 0x725   : > { %v2496_v55 = vpop.f32.mrf.mxu1 }
 0x72a   : > { %v2483_v56 = vpop.f32.mrf.mxu0 }
 0x72b   : > { %v2470_v57 = vpop.f32.mrf.mxu3  ;;  %v2484_v38 = vadd.f32 %v2483_v56, %v2285_v35 }
 0x72d   : > { %v2497_v40 = vadd.f32 %v2496_v55, %v2484_v38  ;;  %v2498_v58 = vpop.f32.mrf.mxu1 }
 0x72f   : > { %v2501_v60 = vadd.f32 %v2497_v40, %v4248_v49 }
 0x730   : > { %v2457_v61 = vpop.f32.mrf.mxu2 }
 0x731   : > { %2503 = vst [vmem:[%s685_s13 + $0x8] sm:$0xff] %v2501_v60  ;;  %v2458_v1 = vadd.f32 %v2457_v61, %v2284_v59 }
 0x732   : > { %v2485_v2 = vpop.f32.mrf.mxu0 }
 0x733   : > { %v2471_v3 = vadd.f32 %v2470_v57, %v2458_v1  ;;  %v2472_v8 = vpop.f32.mrf.mxu3 }
 0x735   : > { %v2500_v9 = vadd.f32 %v2471_v3, %v4245_v5 }
 0x737   : > { %2502 = vst [vmem:[%s685_s13] sm:$0xff] %v2500_v9 }
 0x738   : > { %v2459_v12 = vpop.f32.mrf.mxu2 }
 0x739 PF: > { %s4305_s16 = sld [smem:[#allocation13_spill]] }
 0x73f   : > { %s30_s24 = sadd.s32 1, %s4305_s16  }
 0x740   : > { %p27_p7 = scmp.ge.s32.totalorder %s30_s24, 4  }
 0x742   :  { %29 = sbr.rel (!%p27_p7) target bundleno = 10 (0xa), region = 148 }
 0x747   :  { %2525 = vsyncpa [#allocation3], 1 }
 0x748   :  { %2527 = vsyncpa [#allocation3 + $0x1], 1 }
 0x749   :  { %2528 = vsyncpa [#allocation5], 1 }
 0x74a   :  { %2529 = vsyncpa [#allocation8], 1 }

// kernel: vip_block_forward.4
= control target key start
LH: loop header
LB: loop body
LE: loop exit
PB: predicated region body
PF: predicated region fallthrough
CT: control target
= control target key end

     0   :  { %s5439_s0 = inlined_call_operand.vmem [shape: f32[2,16,256], index: 0, kind: input, shape index: {}]   ;;  %s5440_s1 = inlined_call_operand.vmem [shape: f32[2,8,256], index: 1, kind: input, shape index: {}]   ;;  %s5441_s2 = inlined_call_operand.vmem [shape: f32[2,8,256], index: 2, kind: input, shape index: {}]   ;;  %s5442_s3 = inlined_call_operand.vmem [shape: f32[2,16,1], index: 3, kind: input, shape index: {}]   ;;  %s5443_s4 = inlined_call_operand.hbm [shape: bf16[256,256], index: 4, kind: input, shape index: {}]   ;;  %s5444_s5 = inlined_call_operand.vmem [shape: f32[1,256], index: 5, kind: input, shape index: {}]   ;;  %s5445_s6 = inlined_call_operand.hbm [shape: bf16[256,256], index: 6, kind: input, shape index: {}]   ;;  %s5446_s7 = inlined_call_operand.vmem [shape: f32[1,256], index: 7, kind: input, shape index: {}]   ;;  %s5447_s8 = inlined_call_operand.hbm [shape: bf16[256,256], index: 8, kind: input, shape index: {}]   ;;  %s5448_s9 = inlined_call_operand.vmem [shape: f32[1,256], index: 9, kind: input, shape index: {}]   ;;  %s5449_s10 = inlined_call_operand.hbm [shape: bf16[256,256], index: 10, kind: input, shape index: {}]   ;;  %s5450_s11 = inlined_call_operand.vmem [shape: f32[1,256], index: 11, kind: input, shape index: {}]   ;;  %s5451_s12 = inlined_call_operand.hbm [shape: bf16[256,512], index: 12, kind: input, shape index: {}]   ;;  %s5452_s13 = inlined_call_operand.vmem [shape: f32[1,512], index: 13, kind: input, shape index: {}]   ;;  %s5453_s14 = inlined_call_operand.hbm [shape: bf16[512,256], index: 14, kind: input, shape index: {}]   ;;  %s5454_s15 = inlined_call_operand.vmem [shape: f32[1,256], index: 15, kind: input, shape index: {}]   ;;  %s5455_s16 = inlined_call_operand.vmem [shape: f32[2,16,256], index: 16, kind: output, shape index: {}]  }
   0x1   :  { %5456 = sst [smem:[#allocation16_spill]] %s5439_s0 }
   0x2   :  { %5457 = sst [smem:[#allocation17_spill]] %s5443_s4 }
   0x3   :  { %5458 = sst [smem:[#allocation18_spill]] %s5445_s6 }
   0x4   :  { %5459 = sst [smem:[#allocation19_spill]] %s5447_s8 }
   0x5   :  { %21 = vsyncpa [#allocation3], 0 }
   0x6   :  { %22 = vsyncpa [#allocation5], 0 }
   0x7   :  { %23 = vsyncpa [#allocation8], 0 }
   0x8   :  { %24 = vsyncpa [#allocation11], 0  ;;  %s5011_s21 = smov 0  }
   0x9 LB: > { %s5017_s22 = sadd.s32 4294967295, %s4912_s21   ;;  %p3269_p0 = scmp.ge.s32.totalorder %s4912_s21, 1  ;;  %s4912_s21 = sphi %s5011_s21, %s30_s21  }
   0xa   : > { %p417_p1 = scmp.lt.s32.totalorder %s4912_s21, 3  ;;  %p4626_p2 = scmp.eq.s32.totalorder %s5017_s22, 0 }
   0xb   : > { %s5460_s6 = sld [smem:[#allocation18_spill]]  ;;  %s479_s29 = sshll.u32 %s5449_s10, 4  ;;  %s480_s29 = int_to_ptr.hbm [resolvable:$true] %s479_s29 }
   0xc   : > { %p5025_p3 = pnand %p3269_p0, %p417_p1  ;;  %s4914_s30 = smov [#allocation4]  }
   0xd   : > { %s447_s0 = sshll.u32 %s4914_s30, 4  ;;  %s4915_s18 = smov [#allocation7]   ;;  %s448_s0 = int_to_ptr.vmem [resolvable:$true] %s447_s0 }
   0xe   : > { %p4607_p4 = pneg %p5025_p3  ;;  %s481_s19 = sshll.u32 %s4915_s18, 4  ;;  %s482_s19 = int_to_ptr.vmem [resolvable:$true] %s481_s19 }
   0xf   : > { %s5463_s4 = sld [smem:[#allocation17_spill]]  ;;  %s4916_s27 = smov 128  }
  0x10   : > { %p5036_p5 = pnand %p4626_p2, %p4607_p4  ;;  %s4917_s28 = smov 8  }
  0x11   : > { %s445_s25 = sshll.u32 %s5460_s6, 4  ;;  %s4918_s30 = smov [#allocation2]   ;;  %s446_s25 = int_to_ptr.hbm [resolvable:$true] %s445_s25 }
  0x12   : > { %4613 = dma.hbm_to_vmem [thread:$0]  (!%p5036_p5), %s446_s25, 4096, %s448_s0, [#allocation5], %s4916_s27, %s4916_s27, %s4917_s28  }
  0x13   : > { %4619 = dma.hbm_to_vmem [thread:$0]  (!%p5036_p5), %s480_s29, 4096, %s482_s19, [#allocation8], %s4916_s27, %s4916_s27, %s4917_s28  }
  0x14   : > { %s430_s18 = sshll.u32 %s4918_s30, 4  ;;  %s5464_s8 = sld [smem:[#allocation19_spill]]  ;;  %s431_s18 = int_to_ptr.vmem [resolvable:$true] %s430_s18 }
  0x15   : > { %s428_s24 = sshll.u32 %s5463_s4, 4  ;;  %s496_s4 = sshll.u32 %s5451_s12, 4  ;;  %s429_s24 = int_to_ptr.hbm [resolvable:$true] %s428_s24  ;;  %s497_s4 = int_to_ptr.hbm [resolvable:$true] %s496_s4 }
  0x16   : > { %4610 = dma.hbm_to_vmem [thread:$0]  (!%p5036_p5), %s429_s24, 4096, %s431_s18, [#allocation3], %s4916_s27, %s4916_s27, %s4917_s28  }
  0x17   : > { %s4919_s29 = smov [#allocation6]   ;;  %s4920_s6 = smov [#allocation9]  }
  0x18   : > { %s464_s19 = sshll.u32 %s4919_s29, 4  ;;  %s498_s30 = sshll.u32 %s4920_s6, 4  ;;  %s465_s19 = int_to_ptr.vmem [resolvable:$true] %s464_s19  ;;  %s499_s30 = int_to_ptr.vmem [resolvable:$true] %s498_s30 }
  0x19   : > { %s4921_s20 = smov 256   ;;  %s513_s25 = sshll.u32 %s5453_s14, 4  ;;  %s514_s25 = int_to_ptr.hbm [resolvable:$true] %s513_s25 }
  0x1a   : > { %s462_s23 = sshll.u32 %s5464_s8, 4  ;;  %s4922_s8 = smov 16   ;;  %s463_s23 = int_to_ptr.hbm [resolvable:$true] %s462_s23 }
  0x1b   : > { %4616 = dma.hbm_to_vmem [thread:$0]  (!%p5036_p5), %s463_s23, 4096, %s465_s19, [#allocation5], %s4916_s27, %s4916_s27, %s4917_s28  }
  0x1c   : > { %4622 = dma.hbm_to_vmem [thread:$0]  (!%p5036_p5), %s497_s4, 8192, %s499_s30, [#allocation8], %s4921_s20, %s4921_s20, %s4922_s8  }
  0x1d   : > { %s4923_s0 = smov [#allocation10]   ;;  %566 = sbr.rel (%p5025_p3) target bundleno = 1782 (0x6f6), region = 84 }
  0x1e   : > { %s515_s29 = sshll.u32 %s4923_s0, 4  ;;  %s516_s29 = int_to_ptr.vmem [resolvable:$true] %s515_s29 }
  0x1f   : > { %4625 = dma.hbm_to_vmem [thread:$0]  (!%p5036_p5), %s514_s25, 8192, %s516_s29, [#allocation11], %s4916_s27, %s4916_s27, %s4917_s28  }
  0x22   : > { %4895 = dma.done.wait (%p4626_p2), [#allocation3], 4096  }
  0x23   : > { %4897 = vsyncadd (%p4626_p2), [#allocation3], 4294963200 }
  0x24   : > { %4899 = dma.done.wait (%p4626_p2), [#allocation5], 8192  }
  0x25   : > { %4901 = vsyncadd (%p4626_p2), [#allocation5], 4294959104 }
  0x26   : > { %4903 = dma.done.wait (%p4626_p2), [#allocation8], 12288  }
  0x27   : > { %4905 = vsyncadd (%p4626_p2), [#allocation8], 4294955008 }
  0x28   : > { %4907 = dma.done.wait (%p4626_p2), [#allocation11], 8192  }
  0x29   : > { %4909 = vsyncadd (%p4626_p2), [#allocation11], 4294959104  ;;  %p657_p6 = scmp.lt.s32.totalorder %s5017_s22, 1  ;;  %s5465_s27 = sld [smem:[#allocation16_spill]]  ;;  %v4924_v14 = vmov 256.0   ;;  %vm1656_vm15 = vcmask 1043456  }
  0x2a   : > { %4660 = vrcp.f32 %v4924_v14  ;;  %v3352_v19 = vld [vmem:[#allocation2 + $0x70] sm:$0xf]  ;;  %v4342_v20 = vld [vmem:[#allocation2 + $0x74] sm:$0xf0]  ;;  %v4341_v25 = vld [vmem:[#allocation2 + $0x74] sm:$0xf] }
  0x2b   : > { %s5467_s22 = smov (!%p657_p6, %s5017_s22), 1  ;;  %v3416_v21 = vld [vmem:[#allocation2 + $0xf0] sm:$0xf]  ;;  %v3353_v23 = vor.u32 %v4342_v20, %v3352_v19  ;;  %v4358_v24 = vld [vmem:[#allocation2 + $0xf4] sm:$0xf0] }
  0x2c   : > { %s4322_s4 = sshll.u32 %s5467_s22, 5  ;;  %s5103_s8 = sshll.u32 %s5467_s22, 4  ;;  %v3354_v26 = vld [vmem:[#allocation2 + $0x78] sm:$0xf0]  ;;  %v3417_v27 = vor.u32 %v4358_v24, %v3416_v21  ;;  %v4357_v29 = vld [vmem:[#allocation2 + $0xf4] sm:$0xf] }
  0x2d   : > { %s666_s6 = scalar_lea.vmem %s5440_s1, %s5103_s8  ;;  %s671_s24 = scalar_lea.vmem %s5441_s2, %s5103_s8  ;;  %v3357_v28 = vor.u32 %v4341_v25, %v3354_v26  ;;  %v3418_v30 = vld [vmem:[#allocation2 + $0xf8] sm:$0xf0]  ;;  %v3344_v31 = vld [vmem:[#allocation2 + $0x60] sm:$0xf]  ;;  %952 = vmatpush.bf16.msra.mxu0 %v3353_v23  ;;  %v4340_v33 = vld [vmem:[#allocation2 + $0x64] sm:$0xf0] }
  0x2e   : > { %v5128_v3 = vld [vmem:[%s666_s6] sm:$0xff]  ;;  %v5130_v4 = vld [vmem:[%s666_s6 + $0x8] sm:$0xff]  ;;  %v3421_v32 = vor.u32 %v4357_v29, %v3418_v30  ;;  %966 = vmatpush.bf16.msra.mxu1 %v3417_v27  ;;  %v3345_v36 = vor.u32 %v4340_v33, %v3344_v31  ;;  %v3336_v44 = vld [vmem:[#allocation2 + $0x50] sm:$0xf]  ;;  %s676_s26 = scalar_lea.vmem %s5442_s3, %s5103_s8  ;;  %s681_s0 = scalar_lea.vmem %s5455_s16, %s4322_s4 }
  0x2f   : > { %s5110_s28 = scalar_lea.vmem %s5465_s27, %s4322_s4  ;;  %v689_v5 = vld [vmem:[%s671_s24] sm:$0xff]  ;;  %v690_v6 = vld [vmem:[%s671_s24 + $0x8] sm:$0xff]  ;;  %v1287_v13 = vadd.f32 %v5130_v4, %v5128_v3  ;;  %980 = vmatpush.bf16.msra.mxu2 %v3357_v28  ;;  %v4338_v45 = vld [vmem:[#allocation2 + $0x54] sm:$0xf0] }
  0x30   : > { %v5121_v0 = vld [vmem:[%s5110_s28] sm:$0xff]  ;;  %v5124_v1 = vld [vmem:[%s5110_s28 + $0x8] sm:$0xff]  ;;  %v5133_v7 = vadd.f32 %v689_v5, %v5128_v3  ;;  %v5136_v8 = vadd.f32 %v690_v6, %v5130_v4  ;;  %v5139_v9 = vld [vmem:[%s5110_s28 + $0x10] sm:$0xff]  ;;  %v4661_v15 = vpop.eup %4660  ;;  %994 = vmatpush.bf16.msra.mxu3 %v3421_v32  ;;  %v3337_v51 = vor.u32 %v4338_v45, %v3336_v44 }
  0x31   : > { %v695_v2 = vadd.f32 %v5124_v1, %v5121_v0  ;;  %v5142_v10 = vld [vmem:[%s5110_s28 + $0x18] sm:$0xff]  ;;  %v702_v16 = vmul.f32 256.0, %v4661_v15  ;;  %vm706_vm0 = vweird.f32 %v4661_v15  ;;  %v3408_v34 = vld [vmem:[#allocation2 + $0xe0] sm:$0xf]  ;;  %v4356_v35 = vld [vmem:[#allocation2 + $0xe4] sm:$0xf0]  ;;  %953 = vmatpush.bf16.msra.mxu0 %v3345_v36 }
  0x32   : > { %v1010_v11 = vadd.f32 %v5136_v8, %v5133_v7  ;;  %v698_v12 = vadd.f32 %v5142_v10, %v5139_v9  ;;  %v3409_v37 = vor.u32 %v4356_v35, %v3408_v34  ;;  %v4339_v38 = vld [vmem:[#allocation2 + $0x64] sm:$0xf]  ;;  %v3346_v39 = vld [vmem:[#allocation2 + $0x68] sm:$0xf0]  ;;  %v3400_v47 = vld [vmem:[#allocation2 + $0xd0] sm:$0xf] }
  0x33   : > { %696 = vadd.xlane.f32.xlu0 %v695_v2  ;;  %v703_v17 = vsub.f32 1.0, %v702_v16  ;;  %v4355_v40 = vld [vmem:[#allocation2 + $0xe4] sm:$0xf]  ;;  %v3349_v42 = vor.u32 %v4339_v38, %v3346_v39  ;;  %v3410_v43 = vld [vmem:[#allocation2 + $0xe8] sm:$0xf0] }
  0x34   : > { %1011 = vadd.xlane.f32.xlu1 %v1010_v11  ;;  %v3413_v46 = vor.u32 %v4355_v40, %v3410_v43  ;;  %v4354_v48 = vld [vmem:[#allocation2 + $0xd4] sm:$0xf0]  ;;  %v4337_v49 = vld [vmem:[#allocation2 + $0x54] sm:$0xf]  ;;  %v3338_v52 = vld [vmem:[#allocation2 + $0x58] sm:$0xf0]  ;;  %967 = vmatpush.bf16.msra.mxu1 %v3409_v37 }
  0x35   : > { %v704_v18 = vmul.f32 %v4661_v15, %v703_v17  ;;  %v4353_v53 = vld [vmem:[#allocation2 + $0xd4] sm:$0xf]  ;;  %v3402_v54 = vld [vmem:[#allocation2 + $0xd8] sm:$0xf0]  ;;  %981 = vmatpush.bf16.msra.mxu2 %v3349_v42  ;;  %v3401_v56 = vor.u32 %v4354_v48, %v3400_v47  ;;  %v3341_v57 = vor.u32 %v4337_v49, %v3338_v52  ;;  %v3328_v58 = vld [vmem:[#allocation2 + $0x40] sm:$0xf]  ;;  %954 = vmatpush.bf16.msra.mxu0 %v3337_v51 }
  0x36   : > { %v4336_v59 = vld [vmem:[#allocation2 + $0x44] sm:$0xf0]  ;;  %995 = vmatpush.bf16.msra.mxu3 %v3413_v46  ;;  %v3405_v60 = vor.u32 %v4353_v53, %v3402_v54  ;;  %v3392_v61 = vld [vmem:[#allocation2 + $0xc0] sm:$0xf]  ;;  %v4335_v63 = vld [vmem:[#allocation2 + $0x44] sm:$0xf] }
  0x37   : > { %v705_v22 = vadd.f32 %v4661_v15, %v704_v18  ;;  %v4352_v62 = vld [vmem:[#allocation2 + $0xc4] sm:$0xf0]  ;;  %v3330_v6 = vld [vmem:[#allocation2 + $0x48] sm:$0xf0]  ;;  %v4351_v11 = vld [vmem:[#allocation2 + $0xc4] sm:$0xf] }
  0x38   : > { %968 = vmatpush.bf16.msra.mxu1 %v3401_v56  ;;  %v3393_v17 = vor.u32 %v4352_v62, %v3392_v61  ;;  %v4334_v18 = vld [vmem:[#allocation2 + $0x34] sm:$0xf0]  ;;  %v3384_v20 = vld [vmem:[#allocation2 + $0xb0] sm:$0xf]  ;;  %v3322_v24 = vld [vmem:[#allocation2 + $0x38] sm:$0xf0] }
  0x39   : > { %v5151_v41 = vsel %vm706_vm0, %v4661_v15, %v705_v22  ;;  %982 = vmatpush.bf16.msra.mxu2 %v3341_v57  ;;  %v4350_v21 = vld [vmem:[#allocation2 + $0xb4] sm:$0xf0]  ;;  %v4333_v22 = vld [vmem:[#allocation2 + $0x34] sm:$0xf]  ;;  %v3386_v26 = vld [vmem:[#allocation2 + $0xb8] sm:$0xf0] }
  0x3a   : > { %996 = vmatpush.bf16.msra.mxu3 %v3405_v60  ;;  %v4349_v25 = vld [vmem:[#allocation2 + $0xb4] sm:$0xf]  ;;  %v3385_v31 = vor.u32 %v4350_v21, %v3384_v20  ;;  %v3312_v32 = vld [vmem:[#allocation2 + $0x20] sm:$0xf]  ;;  %v4332_v33 = vld [vmem:[#allocation2 + $0x24] sm:$0xf0]  ;;  %v3325_v34 = vor.u32 %v4333_v22, %v3322_v24 }
  0x3b   : > { %699 = vadd.xlane.f32.xlu0 %v698_v12  ;;  %v3394_v12 = vld [vmem:[#allocation2 + $0xc8] sm:$0xf0]  ;;  %v3389_v35 = vor.u32 %v4349_v25, %v3386_v26  ;;  %v3376_v36 = vld [vmem:[#allocation2 + $0xa0] sm:$0xf]  ;;  %v4348_v37 = vld [vmem:[#allocation2 + $0xa4] sm:$0xf0]  ;;  %v3313_v46 = vor.u32 %v4332_v33, %v3312_v32 }
  0x3c   : > { %v3397_v19 = vor.u32 %v4351_v11, %v3394_v12  ;;  %969 = vmatpush.bf16.msra.mxu1 %v3393_v17  ;;  %v4331_v38 = vld [vmem:[#allocation2 + $0x24] sm:$0xf]  ;;  %v3314_v42 = vld [vmem:[#allocation2 + $0x28] sm:$0xf0]  ;;  %v3304_v60 = vld [vmem:[#allocation2 + $0x10] sm:$0xf] }
  0x3d   : > { %v4347_v43 = vld [vmem:[#allocation2 + $0xa4] sm:$0xf]  ;;  %v3378_v44 = vld [vmem:[#allocation2 + $0xa8] sm:$0xf0]  ;;  %v3317_v49 = vor.u32 %v4331_v38, %v3314_v42  ;;  %v4330_v61 = vld [vmem:[#allocation2 + $0x14] sm:$0xf0] }
  0x3e   : > { %997 = vmatpush.bf16.msra.mxu3 %v3397_v19  ;;  %v3368_v62 = vld [vmem:[#allocation2 + $0x90] sm:$0xf]  ;;  %v3306_v11 = vld [vmem:[#allocation2 + $0x18] sm:$0xf0]  ;;  %v4328_v17 = vld [vmem:[#allocation2 + $0x4] sm:$0xf0] }
  0x3f   : > { %v4327_v19 = vld [vmem:[#allocation2 + $0x4] sm:$0xf]  ;;  %v3298_v20 = vld [vmem:[#allocation2 + $0x8] sm:$0xf0]  ;;  %v3480_v25 = vld [vmem:[#allocation4 + $0x70] sm:$0xf] }
  0x40   : > { %970 = vmatpush.bf16.msra.mxu1 %v3385_v31  ;;  %v3301_v22 = vor.u32 %v4327_v19, %v3298_v20  ;;  %v3362_v24 = vld [vmem:[#allocation2 + $0x88] sm:$0xf0]  ;;  %v4373_v32 = vld [vmem:[#allocation4 + $0x74] sm:$0xf]  ;;  %v3482_v33 = vld [vmem:[#allocation4 + $0x78] sm:$0xf0] }
  0x41   : > { %v4372_v38 = vld [vmem:[#allocation4 + $0x64] sm:$0xf0]  ;;  %v3448_v19 = vld [vmem:[#allocation4 + $0x30] sm:$0xf]  ;;  %v4366_v20 = vld [vmem:[#allocation4 + $0x34] sm:$0xf0] }
  0x42   : > { %998 = vmatpush.bf16.msra.mxu3 %v3389_v35  ;;  %v3485_v35 = vor.u32 %v4373_v32, %v3482_v33  ;;  %v4364_v32 = vld [vmem:[#allocation4 + $0x24] sm:$0xf0]  ;;  %v3504_v33 = vld [vmem:[#allocation4 + $0xa0] sm:$0xf] }
  0x43   : > { %1288 = vadd.xlane.f32.xlu0 %v1287_v13  ;;  %v3329_v13 = vor.u32 %v4336_v59, %v3328_v58 }
  0x45   : > { %955 = vmatpush.bf16.msra.mxu0 %v3329_v13  ;;  %v4345_v13 = vld [vmem:[#allocation2 + $0x94] sm:$0xf] }
  0xa6   : > { %v697_v50 = vpop.xlane.xlu0 %696 }
  0xa7   : > { %v708_v55 = vmul.f32 %v5151_v41, %v697_v50  ;;  %v1012_v16 = vpop.xlane.xlu1 %1011  ;;  %v3381_v50 = vor.u32 %v4347_v43, %v3378_v44  ;;  %v3536_v44 = vld [vmem:[#allocation4 + $0xe0] sm:$0xf] }
  0xa8   : > { %v1013_v28 = vmul.f32 %v1012_v16, %v5151_v41  ;;  %v3296_v16 = vld [vmem:[#allocation2] sm:$0xf] }
  0xa9   : > { %v5155_v2 = vsub.f32 %v5121_v0, %v708_v55  ;;  %v5158_v5 = vsub.f32 %v5124_v1, %v708_v55  ;;  %v3320_v0 = vld [vmem:[#allocation2 + $0x30] sm:$0xf]  ;;  %v3333_v1 = vor.u32 %v4335_v63, %v3330_v6  ;;  %999 = vmatpush.bf16.msra.mxu3 %v3381_v50  ;;  %v3305_v63 = vor.u32 %v4330_v61, %v3304_v60  ;;  %v4346_v6 = vld [vmem:[#allocation2 + $0x94] sm:$0xf0]  ;;  %v3538_v50 = vld [vmem:[#allocation4 + $0xe8] sm:$0xf0] }
  0xaa   : > { %v3321_v29 = vor.u32 %v4334_v18, %v3320_v0  ;;  %v5173_v45 = vsub.f32 %v5133_v7, %v1013_v28  ;;  %v5176_v47 = vsub.f32 %v5136_v8, %v1013_v28  ;;  %v3369_v12 = vor.u32 %v4346_v6, %v3368_v62  ;;  %v3360_v0 = vld [vmem:[#allocation2 + $0x80] sm:$0xf]  ;;  %v3544_v28 = vld [vmem:[#allocation4 + $0xf0] sm:$0xf]  ;;  %v4385_v62 = vld [vmem:[#allocation4 + $0xd4] sm:$0xf] }
  0xab   : > { %v714_v14 = vmul.f32 %v5155_v2, %v5155_v2  ;;  %v715_v15 = vmul.f32 %v5158_v5, %v5158_v5  ;;  %983 = vmatpush.bf16.msra.mxu2 %v3333_v1  ;;  %v3297_v18 = vor.u32 %v4328_v17, %v3296_v16  ;;  %v4344_v1 = vld [vmem:[#allocation2 + $0x84] sm:$0xf0] }
  0xac   : > { %956 = vmatpush.bf16.msra.mxu0 %v3321_v29  ;;  %v1016_v8 = vmul.f32 %v5173_v45, %v5173_v45  ;;  %v1017_v53 = vmul.f32 %v5176_v47, %v5176_v47  ;;  %v3361_v21 = vor.u32 %v4344_v1, %v3360_v0  ;;  %v4390_v29 = vld [vmem:[#allocation4 + $0xf4] sm:$0xf0]  ;;  %v4383_v0 = vld [vmem:[#allocation4 + $0xc4] sm:$0xf] }
  0xad   : > { %v718_v23 = vadd.f32 %v715_v15, %v714_v14  ;;  %v3370_v14 = vld [vmem:[#allocation2 + $0x98] sm:$0xf0]  ;;  %v3545_v31 = vor.u32 %v4390_v29, %v3544_v28  ;;  %v4381_v28 = vld [vmem:[#allocation4 + $0xb4] sm:$0xf] }
  0xae   : > { %v700_v27 = vpop.xlane.xlu0 %699  ;;  %v1018_v56 = vadd.f32 %v1017_v53, %v1016_v8  ;;  %v3373_v15 = vor.u32 %v4345_v13, %v3370_v14  ;;  %v4370_v8 = vld [vmem:[#allocation4 + $0x54] sm:$0xf0]  ;;  %v3528_v53 = vld [vmem:[#allocation4 + $0xd0] sm:$0xf]  ;;  %v4384_v13 = vld [vmem:[#allocation4 + $0xc4] sm:$0xf0] }
  0xaf   : > { %v709_v30 = vmul.f32 %v5151_v41, %v700_v27  ;;  %719 = vadd.xlane.f32.xlu1 %v718_v23  ;;  %984 = vmatpush.bf16.msra.mxu2 %v3325_v34  ;;  %v4343_v23 = vld [vmem:[#allocation2 + $0x84] sm:$0xf]  ;;  %v4374_v27 = vld [vmem:[#allocation4 + $0x74] sm:$0xf0]  ;;  %v4389_v34 = vld [vmem:[#allocation4 + $0xf4] sm:$0xf] }
  0xb0   : > { %957 = vmatpush.bf16.msra.mxu0 %v3313_v46  ;;  %1000 = vmatpush.bf16.msra.mxu3 %v3373_v15  ;;  %v3365_v26 = vor.u32 %v4343_v23, %v3362_v24  ;;  %v4388_v46 = vld [vmem:[#allocation4 + $0xe4] sm:$0xf0]  ;;  %v4367_v14 = vld [vmem:[#allocation4 + $0x44] sm:$0xf]  ;;  %v3458_v15 = vld [vmem:[#allocation4 + $0x48] sm:$0xf0] }
  0xb1   : > { %v5167_v39 = vsub.f32 %v5139_v9, %v709_v30  ;;  %v5170_v40 = vsub.f32 %v5142_v10, %v709_v30  ;;  %v3377_v10 = vor.u32 %v4348_v37, %v3376_v36  ;;  %v3481_v30 = vor.u32 %v4374_v27, %v3480_v25  ;;  %v3546_v36 = vld [vmem:[#allocation4 + $0xf8] sm:$0xf0]  ;;  %v3472_v37 = vld [vmem:[#allocation4 + $0x60] sm:$0xf]  ;;  %v4382_v23 = vld [vmem:[#allocation4 + $0xb4] sm:$0xf0] }
  0xb2   : > { %v3549_v42 = vor.u32 %v4389_v34, %v3546_v36  ;;  %v3473_v43 = vor.u32 %v4372_v38, %v3472_v37  ;;  %v3461_v17 = vor.u32 %v4367_v14, %v3458_v15  ;;  %v4365_v24 = vld [vmem:[#allocation4 + $0x34] sm:$0xf]  ;;  %v3450_v25 = vld [vmem:[#allocation4 + $0x38] sm:$0xf0]  ;;  %v4363_v36 = vld [vmem:[#allocation4 + $0x24] sm:$0xf] }
  0xb3   : > { %v716_v48 = vmul.f32 %v5167_v39, %v5167_v39  ;;  %v717_v9 = vmul.f32 %v5170_v40, %v5170_v40  ;;  %971 = vmatpush.bf16.msra.mxu1 %v3377_v10  ;;  %985 = vmatpush.bf16.msra.mxu2 %v3317_v49  ;;  %v3474_v10 = vld [vmem:[#allocation4 + $0x68] sm:$0xf0]  ;;  %v4387_v49 = vld [vmem:[#allocation4 + $0xe4] sm:$0xf]  ;;  %v3453_v27 = vor.u32 %v4365_v24, %v3450_v25  ;;  %v3514_v29 = vld [vmem:[#allocation4 + $0xb8] sm:$0xf0] }
  0xb4   : > { %958 = vmatpush.bf16.msra.mxu0 %v3305_v63  ;;  %1001 = vmatpush.bf16.msra.mxu3 %v3365_v26  ;;  %v3530_v63 = vld [vmem:[#allocation4 + $0xd8] sm:$0xf0]  ;;  %v3442_v37 = vld [vmem:[#allocation4 + $0x28] sm:$0xf0]  ;;  %v4375_v14 = vld [vmem:[#allocation4 + $0x84] sm:$0xf] }
  0xb5   : > { %v721_v51 = vadd.f32 %v717_v9, %v716_v48  ;;  %v4371_v48 = vld [vmem:[#allocation4 + $0x64] sm:$0xf]  ;;  %v3537_v9 = vor.u32 %v4388_v46, %v3536_v44  ;;  %v3533_v6 = vor.u32 %v4385_v62, %v3530_v63  ;;  %v3506_v44 = vld [vmem:[#allocation4 + $0xa8] sm:$0xf0]  ;;  %v3488_v62 = vld [vmem:[#allocation4 + $0x80] sm:$0xf] }
  0xb6   : > { %v1289_v7 = vpop.xlane.xlu0 %1288  ;;  %v3490_v15 = vld [vmem:[#allocation4 + $0x88] sm:$0xf0] }
  0xb7   : > { %722 = vadd.xlane.f32.xlu2 %v721_v51  ;;  %v1290_v52 = vmul.f32 %v1289_v7, %v5151_v41  ;;  %972 = vmatpush.bf16.msra.mxu1 %v3369_v12  ;;  %v3477_v51 = vor.u32 %v4371_v48, %v3474_v10  ;;  %v3541_v7 = vor.u32 %v4387_v49, %v3538_v50  ;;  %v3520_v12 = vld [vmem:[#allocation4 + $0xc0] sm:$0xf]  ;;  %v3432_v48 = vld [vmem:[#allocation4 + $0x10] sm:$0xf]  ;;  %v4378_v50 = vld [vmem:[#allocation4 + $0x94] sm:$0xf0] }
  0xb8   : > { %959 = vmatpush.bf16.msra.mxu0 %v3297_v18  ;;  %1274 = vmatpush.bf16.msrb.mxu3 %v3549_v42  ;;  %v3521_v16 = vor.u32 %v4384_v13, %v3520_v12  ;;  %v3522_v18 = vld [vmem:[#allocation4 + $0xc8] sm:$0xf0]  ;;  %v3445_v42 = vor.u32 %v4363_v36, %v3442_v37  ;;  %v3496_v10 = vld [vmem:[#allocation4 + $0x90] sm:$0xf] }
  0xb9   : > { %v5188_v54 = vsub.f32 %v5128_v3, %v1290_v52  ;;  %v5191_v55 = vsub.f32 %v5130_v4, %v1290_v52  ;;  %v4329_v3 = vld [vmem:[#allocation2 + $0x14] sm:$0xf]  ;;  %v3464_v52 = vld [vmem:[#allocation4 + $0x50] sm:$0xf]  ;;  %v3525_v1 = vor.u32 %v4383_v0, %v3522_v18 }
  0xba   : > { %v3309_v4 = vor.u32 %v4329_v3, %v3306_v11  ;;  %v3456_v3 = vld [vmem:[#allocation4 + $0x40] sm:$0xf]  ;;  %v4368_v11 = vld [vmem:[#allocation4 + $0x44] sm:$0xf0] }
  0xbb   : > { %v1293_v57 = vmul.f32 %v5188_v54, %v5188_v54  ;;  %v1294_v58 = vmul.f32 %v5191_v55, %v5191_v55  ;;  %973 = vmatpush.bf16.msra.mxu1 %v3361_v21  ;;  %v3512_v21 = vld [vmem:[#allocation4 + $0xb0] sm:$0xf] }
  0xbc   : > { %986 = vmatpush.bf16.msra.mxu2 %v3309_v4  ;;  %1235 = vmatpush.bf16.msrb.mxu0 %v3481_v30  ;;  %v3457_v4 = vor.u32 %v4368_v11, %v3456_v3  ;;  %v3513_v26 = vor.u32 %v4382_v23, %v3512_v21  ;;  %v3517_v30 = vor.u32 %v4381_v28, %v3514_v29  ;;  %v4359_v3 = vld [vmem:[#allocation4 + $0x4] sm:$0xf]  ;;  %v3426_v11 = vld [vmem:[#allocation4 + $0x8] sm:$0xf0] }
  0xbd   : > { %v1295_v59 = vadd.f32 %v1294_v58, %v1293_v57  ;;  %v4386_v57 = vld [vmem:[#allocation4 + $0xd4] sm:$0xf0]  ;;  %v4369_v58 = vld [vmem:[#allocation4 + $0x54] sm:$0xf]  ;;  %1275 = vmatpush.bf16.msrb.mxu3 %v3541_v7  ;;  %v3434_v7 = vld [vmem:[#allocation4 + $0x18] sm:$0xf0]  ;;  %v3429_v13 = vor.u32 %v4359_v3, %v3426_v11 }
  0xbe   : > { %v3529_v60 = vor.u32 %v4386_v57, %v3528_v53  ;;  %v4377_v53 = vld [vmem:[#allocation4 + $0x94] sm:$0xf] }
  0xbf   : > { %1019 = vadd.xlane.f32.xlu2 %v1018_v56  ;;  %1296 = vadd.xlane.f32.xlu1 %v1295_v59  ;;  %v3465_v56 = vor.u32 %v4370_v8, %v3464_v52  ;;  %v3466_v59 = vld [vmem:[#allocation4 + $0x58] sm:$0xf0]  ;;  %v3497_v52 = vor.u32 %v4378_v50, %v3496_v10  ;;  %v4405_v10 = vld [vmem:[#allocation6 + $0x74] sm:$0xf] }
  0xc0   : > { %987 = vmatpush.bf16.msra.mxu2 %v3301_v22  ;;  %1248 = vmatpush.bf16.msrb.mxu1 %v3545_v31  ;;  %v3469_v61 = vor.u32 %v4369_v58, %v3466_v59  ;;  %v3449_v22 = vor.u32 %v4366_v20, %v3448_v19  ;;  %v3440_v31 = vld [vmem:[#allocation4 + $0x20] sm:$0xf] }
  0xc1   : > { %1236 = vmatpush.bf16.msrb.mxu0 %v3473_v43  ;;  %1276 = vmatpush.bf16.msrb.mxu3 %v3533_v6  ;;  %v3441_v34 = vor.u32 %v4364_v32, %v3440_v31  ;;  %v4379_v43 = vld [vmem:[#allocation4 + $0xa4] sm:$0xf]  ;;  %v4376_v6 = vld [vmem:[#allocation4 + $0x84] sm:$0xf0] }
  0xc2   : > { %v3509_v46 = vor.u32 %v4379_v43, %v3506_v44  ;;  %v4406_v43 = vld [vmem:[#allocation6 + $0x74] sm:$0xf0] }
  0xc4   : > { %1261 = vmatpush.bf16.msrb.mxu2 %v3485_v35  ;;  %1249 = vmatpush.bf16.msrb.mxu1 %v3537_v9  ;;  %v4380_v35 = vld [vmem:[#allocation4 + $0xa4] sm:$0xf0]  ;;  %v4362_v9 = vld [vmem:[#allocation4 + $0x14] sm:$0xf0] }
  0xc5   : > { %1237 = vmatpush.bf16.msrb.mxu0 %v3465_v56  ;;  %1277 = vmatpush.bf16.msrb.mxu3 %v3525_v1  ;;  %v3505_v38 = vor.u32 %v4380_v35, %v3504_v33  ;;  %v3433_v49 = vor.u32 %v4362_v9, %v3432_v48  ;;  %v3498_v56 = vld [vmem:[#allocation4 + $0x98] sm:$0xf0]  ;;  %v3672_v48 = vld [vmem:[#allocation6 + $0xf0] sm:$0xf]  ;;  %v4422_v9 = vld [vmem:[#allocation6 + $0xf4] sm:$0xf0] }
  0xc6   : > { %v3501_v58 = vor.u32 %v4377_v53, %v3498_v56  ;;  %v3674_v53 = vld [vmem:[#allocation6 + $0xf8] sm:$0xf0] }
  0xc8   : > { %1262 = vmatpush.bf16.msrb.mxu2 %v3477_v51  ;;  %1250 = vmatpush.bf16.msrb.mxu1 %v3529_v60  ;;  %v4361_v51 = vld [vmem:[#allocation4 + $0x14] sm:$0xf]  ;;  %v3424_v60 = vld [vmem:[#allocation4] sm:$0xf] }
  0xc9   : > { %1238 = vmatpush.bf16.msrb.mxu0 %v3457_v4  ;;  %1278 = vmatpush.bf16.msrb.mxu3 %v3517_v30  ;;  %v3437_v8 = vor.u32 %v4361_v51, %v3434_v7  ;;  %v3489_v4 = vor.u32 %v4376_v6, %v3488_v62  ;;  %v4404_v62 = vld [vmem:[#allocation6 + $0x64] sm:$0xf0] }
  0xca   : > { %v4420_v6 = vld [vmem:[#allocation6 + $0xe4] sm:$0xf0] }
  0xcc   : > { %1263 = vmatpush.bf16.msrb.mxu2 %v3469_v61  ;;  %1251 = vmatpush.bf16.msrb.mxu1 %v3521_v16  ;;  %v4360_v61 = vld [vmem:[#allocation4 + $0x4] sm:$0xf0]  ;;  %v3493_v16 = vor.u32 %v4375_v14, %v3490_v15 }
  0xcd   : > { %1239 = vmatpush.bf16.msrb.mxu0 %v3449_v22  ;;  %1279 = vmatpush.bf16.msrb.mxu3 %v3509_v46  ;;  %v3425_v63 = vor.u32 %v4360_v61, %v3424_v60  ;;  %v3673_v61 = vor.u32 %v4422_v9, %v3672_v48 }
  0xd0   : > { %1264 = vmatpush.bf16.msrb.mxu2 %v3461_v17  ;;  %1252 = vmatpush.bf16.msrb.mxu1 %v3513_v26 }
  0xd1   : > { %1240 = vmatpush.bf16.msrb.mxu0 %v3441_v34  ;;  %1280 = vmatpush.bf16.msrb.mxu3 %v3501_v58 }
  0xd4   : > { %1265 = vmatpush.bf16.msrb.mxu2 %v3453_v27  ;;  %1253 = vmatpush.bf16.msrb.mxu1 %v3505_v38 }
  0xd5   : > { %1241 = vmatpush.bf16.msrb.mxu0 %v3433_v49  ;;  %1281 = vmatpush.bf16.msrb.mxu3 %v3493_v16  ;;  %v3592_v16 = vld [vmem:[#allocation6 + $0x50] sm:$0xf] }
  0xd8   : > { %1266 = vmatpush.bf16.msrb.mxu2 %v3445_v42  ;;  %1254 = vmatpush.bf16.msrb.mxu1 %v3497_v52  ;;  %v3608_v42 = vld [vmem:[#allocation6 + $0x70] sm:$0xf]  ;;  %v3610_v52 = vld [vmem:[#allocation6 + $0x78] sm:$0xf0] }
  0xd9   : > { %1242 = vmatpush.bf16.msrb.mxu0 %v3425_v63  ;;  %v3609_v60 = vor.u32 %v4406_v43, %v3608_v42  ;;  %v3664_v63 = vld [vmem:[#allocation6 + $0xe0] sm:$0xf]  ;;  %v4415_v42 = vld [vmem:[#allocation6 + $0xc4] sm:$0xf]  ;;  %v3650_v43 = vld [vmem:[#allocation6 + $0xc8] sm:$0xf0] }
  0xda   : > { %v3665_v14 = vor.u32 %v4420_v6, %v3664_v63 }
  0xdc   : > { %1267 = vmatpush.bf16.msrb.mxu2 %v3437_v8  ;;  %1255 = vmatpush.bf16.msrb.mxu1 %v3489_v4  ;;  %v4421_v8 = vld [vmem:[#allocation6 + $0xf4] sm:$0xf] }
  0xdd   : > { %v3677_v11 = vor.u32 %v4421_v8, %v3674_v53  ;;  %v3578_v8 = vld [vmem:[#allocation6 + $0x38] sm:$0xf0] }
  0xe0   : > { %1268 = vmatpush.bf16.msrb.mxu2 %v3429_v13 }
 0x122   : > { %v720_v57 = vpop.xlane.xlu1 %719 }
 0x123   : > { %v724_v59 = vmul.f32 %v720_v57, %v5151_v41  ;;  %v3600_v57 = vld [vmem:[#allocation6 + $0x60] sm:$0xf] }
 0x124   : > { %v3601_v13 = vor.u32 %v4404_v62, %v3600_v57  ;;  %v3642_v57 = vld [vmem:[#allocation6 + $0xb8] sm:$0xf0]  ;;  %v3632_v62 = vld [vmem:[#allocation6 + $0xa0] sm:$0xf] }
 0x125   : > { %v726_v12 = vadd.f32 1e-05, %v724_v59 }
 0x127   : > { %4662 = vrsqrt.f32 %v726_v12  ;;  %vm734_vm2 = vweird.f32 %v726_v12 }
 0x12a   : > { %v723_v17 = vpop.xlane.xlu2 %722 }
 0x12b   : > { %v725_v0 = vmul.f32 %v723_v17, %v5151_v41  ;;  %v4402_v17 = vld [vmem:[#allocation6 + $0x54] sm:$0xf0] }
 0x12d   : > { %v4663_v18 = vpop.eup %4662  ;;  %v727_v1 = vadd.f32 1e-05, %v725_v0 }
 0x12e   : > { %v729_v19 = vmul.f32 %v4663_v18, %v726_v12  ;;  %vm735_vm1 = vweird.f32 %v4663_v18  ;;  %v3602_v12 = vld [vmem:[#allocation6 + $0x68] sm:$0xf0] }
 0x12f   : > { %4664 = vrsqrt.f32 %v727_v1  ;;  %vm736_vm4 = vmor %vm734_vm2, %vm735_vm1  ;;  %vm744_vm5 = vweird.f32 %v727_v1  ;;  %vm1626_vm1 = vcmask 64512  }
 0x130   : > { %v730_v20 = vmul.f32 %v4663_v18, %v729_v19  ;;  %v4401_v19 = vld [vmem:[#allocation6 + $0x54] sm:$0xf] }
 0x132   : > { %v731_v21 = vmul.f32 0.5, %v730_v20  ;;  %v1020_v22 = vpop.xlane.xlu2 %1019  ;;  %v1297_v26 = vpop.xlane.xlu1 %1296 }
 0x133   : > { %v1021_v23 = vmul.f32 %v1020_v22, %v5151_v41  ;;  %v1298_v30 = vmul.f32 %v1297_v26, %v5151_v41  ;;  %v3594_v22 = vld [vmem:[#allocation6 + $0x58] sm:$0xf0] }
 0x134   : > { %v732_v27 = vsub.f32 1.5, %v731_v21 }
 0x135   : > { %v4665_v24 = vpop.eup %4664  ;;  %v5200_v25 = vadd.f32 1e-05, %v1021_v23  ;;  %v5204_v34 = vadd.f32 1e-05, %v1298_v30  ;;  %v4417_v23 = vld [vmem:[#allocation6 + $0xd4] sm:$0xf] }
 0x136   : > { %v739_v28 = vmul.f32 %v4665_v24, %v727_v1  ;;  %v733_v32 = vmul.f32 %v4663_v18, %v732_v27  ;;  %vm745_vm3 = vweird.f32 %v4665_v24  ;;  %v4418_v1 = vld [vmem:[#allocation6 + $0xd4] sm:$0xf0]  ;;  %v3584_v27 = vld [vmem:[#allocation6 + $0x40] sm:$0xf] }
 0x137   : > { %4666 = vrsqrt.f32 %v5200_v25  ;;  %vm746_vm6 = vmor %vm744_vm5, %vm745_vm3  ;;  %vm1029_vm7 = vweird.f32 %v5200_v25  ;;  %vm1306_vm10 = vweird.f32 %v5204_v34 }
 0x138   : > { %v740_v29 = vmul.f32 %v4665_v24, %v739_v28  ;;  %v737_v37 = vsel %vm736_vm4, %v4663_v18, %v733_v32  ;;  %4668 = vrsqrt.f32 %v5204_v34  ;;  %v3656_v18 = vld [vmem:[#allocation6 + $0xd0] sm:$0xf]  ;;  %v4400_v28 = vld [vmem:[#allocation6 + $0x44] sm:$0xf0] }
 0x139   : > { %v748_v49 = vmul.f32 %v737_v37, %v5155_v2  ;;  %v749_v51 = vmul.f32 %v737_v37, %v5158_v5  ;;  %v3613_v2 = vor.u32 %v4405_v10, %v3610_v52  ;;  %v4419_v5 = vld [vmem:[#allocation6 + $0xe4] sm:$0xf]  ;;  %v3657_v26 = vor.u32 %v4418_v1, %v3656_v18  ;;  %v4416_v32 = vld [vmem:[#allocation6 + $0xc4] sm:$0xf0]  ;;  %v3576_v10 = vld [vmem:[#allocation6 + $0x30] sm:$0xf] }
 0x13a   : > { %v741_v31 = vmul.f32 0.5, %v740_v29  ;;  %v3597_v29 = vor.u32 %v4401_v19, %v3594_v22  ;;  %v4397_v52 = vld [vmem:[#allocation6 + $0x34] sm:$0xf]  ;;  %v4410_v18 = vld [vmem:[#allocation6 + $0x94] sm:$0xf0] }
 0x13b   : > { %v3581_v63 = vor.u32 %v4397_v52, %v3578_v8  ;;  %v4393_v1 = vld [vmem:[#allocation6 + $0x14] sm:$0xf]  ;;  %v3626_v22 = vld [vmem:[#allocation6 + $0x98] sm:$0xf0] }
 0x13c   : > { %v742_v33 = vsub.f32 1.5, %v741_v31  ;;  %v3648_v31 = vld [vmem:[#allocation6 + $0xc0] sm:$0xf] }
 0x13d   : > { %v5206_v35 = vpop.eup %4666 }
 0x13e   : > { %v1024_v36 = vmul.f32 %v5206_v35, %v5200_v25  ;;  %v743_v38 = vmul.f32 %v4665_v24, %v742_v33  ;;  %v5216_v4 = vpop.eup %4668  ;;  %vm1030_vm8 = vweird.f32 %v5206_v35  ;;  %v3593_v25 = vor.u32 %v4402_v17, %v3592_v16  ;;  %v4399_v33 = vld [vmem:[#allocation6 + $0x44] sm:$0xf] }
 0x13f   : > { %v1301_v21 = vmul.f32 %v5216_v4, %v5204_v34  ;;  %vm1031_vm9 = vmor %vm1029_vm7, %vm1030_vm8  ;;  %vm1307_vm11 = vweird.f32 %v5216_v4 }
 0x140   : > { %v1025_v44 = vmul.f32 %v5206_v35, %v1024_v36  ;;  %v747_v46 = vsel %vm746_vm6, %v4665_v24, %v743_v38  ;;  %v3658_v24 = vld [vmem:[#allocation6 + $0xd8] sm:$0xf0]  ;;  %v3586_v38 = vld [vmem:[#allocation6 + $0x48] sm:$0xf0]  ;;  %vm1308_vm12 = vmor %vm1306_vm10, %vm1307_vm11 }
 0x141   : > { %v750_v50 = vmul.f32 %v747_v46, %v5167_v39  ;;  %v751_v7 = vmul.f32 %v747_v46, %v5170_v40  ;;  %v4403_v39 = vld [vmem:[#allocation6 + $0x64] sm:$0xf]  ;;  %v3666_v40 = vld [vmem:[#allocation6 + $0xe8] sm:$0xf0]  ;;  %v3661_v30 = vor.u32 %v4417_v23, %v3658_v24  ;;  %v1302_v37 = vmul.f32 %v5216_v4, %v1301_v21  ;;  %v4409_v21 = vld [vmem:[#allocation6 + $0x94] sm:$0xf] }
 0x142   : > { %v1026_v56 = vmul.f32 0.5, %v1025_v44  ;;  %v3605_v15 = vor.u32 %v4403_v39, %v3602_v12  ;;  %v3669_v0 = vor.u32 %v4419_v5, %v3666_v40  ;;  %v3585_v44 = vor.u32 %v4400_v28, %v3584_v27  ;;  %v4411_v12 = vld [vmem:[#allocation6 + $0xa4] sm:$0xf]  ;;  %v3634_v5 = vld [vmem:[#allocation6 + $0xa8] sm:$0xf0] }
 0x143   : > { %v752_v58 = vpack.c.bf16 %v750_v50, %v748_v49  ;;  %v753_v59 = vpack.c.bf16 %v751_v7, %v749_v51  ;;  %v3649_v46 = vor.u32 %v4416_v32, %v3648_v31  ;;  %v4398_v49 = vld [vmem:[#allocation6 + $0x34] sm:$0xf0]  ;;  %v3640_v50 = vld [vmem:[#allocation6 + $0xb0] sm:$0xf]  ;;  %v3589_v51 = vor.u32 %v4399_v33, %v3586_v38  ;;  %v3616_v27 = vld [vmem:[#allocation6 + $0x80] sm:$0xf] }
 0x144   : > { %v1027_v3 = vsub.f32 1.5, %v1026_v56  ;;  %v4414_v7 = vld [vmem:[#allocation6 + $0xb4] sm:$0xf0]  ;;  %v1303_v53 = vmul.f32 0.5, %v1302_v37  ;;  %v4413_v56 = vld [vmem:[#allocation6 + $0xb4] sm:$0xf]  ;;  %v3637_v17 = vor.u32 %v4411_v12, %v3634_v5 }
 0x145   : > { %960 = vmatmul.bf16.vlgmr.msra.gmra.mxu0 %v752_v58  ;;  %974 = vmatmul.bf16.vlgmr.msra.gmra.mxu1 %v753_v59  ;;  %v3645_v6 = vor.u32 %v4413_v56, %v3642_v57  ;;  %v4391_v31 = vld [vmem:[#allocation6 + $0x4] sm:$0xf]  ;;  %v3554_v32 = vld [vmem:[#allocation6 + $0x8] sm:$0xf0] }
 0x146   : > { %988 = vmatmul.bf16.vlgmr.msra.gmra.mxu2 %v752_v58  ;;  %1002 = vmatmul.bf16.vlgmr.msra.gmra.mxu3 %v753_v59  ;;  %v1028_v20 = vmul.f32 %v5206_v35, %v1027_v3  ;;  %v3577_v58 = vor.u32 %v4398_v49, %v3576_v10  ;;  %v4412_v3 = vld [vmem:[#allocation6 + $0xa4] sm:$0xf0]  ;;  %v1304_v39 = vsub.f32 1.5, %v1303_v53  ;;  %v3618_v37 = vld [vmem:[#allocation6 + $0x88] sm:$0xf0] }
 0x147   : > { %1512 = vmatpush.bf16.msra.mxu0 %v3609_v60  ;;  %1525 = vmatpush.bf16.msra.mxu1 %v3673_v61  ;;  %v3641_v60 = vor.u32 %v4414_v7, %v3640_v50  ;;  %v4396_v61 = vld [vmem:[#allocation6 + $0x24] sm:$0xf0]  ;;  %v786_v7 = vld [vmem:[%s5444_s5] sm:$0x3] }
 0x148   : > { %1538 = vmatpush.bf16.msra.mxu2 %v3613_v2  ;;  %1551 = vmatpush.bf16.msra.mxu3 %v3677_v11  ;;  %v1032_v36 = vsel %vm1031_vm9, %v5206_v35, %v1028_v20  ;;  %v3653_v35 = vor.u32 %v4415_v42, %v3650_v43  ;;  %v4395_v2 = vld [vmem:[#allocation6 + $0x24] sm:$0xf]  ;;  %v3570_v11 = vld [vmem:[#allocation6 + $0x28] sm:$0xf0]  ;;  %v1305_v19 = vmul.f32 %v5216_v4, %v1304_v39  ;;  %v3562_v20 = vld [vmem:[#allocation6 + $0x18] sm:$0xf0] }
 0x149   : > { %v1033_v48 = vmul.f32 %v1032_v36, %v5173_v45  ;;  %v1034_v9 = vmul.f32 %v1032_v36, %v5176_v47  ;;  %v3568_v47 = vld [vmem:[#allocation6 + $0x20] sm:$0xf]  ;;  %v3573_v16 = vor.u32 %v4395_v2, %v3570_v11  ;;  %v3565_v28 = vor.u32 %v4393_v1, %v3562_v20  ;;  %v4407_v36 = vld [vmem:[#allocation6 + $0x84] sm:$0xf]  ;;  %v692_v57 = vld [vmem:[%s676_s26 + $0x8] sm:$0xff] }
 0x14a   : > { %v3569_v40 = vor.u32 %v4396_v61, %v3568_v47  ;;  %v1309_v33 = vsel %vm1308_vm12, %v5216_v4, %v1305_v19  ;;  %v3557_v42 = vor.u32 %v4391_v31, %v3554_v32  ;;  %v3621_v43 = vor.u32 %v4407_v36, %v3618_v37 }
 0x14b   : > { %1513 = vmatpush.bf16.msra.mxu0 %v3601_v13  ;;  %1526 = vmatpush.bf16.msra.mxu1 %v3665_v14  ;;  %v1035_v59 = vpack.c.bf16 %v1033_v48, %v1033_v48  ;;  %v1036_v45 = vpack.c.bf16 %v1034_v9, %v1034_v9  ;;  %v3633_v13 = vor.u32 %v4412_v3, %v3632_v62  ;;  %v3560_v14 = vld [vmem:[#allocation6 + $0x10] sm:$0xf]  ;;  %vm694_vm13 = vcmp.gt.f32.partialorder %v692_v57, 0.5 }
 0x14c   : > { %1539 = vmatpush.bf16.msra.mxu2 %v3605_v15  ;;  %1552 = vmatpush.bf16.msra.mxu3 %v3669_v0  ;;  %v4394_v15 = vld [vmem:[#allocation6 + $0x14] sm:$0xf0]  ;;  %v3624_v0 = vld [vmem:[#allocation6 + $0x90] sm:$0xf] }
 0x14d   : > { %v3561_v23 = vor.u32 %v4394_v15, %v3560_v14  ;;  %v3625_v24 = vor.u32 %v4410_v18, %v3624_v0  ;;  %v789_v14 = vperm.slane %v786_v7, 1  ;;  %v1346_v0 = vld [vmem:[%s5448_s9] sm:$0x3] }
 0x14e   : > { %v1348_v20 = vperm.slane %v1346_v0, 0 }
 0x14f   : > { %1514 = vmatpush.bf16.msra.mxu0 %v3593_v25  ;;  %1527 = vmatpush.bf16.msra.mxu1 %v3657_v26  ;;  %v3552_v25 = vld [vmem:[#allocation6] sm:$0xf]  ;;  %v4392_v26 = vld [vmem:[#allocation6 + $0x4] sm:$0xf0] }
 0x150   : > { %1540 = vmatpush.bf16.msra.mxu2 %v3597_v29  ;;  %1553 = vmatpush.bf16.msra.mxu3 %v3661_v30  ;;  %v3629_v29 = vor.u32 %v4409_v21, %v3626_v22  ;;  %v4408_v30 = vld [vmem:[#allocation6 + $0x84] sm:$0xf0]  ;;  %v3553_v34 = vor.u32 %v4392_v26, %v3552_v25 }
 0x151   : > { %v3617_v38 = vor.u32 %v4408_v30, %v3616_v27  ;;  %v1349_v30 = vperm.slane %v1346_v0, 1 }
 0x153   : > { %1515 = vmatpush.bf16.msra.mxu0 %v3585_v44  ;;  %1528 = vmatpush.bf16.msra.mxu1 %v3649_v46  ;;  %v1310_v44 = vmul.f32 %v1309_v33, %v5188_v54  ;;  %v1311_v46 = vmul.f32 %v1309_v33, %v5191_v55  ;;  %v1069_v54 = vld [vmem:[%s5446_s7] sm:$0x3] }
 0x154   : > { %1541 = vmatpush.bf16.msra.mxu2 %v3589_v51  ;;  %1554 = vmatpush.bf16.msra.mxu3 %v3653_v35  ;;  %v1071_v55 = vperm.slane %v1069_v54, 0 }
 0x155   : > { %1243 = vmatmul.bf16.vlgmr.msrb.gmra.mxu0 %v1035_v59  ;;  %1256 = vmatmul.bf16.vlgmr.msrb.gmra.mxu1 %v1036_v45  ;;  %v1312_v4 = vpack.c.bf16 %v1310_v44, %v1310_v44  ;;  %v1313_v48 = vpack.c.bf16 %v1311_v46, %v1311_v46 }
 0x156   : > { %1269 = vmatmul.bf16.vlgmr.msrb.gmra.mxu2 %v1035_v59  ;;  %1282 = vmatmul.bf16.vlgmr.msrb.gmra.mxu3 %v1036_v45  ;;  %v4925_v45 = vmov 0  }
 0x157   : > { %1516 = vmatpush.bf16.msra.mxu0 %v3577_v58  ;;  %1529 = vmatpush.bf16.msra.mxu1 %v3641_v60  ;;  %v691_v58 = vld [vmem:[%s676_s26] sm:$0xff]  ;;  %v788_v60 = vperm.slane %v786_v7, 0  ;;  %v1615_v47 = vsel %vm694_vm13, 1, %v4925_v45 }
 0x158   : > { %1542 = vmatpush.bf16.msra.mxu2 %v3581_v63  ;;  %1555 = vmatpush.bf16.msra.mxu3 %v3645_v6  ;;  %vm693_vm14 = vcmp.gt.f32.partialorder %v691_v58, 0.5  ;;  %v1072_v6 = vperm.slane %v1069_v54, 1 }
 0x159   : > { %4659 = vset.pattern.permute.xlu0 %v4925_v45  ;;  %4658 = vset.pattern.permute.xlu2 %v4925_v45  ;;  %v1614_v61 = vsel %vm693_vm14, 1, %v4925_v45 }
 0x15a   : > { %1620 = vperm.xlu0 %4659, %v1615_v47   ;;  %1617 = vperm.xlu2 %4658, %v1614_v61  }
 0x15b   : > { %1517 = vmatpush.bf16.msra.mxu0 %v3569_v40  ;;  %1530 = vmatpush.bf16.msra.mxu1 %v3633_v13 }
 0x15c   : > { %1543 = vmatpush.bf16.msra.mxu2 %v3573_v16  ;;  %1556 = vmatpush.bf16.msra.mxu3 %v3637_v17 }
 0x15f   : > { %1518 = vmatpush.bf16.msra.mxu0 %v3561_v23  ;;  %1531 = vmatpush.bf16.msra.mxu1 %v3625_v24 }
 0x160   : > { %1544 = vmatpush.bf16.msra.mxu2 %v3565_v28  ;;  %1557 = vmatpush.bf16.msra.mxu3 %v3629_v29 }
 0x163   : > { %1519 = vmatpush.bf16.msra.mxu0 %v3553_v34  ;;  %1532 = vmatpush.bf16.msra.mxu1 %v3617_v38 }
 0x164   : > { %1545 = vmatpush.bf16.msra.mxu2 %v3557_v42  ;;  %1558 = vmatpush.bf16.msra.mxu3 %v3621_v43 }
 0x166   : > { %1520 = vmatmul.bf16.vlgmr.msra.gmra.mxu0 %v1312_v4  ;;  %1533 = vmatmul.bf16.vlgmr.msra.gmra.mxu1 %v1313_v48 }
 0x167   : > { %1546 = vmatmul.bf16.vlgmr.msra.gmra.mxu2 %v1312_v4  ;;  %1559 = vmatmul.bf16.vlgmr.msra.gmra.mxu3 %v1313_v48 }
 0x1b4   : > { %v5250_v48 = vpop.permute.xlu2 %1617 }
 0x1b5   : > { %vm1622_vm0 = vcmp.eq.s32.totalorder %v5250_v48, 1 }
 0x1c2   : > { %v961_v9 = vpop.f32.mrf.mxu0  ;;  %v975_v10 = vpop.f32.mrf.mxu1 }
 0x1c3   : > { %v962_v2 = vadd.f32 %v961_v9, %v788_v60 }
 0x1c5   : > { %v976_v15 = vadd.f32 %v975_v10, %v962_v2 }
 0x1c9   : > { %v989_v49 = vpop.f32.mrf.mxu2  ;;  %v1003_v50 = vpop.f32.mrf.mxu3 }
 0x1ca   : > { %v963_v51 = vpop.f32.mrf.mxu0  ;;  %v977_v35 = vpop.f32.mrf.mxu1  ;;  %v990_v19 = vadd.f32 %v989_v49, %v789_v14 }
 0x1cb   : > { %v964_v63 = vadd.f32 %v963_v51, %v788_v60 }
 0x1cc   : > { %v1004_v24 = vadd.f32 %v1003_v50, %v990_v19  ;;  %v5256_v51 = vpop.permute.xlu0 %1620  ;;  %v3802_v19 = vld [vmem:[#allocation7 + $0x70] sm:$0xf] }
 0x1cd   : > { %v978_v12 = vadd.f32 %v977_v35, %v964_v63  ;;  %vm1623_vm2 = vcmp.eq.s32.totalorder %v5256_v51, 1  ;;  %v4425_v51 = vld [vmem:[#allocation7 + $0x14] sm:$0xf] }
 0x1cf   : > { %v1596_v18 = vpack.c.bf16 %v978_v12, %v976_v15 }
 0x1d1   : > { %v991_v52 = vpop.f32.mrf.mxu2  ;;  %v1005_v8 = vpop.f32.mrf.mxu3 }
 0x1d2   : > { %v1244_v53 = vpop.f32.mrf.mxu0  ;;  %v1257_v56 = vpop.f32.mrf.mxu1  ;;  %v992_v17 = vadd.f32 %v991_v52, %v789_v14 }
 0x1d3   : > { %v1245_v59 = vadd.f32 %v1244_v53, %v1071_v55 }
 0x1d4   : > { %v1006_v21 = vadd.f32 %v1005_v8, %v992_v17 }
 0x1d5   : > { %v1258_v62 = vadd.f32 %v1257_v56, %v1245_v59 }
 0x1d6   : > { %v1675_v28 = vpack.c.bf16 %v1006_v21, %v1004_v24  ;;  %v4437_v21 = vld [vmem:[#allocation7 + $0x74] sm:$0xf]  ;;  %v3794_v24 = vld [vmem:[#allocation7 + $0x60] sm:$0xf] }
 0x1d7   : > { %v1597_v3 = vpack.c.bf16 %v1258_v62, %v1258_v62 }
 0x1d9   : > { %v1270_v11 = vpop.f32.mrf.mxu2  ;;  %v1283_v39 = vpop.f32.mrf.mxu3  ;;  %1605 = vmatpush.bf16.xpose.msrb.mxu0 %v1597_v3 }
 0x1da   : > { %v1271_v5 = vadd.f32 %v1270_v11, %v1072_v6  ;;  %v1246_v40 = vpop.f32.mrf.mxu0  ;;  %v1259_v13 = vpop.f32.mrf.mxu1 }
 0x1dc   : > { %v1284_v16 = vadd.f32 %v1283_v39, %v1271_v5 }
 0x1de   : > { %v1676_v1 = vpack.c.bf16 %v1284_v16, %v1284_v16 }
 0x1e0   : > { %1684 = vmatpush.bf16.xpose.msrb.mxu2 %v1676_v1  ;;  %1606 = vmatmul.bf16.vlgmr.msrb.gmra.mxu0 %v1596_v18 }
 0x1e1   : > { %v1272_v22 = vpop.f32.mrf.mxu2  ;;  %v1285_v23 = vpop.f32.mrf.mxu3 }
 0x1e2   : > { %v3804_v23 = vld [vmem:[#allocation7 + $0x78] sm:$0xf0] }
 0x1e3   : > { %v1521_v25 = vpop.f32.mrf.mxu0  ;;  %v1534_v26 = vpop.f32.mrf.mxu1 }
 0x1e4   : > { %v1522_v27 = vadd.f32 %v1521_v25, %v1348_v20  ;;  %v4438_v20 = vld [vmem:[#allocation7 + $0x74] sm:$0xf0]  ;;  %v4436_v25 = vld [vmem:[#allocation7 + $0x64] sm:$0xf0] }
 0x1e5   : > { %v3803_v22 = vor.u32 %v4438_v20, %v3802_v19  ;;  %v4452_v19 = vld [vmem:[#allocation7 + $0xe4] sm:$0xf0] }
 0x1e6   : > { %v1535_v29 = vadd.f32 %v1534_v26, %v1522_v27  ;;  %v3807_v26 = vor.u32 %v4437_v21, %v3804_v23  ;;  %v4435_v27 = vld [vmem:[#allocation7 + $0x64] sm:$0xf]  ;;  %v4426_v23 = vld [vmem:[#allocation7 + $0x14] sm:$0xf0] }
 0x1e7   : > { %1685 = vmatmul.bf16.vlgmr.msrb.gmra.mxu2 %v1675_v28  ;;  %v3796_v28 = vld [vmem:[#allocation7 + $0x68] sm:$0xf0]  ;;  %v4451_v21 = vld [vmem:[#allocation7 + $0xe4] sm:$0xf] }
 0x1e8   : > { %v1652_v31 = vpack.c.bf16 %v1535_v29, %v1535_v29  ;;  %1930 = vmatpush.bf16.msra.mxu2 %v3803_v22  ;;  %v3795_v29 = vor.u32 %v4436_v25, %v3794_v24  ;;  %v3754_v22 = vld [vmem:[#allocation7 + $0x10] sm:$0xf]  ;;  %v3756_v24 = vld [vmem:[#allocation7 + $0x18] sm:$0xf0] }
 0x1e9   : > { %v3755_v25 = vor.u32 %v4426_v23, %v3754_v22 }
 0x1ea   : > { %v1658_v32 = vsel %vm1656_vm15, %v1652_v31, 0  ;;  %v1547_v33 = vpop.f32.mrf.mxu2  ;;  %v1560_v36 = vpop.f32.mrf.mxu3  ;;  %v3786_v31 = vld [vmem:[#allocation7 + $0x50] sm:$0xf] }
 0x1eb   : > { %v1548_v37 = vadd.f32 %v1547_v33, %v1349_v30  ;;  %v1523_v34 = vpop.f32.mrf.mxu0  ;;  %v1536_v38 = vpop.f32.mrf.mxu1  ;;  %1667 = vmatpush.bf16.msrb.mxu1 %v1658_v32  ;;  %v3799_v30 = vor.u32 %v4435_v27, %v3796_v28  ;;  %v4434_v32 = vld [vmem:[#allocation7 + $0x54] sm:$0xf0]  ;;  %v4433_v33 = vld [vmem:[#allocation7 + $0x54] sm:$0xf]  ;;  %v3722_v27 = vld [vmem:[#allocation7 + $0xd0] sm:$0xf] }
 0x1ec   : > { %v3738_v34 = vld [vmem:[#allocation7 + $0xf0] sm:$0xf]  ;;  %1931 = vmatpush.bf16.msra.mxu2 %v3795_v29  ;;  %v3787_v38 = vor.u32 %v4434_v32, %v3786_v31  ;;  %v4450_v28 = vld [vmem:[#allocation7 + $0xd4] sm:$0xf0]  ;;  %v4449_v29 = vld [vmem:[#allocation7 + $0xd4] sm:$0xf] }
 0x1ed   : > { %v1561_v42 = vadd.f32 %v1560_v36, %v1548_v37  ;;  %v3788_v36 = vld [vmem:[#allocation7 + $0x58] sm:$0xf0] }
 0x1ee   : > { %v3724_v31 = vld [vmem:[#allocation7 + $0xd8] sm:$0xf0] }
 0x1ef   : > { %v1720_v43 = vpack.c.bf16 %v1561_v42, %v1561_v42  ;;  %v4454_v42 = vld [vmem:[#allocation7 + $0xf4] sm:$0xf0]  ;;  %v3727_v32 = vor.u32 %v4449_v29, %v3724_v31 }
 0x1f0   : > { %1932 = vmatpush.bf16.msra.mxu2 %v3787_v38  ;;  %v3748_v38 = vld [vmem:[#allocation7 + $0x8] sm:$0xf0] }
 0x1f1   : > { %v1725_v44 = vsel %vm1656_vm15, %v1720_v43, 0  ;;  %v4453_v43 = vld [vmem:[#allocation7 + $0xf4] sm:$0xf] }
 0x1f2   : > { %v1549_v46 = vpop.f32.mrf.mxu2  ;;  %v1562_v4 = vpop.f32.mrf.mxu3  ;;  %1734 = vmatpush.bf16.msrb.mxu3 %v1725_v44  ;;  %v3740_v44 = vld [vmem:[#allocation7 + $0xf8] sm:$0xf0] }
 0x1f3   : > { %v3791_v46 = vor.u32 %v4433_v33, %v3788_v36  ;;  %v3778_v4 = vld [vmem:[#allocation7 + $0x40] sm:$0xf]  ;;  %v4424_v36 = vld [vmem:[#allocation7 + $0x4] sm:$0xf0] }
 0x1f4   : > { %v3746_v33 = vld [vmem:[#allocation7] sm:$0xf] }
 0x1f6   : > { %1944 = vmatpush.bf16.msra.mxu3 %v3807_v26  ;;  %v3759_v26 = vor.u32 %v4425_v51, %v3756_v24  ;;  %v4707_v51 = vld [vmem:[%s5110_s28 + $0x8] sm:$0xff] }
 0x1fa   : > { %1945 = vmatpush.bf16.msra.mxu3 %v3799_v30  ;;  %v3723_v30 = vor.u32 %v4450_v28, %v3722_v27 }
 0x1fe   : > { %1946 = vmatpush.bf16.msra.mxu3 %v3791_v46  ;;  %v4447_v46 = vld [vmem:[#allocation7 + $0xc4] sm:$0xf] }
 0x25d   : > { %v1607_v9 = vpop.f32.mrf.mxu0 }
 0x25e   : > { %v1612_v10 = vmul.f32 0.088388346, %v1607_v9  ;;  %v4432_v9 = vld [vmem:[#allocation7 + $0x44] sm:$0xf0] }
 0x260   : > { %v1624_v49 = vsel %vm1622_vm0, -1e+30, %v1612_v10  ;;  %v3739_v10 = vor.u32 %v4454_v42, %v3738_v34  ;;  %v3747_v34 = vor.u32 %v4424_v36, %v3746_v33  ;;  %v4708_v36 = vld [vmem:[%s5110_s28 + $0x10] sm:$0xff] }
 0x261   : > { %v1627_v50 = vsel %vm1626_vm1, %v1624_v49, -inf }
 0x262   : > { %1628 = vmax.xlane.f32.xlu1 %v1627_v50  ;;  %1822 = vmatpush.bf16.msra.mxu0 %v3739_v10 }
 0x265   : > { %v1609_v35 = vpop.f32.mrf.mxu0 }
 0x266   : > { %v1613_v54 = vmul.f32 0.088388346, %v1609_v35  ;;  %v4431_v35 = vld [vmem:[#allocation7 + $0x44] sm:$0xf] }
 0x268   : > { %v1625_v55 = vsel %vm1623_vm2, -1e+30, %v1613_v54  ;;  %v3780_v54 = vld [vmem:[#allocation7 + $0x48] sm:$0xf0] }
 0x269   : > { %v1630_v7 = vsel %vm1626_vm1, %v1625_v55, -inf }
 0x26a   : > { %v1686_v52 = vpop.f32.mrf.mxu2  ;;  %1631 = vmax.xlane.f32.xlu1 %v1630_v7 }
 0x26b   : > { %v1691_v8 = vmul.f32 0.088388346, %v1686_v52  ;;  %v3783_v52 = vor.u32 %v4431_v35, %v3780_v54  ;;  %v4445_v35 = vld [vmem:[#allocation7 + $0xb4] sm:$0xf] }
 0x26d   : > { %v1693_v53 = vsel %vm1622_vm0, -1e+30, %v1691_v8  ;;  %v3770_v8 = vld [vmem:[#allocation7 + $0x30] sm:$0xf]  ;;  %1947 = vmatpush.bf16.msra.mxu3 %v3783_v52  ;;  %v3698_v52 = vld [vmem:[#allocation7 + $0xa0] sm:$0xf] }
 0x26e   : > { %v1695_v56 = vsel %vm1626_vm1, %v1693_v53, -inf }
 0x272   : > { %v1688_v57 = vpop.f32.mrf.mxu2  ;;  %1696 = vmax.xlane.f32.xlu1 %v1695_v56 }
 0x273   : > { %v1692_v58 = vmul.f32 0.088388346, %v1688_v57  ;;  %v4429_v57 = vld [vmem:[#allocation7 + $0x34] sm:$0xf] }
 0x275   : > { %v1694_v59 = vsel %vm1623_vm2, -1e+30, %v1692_v58  ;;  %v3772_v58 = vld [vmem:[#allocation7 + $0x38] sm:$0xf0] }
 0x276   : > { %v1698_v45 = vsel %vm1626_vm1, %v1694_v59, -inf }
 0x277   : > { %1699 = vmax.xlane.f32.xlu2 %v1698_v45 }
 0x2d5   : > { %v1629_v60 = vpop.xlane.xlu1 %1628 }
 0x2d6   : > { %v1633_v47 = vsub.f32 %v1624_v49, %v1629_v60  ;;  %v3743_v49 = vor.u32 %v4453_v43, %v3740_v44  ;;  %v3714_v43 = vld [vmem:[#allocation7 + $0xc0] sm:$0xf]  ;;  %v4448_v44 = vld [vmem:[#allocation7 + $0xc4] sm:$0xf0] }
 0x2d8   : > { %v1635_v61 = vmul.f32 1.442695, %v1633_v47  ;;  %1836 = vmatpush.bf16.msra.mxu1 %v3743_v49  ;;  %v3706_v49 = vld [vmem:[#allocation7 + $0xb0] sm:$0xf] }
 0x2da   : > { %4670 = vpow2.f32 %v1635_v61 }
 0x2dd   : > { %v1632_v62 = vpop.xlane.xlu1 %1631 }
 0x2de   : > { %v1634_v63 = vsub.f32 %v1625_v55, %v1632_v62  ;;  %v3779_v55 = vor.u32 %v4432_v9, %v3778_v4  ;;  %v3775_v62 = vor.u32 %v4429_v57, %v3772_v58  ;;  %v3715_v4 = vor.u32 %v4448_v44, %v3714_v43  ;;  %v3716_v9 = vld [vmem:[#allocation7 + $0xc8] sm:$0xf0] }
 0x2df   : > { %v3719_v10 = vor.u32 %v4447_v46, %v3716_v9  ;;  %v3700_v57 = vld [vmem:[#allocation7 + $0xa8] sm:$0xf0]  ;;  %v3922_v46 = vld [vmem:[#allocation9 + $0xe0] sm:$0xf] }
 0x2e0   : > { %v5268_v6 = vpop.eup %4670  ;;  %v1637_v3 = vmul.f32 1.442695, %v1634_v63  ;;  %1933 = vmatpush.bf16.msra.mxu2 %v3779_v55  ;;  %1948 = vmatpush.bf16.msra.mxu3 %v3775_v62  ;;  %v3708_v55 = vld [vmem:[#allocation7 + $0xb8] sm:$0xf0]  ;;  %v4050_v9 = vld [vmem:[#allocation9 + $0x1e0] sm:$0xf] }
 0x2e1   : > { %v1639_v2 = vsel %vm1626_vm1, %v5268_v6, 0.0 }
 0x2e2   : > { %4672 = vpow2.f32 %v1637_v3  ;;  %1640 = vadd.xlane.f32.xlu1 %v1639_v2 }
 0x2e5   : > { %v1697_v11 = vpop.xlane.xlu1 %1696 }
 0x2e6   : > { %v1701_v39 = vsub.f32 %v1693_v53, %v1697_v11  ;;  %v4430_v53 = vld [vmem:[#allocation7 + $0x34] sm:$0xf0] }
 0x2e7   : > { %v3771_v60 = vor.u32 %v4430_v53, %v3770_v8  ;;  %v4444_v8 = vld [vmem:[#allocation7 + $0xa4] sm:$0xf0]  ;;  %v4443_v53 = vld [vmem:[#allocation7 + $0xa4] sm:$0xf] }
 0x2e8   : > { %v5272_v12 = vpop.eup %4672  ;;  %v1703_v5 = vmul.f32 1.442695, %v1701_v39  ;;  %v3703_v58 = vor.u32 %v4443_v53, %v3700_v57  ;;  %v4034_v57 = vld [vmem:[#allocation9 + $0x1c0] sm:$0xf] }
 0x2e9   : > { %v1642_v40 = vsel %vm1626_vm1, %v5272_v12, 0.0  ;;  %1934 = vmatpush.bf16.msra.mxu2 %v3771_v60  ;;  %v4441_v60 = vld [vmem:[#allocation7 + $0x94] sm:$0xf] }
 0x2ea   : > { %4674 = vpow2.f32 %v1703_v5  ;;  %v1700_v13 = vpop.xlane.xlu2 %1699  ;;  %1643 = vadd.xlane.f32.xlu1 %v1642_v40 }
 0x2eb   : > { %v1702_v14 = vsub.f32 %v1694_v59, %v1700_v13  ;;  %v3762_v13 = vld [vmem:[#allocation7 + $0x20] sm:$0xf] }
 0x2ed   : > { %v1705_v15 = vmul.f32 1.442695, %v1702_v14  ;;  %v4428_v14 = vld [vmem:[#allocation7 + $0x24] sm:$0xf0] }
 0x2ef   : > { %4676 = vpow2.f32 %v1705_v15  ;;  %v4427_v15 = vld [vmem:[#allocation7 + $0x24] sm:$0xf] }
 0x2f0   : > { %v5276_v16 = vpop.eup %4674 }
 0x2f1   : > { %v1707_v17 = vsel %vm1626_vm1, %v5276_v16, 0.0 }
 0x2f2   : > { %1708 = vadd.xlane.f32.xlu0 %v1707_v17  ;;  %v3763_v17 = vor.u32 %v4428_v14, %v3762_v13 }
 0x2f4   : > { %1935 = vmatpush.bf16.msra.mxu2 %v3763_v17 }
 0x2f5   : > { %v5280_v0 = vpop.eup %4676 }
 0x2f6   : > { %v1710_v18 = vsel %vm1626_vm1, %v5280_v0, 0.0 }
 0x2f7   : > { %1711 = vadd.xlane.f32.xlu1 %v1710_v18  ;;  %v3764_v18 = vld [vmem:[#allocation7 + $0x28] sm:$0xf0] }
 0x2f8   : > { %1936 = vmatpush.bf16.msra.mxu2 %v3755_v25 }
 0x2fc   : > { %1937 = vmatpush.bf16.msra.mxu2 %v3747_v34  ;;  %v4709_v34 = vld [vmem:[%s5110_s28 + $0x18] sm:$0xff] }
 0x355   : > { %v1641_v1 = vpop.xlane.xlu1 %1640 }
 0x356   : > { %4678 = vrcp.f32 %v1641_v1  ;;  %v3730_v1 = vld [vmem:[#allocation7 + $0xe0] sm:$0xf] }
 0x357   : > { %v3731_v20 = vor.u32 %v4452_v19, %v3730_v1  ;;  %v1962_v1 = vld [vmem:[%s5450_s11] sm:$0x3] }
 0x358   : > { %v1965_v22 = vperm.slane %v1962_v1, 1 }
 0x359   : > { %1823 = vmatpush.bf16.msra.mxu0 %v3731_v20 }
 0x35c   : > { %v4679_v50 = vpop.eup %4678 }
 0x35d   : > { %v1644_v37 = vpop.xlane.xlu1 %1643  ;;  %v1647_v7 = vmul.f32 %v4679_v50, %v5268_v6  ;;  %1824 = vmatpush.bf16.msra.mxu0 %v3723_v30  ;;  %v4446_v50 = vld [vmem:[#allocation7 + $0xb4] sm:$0xf0] }
 0x35e   : > { %4680 = vrcp.f32 %v1644_v37  ;;  %v4423_v37 = vld [vmem:[#allocation7 + $0x4] sm:$0xf]  ;;  %v3707_v54 = vor.u32 %v4446_v50, %v3706_v49  ;;  %v4517_v49 = vld [vmem:[#allocation9 + $0x1ec] sm:$0xf0] }
 0x35f   : > { %v1649_v47 = vsel %vm1622_vm0, 0.0, %v1647_v7  ;;  %v3751_v42 = vor.u32 %v4423_v37, %v3748_v38  ;;  %v3711_v7 = vor.u32 %v4445_v35, %v3708_v55  ;;  %v4483_v50 = vld [vmem:[#allocation9 + $0xe4] sm:$0xf]  ;;  %v3924_v35 = vld [vmem:[#allocation9 + $0xf0] sm:$0xf0] }
 0x360   : > { %v3927_v55 = vor.u32 %v4483_v50, %v3924_v35  ;;  %v3986_v50 = vld [vmem:[#allocation9 + $0x160] sm:$0xf] }
 0x361   : > { %1825 = vmatpush.bf16.msra.mxu0 %v3715_v4  ;;  %v4485_v4 = vld [vmem:[#allocation9 + $0xec] sm:$0xf0] }
 0x362   : > { %2511 = vmatpush.bf16.msrb.mxu2 %v3927_v55  ;;  %v4467_v55 = vld [vmem:[#allocation9 + $0x64] sm:$0xf] }
 0x364   : > { %v4681_v56 = vpop.eup %4680 }
 0x365   : > { %v1648_v59 = vmul.f32 %v4681_v56, %v5272_v12  ;;  %v1709_v45 = vpop.xlane.xlu0 %1708  ;;  %1826 = vmatpush.bf16.msra.mxu0 %v3707_v54  ;;  %v3699_v56 = vor.u32 %v4444_v8, %v3698_v52  ;;  %v4051_v54 = vor.u32 %v4517_v49, %v4050_v9  ;;  %v4052_v52 = vld [vmem:[#allocation9 + $0x1f0] sm:$0xf0]  ;;  %v3906_v8 = vld [vmem:[#allocation9 + $0xc0] sm:$0xf]  ;;  %v4469_v49 = vld [vmem:[#allocation9 + $0x6c] sm:$0xf0] }
 0x366   : > { %4682 = vrcp.f32 %v1709_v45  ;;  %v4442_v45 = vld [vmem:[#allocation7 + $0x94] sm:$0xf0] }
 0x367   : > { %v1650_v61 = vsel %vm1623_vm2, 0.0, %v1648_v59  ;;  %v3690_v59 = vld [vmem:[#allocation7 + $0x90] sm:$0xf] }
 0x368   : > { %v1651_v63 = vpack.c.bf16 %v1650_v61, %v1649_v47  ;;  %v3691_v47 = vor.u32 %v4442_v45, %v3690_v59  ;;  %v3692_v61 = vld [vmem:[#allocation7 + $0x98] sm:$0xf0] }
 0x369   : > { %1827 = vmatpush.bf16.msra.mxu0 %v3699_v56  ;;  %v3695_v62 = vor.u32 %v4441_v60, %v3692_v61  ;;  %v4481_v56 = vld [vmem:[#allocation9 + $0xcc] sm:$0xf0]  ;;  %v4479_v60 = vld [vmem:[#allocation9 + $0xc4] sm:$0xf] }
 0x36a   : > { %v1712_v6 = vpop.xlane.xlu1 %1711  ;;  %3678 = vmatmul.msk.bf16.vlgmr.msrb.gmra.mxu1 %vm1626_vm1, %v1651_v63  ;;  %v3682_v63 = vld [vmem:[#allocation7 + $0x80] sm:$0xf]  ;;  %v3907_v59 = vor.u32 %v4481_v56, %v3906_v8  ;;  %v4511_v61 = vld [vmem:[#allocation9 + $0x1c4] sm:$0xf]  ;;  %v3988_v56 = vld [vmem:[#allocation9 + $0x170] sm:$0xf0] }
 0x36b   : > { %4684 = vrcp.f32 %v1712_v6  ;;  %v4440_v6 = vld [vmem:[#allocation7 + $0x84] sm:$0xf0] }
 0x36c   : > { %v4683_v3 = vpop.eup %4682 }
 0x36d   : > { %v1715_v2 = vmul.f32 %v4683_v3, %v5276_v16  ;;  %v3767_v16 = vor.u32 %v4427_v15, %v3764_v18  ;;  %1828 = vmatpush.bf16.msra.mxu0 %v3691_v47  ;;  %v4439_v3 = vld [vmem:[#allocation7 + $0x84] sm:$0xf]  ;;  %v3908_v47 = vld [vmem:[#allocation9 + $0xd0] sm:$0xf0] }
 0x36f   : > { %v1717_v12 = vsel %vm1622_vm0, 0.0, %v1715_v2  ;;  %1949 = vmatpush.bf16.msra.mxu3 %v3767_v16  ;;  %v3683_v2 = vor.u32 %v4440_v6, %v3682_v63  ;;  %v4036_v63 = vld [vmem:[#allocation9 + $0x1d0] sm:$0xf0]  ;;  %v3890_v6 = vld [vmem:[#allocation9 + $0xa0] sm:$0xf] }
 0x371   : > { %v4685_v11 = vpop.eup %4684  ;;  %1829 = vmatpush.bf16.msra.mxu0 %v3683_v2  ;;  %v4039_v2 = vor.u32 %v4511_v61, %v4036_v63  ;;  %v4463_v61 = vld [vmem:[#allocation9 + $0x44] sm:$0xf] }
 0x372   : > { %v1716_v39 = vmul.f32 %v4685_v11, %v5280_v0  ;;  %v3732_v0 = vld [vmem:[#allocation7 + $0xe8] sm:$0xf0] }
 0x373   : > { %v3735_v48 = vor.u32 %v4451_v21, %v3732_v0  ;;  %1950 = vmatpush.bf16.msra.mxu3 %v3759_v26  ;;  %v3684_v11 = vld [vmem:[#allocation7 + $0x88] sm:$0xf0]  ;;  %v1964_v21 = vperm.slane %v1962_v1, 0 }
 0x374   : > { %v1718_v5 = vsel %vm1623_vm2, 0.0, %v1716_v39  ;;  %v3687_v39 = vor.u32 %v4439_v3, %v3684_v11  ;;  %v4477_v3 = vld [vmem:[#allocation9 + $0xac] sm:$0xf0]  ;;  %v4018_v11 = vld [vmem:[#allocation9 + $0x1a0] sm:$0xf] }
 0x375   : > { %v1719_v40 = vpack.c.bf16 %v1718_v5, %v1717_v12  ;;  %1837 = vmatpush.bf16.msra.mxu1 %v3735_v48  ;;  %v4706_v48 = vld [vmem:[%s5110_s28] sm:$0xff] }
 0x377   : > { %3679 = vmatmul.msk.bf16.vlgmr.msrb.gmra.mxu3 %vm1626_vm1, %v1719_v40 }
 0x378   : > { %1951 = vmatpush.bf16.msra.mxu3 %v3751_v42 }
 0x379   : > { %1838 = vmatpush.bf16.msra.mxu1 %v3727_v32 }
 0x37d   : > { %1839 = vmatpush.bf16.msra.mxu1 %v3719_v10  ;;  %v3923_v10 = vor.u32 %v4485_v4, %v3922_v46  ;;  %v4503_v46 = vld [vmem:[#allocation9 + $0x184] sm:$0xf]  ;;  %v4004_v4 = vld [vmem:[#allocation9 + $0x190] sm:$0xf0] }
 0x37e   : > { %v4007_v9 = vor.u32 %v4503_v46, %v4004_v4 }
 0x37f   : > { %2483 = vmatpush.bf16.msrb.mxu0 %v3923_v10  ;;  %v3858_v10 = vld [vmem:[#allocation9 + $0x60] sm:$0xf] }
 0x380   : > { %v3859_v35 = vor.u32 %v4469_v49, %v3858_v10  ;;  %v3932_v10 = vld [vmem:[#allocation9 + $0xf8] sm:$0xf0]  ;;  %v4516_v49 = vld [vmem:[#allocation9 + $0x1ec] sm:$0xf] }
 0x381   : > { %1840 = vmatpush.bf16.msra.mxu1 %v3711_v7  ;;  %v4515_v7 = vld [vmem:[#allocation9 + $0x1e4] sm:$0xf] }
 0x382   : > { %v4055_v53 = vor.u32 %v4515_v7, %v4052_v52  ;;  %v3860_v7 = vld [vmem:[#allocation9 + $0x70] sm:$0xf0] }
 0x383   : > { %2484 = vmatpush.bf16.msrb.mxu0 %v3907_v59  ;;  %v3863_v8 = vor.u32 %v4467_v55, %v3860_v7  ;;  %v4465_v59 = vld [vmem:[#allocation9 + $0x4c] sm:$0xf0]  ;;  %v4482_v55 = vld [vmem:[#allocation9 + $0xd4] sm:$0xf0] }
 0x384   : > { %2525 = vmatpush.bf16.msrb.mxu3 %v4055_v53  ;;  %v4499_v53 = vld [vmem:[#allocation9 + $0x164] sm:$0xf] }
 0x385   : > { %1841 = vmatpush.bf16.msra.mxu1 %v3703_v58  ;;  %v4513_v58 = vld [vmem:[#allocation9 + $0x1cc] sm:$0xf0] }
 0x386   : > { %v4035_v45 = vor.u32 %v4513_v58, %v4034_v57  ;;  %v3991_v57 = vor.u32 %v4499_v53, %v3988_v56  ;;  %v3842_v58 = vld [vmem:[#allocation9 + $0x40] sm:$0xf]  ;;  %v4514_v53 = vld [vmem:[#allocation9 + $0x1d4] sm:$0xf0]  ;;  %v4480_v56 = vld [vmem:[#allocation9 + $0xcc] sm:$0xf] }
 0x388   : > { %2526 = vmatpush.bf16.msrb.mxu3 %v4039_v2  ;;  %v3972_v2 = vld [vmem:[#allocation9 + $0x150] sm:$0xf0] }
 0x389   : > { %1842 = vmatpush.bf16.msra.mxu1 %v3695_v62  ;;  %v3911_v62 = vor.u32 %v4479_v60, %v3908_v47  ;;  %v3843_v60 = vor.u32 %v4465_v59, %v3842_v58  ;;  %v4497_v47 = vld [vmem:[#allocation9 + $0x14c] sm:$0xf0]  ;;  %v3916_v58 = vld [vmem:[#allocation9 + $0xd8] sm:$0xf0]  ;;  %v4512_v59 = vld [vmem:[#allocation9 + $0x1cc] sm:$0xf] }
 0x38b   : > { %2512 = vmatpush.bf16.msrb.mxu2 %v3911_v62  ;;  %v3844_v62 = vld [vmem:[#allocation9 + $0x50] sm:$0xf0] }
 0x38d   : > { %1843 = vmatpush.bf16.msra.mxu1 %v3687_v39  ;;  %v4509_v39 = vld [vmem:[#allocation9 + $0x1ac] sm:$0xf0] }
 0x391   : > { %2497 = vmatpush.bf16.msrb.mxu1 %v4051_v54  ;;  %v4501_v54 = vld [vmem:[#allocation9 + $0x16c] sm:$0xf0] }
 0x392   : > { %v3987_v52 = vor.u32 %v4501_v54, %v3986_v50  ;;  %v3914_v54 = vld [vmem:[#allocation9 + $0xc8] sm:$0xf] }
 0x395   : > { %2498 = vmatpush.bf16.msrb.mxu1 %v4035_v45  ;;  %v3970_v45 = vld [vmem:[#allocation9 + $0x140] sm:$0xf] }
 0x396   : > { %v3971_v63 = vor.u32 %v4497_v47, %v3970_v45  ;;  %v4044_v45 = vld [vmem:[#allocation9 + $0x1d8] sm:$0xf0] }
 0x397   : > { %v4047_v47 = vor.u32 %v4512_v59, %v4044_v45  ;;  %v4462_v45 = vld [vmem:[#allocation9 + $0x34] sm:$0xf0] }
 0x3e7   : > { %v1669_v12 = vpop.f32.mrf.mxu1 }
 0x3ef   : > { %v1671_v5 = vpop.f32.mrf.mxu1 }
 0x3f0   : > { %v1674_v40 = vpack.c.bf16 %v1671_v5, %v1669_v12  ;;  %v4475_v12 = vld [vmem:[#allocation9 + $0xa4] sm:$0xf]  ;;  %v3891_v5 = vor.u32 %v4477_v3, %v3890_v6  ;;  %v3847_v6 = vor.u32 %v4463_v61, %v3844_v62  ;;  %v3898_v61 = vld [vmem:[#allocation9 + $0xa8] sm:$0xf]  ;;  %v4478_v62 = vld [vmem:[#allocation9 + $0xb4] sm:$0xf0] }
 0x3f1   : > { %v4495_v3 = vld [vmem:[#allocation9 + $0x144] sm:$0xf] }
 0x3f2   : > { %1938 = vmatmul.bf16.vlgmr.msra.gmra.mxu2 %v1674_v40  ;;  %1952 = vmatmul.bf16.vlgmr.msra.gmra.mxu3 %v1674_v40  ;;  %v3892_v40 = vld [vmem:[#allocation9 + $0xb0] sm:$0xf0] }
 0x3f3   : > { %2485 = vmatpush.bf16.msrb.mxu0 %v3891_v5  ;;  %v3954_v5 = vld [vmem:[#allocation9 + $0x120] sm:$0xf] }
 0x3fa   : > { %v1736_v13 = vpop.f32.mrf.mxu3 }
 0x402   : > { %v1738_v14 = vpop.f32.mrf.mxu3 }
 0x403   : > { %v1741_v15 = vpack.c.bf16 %v1738_v14, %v1736_v13  ;;  %v4507_v13 = vld [vmem:[#allocation9 + $0x1a4] sm:$0xf]  ;;  %v4020_v14 = vld [vmem:[#allocation9 + $0x1b0] sm:$0xf0] }
 0x405   : > { %1830 = vmatmul.bf16.vlgmr.msra.gmra.mxu0 %v1741_v15  ;;  %1844 = vmatmul.bf16.vlgmr.msra.gmra.mxu1 %v1741_v15  ;;  %v4019_v15 = vor.u32 %v4509_v39, %v4018_v11  ;;  %v3975_v11 = vor.u32 %v4495_v3, %v3972_v2  ;;  %v3826_v39 = vld [vmem:[#allocation9 + $0x20] sm:$0xf]  ;;  %v4510_v3 = vld [vmem:[#allocation9 + $0x1b4] sm:$0xf0]  ;;  %v4476_v2 = vld [vmem:[#allocation9 + $0xac] sm:$0xf] }
 0x407   : > { %2499 = vmatpush.bf16.msrb.mxu1 %v4019_v15  ;;  %v3828_v15 = vld [vmem:[#allocation9 + $0x30] sm:$0xf0] }
 0x475   : > { %v1939_v17 = vpop.f32.mrf.mxu2  ;;  %v1953_v18 = vpop.f32.mrf.mxu3 }
 0x47d   : > { %v1941_v27 = vpop.f32.mrf.mxu2  ;;  %v1955_v28 = vpop.f32.mrf.mxu3 }
 0x482   : > { %v1831_v19 = vpop.f32.mrf.mxu0  ;;  %v1845_v16 = vpop.f32.mrf.mxu1 }
 0x483   : > { %v1940_v20 = vadd.f32 %v1939_v17, %v1831_v19  ;;  %v1954_v0 = vadd.f32 %v1953_v18, %v1845_v16  ;;  %v3895_v17 = vor.u32 %v4475_v12, %v3892_v40  ;;  %v4023_v18 = vor.u32 %v4507_v13, %v4020_v14  ;;  %v4461_v12 = vld [vmem:[#allocation9 + $0x2c] sm:$0xf0]  ;;  %v4459_v14 = vld [vmem:[#allocation9 + $0x24] sm:$0xf] }
 0x484   : > { %v3827_v40 = vor.u32 %v4461_v12, %v3826_v39  ;;  %v4493_v13 = vld [vmem:[#allocation9 + $0x12c] sm:$0xf0] }
 0x485   : > { %v1958_v23 = vadd.f32 %v4706_v48, %v1940_v20  ;;  %v1959_v24 = vadd.f32 %v4707_v51, %v1954_v0  ;;  %2513 = vmatpush.bf16.msrb.mxu2 %v3895_v17  ;;  %2527 = vmatpush.bf16.msrb.mxu3 %v4023_v18  ;;  %v3955_v17 = vor.u32 %v4493_v13, %v3954_v5  ;;  %v4508_v5 = vld [vmem:[#allocation9 + $0x1ac] sm:$0xf] }
 0x486   : > { %v3831_v18 = vor.u32 %v4459_v14, %v3828_v15  ;;  %v3882_v14 = vld [vmem:[#allocation9 + $0x88] sm:$0xf]  ;;  %v4474_v15 = vld [vmem:[#allocation9 + $0x94] sm:$0xf0] }
 0x487   : > { %v5303_v25 = vadd.f32 %v1964_v21, %v1958_v23  ;;  %v5305_v26 = vadd.f32 %v1965_v22, %v1959_v24 }
 0x489   : > { %v2102_v29 = vadd.f32 %v5305_v26, %v5303_v25  ;;  %2528 = vmatpush.bf16.msrb.mxu3 %v4007_v9  ;;  %v4484_v9 = vld [vmem:[#allocation9 + $0xec] sm:$0xf] }
 0x48a   : > { %v1833_v30 = vpop.f32.mrf.mxu0  ;;  %v1847_v31 = vpop.f32.mrf.mxu1  ;;  %v3935_v50 = vor.u32 %v4484_v9, %v3932_v10 }
 0x48b   : > { %v1942_v32 = vadd.f32 %v1941_v27, %v1833_v30  ;;  %v1956_v33 = vadd.f32 %v1955_v28, %v1847_v31  ;;  %2103 = vadd.xlane.f32.xlu1 %v2102_v29  ;;  %v3874_v30 = vld [vmem:[#allocation9 + $0x80] sm:$0xf]  ;;  %v4473_v31 = vld [vmem:[#allocation9 + $0x8c] sm:$0xf0] }
 0x48d   : > { %v1960_v37 = vadd.f32 %v4708_v36, %v1942_v32  ;;  %v1961_v38 = vadd.f32 %v4709_v34, %v1956_v33  ;;  %v4002_v32 = vld [vmem:[#allocation9 + $0x180] sm:$0xf]  ;;  %v3875_v33 = vor.u32 %v4473_v31, %v3874_v30  ;;  %v4505_v36 = vld [vmem:[#allocation9 + $0x18c] sm:$0xf0]  ;;  %v3876_v34 = vld [vmem:[#allocation9 + $0x90] sm:$0xf0]  ;;  %2529 = vmatpush.bf16.msrb.mxu3 %v3991_v57 }
 0x48f   : > { %v5311_v42 = vadd.f32 %v1964_v21, %v1960_v37  ;;  %v5313_v43 = vadd.f32 %v1965_v22, %v1961_v38  ;;  %v4471_v37 = vld [vmem:[#allocation9 + $0x84] sm:$0xf]  ;;  %v4003_v38 = vor.u32 %v4505_v36, %v4002_v32  ;;  %2486 = vmatpush.bf16.msrb.mxu0 %v3875_v33  ;;  %v3940_v33 = vld [vmem:[#allocation9 + $0x110] sm:$0xf0]  ;;  %v3930_v36 = vld [vmem:[#allocation9 + $0xe8] sm:$0xf] }
 0x490   : > { %v4487_v32 = vld [vmem:[#allocation9 + $0x104] sm:$0xf] }
 0x491   : > { %v2105_v44 = vadd.f32 %v5313_v43, %v5311_v42  ;;  %2500 = vmatpush.bf16.msrb.mxu1 %v4003_v38  ;;  %2530 = vmatpush.bf16.msrb.mxu3 %v3975_v11  ;;  %v4058_v38 = vld [vmem:[#allocation9 + $0x1e8] sm:$0xf]  ;;  %v3900_v11 = vld [vmem:[#allocation9 + $0xb8] sm:$0xf0] }
 0x492   : > { %v3903_v12 = vor.u32 %v4476_v2, %v3900_v11  ;;  %v3964_v2 = vld [vmem:[#allocation9 + $0x138] sm:$0xf0] }
 0x493   : > { %2106 = vadd.xlane.f32.xlu1 %v2105_v44  ;;  %v3879_v44 = vor.u32 %v4471_v37, %v3876_v34  ;;  %2487 = vmatpush.bf16.msrb.mxu0 %v3859_v35  ;;  %v3943_v37 = vor.u32 %v4487_v32, %v3940_v33  ;;  %v4486_v34 = vld [vmem:[#allocation9 + $0xf4] sm:$0xf0]  ;;  %v4060_v35 = vld [vmem:[#allocation9 + $0x1f8] sm:$0xf0]  ;;  %v3994_v32 = vld [vmem:[#allocation9 + $0x168] sm:$0xf] }
 0x494   : > { %v3931_v46 = vor.u32 %v4486_v34, %v3930_v36  ;;  %v4063_v7 = vor.u32 %v4516_v49, %v4060_v35  ;;  %v4468_v34 = vld [vmem:[#allocation9 + $0x6c] sm:$0xf]  ;;  %v3850_v49 = vld [vmem:[#allocation9 + $0x48] sm:$0xf] }
 0x495   : > { %2514 = vmatpush.bf16.msrb.mxu2 %v3879_v44  ;;  %2501 = vmatpush.bf16.msrb.mxu1 %v3987_v52  ;;  %v4518_v44 = vld [vmem:[#allocation9 + $0x1f4] sm:$0xf0]  ;;  %v3915_v52 = vor.u32 %v4482_v55, %v3914_v54  ;;  %v3978_v35 = vld [vmem:[#allocation9 + $0x148] sm:$0xf]  ;;  %v4464_v55 = vld [vmem:[#allocation9 + $0x4c] sm:$0xf] }
 0x496   : > { %v4059_v4 = vor.u32 %v4518_v44, %v4058_v38  ;;  %v3868_v44 = vld [vmem:[#allocation9 + $0x78] sm:$0xf0]  ;;  %v4498_v54 = vld [vmem:[#allocation9 + $0x154] sm:$0xf0] }
 0x497   : > { %2488 = vmatpush.bf16.msrb.mxu0 %v3843_v60  ;;  %v3919_v60 = vor.u32 %v4480_v56, %v3916_v58  ;;  %v3871_v9 = vor.u32 %v4468_v34, %v3868_v44  ;;  %v3980_v56 = vld [vmem:[#allocation9 + $0x158] sm:$0xf0] }
 0x499   : > { %2515 = vmatpush.bf16.msrb.mxu2 %v3863_v8  ;;  %2502 = vmatpush.bf16.msrb.mxu1 %v3971_v63  ;;  %v4042_v8 = vld [vmem:[#allocation9 + $0x1c8] sm:$0xf] }
 0x49a   : > { %v4043_v57 = vor.u32 %v4514_v53, %v4042_v8  ;;  %v4026_v63 = vld [vmem:[#allocation9 + $0x1a8] sm:$0xf]  ;;  %v3979_v8 = vor.u32 %v4498_v54, %v3978_v35  ;;  %v4496_v53 = vld [vmem:[#allocation9 + $0x14c] sm:$0xf] }
 0x49b   : > { %2489 = vmatpush.bf16.msrb.mxu0 %v3827_v40  ;;  %v4027_v39 = vor.u32 %v4510_v3, %v4026_v63  ;;  %v4028_v40 = vld [vmem:[#allocation9 + $0x1b8] sm:$0xf0]  ;;  %v4460_v63 = vld [vmem:[#allocation9 + $0x2c] sm:$0xf] }
 0x49c   : > { %v4031_v13 = vor.u32 %v4508_v5, %v4028_v40  ;;  %v4492_v3 = vld [vmem:[#allocation9 + $0x12c] sm:$0xf]  ;;  %v3818_v40 = vld [vmem:[#allocation9 + $0x8] sm:$0xf] }
 0x49d   : > { %2516 = vmatpush.bf16.msrb.mxu2 %v3847_v6  ;;  %2503 = vmatpush.bf16.msrb.mxu1 %v3955_v17  ;;  %v3899_v6 = vor.u32 %v4478_v62, %v3898_v61  ;;  %v4010_v17 = vld [vmem:[#allocation9 + $0x188] sm:$0xf]  ;;  %v3983_v62 = vor.u32 %v4496_v53, %v3980_v56  ;;  %v4114_v56 = vld [vmem:[#allocation10 + $0x60] sm:$0xf] }
 0x4a1   : > { %2517 = vmatpush.bf16.msrb.mxu2 %v3831_v18  ;;  %v3883_v18 = vor.u32 %v4474_v15, %v3882_v14  ;;  %v4458_v15 = vld [vmem:[#allocation9 + $0x14] sm:$0xf0] }
 0x4fe   : > { %v2104_v1 = vpop.xlane.xlu1 %2103 }
 0x4ff   : > { %v2108_v19 = vmul.f32 %v2104_v1, %v5151_v41  ;;  %v4491_v1 = vld [vmem:[#allocation9 + $0x124] sm:$0xf] }
 0x501   : > { %v5319_v16 = vsub.f32 %v5303_v25, %v2108_v19  ;;  %v5322_v20 = vsub.f32 %v5305_v26, %v2108_v19  ;;  %v3956_v19 = vld [vmem:[#allocation9 + $0x130] sm:$0xf0] }
 0x503   : > { %v2114_v21 = vmul.f32 %v5319_v16, %v5319_v16  ;;  %v2115_v0 = vmul.f32 %v5322_v20, %v5322_v20 }
 0x505   : > { %v2118_v22 = vadd.f32 %v2115_v0, %v2114_v21  ;;  %v3959_v21 = vor.u32 %v4491_v1, %v3956_v19  ;;  %v3810_v0 = vld [vmem:[#allocation9] sm:$0xf]  ;;  %v4506_v1 = vld [vmem:[#allocation9 + $0x194] sm:$0xf0]  ;;  %v4472_v19 = vld [vmem:[#allocation9 + $0x8c] sm:$0xf] }
 0x506   : > { %v2107_v48 = vpop.xlane.xlu1 %2106 }
 0x507   : > { %v2109_v23 = vmul.f32 %v2107_v48, %v5151_v41  ;;  %2119 = vadd.xlane.f32.xlu2 %v2118_v22  ;;  %v4457_v22 = vld [vmem:[#allocation9 + $0xc] sm:$0xf0]  ;;  %v3938_v48 = vld [vmem:[#allocation9 + $0x100] sm:$0xf]  ;;  %2531 = vmatpush.bf16.msrb.mxu3 %v3959_v21  ;;  %v3884_v21 = vld [vmem:[#allocation9 + $0x98] sm:$0xf0] }
 0x509   : > { %v5330_v51 = vsub.f32 %v5311_v42, %v2109_v23  ;;  %v5333_v24 = vsub.f32 %v5313_v43, %v2109_v23  ;;  %v3811_v23 = vor.u32 %v4457_v22, %v3810_v0  ;;  %v4011_v22 = vor.u32 %v4506_v1, %v4010_v17  ;;  %v3946_v17 = vld [vmem:[#allocation9 + $0x108] sm:$0xf]  ;;  %v4456_v1 = vld [vmem:[#allocation9 + $0xc] sm:$0xf] }
 0x50b   : > { %v2116_v27 = vmul.f32 %v5330_v51, %v5330_v51  ;;  %v2117_v28 = vmul.f32 %v5333_v24, %v5333_v24  ;;  %2490 = vmatpush.bf16.msrb.mxu0 %v3811_v23  ;;  %2532 = vmatpush.bf16.msrb.mxu3 %v3943_v37  ;;  %v4504_v23 = vld [vmem:[#allocation9 + $0x18c] sm:$0xf]  ;;  %v4502_v37 = vld [vmem:[#allocation9 + $0x174] sm:$0xf0] }
 0x50c   : > { %v3995_v38 = vor.u32 %v4502_v37, %v3994_v32 }
 0x50d   : > { %v2121_v29 = vadd.f32 %v2117_v28, %v2116_v27  ;;  %v4489_v27 = vld [vmem:[#allocation9 + $0x10c] sm:$0xf0]  ;;  %v4455_v28 = vld [vmem:[#allocation9 + $0x4] sm:$0xf] }
 0x50e   : > { %v3939_v30 = vor.u32 %v4489_v27, %v3938_v48  ;;  %v3887_v48 = vor.u32 %v4472_v19, %v3884_v21  ;;  %v4012_v27 = vld [vmem:[#allocation9 + $0x198] sm:$0xf0] }
 0x50f   : > { %2122 = vadd.xlane.f32.xlu1 %v2121_v29  ;;  %v3812_v29 = vld [vmem:[#allocation9 + $0x10] sm:$0xf0]  ;;  %2539 = vmatpush.bf16.msra.mxu0 %v3931_v46  ;;  %v4500_v46 = vld [vmem:[#allocation9 + $0x16c] sm:$0xf]  ;;  %v3820_v19 = vld [vmem:[#allocation9 + $0x18] sm:$0xf0] }
 0x510   : > { %v3815_v31 = vor.u32 %v4455_v28, %v3812_v29  ;;  %2504 = vmatpush.bf16.msrb.mxu1 %v3939_v30  ;;  %2581 = vmatpush.bf16.msra.mxu3 %v4063_v7  ;;  %v4015_v29 = vor.u32 %v4504_v23, %v4012_v27  ;;  %v3866_v30 = vld [vmem:[#allocation9 + $0x68] sm:$0xf]  ;;  %v3852_v7 = vld [vmem:[#allocation9 + $0x58] sm:$0xf0] }
 0x511   : > { %v3855_v59 = vor.u32 %v4464_v55, %v3852_v7 }
 0x512   : > { %2518 = vmatpush.bf16.msrb.mxu2 %v3815_v31  ;;  %v4470_v31 = vld [vmem:[#allocation9 + $0x74] sm:$0xf0] }
 0x513   : > { %2540 = vmatpush.bf16.msra.mxu0 %v3915_v52  ;;  %v3867_v36 = vor.u32 %v4470_v31, %v3866_v30 }
 0x514   : > { %2553 = vmatpush.bf16.msra.mxu1 %v4059_v4  ;;  %2582 = vmatpush.bf16.msra.mxu3 %v4047_v47  ;;  %v3996_v4 = vld [vmem:[#allocation9 + $0x178] sm:$0xf0]  ;;  %v4494_v47 = vld [vmem:[#allocation9 + $0x134] sm:$0xf0] }
 0x515   : > { %v3999_v10 = vor.u32 %v4500_v46, %v3996_v4  ;;  %v4122_v4 = vld [vmem:[#allocation10 + $0x70] sm:$0xf] }
 0x516   : > { %2567 = vmatpush.bf16.msra.mxu2 %v3935_v50  ;;  %v4466_v50 = vld [vmem:[#allocation9 + $0x54] sm:$0xf0] }
 0x517   : > { %2541 = vmatpush.bf16.msra.mxu0 %v3899_v6  ;;  %v3851_v52 = vor.u32 %v4466_v50, %v3850_v49  ;;  %v3836_v6 = vld [vmem:[#allocation9 + $0x38] sm:$0xf0]  ;;  %v4186_v49 = vld [vmem:[#allocation10 + $0xf0] sm:$0xf]  ;;  %v4550_v50 = vld [vmem:[#allocation10 + $0xf4] sm:$0xf0] }
 0x518   : > { %2554 = vmatpush.bf16.msra.mxu1 %v4043_v57  ;;  %2583 = vmatpush.bf16.msra.mxu3 %v4031_v13  ;;  %v3834_v57 = vld [vmem:[#allocation9 + $0x28] sm:$0xf]  ;;  %v3839_v14 = vor.u32 %v4460_v63, %v3836_v6  ;;  %v4187_v53 = vor.u32 %v4550_v50, %v4186_v49  ;;  %v4546_v63 = vld [vmem:[#allocation10 + $0xd4] sm:$0xf0]  ;;  %v4226_v49 = vld [vmem:[#allocation10 + $0x140] sm:$0xf] }
 0x51a   : > { %2568 = vmatpush.bf16.msra.mxu2 %v3919_v60  ;;  %v3962_v60 = vld [vmem:[#allocation9 + $0x128] sm:$0xf] }
 0x51b   : > { %2542 = vmatpush.bf16.msra.mxu0 %v3883_v18  ;;  %v3963_v5 = vor.u32 %v4494_v47, %v3962_v60  ;;  %v3967_v18 = vor.u32 %v4492_v3, %v3964_v2  ;;  %v4098_v60 = vld [vmem:[#allocation10 + $0x40] sm:$0xf]  ;;  %v4528_v47 = vld [vmem:[#allocation10 + $0x44] sm:$0xf0]  ;;  %v4090_v3 = vld [vmem:[#allocation10 + $0x30] sm:$0xf] }
 0x51c   : > { %2555 = vmatpush.bf16.msra.mxu1 %v4027_v39  ;;  %2584 = vmatpush.bf16.msra.mxu3 %v4015_v29  ;;  %v4526_v2 = vld [vmem:[#allocation10 + $0x34] sm:$0xf0] }
 0x51e   : > { %2569 = vmatpush.bf16.msra.mxu2 %v3903_v12  ;;  %v3835_v12 = vor.u32 %v4462_v45, %v3834_v57  ;;  %v4532_v57 = vld [vmem:[#allocation10 + $0x64] sm:$0xf0] }
 0x51f   : > { %2543 = vmatpush.bf16.msra.mxu0 %v3867_v36 }
 0x520   : > { %2556 = vmatpush.bf16.msra.mxu1 %v4011_v22  ;;  %2585 = vmatpush.bf16.msra.mxu3 %v3999_v10  ;;  %v3948_v22 = vld [vmem:[#allocation9 + $0x118] sm:$0xf0]  ;;  %v4534_v10 = vld [vmem:[#allocation10 + $0x74] sm:$0xf0] }
 0x522   : > { %2570 = vmatpush.bf16.msra.mxu2 %v3887_v48  ;;  %v3819_v48 = vor.u32 %v4458_v15, %v3818_v40  ;;  %v4162_v40 = vld [vmem:[#allocation10 + $0xc0] sm:$0xf] }
 0x523   : > { %2544 = vmatpush.bf16.msra.mxu0 %v3851_v52  ;;  %v4082_v15 = vld [vmem:[#allocation10 + $0x20] sm:$0xf] }
 0x524   : > { %2557 = vmatpush.bf16.msra.mxu1 %v3995_v38  ;;  %2586 = vmatpush.bf16.msra.mxu3 %v3983_v62  ;;  %v4170_v62 = vld [vmem:[#allocation10 + $0xd0] sm:$0xf] }
 0x525   : > { %v4171_v6 = vor.u32 %v4546_v63, %v4170_v62  ;;  %v4576_v63 = vld [vmem:[#allocation10 + $0x1c4] sm:$0xf0] }
 0x526   : > { %2571 = vmatpush.bf16.msra.mxu2 %v3871_v9 }
 0x527   : > { %2545 = vmatpush.bf16.msra.mxu0 %v3835_v12  ;;  %v4566_v12 = vld [vmem:[#allocation10 + $0x174] sm:$0xf0] }
 0x528   : > { %2558 = vmatpush.bf16.msra.mxu1 %v3979_v8  ;;  %2587 = vmatpush.bf16.msra.mxu3 %v3967_v18  ;;  %v4123_v8 = vor.u32 %v4534_v10, %v4122_v4  ;;  %v4520_v10 = vld [vmem:[#allocation10 + $0x4] sm:$0xf0] }
 0x52a   : > { %2572 = vmatpush.bf16.msra.mxu2 %v3855_v59  ;;  %v4548_v59 = vld [vmem:[#allocation10 + $0xe4] sm:$0xf0] }
 0x52b   : > { %2546 = vmatpush.bf16.msra.mxu0 %v3819_v48 }
 0x52c   : > { %2559 = vmatpush.bf16.msra.mxu1 %v3963_v5 }
 0x52e   : > { %2573 = vmatpush.bf16.msra.mxu2 %v3839_v14 }
 0x57a   : > { %v2120_v0 = vpop.xlane.xlu2 %2119 }
 0x57b   : > { %v2124_v28 = vmul.f32 %v2120_v0, %v5151_v41  ;;  %v4488_v0 = vld [vmem:[#allocation9 + $0x10c] sm:$0xf] }
 0x57c   : > { %v3951_v29 = vor.u32 %v4488_v0, %v3948_v22  ;;  %v4542_v0 = vld [vmem:[#allocation10 + $0xb4] sm:$0xf0]  ;;  %v4314_v22 = vld [vmem:[#allocation10 + $0x1f0] sm:$0xf] }
 0x57d   : > { %v5340_v33 = vadd.f32 1e-05, %v2124_v28  ;;  %v3823_v28 = vor.u32 %v4456_v1, %v3820_v19  ;;  %v4564_v1 = vld [vmem:[#allocation10 + $0x164] sm:$0xf0] }
 0x57e   : > { %2588 = vmatpush.bf16.msra.mxu3 %v3951_v29  ;;  %v4522_v29 = vld [vmem:[#allocation10 + $0x14] sm:$0xf0] }
 0x57f   : > { %4686 = vrsqrt.f32 %v5340_v33  ;;  %2574 = vmatpush.bf16.msra.mxu2 %v3823_v28  ;;  %vm2134_vm4 = vweird.f32 %v5340_v33  ;;  %v4074_v28 = vld [vmem:[#allocation10 + $0x10] sm:$0xf] }
 0x582   : > { %v2123_v58 = vpop.xlane.xlu1 %2122 }
 0x583   : > { %v2125_v61 = vmul.f32 %v2123_v58, %v5151_v41  ;;  %v4490_v41 = vld [vmem:[#allocation9 + $0x114] sm:$0xf0]  ;;  %v4115_v58 = vor.u32 %v4532_v57, %v4114_v56 }
 0x584   : > { %v3947_v23 = vor.u32 %v4490_v41, %v3946_v17  ;;  %v4524_v17 = vld [vmem:[#allocation10 + $0x24] sm:$0xf0]  ;;  %v4242_v41 = vld [vmem:[#allocation10 + $0x160] sm:$0xf]  ;;  %v4578_v57 = vld [vmem:[#allocation10 + $0x1d4] sm:$0xf0] }
 0x585   : > { %v4687_v11 = vpop.eup %4686  ;;  %v2127_v39 = vadd.f32 1e-05, %v2125_v61  ;;  %v4099_v61 = vor.u32 %v4528_v47, %v4098_v60  ;;  %v4083_v18 = vor.u32 %v4524_v17, %v4082_v15  ;;  %v4243_v19 = vor.u32 %v4564_v1, %v4242_v41  ;;  %v4130_v60 = vld [vmem:[#allocation10 + $0x80] sm:$0xf]  ;;  %v4536_v47 = vld [vmem:[#allocation10 + $0x84] sm:$0xf0] }
 0x586   : > { %v2129_v13 = vmul.f32 %v4687_v11, %v5340_v33  ;;  %2560 = vmatpush.bf16.msra.mxu1 %v3947_v23  ;;  %vm2135_vm3 = vweird.f32 %v4687_v11  ;;  %v4582_v23 = vld [vmem:[#allocation10 + $0x1f4] sm:$0xf0]  ;;  %v4131_v62 = vor.u32 %v4536_v47, %v4130_v60  ;;  %v4282_v17 = vld [vmem:[#allocation10 + $0x1b0] sm:$0xf]  ;;  %v4084_v60 = vld [vmem:[#allocation10 + $0x28] sm:$0xf0] }
 0x587   : > { %4688 = vrsqrt.f32 %v2127_v39  ;;  %vm2136_vm6 = vmor %vm2134_vm4, %vm2135_vm3  ;;  %vm2144_vm7 = vweird.f32 %v2127_v39  ;;  %v4574_v41 = vld [vmem:[#allocation10 + $0x1b4] sm:$0xf0]  ;;  %v4563_v47 = vld [vmem:[#allocation10 + $0x164] sm:$0xf] }
 0x588   : > { %v2130_v21 = vmul.f32 %v4687_v11, %v2129_v13  ;;  %v4544_v13 = vld [vmem:[#allocation10 + $0xc4] sm:$0xf0]  ;;  %v4283_v1 = vor.u32 %v4574_v41, %v4282_v17  ;;  %v4581_v17 = vld [vmem:[#allocation10 + $0x1f4] sm:$0xf] }
 0x589   : > { %v4163_v14 = vor.u32 %v4544_v13, %v4162_v40  ;;  %v4529_v13 = vld [vmem:[#allocation10 + $0x54] sm:$0xf] }
 0x58a   : > { %v2131_v27 = vmul.f32 0.5, %v2130_v21  ;;  %v4154_v21 = vld [vmem:[#allocation10 + $0xb0] sm:$0xf] }
 0x58b   : > { %v4155_v48 = vor.u32 %v4542_v0, %v4154_v21  ;;  %v4180_v21 = vld [vmem:[#allocation10 + $0xe8] sm:$0xf0] }
 0x58c   : > { %v2132_v31 = vsub.f32 1.5, %v2131_v27  ;;  %v4315_v27 = vor.u32 %v4582_v23, %v4314_v22  ;;  %v4202_v22 = vld [vmem:[#allocation10 + $0x110] sm:$0xf] }
 0x58d   : > { %v4689_v30 = vpop.eup %4688 }
 0x58e   : > { %v2139_v32 = vmul.f32 %v4689_v30, %v2127_v39  ;;  %v2133_v37 = vmul.f32 %v4687_v11, %v2132_v31  ;;  %vm2145_vm5 = vweird.f32 %v4689_v30  ;;  %v4250_v39 = vld [vmem:[#allocation10 + $0x170] sm:$0xf]  ;;  %v4075_v31 = vor.u32 %v4522_v29, %v4074_v28  ;;  %v4100_v28 = vld [vmem:[#allocation10 + $0x48] sm:$0xf0] }
 0x58f   : > { %vm2146_vm8 = vmor %vm2144_vm7, %vm2145_vm5  ;;  %v4251_v5 = vor.u32 %v4566_v12, %v4250_v39  ;;  %v4210_v12 = vld [vmem:[#allocation10 + $0x120] sm:$0xf] }
 0x590   : > { %v2140_v36 = vmul.f32 %v4689_v30, %v2139_v32  ;;  %v2137_v44 = vsel %vm2136_vm6, %v4687_v11, %v2133_v37  ;;  %v4091_v11 = vor.u32 %v4526_v2, %v4090_v3  ;;  %v4562_v32 = vld [vmem:[#allocation10 + $0x154] sm:$0xf0]  ;;  %v4146_v37 = vld [vmem:[#allocation10 + $0xa0] sm:$0xf]  ;;  %v4188_v3 = vld [vmem:[#allocation10 + $0xf8] sm:$0xf0] }
 0x591   : > { %v2148_v35 = vmul.f32 %v2137_v44, %v5319_v16  ;;  %v2149_v55 = vmul.f32 %v2137_v44, %v5322_v20  ;;  %v4106_v16 = vld [vmem:[#allocation10 + $0x50] sm:$0xf]  ;;  %v4530_v20 = vld [vmem:[#allocation10 + $0x54] sm:$0xf0]  ;;  %v4306_v44 = vld [vmem:[#allocation10 + $0x1e0] sm:$0xf] }
 0x592   : > { %v2141_v34 = vmul.f32 0.5, %v2140_v36  ;;  %v5353_v2 = vld [vmem:[%s5452_s13] sm:$0xf] }
 0x594   : > { %v2142_v38 = vsub.f32 1.5, %v2141_v34  ;;  %v4540_v34 = vld [vmem:[#allocation10 + $0xa4] sm:$0xf0] }
 0x596   : > { %v2143_v46 = vmul.f32 %v4689_v30, %v2142_v38  ;;  %v4147_v38 = vor.u32 %v4540_v34, %v4146_v37 }
 0x598   : > { %v2147_v9 = vsel %vm2146_vm8, %v4689_v30, %v2143_v46  ;;  %v4234_v30 = vld [vmem:[#allocation10 + $0x150] sm:$0xf]  ;;  %v4580_v46 = vld [vmem:[#allocation10 + $0x1e4] sm:$0xf0] }
 0x599   : > { %v2150_v54 = vmul.f32 %v2147_v9, %v5330_v51  ;;  %v2151_v33 = vmul.f32 %v2147_v9, %v5333_v24  ;;  %v4107_v51 = vor.u32 %v4530_v20, %v4106_v16  ;;  %v4178_v24 = vld [vmem:[#allocation10 + $0xe0] sm:$0xf]  ;;  %v4235_v36 = vor.u32 %v4562_v32, %v4234_v30  ;;  %v4218_v16 = vld [vmem:[#allocation10 + $0x130] sm:$0xf]  ;;  %v4558_v20 = vld [vmem:[#allocation10 + $0x134] sm:$0xf0] }
 0x59a   : > { %v4179_v45 = vor.u32 %v4548_v59, %v4178_v24  ;;  %v4307_v4 = vor.u32 %v4580_v46, %v4306_v44  ;;  %v4066_v9 = vld [vmem:[#allocation10] sm:$0xf]  ;;  %v4531_v24 = vld [vmem:[#allocation10 + $0x64] sm:$0xf]  ;;  %v4116_v59 = vld [vmem:[#allocation10 + $0x68] sm:$0xf0] }
 0x59b   : > { %v2152_v7 = vpack.c.bf16 %v2150_v54, %v2148_v35  ;;  %v2153_v52 = vpack.c.bf16 %v2151_v33, %v2149_v55  ;;  %v4067_v50 = vor.u32 %v4520_v10, %v4066_v9  ;;  %v4560_v35 = vld [vmem:[#allocation10 + $0x144] sm:$0xf0]  ;;  %v4533_v54 = vld [vmem:[#allocation10 + $0x74] sm:$0xf]  ;;  %v4124_v55 = vld [vmem:[#allocation10 + $0x78] sm:$0xf0] }
 0x59c   : > { %v4227_v33 = vor.u32 %v4560_v35, %v4226_v49  ;;  %v4274_v32 = vld [vmem:[#allocation10 + $0x1a0] sm:$0xf]  ;;  %v4172_v44 = vld [vmem:[#allocation10 + $0xd8] sm:$0xf0]  ;;  %v2156_v46 = vperm.slane %v5353_v2, 1 }
 0x59d   : > { %2491 = vmatmul.bf16.vlgmr.msrb.gmra.mxu0 %v2152_v7  ;;  %2505 = vmatmul.bf16.vlgmr.msrb.gmra.mxu1 %v2153_v52  ;;  %v4194_v9 = vld [vmem:[#allocation10 + $0x100] sm:$0xf]  ;;  %v4552_v10 = vld [vmem:[#allocation10 + $0x104] sm:$0xf0]  ;;  %v4525_v35 = vld [vmem:[#allocation10 + $0x34] sm:$0xf] }
 0x59e   : > { %2519 = vmatmul.bf16.vlgmr.msrb.gmra.mxu2 %v2152_v7  ;;  %2533 = vmatmul.bf16.vlgmr.msrb.gmra.mxu3 %v2153_v52 }
 0x59f   : > { %2996 = vmatpush.bf16.msrb.mxu0 %v4123_v8  ;;  %3010 = vmatpush.bf16.msrb.mxu1 %v4187_v53  ;;  %v4538_v8 = vld [vmem:[#allocation10 + $0x94] sm:$0xf0]  ;;  %v4298_v53 = vld [vmem:[#allocation10 + $0x1d0] sm:$0xf] }
 0x5a0   : > { %3024 = vmatpush.bf16.msrb.mxu2 %v4251_v5  ;;  %3038 = vmatpush.bf16.msrb.mxu3 %v4315_v27  ;;  %v4556_v5 = vld [vmem:[#allocation10 + $0x124] sm:$0xf0]  ;;  %v4527_v27 = vld [vmem:[#allocation10 + $0x44] sm:$0xf] }
 0x5a1   : > { %v4211_v40 = vor.u32 %v4556_v5, %v4210_v12 }
 0x5a3   : > { %2997 = vmatpush.bf16.msrb.mxu0 %v4115_v58  ;;  %3011 = vmatpush.bf16.msrb.mxu1 %v4179_v45  ;;  %v4299_v58 = vor.u32 %v4578_v57, %v4298_v53  ;;  %v4119_v45 = vor.u32 %v4531_v24, %v4116_v59 }
 0x5a4   : > { %3025 = vmatpush.bf16.msrb.mxu2 %v4243_v19  ;;  %3039 = vmatpush.bf16.msrb.mxu3 %v4307_v4  ;;  %v4547_v19 = vld [vmem:[#allocation10 + $0xe4] sm:$0xf] }
 0x5a5   : > { %v4183_v0 = vor.u32 %v4547_v19, %v4180_v21  ;;  %v4316_v19 = vld [vmem:[#allocation10 + $0x1f8] sm:$0xf0] }
 0x5a7   : > { %2998 = vmatpush.bf16.msrb.mxu0 %v4107_v51  ;;  %3012 = vmatpush.bf16.msrb.mxu1 %v4171_v6  ;;  %v4219_v51 = vor.u32 %v4558_v20, %v4218_v16  ;;  %v4549_v6 = vld [vmem:[#allocation10 + $0xf4] sm:$0xf]  ;;  %v4164_v16 = vld [vmem:[#allocation10 + $0xc8] sm:$0xf0] }
 0x5a8   : > { %3026 = vmatpush.bf16.msrb.mxu2 %v4235_v36  ;;  %3040 = vmatpush.bf16.msrb.mxu3 %v4299_v58  ;;  %v4191_v39 = vor.u32 %v4549_v6, %v4188_v3  ;;  %v4572_v36 = vld [vmem:[#allocation10 + $0x1a4] sm:$0xf0]  ;;  %v4543_v58 = vld [vmem:[#allocation10 + $0xc4] sm:$0xf]  ;;  %v4244_v3 = vld [vmem:[#allocation10 + $0x168] sm:$0xf0] }
 0x5a9   : > { %v4275_v34 = vor.u32 %v4572_v36, %v4274_v32  ;;  %v4167_v59 = vor.u32 %v4543_v58, %v4164_v16  ;;  %v2157_v32 = vperm.slane %v5353_v2, 2  ;;  %v4228_v58 = vld [vmem:[#allocation10 + $0x148] sm:$0xf0]  ;;  %v4537_v16 = vld [vmem:[#allocation10 + $0x94] sm:$0xf] }
 0x5ab   : > { %2999 = vmatpush.bf16.msrb.mxu0 %v4099_v61  ;;  %3013 = vmatpush.bf16.msrb.mxu1 %v4163_v14  ;;  %v4290_v61 = vld [vmem:[#allocation10 + $0x1c0] sm:$0xf]  ;;  %v4108_v14 = vld [vmem:[#allocation10 + $0x58] sm:$0xf0] }
 0x5ac   : > { %3027 = vmatpush.bf16.msrb.mxu2 %v4227_v33  ;;  %v4111_v15 = vor.u32 %v4529_v13, %v4108_v14  ;;  %v4541_v14 = vld [vmem:[#allocation10 + $0xb4] sm:$0xf] }
 0x5ad   : > { %2547 = vmatmul.bf16.vlgmr.msra.gmra.mxu0 %v2152_v7  ;;  %2561 = vmatmul.bf16.vlgmr.msra.gmra.mxu1 %v2153_v52 }
 0x5ae   : > { %2575 = vmatmul.bf16.vlgmr.msra.gmra.mxu2 %v2152_v7  ;;  %2589 = vmatmul.bf16.vlgmr.msra.gmra.mxu3 %v2153_v52  ;;  %v4127_v7 = vor.u32 %v4533_v54, %v4124_v55  ;;  %v4138_v52 = vld [vmem:[#allocation10 + $0x90] sm:$0xf]  ;;  %v4092_v54 = vld [vmem:[#allocation10 + $0x38] sm:$0xf0]  ;;  %v4565_v55 = vld [vmem:[#allocation10 + $0x174] sm:$0xf] }
 0x5af   : > { %3000 = vmatpush.bf16.msrb.mxu0 %v4091_v11  ;;  %3014 = vmatpush.bf16.msrb.mxu1 %v4155_v48  ;;  %v4139_v56 = vor.u32 %v4538_v8, %v4138_v52  ;;  %v4291_v11 = vor.u32 %v4576_v63, %v4290_v61  ;;  %v4554_v48 = vld [vmem:[#allocation10 + $0x114] sm:$0xf0]  ;;  %v4095_v33 = vor.u32 %v4525_v35, %v4092_v54  ;;  %v4266_v52 = vld [vmem:[#allocation10 + $0x190] sm:$0xf]  ;;  %v4308_v35 = vld [vmem:[#allocation10 + $0x1e8] sm:$0xf0] }
 0x5b0   : > { %3028 = vmatpush.bf16.msrb.mxu2 %v4219_v51  ;;  %v4203_v23 = vor.u32 %v4554_v48, %v4202_v22  ;;  %v4570_v8 = vld [vmem:[#allocation10 + $0x194] sm:$0xf0]  ;;  %v4319_v22 = vor.u32 %v4581_v17, %v4316_v19  ;;  %v4521_v48 = vld [vmem:[#allocation10 + $0x14] sm:$0xf]  ;;  %v4519_v54 = vld [vmem:[#allocation10 + $0x4] sm:$0xf] }
 0x5b1   : > { %3041 = vmatpush.bf16.msrb.mxu3 %v4291_v11  ;;  %v4267_v57 = vor.u32 %v4570_v8, %v4266_v52  ;;  %v4258_v11 = vld [vmem:[#allocation10 + $0x180] sm:$0xf]  ;;  %v4535_v17 = vld [vmem:[#allocation10 + $0x84] sm:$0xf] }
 0x5b3   : > { %3001 = vmatpush.bf16.msrb.mxu0 %v4083_v18  ;;  %3015 = vmatpush.bf16.msrb.mxu1 %v4147_v38  ;;  %v2155_v18 = vperm.slane %v5353_v2, 0  ;;  %v4545_v38 = vld [vmem:[#allocation10 + $0xd4] sm:$0xf] }
 0x5b4   : > { %3029 = vmatpush.bf16.msrb.mxu2 %v4211_v40  ;;  %v4175_v4 = vor.u32 %v4545_v38, %v4172_v44  ;;  %v4247_v40 = vor.u32 %v4563_v47, %v4244_v3  ;;  %v4148_v38 = vld [vmem:[#allocation10 + $0xa8] sm:$0xf0]  ;;  %v4579_v44 = vld [vmem:[#allocation10 + $0x1e4] sm:$0xf]  ;;  %v4557_v3 = vld [vmem:[#allocation10 + $0x134] sm:$0xf] }
 0x5b5   : > { %3042 = vmatpush.bf16.msrb.mxu3 %v4283_v1 }
 0x5b7   : > { %3002 = vmatpush.bf16.msrb.mxu0 %v4075_v31  ;;  %3016 = vmatpush.bf16.msrb.mxu1 %v4139_v56  ;;  %v4103_v31 = vor.u32 %v4527_v27, %v4100_v28 }
 0x5b8   : > { %3030 = vmatpush.bf16.msrb.mxu2 %v4203_v23  ;;  %v4076_v23 = vld [vmem:[#allocation10 + $0x18] sm:$0xf0] }
 0x5b9   : > { %3043 = vmatpush.bf16.msrb.mxu3 %v4275_v34  ;;  %v4079_v28 = vor.u32 %v4521_v48, %v4076_v23  ;;  %v4539_v34 = vld [vmem:[#allocation10 + $0xa4] sm:$0xf] }
 0x5ba   : > { %v4575_v23 = vld [vmem:[#allocation10 + $0x1c4] sm:$0xf] }
 0x5bb   : > { %3003 = vmatpush.bf16.msrb.mxu0 %v4067_v50  ;;  %3017 = vmatpush.bf16.msrb.mxu1 %v4131_v62  ;;  %v4195_v50 = vor.u32 %v4552_v10, %v4194_v9 }
 0x5bd   : > { %3031 = vmatpush.bf16.msrb.mxu2 %v4195_v50  ;;  %3044 = vmatpush.bf16.msrb.mxu3 %v4267_v57  ;;  %v4151_v50 = vor.u32 %v4539_v34, %v4148_v38  ;;  %v4559_v57 = vld [vmem:[#allocation10 + $0x144] sm:$0xf] }
 0x5bf   : > { %3052 = vmatpush.bf16.msra.mxu0 %v4127_v7  ;;  %3066 = vmatpush.bf16.msra.mxu1 %v4191_v39  ;;  %v4252_v7 = vld [vmem:[#allocation10 + $0x178] sm:$0xf0]  ;;  %v4568_v39 = vld [vmem:[#allocation10 + $0x184] sm:$0xf0] }
 0x5c0   : > { %v4255_v56 = vor.u32 %v4565_v55, %v4252_v7  ;;  %v4259_v13 = vor.u32 %v4568_v39, %v4258_v11  ;;  %v4068_v55 = vld [vmem:[#allocation10 + $0x8] sm:$0xf0]  ;;  %v4220_v11 = vld [vmem:[#allocation10 + $0x138] sm:$0xf0] }
 0x5c2   : > { %3080 = vmatpush.bf16.msra.mxu2 %v4255_v56  ;;  %3045 = vmatpush.bf16.msrb.mxu3 %v4259_v13  ;;  %v4071_v56 = vor.u32 %v4519_v54, %v4068_v55 }
 0x5c3   : > { %3053 = vmatpush.bf16.msra.mxu0 %v4119_v45  ;;  %3067 = vmatpush.bf16.msra.mxu1 %v4183_v0  ;;  %v4523_v45 = vld [vmem:[#allocation10 + $0x24] sm:$0xf] }
 0x5c4   : > { %v4087_v6 = vor.u32 %v4523_v45, %v4084_v60  ;;  %v4577_v45 = vld [vmem:[#allocation10 + $0x1d4] sm:$0xf]  ;;  %v4300_v60 = vld [vmem:[#allocation10 + $0x1d8] sm:$0xf0] }
 0x5c6   : > { %3081 = vmatpush.bf16.msra.mxu2 %v4247_v40  ;;  %3094 = vmatpush.bf16.msra.mxu3 %v4319_v22 }
 0x5c7   : > { %3054 = vmatpush.bf16.msra.mxu0 %v4111_v15  ;;  %3068 = vmatpush.bf16.msra.mxu1 %v4175_v4  ;;  %v4156_v15 = vld [vmem:[#allocation10 + $0xb8] sm:$0xf0] }
 0x5c8   : > { %v4159_v1 = vor.u32 %v4541_v14, %v4156_v15 }
 0x5cb   : > { %3055 = vmatpush.bf16.msra.mxu0 %v4103_v31  ;;  %3069 = vmatpush.bf16.msra.mxu1 %v4167_v59  ;;  %v4140_v59 = vld [vmem:[#allocation10 + $0x98] sm:$0xf0] }
 0x5cf   : > { %3056 = vmatpush.bf16.msra.mxu0 %v4095_v33  ;;  %3070 = vmatpush.bf16.msra.mxu1 %v4159_v1  ;;  %v4132_v1 = vld [vmem:[#allocation10 + $0x88] sm:$0xf0] }
 0x5d0   : > { %v4135_v48 = vor.u32 %v4535_v17, %v4132_v1 }
 0x5d3   : > { %3057 = vmatpush.bf16.msra.mxu0 %v4087_v6  ;;  %3071 = vmatpush.bf16.msra.mxu1 %v4151_v50  ;;  %v4303_v6 = vor.u32 %v4577_v45, %v4300_v60  ;;  %v4276_v60 = vld [vmem:[#allocation10 + $0x1a8] sm:$0xf0] }
 0x5d7   : > { %3058 = vmatpush.bf16.msra.mxu0 %v4079_v28 }
 0x5db   : > { %3059 = vmatpush.bf16.msra.mxu0 %v4071_v56 }
 0x61a   : > { %v2492_v29 = vpop.f32.mrf.mxu0  ;;  %v2506_v30 = vpop.f32.mrf.mxu1 }
 0x61b   : > { %v2493_v37 = vadd.f32 %v2492_v29, %v2155_v18  ;;  %v4236_v29 = vld [vmem:[#allocation10 + $0x158] sm:$0xf0] }
 0x61d   : > { %v5359_v49 = vadd.f32 %v2506_v30, %v2493_v37 }
 0x61f   : > { %v2603_v53 = vmul.f32 0.044715, %v5359_v49 }
 0x621   : > { %v2611_v20 = vmul.f32 %v2603_v53, %v5359_v49  ;;  %v2520_v51 = vpop.f32.mrf.mxu2  ;;  %v2534_v24 = vpop.f32.mrf.mxu3  ;;  %v4311_v53 = vor.u32 %v4579_v44, %v4308_v35 }
 0x622   : > { %v2521_v61 = vadd.f32 %v2520_v51, %v2156_v46  ;;  %v2494_v62 = vpop.f32.mrf.mxu0  ;;  %v2508_v63 = vpop.f32.mrf.mxu1 }
 0x623   : > { %v2619_v12 = vmul.f32 %v2611_v20, %v5359_v49  ;;  %v2495_v5 = vadd.f32 %v2494_v62, %v2155_v18  ;;  %v4561_v18 = vld [vmem:[#allocation10 + $0x154] sm:$0xf]  ;;  %3095 = vmatpush.bf16.msra.mxu3 %v4311_v53 }
 0x624   : > { %v5368_v41 = vadd.f32 %v2534_v24, %v2521_v61  ;;  %v4239_v36 = vor.u32 %v4561_v18, %v4236_v29  ;;  %v4231_v24 = vor.u32 %v4559_v57, %v4228_v58  ;;  %v4143_v61 = vor.u32 %v4537_v16, %v4140_v59  ;;  %v4292_v18 = vld [vmem:[#allocation10 + $0x1c8] sm:$0xf0]  ;;  %v4571_v57 = vld [vmem:[#allocation10 + $0x1a4] sm:$0xf] }
 0x625   : > { %v2627_v21 = vadd.f32 %v2619_v12, %v5359_v49  ;;  %v5371_v0 = vadd.f32 %v2508_v63, %v2495_v5  ;;  %v2158_v12 = vperm.slane %v5353_v2, 3  ;;  %v4223_v5 = vor.u32 %v4557_v3, %v4220_v11  ;;  %v4196_v11 = vld [vmem:[#allocation10 + $0x108] sm:$0xf0] }
 0x626   : > { %v2604_v27 = vmul.f32 0.044715, %v5368_v41  ;;  %3082 = vmatpush.bf16.msra.mxu2 %v4239_v36  ;;  %3072 = vmatpush.bf16.msra.mxu1 %v4143_v61  ;;  %v4295_v36 = vor.u32 %v4575_v23, %v4292_v18  ;;  %v4279_v3 = vor.u32 %v4571_v57, %v4276_v60  ;;  %v2596_v2 = vmul.f32 0.5, %v5368_v41 }
 0x627   : > { %v2635_v30 = vmul.f32 0.7978846, %v2627_v21  ;;  %v2607_v31 = vmul.f32 0.044715, %v5371_v0  ;;  %3096 = vmatpush.bf16.msra.mxu3 %v4303_v6  ;;  %v2599_v59 = vmul.f32 0.5, %v5371_v0 }
 0x628   : > { %v2612_v37 = vmul.f32 %v2604_v27, %v5368_v41  ;;  %v4555_v27 = vld [vmem:[#allocation10 + $0x124] sm:$0xf] }
 0x629   : > { %v2615_v4 = vmul.f32 %v2607_v31, %v5371_v0  ;;  %v2522_v9 = vpop.f32.mrf.mxu2  ;;  %v2536_v10 = vpop.f32.mrf.mxu3  ;;  %4690 = vtanh.f32 %v2635_v30 }
 0x62a   : > { %v2620_v33 = vmul.f32 %v2612_v37, %v5368_v41  ;;  %v2523_v7 = vadd.f32 %v2522_v9, %v2156_v46  ;;  %v2548_v52 = vpop.f32.mrf.mxu0  ;;  %v2562_v8 = vpop.f32.mrf.mxu1  ;;  %3083 = vmatpush.bf16.msra.mxu2 %v4231_v24  ;;  %v4212_v37 = vld [vmem:[#allocation10 + $0x128] sm:$0xf0]  ;;  %3073 = vmatpush.bf16.msra.mxu1 %v4135_v48  ;;  %v4284_v9 = vld [vmem:[#allocation10 + $0x1b8] sm:$0xf0] }
 0x62b   : > { %v2623_v20 = vmul.f32 %v2615_v4, %v5371_v0  ;;  %v2549_v51 = vadd.f32 %v2548_v52, %v2157_v32  ;;  %v4215_v44 = vor.u32 %v4555_v27, %v4212_v37  ;;  %v4573_v4 = vld [vmem:[#allocation10 + $0x1b4] sm:$0xf]  ;;  %3097 = vmatpush.bf16.msra.mxu3 %v4295_v36  ;;  %v4260_v37 = vld [vmem:[#allocation10 + $0x188] sm:$0xf0] }
 0x62c   : > { %v2628_v47 = vadd.f32 %v2620_v33, %v5368_v41  ;;  %v5385_v46 = vadd.f32 %v2536_v10, %v2523_v7  ;;  %v4287_v54 = vor.u32 %v4573_v4, %v4284_v9  ;;  %v4553_v52 = vld [vmem:[#allocation10 + $0x114] sm:$0xf] }
 0x62d   : > { %v2631_v62 = vadd.f32 %v2623_v20, %v5371_v0  ;;  %v5388_v63 = vadd.f32 %v2562_v8, %v2549_v51  ;;  %v2595_v51 = vmul.f32 0.5, %v5359_v49 }
 0x62e   : > { %v2608_v39 = vmul.f32 0.044715, %v5385_v46  ;;  %v2636_v14 = vmul.f32 0.7978846, %v2628_v47  ;;  %3084 = vmatpush.bf16.msra.mxu2 %v4223_v5  ;;  %v4551_v47 = vld [vmem:[#allocation10 + $0x104] sm:$0xf] }
 0x62f   : > { %v2639_v40 = vmul.f32 0.7978846, %v2631_v62  ;;  %v2605_v13 = vmul.f32 0.044715, %v5388_v63  ;;  %v4691_v28 = vpop.eup %4690  ;;  %3098 = vmatpush.bf16.msra.mxu3 %v4287_v54  ;;  %v4268_v5 = vld [vmem:[#allocation10 + $0x198] sm:$0xf0] }
 0x630   : > { %v2616_v15 = vmul.f32 %v2608_v39, %v5385_v46  ;;  %v2651_v7 = vadd.f32 1.0, %v4691_v28  ;;  %v4569_v39 = vld [vmem:[#allocation10 + $0x194] sm:$0xf]  ;;  %v2600_v28 = vmul.f32 0.5, %v5385_v46 }
 0x631   : > { %v2613_v19 = vmul.f32 %v2605_v13, %v5388_v63  ;;  %v2576_v21 = vpop.f32.mrf.mxu2  ;;  %v2590_v22 = vpop.f32.mrf.mxu3  ;;  %4692 = vtanh.f32 %v2639_v40 }
 0x632   : > { %v2624_v29 = vmul.f32 %v2616_v15, %v5385_v46  ;;  %v2577_v30 = vadd.f32 %v2576_v21, %v2158_v12  ;;  %v2550_v31 = vpop.f32.mrf.mxu0  ;;  %v2564_v35 = vpop.f32.mrf.mxu1  ;;  %4694 = vtanh.f32 %v2636_v14  ;;  %3085 = vmatpush.bf16.msra.mxu2 %v4215_v44  ;;  %v2659_v6 = vmul.f32 %v2651_v7, %v2595_v51 }
 0x633   : > { %v2621_v34 = vmul.f32 %v2613_v19, %v5388_v63  ;;  %v2551_v38 = vadd.f32 %v2550_v31, %v2157_v32  ;;  %v4204_v32 = vld [vmem:[#allocation10 + $0x118] sm:$0xf0]  ;;  %v4199_v14 = vor.u32 %v4551_v47, %v4196_v11  ;;  %3099 = vmatpush.bf16.msra.mxu3 %v4279_v3 }
 0x634   : > { %v2632_v10 = vadd.f32 %v2624_v29, %v5385_v46  ;;  %v5402_v50 = vadd.f32 %v2590_v22, %v2577_v30  ;;  %v4207_v56 = vor.u32 %v4553_v52, %v4204_v32  ;;  %v4271_v22 = vor.u32 %v4569_v39, %v4268_v5  ;;  %v4567_v30 = vld [vmem:[#allocation10 + $0x184] sm:$0xf] }
 0x635   : > { %v2629_v55 = vadd.f32 %v2621_v34, %v5388_v63  ;;  %v5405_v33 = vadd.f32 %v2564_v35, %v2551_v38  ;;  %v4263_v44 = vor.u32 %v4567_v30, %v4260_v37 }
 0x636   : > { %v2640_v8 = vmul.f32 0.7978846, %v2632_v10  ;;  %v2606_v53 = vmul.f32 0.044715, %v5402_v50  ;;  %3086 = vmatpush.bf16.msra.mxu2 %v4207_v56 }
 0x637   : > { %v4693_v58 = vpop.eup %4692  ;;  %v2637_v16 = vmul.f32 0.7978846, %v2629_v55  ;;  %v2609_v20 = vmul.f32 0.044715, %v5405_v33  ;;  %3100 = vmatpush.bf16.msra.mxu3 %v4271_v22  ;;  %v2597_v55 = vmul.f32 0.5, %v5388_v63  ;;  %v2601_v7 = vmul.f32 0.5, %v5405_v33 }
 0x638   : > { %v2614_v24 = vmul.f32 %v2606_v53, %v5402_v50  ;;  %v2655_v45 = vadd.f32 1.0, %v4693_v58  ;;  %4696 = vtanh.f32 %v2640_v8  ;;  %v4695_v40 = vpop.eup %4694 }
 0x639   : > { %v2617_v61 = vmul.f32 %v2609_v20, %v5405_v33  ;;  %v2578_v62 = vpop.f32.mrf.mxu2  ;;  %v2592_v17 = vpop.f32.mrf.mxu3  ;;  %v2652_v23 = vadd.f32 1.0, %v4695_v40  ;;  %4698 = vtanh.f32 %v2637_v16  ;;  %v2598_v16 = vmul.f32 0.5, %v5402_v50 }
 0x63a   : > { %v2622_v49 = vmul.f32 %v2614_v24, %v5402_v50  ;;  %v2579_v0 = vadd.f32 %v2578_v62, %v2158_v12  ;;  %v2663_v13 = vmul.f32 %v2655_v45, %v2599_v59  ;;  %3087 = vmatpush.bf16.msra.mxu2 %v4199_v14 }
 0x63b   : > { %v2625_v15 = vmul.f32 %v2617_v61, %v5405_v33  ;;  %v2660_v34 = vmul.f32 %v2652_v23, %v2596_v2  ;;  %3101 = vmatpush.bf16.msra.mxu3 %v4263_v44 }
 0x63c   : > { %v2630_v1 = vadd.f32 %v2622_v49, %v5402_v50  ;;  %v2593_v19 = vadd.f32 %v2592_v17, %v2579_v0  ;;  %v2667_v21 = vpack.c.bf16 %v2663_v13, %v2659_v6 }
 0x63d   : > { %v2633_v48 = vadd.f32 %v2625_v15, %v5405_v33  ;;  %v2101_v33 = vld [vmem:[%s5454_s15] sm:$0x3] }
 0x63e   : > { %v4697_v18 = vpop.eup %4696  ;;  %v2610_v27 = vmul.f32 0.044715, %v2593_v19  ;;  %3004 = vmatmul.bf16.vlgmr.msrb.gmra.mxu0 %v2667_v21  ;;  %v2638_v31 = vmul.f32 0.7978846, %v2630_v1  ;;  %v2602_v20 = vmul.f32 0.5, %v2593_v19  ;;  %v2672_v47 = vperm.slane %v2101_v33, 0 }
 0x63f   : > { %v2641_v12 = vmul.f32 0.7978846, %v2633_v48  ;;  %v2656_v29 = vadd.f32 1.0, %v4697_v18  ;;  %v4699_v9 = vpop.eup %4698  ;;  %v2673_v15 = vperm.slane %v2101_v33, 1 }
 0x640   : > { %v2618_v36 = vmul.f32 %v2610_v27, %v2593_v19  ;;  %v2653_v54 = vadd.f32 1.0, %v4699_v9 }
 0x641   : > { %v2664_v38 = vmul.f32 %v2656_v29, %v2600_v28  ;;  %4700 = vtanh.f32 %v2641_v12 }
 0x642   : > { %v2626_v4 = vmul.f32 %v2618_v36, %v2593_v19  ;;  %4702 = vtanh.f32 %v2638_v31  ;;  %v2661_v8 = vmul.f32 %v2653_v54, %v2597_v55 }
 0x643   : > { %v2668_v10 = vpack.c.bf16 %v2664_v38, %v2660_v34 }
 0x644   : > { %v2634_v35 = vadd.f32 %v2626_v4, %v2593_v19 }
 0x645   : > { %3018 = vmatmul.bf16.vlgmr.msrb.gmra.mxu1 %v2668_v10 }
 0x646   : > { %v2642_v41 = vmul.f32 0.7978846, %v2634_v35 }
 0x647   : > { %v4701_v46 = vpop.eup %4700 }
 0x648   : > { %v2657_v52 = vadd.f32 1.0, %v4701_v46  ;;  %4704 = vtanh.f32 %v2642_v41  ;;  %v4703_v32 = vpop.eup %4702 }
 0x649   : > { %v2654_v57 = vadd.f32 1.0, %v4703_v32 }
 0x64a   : > { %v2665_v53 = vmul.f32 %v2657_v52, %v2601_v7 }
 0x64b   : > { %v2662_v24 = vmul.f32 %v2654_v57, %v2598_v16 }
 0x64c   : > { %v2669_v56 = vpack.c.bf16 %v2665_v53, %v2661_v8 }
 0x64e   : > { %v4705_v58 = vpop.eup %4704  ;;  %3032 = vmatmul.bf16.vlgmr.msrb.gmra.mxu2 %v2669_v56  ;;  %3060 = vmatmul.bf16.vlgmr.msra.gmra.mxu0 %v2667_v21 }
 0x64f   : > { %v2658_v51 = vadd.f32 1.0, %v4705_v58 }
 0x651   : > { %v2666_v59 = vmul.f32 %v2658_v51, %v2602_v20 }
 0x653   : > { %v2670_v45 = vpack.c.bf16 %v2666_v59, %v2662_v24 }
 0x655   : > { %3046 = vmatmul.bf16.vlgmr.msrb.gmra.mxu3 %v2670_v45  ;;  %3074 = vmatmul.bf16.vlgmr.msra.gmra.mxu1 %v2668_v10 }
 0x65e   : > { %3088 = vmatmul.bf16.vlgmr.msra.gmra.mxu2 %v2669_v56 }
 0x665   : > { %3102 = vmatmul.bf16.vlgmr.msra.gmra.mxu3 %v2670_v45 }
 0x6bb   : > { %v3005_v63 = vpop.f32.mrf.mxu0 }
 0x6bc   : > { %v3006_v62 = vadd.f32 %v3005_v63, %v2672_v47 }
 0x6c2   : > { %v3019_v60 = vpop.f32.mrf.mxu1 }
 0x6c3   : > { %v3007_v50 = vpop.f32.mrf.mxu0  ;;  %v3020_v6 = vadd.f32 %v3019_v60, %v3006_v62 }
 0x6c4   : > { %v3008_v49 = vadd.f32 %v3007_v50, %v2672_v47 }
 0x6ca   : > { %v3021_v3 = vpop.f32.mrf.mxu1 }
 0x6cb   : > { %v3022_v13 = vadd.f32 %v3021_v3, %v3008_v49  ;;  %v3061_v14 = vpop.f32.mrf.mxu0 }
 0x6cc   : > { %v3062_v48 = vadd.f32 %v3061_v14, %v2673_v15 }
 0x6d1   : > { %v3033_v61 = vpop.f32.mrf.mxu2 }
 0x6d2   : > { %v3034_v11 = vadd.f32 %v3033_v61, %v3020_v6  ;;  %v3075_v1 = vpop.f32.mrf.mxu1 }
 0x6d3   : > { %v3076_v18 = vadd.f32 %v3075_v1, %v3062_v48  ;;  %v3063_v2 = vpop.f32.mrf.mxu0 }
 0x6d8   : > { %v3047_v39 = vpop.f32.mrf.mxu3 }
 0x6d9   : > { %v3048_v5 = vadd.f32 %v3047_v39, %v3034_v11  ;;  %v3035_v40 = vpop.f32.mrf.mxu2 }
 0x6da   : > { %v3036_v17 = vadd.f32 %v3035_v40, %v3022_v13  ;;  %v3077_v29 = vpop.f32.mrf.mxu1 }
 0x6db   : > { %v3108_v0 = vadd.f32 %v3048_v5, %v5303_v25  ;;  %v3064_v25 = vadd.f32 %v3063_v2, %v2673_v15 }
 0x6dd   : > { %3112 = vst [vmem:[%s681_s0] sm:$0xff] %v3108_v0  ;;  %v3078_v36 = vadd.f32 %v3077_v29, %v3064_v25 }
 0x6e0   : > { %v3049_v19 = vpop.f32.mrf.mxu3 }
 0x6e1   : > { %v3050_v21 = vadd.f32 %v3049_v19, %v3036_v17  ;;  %v3089_v22 = vpop.f32.mrf.mxu2 }
 0x6e2   : > { %v3090_v27 = vadd.f32 %v3089_v22, %v3076_v18 }
 0x6e3   : > { %v3110_v23 = vadd.f32 %v3050_v21, %v5311_v42 }
 0x6e5   : > { %3114 = vst [vmem:[%s681_s0 + $0x10] sm:$0xff] %v3110_v23 }
 0x6e8   : > { %v3103_v12 = vpop.f32.mrf.mxu3 }
 0x6e9   : > { %v3104_v28 = vadd.f32 %v3103_v12, %v3090_v27  ;;  %v3091_v31 = vpop.f32.mrf.mxu2 }
 0x6ea   : > { %v3092_v37 = vadd.f32 %v3091_v31, %v3078_v36 }
 0x6eb   : > { %v3109_v30 = vadd.f32 %v3104_v28, %v5305_v26 }
 0x6ed   : > { %3113 = vst [vmem:[%s681_s0 + $0x8] sm:$0xff] %v3109_v30 }
 0x6f0   : > { %v3105_v34 = vpop.f32.mrf.mxu3 }
 0x6f1   : > { %v3106_v38 = vadd.f32 %v3105_v34, %v3092_v37 }
 0x6f3   : > { %v3111_v44 = vadd.f32 %v3106_v38, %v5313_v43 }
 0x6f5   : > { %3115 = vst [vmem:[%s681_s0 + $0x18] sm:$0xff] %v3111_v44 }
 0x6f6 PF: > { %s30_s21 = sadd.s32 1, %s4912_s21  }
 0x6f7   : > { %p27_p7 = scmp.ge.s32.totalorder %s30_s21, 4  }
 0x6f9   :  { %29 = sbr.rel (!%p27_p7) target bundleno = 9 (0x9), region = 148 }
 0x6fe   :  { %3137 = vsyncpa [#allocation3], 1 }
 0x6ff   :  { %3139 = vsyncpa [#allocation3 + $0x1], 1 }
 0x700   :  { %3140 = vsyncpa [#allocation5], 1 }
 0x701   :  { %3141 = vsyncpa [#allocation8], 1 }
 0x702   :  { %3142 = vsyncpa [#allocation11], 1 }

// kernel: vip_block_forward.5
= control target key start
LH: loop header
LB: loop body
LE: loop exit
PB: predicated region body
PF: predicated region fallthrough
CT: control target
= control target key end

     0   :  { %s7346_s0 = inlined_call_operand.vmem [shape: f32[2,16,256], index: 0, kind: input, shape index: {}]   ;;  %s7347_s1 = inlined_call_operand.vmem [shape: f32[2,4,4], index: 1, kind: input, shape index: {}]   ;;  %s7348_s2 = inlined_call_operand.vmem [shape: f32[2,16,1], index: 2, kind: input, shape index: {}]   ;;  %s7349_s3 = inlined_call_operand.vmem [shape: f32[4,4,128], index: 3, kind: input, shape index: {}]   ;;  %s7350_s4 = inlined_call_operand.hbm [shape: bf16[256,768], index: 4, kind: input, shape index: {}]   ;;  %s7351_s5 = inlined_call_operand.vmem [shape: f32[1,768], index: 5, kind: input, shape index: {}]   ;;  %s7352_s6 = inlined_call_operand.hbm [shape: bf16[256,256], index: 6, kind: input, shape index: {}]   ;;  %s7353_s7 = inlined_call_operand.vmem [shape: f32[1,256], index: 7, kind: input, shape index: {}]   ;;  %s7354_s8 = inlined_call_operand.hbm [shape: bf16[256,512], index: 8, kind: input, shape index: {}]   ;;  %s7355_s9 = inlined_call_operand.vmem [shape: f32[1,512], index: 9, kind: input, shape index: {}]   ;;  %s7356_s10 = inlined_call_operand.hbm [shape: bf16[512,256], index: 10, kind: input, shape index: {}]   ;;  %s7357_s11 = inlined_call_operand.vmem [shape: f32[1,256], index: 11, kind: input, shape index: {}]   ;;  %s7358_s12 = inlined_call_operand.vmem [shape: f32[2,16,256], index: 12, kind: output, shape index: {}]  }
   0x1   :  { %7376 = sst [smem:[#allocation41_spill]] %s7350_s4 }
   0x2   :  { %7377 = sst [smem:[#allocation42_spill]] %s7352_s6 }
   0x3   :  { %17 = vsyncpa [#allocation4], 0 }
   0x4   :  { %18 = vsyncpa [#allocation6], 0 }
   0x5   :  { %19 = vsyncpa [#allocation9], 0  ;;  %s6208_s21 = smov 0  }
   0x6 LB: > { %7378 = sst [smem:[#allocation13_spill]] %s6129_s21  ;;  %s6217_s25 = sadd.s32 4294967295, %s6129_s21   ;;  %s6129_s21 = sphi %s6208_s21, %s25_s21  }
   0x7   : > { %s7379_s6 = sld [smem:[#allocation42_spill]]  ;;  %p4509_p0 = scmp.ge.s32.totalorder %s6129_s21, 1 }
   0x8   : > { %p323_p1 = scmp.lt.s32.totalorder %s6129_s21, 3  ;;  %p5849_p2 = scmp.eq.s32.totalorder %s6217_s25, 0 }
   0x9   : > { %s6131_s27 = smov [#allocation5]   ;;  %s7381_s4 = sld [smem:[#allocation41_spill]] }
   0xa   : > { %p6222_p3 = pnand %p4509_p0, %p323_p1  ;;  %s356_s28 = sshll.u32 %s6131_s27, 4  ;;  %s357_s28 = int_to_ptr.vmem [resolvable:$true] %s356_s28 }
   0xb   : > { %s6132_s15 = smov [#allocation3]   ;;  %s6133_s17 = smov 128  }
   0xc   : > { %p5836_p4 = pneg %p6222_p3  ;;  %s339_s16 = sshll.u32 %s6132_s15, 4  ;;  %s340_s16 = int_to_ptr.vmem [resolvable:$true] %s339_s16 }
   0xd   : > { %s354_s24 = sshll.u32 %s7379_s6, 4  ;;  %s6134_s18 = smov 8   ;;  %s355_s24 = int_to_ptr.hbm [resolvable:$true] %s354_s24 }
   0xe   : > { %p6233_p5 = pnand %p5849_p2, %p5836_p4  ;;  %s371_s22 = sshll.u32 %s7354_s8, 4  ;;  %s372_s22 = int_to_ptr.hbm [resolvable:$true] %s371_s22 }
   0xf   : > { %s337_s13 = sshll.u32 %s7381_s4, 4  ;;  %s6135_s23 = smov 384   ;;  %s338_s13 = int_to_ptr.hbm [resolvable:$true] %s337_s13 }
  0x10   : > { %5842 = dma.hbm_to_vmem [thread:$0]  (!%p6233_p5), %s355_s24, 4096, %s357_s28, [#allocation6], %s6133_s17, %s6133_s17, %s6134_s18  }
  0x11   : > { %s6136_s27 = smov 24   ;;  %s6137_s29 = smov [#allocation7]  }
  0x12   : > { %5839 = dma.hbm_to_vmem [thread:$0]  (!%p6233_p5), %s338_s13, 12288, %s340_s16, [#allocation4], %s6135_s23, %s6135_s23, %s6136_s27  }
  0x13   : > { %s373_s30 = sshll.u32 %s6137_s29, 4  ;;  %s6138_s4 = smov 256   ;;  %s374_s30 = int_to_ptr.vmem [resolvable:$true] %s373_s30 }
  0x14   : > { %s6139_s15 = smov 16   ;;  %s388_s24 = sshll.u32 %s7356_s10, 4  ;;  %s389_s24 = int_to_ptr.hbm [resolvable:$true] %s388_s24 }
  0x15   : > { %5845 = dma.hbm_to_vmem [thread:$0]  (!%p6233_p5), %s372_s22, 8192, %s374_s30, [#allocation6], %s6138_s4, %s6138_s4, %s6139_s15  }
  0x16   : > { %s6140_s28 = smov [#allocation8]   ;;  %432 = sbr.rel (%p6222_p3) target bundleno = 3473 (0xd91), region = 68 }
  0x17   : > { %s390_s19 = sshll.u32 %s6140_s28, 4  ;;  %s391_s19 = int_to_ptr.vmem [resolvable:$true] %s390_s19 }
  0x18   : > { %5848 = dma.hbm_to_vmem [thread:$0]  (!%p6233_p5), %s389_s24, 8192, %s391_s19, [#allocation9], %s6133_s17, %s6133_s17, %s6134_s18  }
  0x1b   : > { %6116 = dma.done.wait (%p5849_p2), [#allocation4], 12288  }
  0x1c   : > { %6118 = vsyncadd (%p5849_p2), [#allocation4], 4294955008 }
  0x1d   : > { %6120 = dma.done.wait (%p5849_p2), [#allocation6], 12288  }
  0x1e   : > { %6122 = vsyncadd (%p5849_p2), [#allocation6], 4294955008 }
  0x1f   : > { %6124 = dma.done.wait (%p5849_p2), [#allocation9], 8192  }
  0x20   : > { %6126 = vsyncadd (%p5849_p2), [#allocation9], 4294959104  ;;  %p499_p6 = scmp.lt.s32.totalorder %s6217_s25, 1  ;;  %v6141_v6 = vmov 256.0   ;;  %v4697_v10 = vld [vmem:[#allocation3 + $0x150] sm:$0xf] }
  0x21   : > { %5880 = vrcp.f32 %v6141_v6  ;;  %v5609_v11 = vld [vmem:[#allocation3 + $0x164] sm:$0xf0]  ;;  %v4889_v12 = vld [vmem:[#allocation3 + $0x2d0] sm:$0xf]  ;;  %v5606_v15 = vld [vmem:[#allocation3 + $0x154] sm:$0xf] }
  0x22   : > { %s7442_s25 = smov (!%p499_p6, %s6217_s25), 1  ;;  %v4698_v13 = vor.u32 %v5609_v11, %v4697_v10  ;;  %v5657_v14 = vld [vmem:[#allocation3 + $0x2e4] sm:$0xf0]  ;;  %v4699_v16 = vld [vmem:[#allocation3 + $0x168] sm:$0xf0]  ;;  %vm1400_vm7 = vcmask 1043456  }
  0x23   : > { %s5561_s4 = sshll.u32 %s7442_s25, 5  ;;  %v4890_v17 = vor.u32 %v5657_v14, %v4889_v12  ;;  %v4702_v18 = vor.u32 %v5606_v15, %v4699_v16  ;;  %v5654_v19 = vld [vmem:[#allocation3 + $0x2d4] sm:$0xf]  ;;  %v4891_v20 = vld [vmem:[#allocation3 + $0x2e8] sm:$0xf0]  ;;  %vm1548_vm8 = vcmask 1041408  }
  0x24   : > { %s6275_s26 = scalar_lea.vmem %s7346_s0, %s5561_s4  ;;  %v4673_v21 = vld [vmem:[#allocation3 + $0x120] sm:$0xf]  ;;  %1182 = vmatpush.bf16.msra.mxu0 %v4698_v13  ;;  %v4894_v22 = vor.u32 %v5654_v19, %v4891_v20  ;;  %v5603_v23 = vld [vmem:[#allocation3 + $0x134] sm:$0xf0]  ;;  %v5600_v28 = vld [vmem:[#allocation3 + $0x124] sm:$0xf]  ;;  %s517_s27 = scalar_lea.vmem %s7358_s12, %s5561_s4 }
  0x25   : > { %v6278_v0 = vld [vmem:[%s6275_s26] sm:$0xff]  ;;  %v6281_v1 = vld [vmem:[%s6275_s26 + $0x8] sm:$0xff]  ;;  %v6286_v3 = vld [vmem:[%s6275_s26 + $0x10] sm:$0xff]  ;;  %1196 = vmatpush.bf16.msra.mxu1 %v4890_v17  ;;  %1210 = vmatpush.bf16.msra.mxu2 %v4702_v18  ;;  %v4674_v26 = vor.u32 %v5603_v23, %v4673_v21  ;;  %vm1423_vm9 = vcmask 1041409   ;;  %vm1425_vm10 = vcmask 1042434   ;;  %s4522_s30 = sshll.u32 %s7442_s25, 2 }
  0x26   : > { %v533_v2 = vadd.f32 %v6281_v1, %v6278_v0  ;;  %v6289_v4 = vld [vmem:[%s6275_s26 + $0x18] sm:$0xff]  ;;  %v4865_v24 = vld [vmem:[#allocation3 + $0x2a0] sm:$0xf]  ;;  %v5651_v25 = vld [vmem:[#allocation3 + $0x2b4] sm:$0xf0]  ;;  %1224 = vmatpush.bf16.msra.mxu3 %v4894_v22  ;;  %vm1427_vm11 = vcmask 1043459   ;;  %s507_s28 = scalar_lea.vmem %s7347_s1, %s4522_s30 }
  0x27   : > { %v536_v5 = vadd.f32 %v6289_v4, %v6286_v3  ;;  %v6293_v7 = vpop.eup %5880  ;;  %v4866_v27 = vor.u32 %v5651_v25, %v4865_v24  ;;  %v4675_v29 = vld [vmem:[#allocation3 + $0x138] sm:$0xf0]  ;;  %v5648_v30 = vld [vmem:[#allocation3 + $0x2a4] sm:$0xf]  ;;  %v4649_v34 = vld [vmem:[#allocation3 + $0xf0] sm:$0xf] }
  0x28   : > { %534 = vadd.xlane.f32.xlu0 %v533_v2  ;;  %v540_v8 = vmul.f32 256.0, %v6293_v7  ;;  %v4678_v32 = vor.u32 %v5600_v28, %v4675_v29  ;;  %v4867_v33 = vld [vmem:[#allocation3 + $0x2b8] sm:$0xf0]  ;;  %v5597_v35 = vld [vmem:[#allocation3 + $0x104] sm:$0xf0]  ;;  %1183 = vmatpush.bf16.msra.mxu0 %v4674_v26  ;;  %vm544_vm0 = vweird.f32 %v6293_v7  ;;  %vm1469_vm13 = vcmask 27648  }
  0x29   : > { %v4870_v36 = vor.u32 %v5648_v30, %v4867_v33  ;;  %v4841_v37 = vld [vmem:[#allocation3 + $0x270] sm:$0xf]  ;;  %v5645_v38 = vld [vmem:[#allocation3 + $0x284] sm:$0xf0]  ;;  %v5594_v39 = vld [vmem:[#allocation3 + $0xf4] sm:$0xf]  ;;  %v4650_v40 = vor.u32 %v5597_v35, %v4649_v34  ;;  %1197 = vmatpush.bf16.msra.mxu1 %v4866_v27 }
  0x2a   : > { %v541_v9 = vsub.f32 1.0, %v540_v8  ;;  %v4651_v41 = vld [vmem:[#allocation3 + $0x108] sm:$0xf0]  ;;  %v5642_v42 = vld [vmem:[#allocation3 + $0x274] sm:$0xf]  ;;  %1211 = vmatpush.bf16.msra.mxu2 %v4678_v32  ;;  %v4842_v44 = vor.u32 %v5645_v38, %v4841_v37  ;;  %vm1544_vm14 = vcmask 31744  }
  0x2b   : > { %v4843_v43 = vld [vmem:[#allocation3 + $0x288] sm:$0xf0]  ;;  %v4654_v45 = vor.u32 %v5594_v39, %v4651_v41  ;;  %v4625_v46 = vld [vmem:[#allocation3 + $0xc0] sm:$0xf]  ;;  %v5591_v47 = vld [vmem:[#allocation3 + $0xd4] sm:$0xf0]  ;;  %1225 = vmatpush.bf16.msra.mxu3 %v4870_v36 }
  0x2c   : > { %v542_v31 = vmul.f32 %v6293_v7, %v541_v9  ;;  %v4817_v48 = vld [vmem:[#allocation3 + $0x240] sm:$0xf]  ;;  %v4846_v50 = vor.u32 %v5642_v42, %v4843_v43  ;;  %v5639_v51 = vld [vmem:[#allocation3 + $0x254] sm:$0xf0]  ;;  %v5588_v52 = vld [vmem:[#allocation3 + $0xc4] sm:$0xf]  ;;  %1184 = vmatpush.bf16.msra.mxu0 %v4650_v40  ;;  %v4626_v56 = vor.u32 %v5591_v47, %v4625_v46 }
  0x2d   : > { %v4627_v53 = vld [vmem:[#allocation3 + $0xd8] sm:$0xf0]  ;;  %v5636_v54 = vld [vmem:[#allocation3 + $0x244] sm:$0xf]  ;;  %1198 = vmatpush.bf16.msra.mxu1 %v4842_v44  ;;  %v4818_v57 = vor.u32 %v5639_v51, %v4817_v48  ;;  %v4601_v59 = vld [vmem:[#allocation3 + $0x90] sm:$0xf] }
  0x2e   : > { %v543_v49 = vadd.f32 %v6293_v7, %v542_v31  ;;  %v4819_v55 = vld [vmem:[#allocation3 + $0x258] sm:$0xf0]  ;;  %1212 = vmatpush.bf16.msra.mxu2 %v4654_v45  ;;  %v4630_v58 = vor.u32 %v5588_v52, %v4627_v53  ;;  %v5585_v60 = vld [vmem:[#allocation3 + $0xa4] sm:$0xf0]  ;;  %v4793_v61 = vld [vmem:[#allocation3 + $0x210] sm:$0xf] }
  0x2f   : > { %1226 = vmatpush.bf16.msra.mxu3 %v4846_v50  ;;  %v4822_v63 = vor.u32 %v5636_v54, %v4819_v55  ;;  %v5633_v2 = vld [vmem:[#allocation3 + $0x224] sm:$0xf0]  ;;  %v4603_v6 = vld [vmem:[#allocation3 + $0xa8] sm:$0xf0]  ;;  %v5630_v8 = vld [vmem:[#allocation3 + $0x214] sm:$0xf]  ;;  %v4602_v11 = vor.u32 %v5585_v60, %v4601_v59 }
  0x30   : > { %537 = vadd.xlane.f32.xlu0 %v536_v5  ;;  %v6300_v62 = vsel %vm544_vm0, %v6293_v7, %v543_v49  ;;  %v5582_v5 = vld [vmem:[#allocation3 + $0x94] sm:$0xf]  ;;  %v4795_v9 = vld [vmem:[#allocation3 + $0x228] sm:$0xf0]  ;;  %1185 = vmatpush.bf16.msra.mxu0 %v4626_v56  ;;  %v4794_v13 = vor.u32 %v5633_v2, %v4793_v61  ;;  %v4577_v15 = vld [vmem:[#allocation3 + $0x60] sm:$0xf] }
  0x31   : > { %7383 = vst [vmem:[#allocation14_spill] sm:$0xff] %v6300_v62  ;;  %1199 = vmatpush.bf16.msra.mxu1 %v4818_v57  ;;  %v4606_v14 = vor.u32 %v5582_v5, %v4603_v6  ;;  %v5579_v16 = vld [vmem:[#allocation3 + $0x74] sm:$0xf0]  ;;  %v4798_v7 = vor.u32 %v5630_v8, %v4795_v9  ;;  %v4769_v17 = vld [vmem:[#allocation3 + $0x1e0] sm:$0xf]  ;;  %vm2039_vm15 = vcmask 1044484  }
  0x32   : > { %1213 = vmatpush.bf16.msra.mxu2 %v4630_v58  ;;  %v5627_v18 = vld [vmem:[#allocation3 + $0x1f4] sm:$0xf0]  ;;  %v5576_v19 = vld [vmem:[#allocation3 + $0x64] sm:$0xf]  ;;  %v4579_v22 = vld [vmem:[#allocation3 + $0x78] sm:$0xf0]  ;;  %v4578_v25 = vor.u32 %v5579_v16, %v4577_v15 }
  0x33   : > { %1227 = vmatpush.bf16.msra.mxu3 %v4822_v63  ;;  %v5624_v23 = vld [vmem:[#allocation3 + $0x1e4] sm:$0xf]  ;;  %v4771_v24 = vld [vmem:[#allocation3 + $0x1f8] sm:$0xf0]  ;;  %v4770_v28 = vor.u32 %v5627_v18, %v4769_v17  ;;  %v4553_v37 = vld [vmem:[#allocation3 + $0x30] sm:$0xf] }
  0x34   : > { %1186 = vmatpush.bf16.msra.mxu0 %v4602_v11  ;;  %v4774_v29 = vor.u32 %v5624_v23, %v4771_v24  ;;  %v5573_v38 = vld [vmem:[#allocation3 + $0x44] sm:$0xf0]  ;;  %v4745_v39 = vld [vmem:[#allocation3 + $0x1b0] sm:$0xf]  ;;  %v5570_v42 = vld [vmem:[#allocation3 + $0x34] sm:$0xf] }
  0x35   : > { %1200 = vmatpush.bf16.msra.mxu1 %v4794_v13  ;;  %v4554_v40 = vor.u32 %v5573_v38, %v4553_v37  ;;  %v5621_v41 = vld [vmem:[#allocation3 + $0x1c4] sm:$0xf0]  ;;  %v4555_v43 = vld [vmem:[#allocation3 + $0x48] sm:$0xf0]  ;;  %v5618_v45 = vld [vmem:[#allocation3 + $0x1b4] sm:$0xf] }
  0x36   : > { %1214 = vmatpush.bf16.msra.mxu2 %v4606_v14  ;;  %v4558_v44 = vor.u32 %v5570_v42, %v4555_v43  ;;  %v4529_v47 = vld [vmem:[#allocation3] sm:$0xf]  ;;  %v5567_v48 = vld [vmem:[#allocation3 + $0x14] sm:$0xf0]  ;;  %v5564_v52 = vld [vmem:[#allocation3 + $0x4] sm:$0xf] }
  0x37   : > { %1228 = vmatpush.bf16.msra.mxu3 %v4798_v7  ;;  %v4721_v49 = vld [vmem:[#allocation3 + $0x180] sm:$0xf]  ;;  %v4530_v50 = vor.u32 %v5567_v48, %v4529_v47  ;;  %v5615_v51 = vld [vmem:[#allocation3 + $0x194] sm:$0xf0]  ;;  %v4531_v53 = vld [vmem:[#allocation3 + $0x18] sm:$0xf0] }
  0x38   : > { %1187 = vmatpush.bf16.msra.mxu0 %v4578_v25  ;;  %v4722_v54 = vor.u32 %v5615_v51, %v4721_v49  ;;  %v4534_v55 = vor.u32 %v5564_v52, %v4531_v53  ;;  %v5612_v56 = vld [vmem:[#allocation3 + $0x184] sm:$0xf]  ;;  %v4723_v57 = vld [vmem:[#allocation3 + $0x198] sm:$0xf0]  ;;  %v4705_v58 = vld [vmem:[#allocation3 + $0x158] sm:$0xf] }
  0x39   : > { %1201 = vmatpush.bf16.msra.mxu1 %v4770_v28  ;;  %v4726_v59 = vor.u32 %v5612_v56, %v4723_v57  ;;  %v5610_v60 = vld [vmem:[#allocation3 + $0x16c] sm:$0xf0]  ;;  %v4897_v61 = vld [vmem:[#allocation3 + $0x2d8] sm:$0xf]  ;;  %v5607_v6 = vld [vmem:[#allocation3 + $0x15c] sm:$0xf] }
  0x3a   : > { %v5658_v63 = vld [vmem:[#allocation3 + $0x2ec] sm:$0xf0]  ;;  %v4706_v2 = vor.u32 %v5610_v60, %v4705_v58  ;;  %v4707_v8 = vld [vmem:[#allocation3 + $0x170] sm:$0xf0]  ;;  %v5655_v9 = vld [vmem:[#allocation3 + $0x2dc] sm:$0xf] }
  0x3b   : > { %1229 = vmatpush.bf16.msra.mxu3 %v4774_v29  ;;  %v4898_v5 = vor.u32 %v5658_v63, %v4897_v61  ;;  %v4899_v11 = vld [vmem:[#allocation3 + $0x2f0] sm:$0xf0]  ;;  %v5604_v13 = vld [vmem:[#allocation3 + $0x13c] sm:$0xf0]  ;;  %v4873_v16 = vld [vmem:[#allocation3 + $0x2a8] sm:$0xf] }
  0x3c   : > { %1188 = vmatpush.bf16.msra.mxu0 %v4554_v40  ;;  %v4902_v14 = vor.u32 %v5655_v9, %v4899_v11  ;;  %v5652_v7 = vld [vmem:[#allocation3 + $0x2bc] sm:$0xf0]  ;;  %v5601_v17 = vld [vmem:[#allocation3 + $0x12c] sm:$0xf]  ;;  %v4875_v23 = vld [vmem:[#allocation3 + $0x2c0] sm:$0xf0] }
  0x3d   : > { %v4874_v18 = vor.u32 %v5652_v7, %v4873_v16  ;;  %v4849_v28 = vld [vmem:[#allocation3 + $0x278] sm:$0xf]  ;;  %v5646_v29 = vld [vmem:[#allocation3 + $0x28c] sm:$0xf0]  ;;  %v4633_v38 = vld [vmem:[#allocation3 + $0xc8] sm:$0xf] }
  0x3e   : > { %v4825_v40 = vld [vmem:[#allocation3 + $0x248] sm:$0xf]  ;;  %v5640_v42 = vld [vmem:[#allocation3 + $0x25c] sm:$0xf0]  ;;  %v5589_v43 = vld [vmem:[#allocation3 + $0xcc] sm:$0xf] }
  0x3f   : > { %v4609_v48 = vld [vmem:[#allocation3 + $0x98] sm:$0xf]  ;;  %v5586_v49 = vld [vmem:[#allocation3 + $0xac] sm:$0xf0]  ;;  %v5583_v53 = vld [vmem:[#allocation3 + $0x9c] sm:$0xf] }
  0x40   : > { %1189 = vmatpush.bf16.msra.mxu0 %v4530_v50  ;;  %v4801_v50 = vld [vmem:[#allocation3 + $0x218] sm:$0xf]  ;;  %v4610_v51 = vor.u32 %v5586_v49, %v4609_v48  ;;  %v5634_v52 = vld [vmem:[#allocation3 + $0x22c] sm:$0xf0]  ;;  %v5631_v57 = vld [vmem:[#allocation3 + $0x21c] sm:$0xf] }
  0x41   : > { %v4803_v58 = vld [vmem:[#allocation3 + $0x230] sm:$0xf0]  ;;  %v4585_v60 = vld [vmem:[#allocation3 + $0x68] sm:$0xf]  ;;  %v5580_v61 = vld [vmem:[#allocation3 + $0x7c] sm:$0xf0] }
  0x42   : > { %v4777_v63 = vld [vmem:[#allocation3 + $0x1e8] sm:$0xf]  ;;  %v5625_v11 = vld [vmem:[#allocation3 + $0x1ec] sm:$0xf]  ;;  %v4753_v16 = vld [vmem:[#allocation3 + $0x1b8] sm:$0xf] }
  0x43   : > { %vm2042_vm0 = vcmask 28673   ;;  %s5562_s19 = sshll.u32 %s7442_s25, 4 }
  0x44   : > { %1238 = vmatpush.bf16.msrb.mxu0 %v4706_v2  ;;  %v4586_v2 = vor.u32 %v5580_v61, %v4585_v60  ;;  %v5659_v60 = vld [vmem:[#allocation3 + $0x2f4] sm:$0xf0]  ;;  %v5608_v61 = vld [vmem:[#allocation3 + $0x164] sm:$0xf]  ;;  %s7124_s13 = scalar_lea.vmem %s7348_s2, %s5562_s19 }
  0x9b   : > { %v535_v10 = vpop.xlane.xlu0 %534 }
  0x9c   : > { %v546_v12 = vmul.f32 %v6300_v62, %v535_v10  ;;  %v4710_v10 = vor.u32 %v5607_v6, %v4707_v8  ;;  %v5577_v6 = vld [vmem:[#allocation3 + $0x6c] sm:$0xf]  ;;  %v4587_v8 = vld [vmem:[#allocation3 + $0x80] sm:$0xf0] }
  0x9e   : > { %v6304_v20 = vsub.f32 %v6278_v0, %v546_v12  ;;  %v6307_v21 = vsub.f32 %v6281_v1, %v546_v12  ;;  %v4582_v0 = vor.u32 %v5576_v19, %v4579_v22  ;;  %v4681_v12 = vld [vmem:[#allocation3 + $0x128] sm:$0xf]  ;;  %v4683_v19 = vld [vmem:[#allocation3 + $0x140] sm:$0xf0]  ;;  %v5649_v22 = vld [vmem:[#allocation3 + $0x2ac] sm:$0xf] }
  0x9f   : > { %v4682_v15 = vor.u32 %v5604_v13, %v4681_v12  ;;  %v4686_v24 = vor.u32 %v5601_v17, %v4683_v19  ;;  %v4878_v25 = vor.u32 %v5649_v22, %v4875_v23  ;;  %v4779_v12 = vld [vmem:[#allocation3 + $0x200] sm:$0xf0]  ;;  %v5622_v17 = vld [vmem:[#allocation3 + $0x1cc] sm:$0xf0]  ;;  %v4563_v19 = vld [vmem:[#allocation3 + $0x50] sm:$0xf0] }
  0xa0   : > { %v552_v26 = vmul.f32 %v6304_v20, %v6304_v20  ;;  %v553_v27 = vmul.f32 %v6307_v21, %v6307_v21  ;;  %1215 = vmatpush.bf16.msra.mxu2 %v4582_v0  ;;  %v4782_v13 = vor.u32 %v5625_v11, %v4779_v12  ;;  %v4754_v22 = vor.u32 %v5622_v17, %v4753_v16  ;;  %v5605_v16 = vld [vmem:[#allocation3 + $0x144] sm:$0xf0] }
  0xa1   : > { %1239 = vmatpush.bf16.msrb.mxu0 %v4682_v15  ;;  %v5574_v15 = vld [vmem:[#allocation3 + $0x4c] sm:$0xf0] }
  0xa2   : > { %v556_v30 = vadd.f32 %v553_v27, %v552_v26  ;;  %v4657_v26 = vld [vmem:[#allocation3 + $0xf8] sm:$0xf]  ;;  %v5598_v27 = vld [vmem:[#allocation3 + $0x10c] sm:$0xf0] }
  0xa3   : > { %v538_v1 = vpop.xlane.xlu0 %537  ;;  %v4658_v0 = vor.u32 %v5598_v27, %v4657_v26 }
  0xa4   : > { %v547_v31 = vmul.f32 %v6300_v62, %v538_v1  ;;  %557 = vadd.xlane.f32.xlu1 %v556_v30  ;;  %1216 = vmatpush.bf16.msra.mxu2 %v4558_v44  ;;  %v5595_v30 = vld [vmem:[#allocation3 + $0xfc] sm:$0xf]  ;;  %v4659_v1 = vld [vmem:[#allocation3 + $0x110] sm:$0xf0]  ;;  %v4826_v44 = vor.u32 %v5640_v42, %v4825_v40  ;;  %v4731_v40 = vld [vmem:[#allocation3 + $0x1a0] sm:$0xf0] }
  0xa5   : > { %1240 = vmatpush.bf16.msrb.mxu0 %v4658_v0  ;;  %v4537_v0 = vld [vmem:[#allocation3 + $0x8] sm:$0xf] }
  0xa6   : > { %v6315_v32 = vsub.f32 %v6286_v3, %v547_v31  ;;  %v6318_v33 = vsub.f32 %v6289_v4, %v547_v31  ;;  %v4746_v3 = vor.u32 %v5621_v41, %v4745_v39  ;;  %v4747_v4 = vld [vmem:[#allocation3 + $0x1c8] sm:$0xf0]  ;;  %v4850_v31 = vor.u32 %v5646_v29, %v4849_v28  ;;  %v5592_v39 = vld [vmem:[#allocation3 + $0xdc] sm:$0xf0] }
  0xa7   : > { %v4750_v46 = vor.u32 %v5618_v45, %v4747_v4  ;;  %v4634_v41 = vor.u32 %v5592_v39, %v4633_v38  ;;  %v5637_v4 = vld [vmem:[#allocation3 + $0x24c] sm:$0xf]  ;;  %v5568_v29 = vld [vmem:[#allocation3 + $0x1c] sm:$0xf0] }
  0xa8   : > { %v554_v34 = vmul.f32 %v6315_v32, %v6315_v32  ;;  %v555_v35 = vmul.f32 %v6318_v33, %v6318_v33  ;;  %1202 = vmatpush.bf16.msra.mxu1 %v4746_v3  ;;  %1217 = vmatpush.bf16.msra.mxu2 %v4534_v55  ;;  %v4635_v3 = vld [vmem:[#allocation3 + $0xe0] sm:$0xf0]  ;;  %v4802_v55 = vor.u32 %v5634_v52, %v4801_v50  ;;  %v5613_v39 = vld [vmem:[#allocation3 + $0x18c] sm:$0xf] }
  0xa9   : > { %1230 = vmatpush.bf16.msra.mxu3 %v4750_v46  ;;  %v4638_v45 = vor.u32 %v5589_v43, %v4635_v3  ;;  %v4827_v46 = vld [vmem:[#allocation3 + $0x260] sm:$0xf0]  ;;  %1241 = vmatpush.bf16.msrb.mxu0 %v4634_v41  ;;  %v4734_v41 = vor.u32 %v5613_v39, %v4731_v40  ;;  %v4833_v40 = vld [vmem:[#allocation3 + $0x250] sm:$0xf] }
  0xaa   : > { %v559_v36 = vadd.f32 %v555_v35, %v554_v34  ;;  %v4662_v34 = vor.u32 %v5595_v30, %v4659_v1  ;;  %v5643_v35 = vld [vmem:[#allocation3 + $0x27c] sm:$0xf]  ;;  %v4830_v47 = vor.u32 %v5637_v4, %v4827_v46  ;;  %v4729_v30 = vld [vmem:[#allocation3 + $0x188] sm:$0xf]  ;;  %v4538_v1 = vor.u32 %v5568_v29, %v4537_v0  ;;  %v5647_v0 = vld [vmem:[#allocation3 + $0x294] sm:$0xf0] }
  0xab   : > { %v5596_v29 = vld [vmem:[#allocation3 + $0x104] sm:$0xf] }
  0xac   : > { %560 = vadd.xlane.f32.xlu1 %v559_v36  ;;  %1203 = vmatpush.bf16.msra.mxu1 %v4722_v54  ;;  %v4851_v36 = vld [vmem:[#allocation3 + $0x290] sm:$0xf0] }
  0xad   : > { %1231 = vmatpush.bf16.msra.mxu3 %v4726_v59  ;;  %1266 = vmatpush.bf16.msrb.mxu2 %v4710_v10  ;;  %v4854_v37 = vor.u32 %v5643_v35, %v4851_v36  ;;  %v4611_v54 = vld [vmem:[#allocation3 + $0xb0] sm:$0xf0]  ;;  %v4806_v59 = vor.u32 %v5631_v57, %v4803_v58  ;;  %v4590_v10 = vor.u32 %v5577_v6, %v4587_v8  ;;  %v4539_v35 = vld [vmem:[#allocation3 + $0x20] sm:$0xf0]  ;;  %v5611_v57 = vld [vmem:[#allocation3 + $0x174] sm:$0xf0] }
  0xae   : > { %v4614_v56 = vor.u32 %v5583_v53, %v4611_v54  ;;  %1242 = vmatpush.bf16.msrb.mxu0 %v4610_v51  ;;  %v4715_v8 = vld [vmem:[#allocation3 + $0x178] sm:$0xf0] }
  0xb0   : > { %1252 = vmatpush.bf16.msrb.mxu1 %v4898_v5  ;;  %v5628_v5 = vld [vmem:[#allocation3 + $0x1fc] sm:$0xf0] }
  0xb1   : > { %1280 = vmatpush.bf16.msrb.mxu3 %v4902_v14  ;;  %1267 = vmatpush.bf16.msrb.mxu2 %v4686_v24  ;;  %v4778_v9 = vor.u32 %v5628_v5, %v4777_v63  ;;  %v4561_v14 = vld [vmem:[#allocation3 + $0x38] sm:$0xf]  ;;  %v5619_v24 = vld [vmem:[#allocation3 + $0x1bc] sm:$0xf] }
  0xb2   : > { %1243 = vmatpush.bf16.msrb.mxu0 %v4586_v2  ;;  %v4562_v7 = vor.u32 %v5574_v15, %v4561_v14  ;;  %v4689_v15 = vld [vmem:[#allocation3 + $0x130] sm:$0xf] }
  0xb4   : > { %1253 = vmatpush.bf16.msrb.mxu1 %v4874_v18  ;;  %v5571_v18 = vld [vmem:[#allocation3 + $0x3c] sm:$0xf] }
  0xb5   : > { %1281 = vmatpush.bf16.msrb.mxu3 %v4878_v25  ;;  %1268 = vmatpush.bf16.msrb.mxu2 %v4662_v34  ;;  %v4566_v23 = vor.u32 %v5571_v18, %v4563_v19  ;;  %v4755_v25 = vld [vmem:[#allocation3 + $0x1d0] sm:$0xf0]  ;;  %v5565_v34 = vld [vmem:[#allocation3 + $0xc] sm:$0xf]  ;;  %v5653_v18 = vld [vmem:[#allocation3 + $0x2c4] sm:$0xf0] }
  0xb6   : > { %v4758_v26 = vor.u32 %v5619_v24, %v4755_v25  ;;  %1244 = vmatpush.bf16.msrb.mxu0 %v4562_v7  ;;  %v4542_v38 = vor.u32 %v5565_v34, %v4539_v35  ;;  %v4718_v7 = vor.u32 %v5608_v61, %v4715_v8  ;;  %v4883_v19 = vld [vmem:[#allocation3 + $0x2c8] sm:$0xf0]  ;;  %v4665_v24 = vld [vmem:[#allocation3 + $0x100] sm:$0xf]  ;;  %v5599_v25 = vld [vmem:[#allocation3 + $0x114] sm:$0xf0] }
  0xb7   : > { %v4666_v34 = vor.u32 %v5599_v25, %v4665_v24  ;;  %v5626_v8 = vld [vmem:[#allocation3 + $0x1f4] sm:$0xf]  ;;  %v5569_v24 = vld [vmem:[#allocation3 + $0x24] sm:$0xf0] }
  0xb8   : > { %1254 = vmatpush.bf16.msrb.mxu1 %v4850_v31  ;;  %v5616_v31 = vld [vmem:[#allocation3 + $0x19c] sm:$0xf0] }
  0xb9   : > { %1282 = vmatpush.bf16.msrb.mxu3 %v4854_v37  ;;  %1269 = vmatpush.bf16.msrb.mxu2 %v4638_v45  ;;  %v4730_v37 = vor.u32 %v5616_v31, %v4729_v30  ;;  %v4667_v30 = vld [vmem:[#allocation3 + $0x118] sm:$0xf0] }
  0xba   : > { %1245 = vmatpush.bf16.msrb.mxu0 %v4538_v1  ;;  %v5644_v1 = vld [vmem:[#allocation3 + $0x284] sm:$0xf]  ;;  %v4859_v31 = vld [vmem:[#allocation3 + $0x298] sm:$0xf0] }
  0xbb   : > { %v4862_v39 = vor.u32 %v5644_v1, %v4859_v31  ;;  %v4739_v1 = vld [vmem:[#allocation3 + $0x1a8] sm:$0xf0] }
  0xbc   : > { %1255 = vmatpush.bf16.msrb.mxu1 %v4826_v44 }
  0xbd   : > { %1283 = vmatpush.bf16.msrb.mxu3 %v4830_v47  ;;  %1270 = vmatpush.bf16.msrb.mxu2 %v4614_v56  ;;  %v4713_v56 = vld [vmem:[#allocation3 + $0x160] sm:$0xf] }
  0xc0   : > { %1256 = vmatpush.bf16.msrb.mxu1 %v4802_v55 }
  0xc1   : > { %1284 = vmatpush.bf16.msrb.mxu3 %v4806_v59  ;;  %1271 = vmatpush.bf16.msrb.mxu2 %v4590_v10  ;;  %v4905_v59 = vld [vmem:[#allocation3 + $0x2e0] sm:$0xf]  ;;  %v4907_v10 = vld [vmem:[#allocation3 + $0x2f8] sm:$0xf0] }
  0xc2   : > { %v4906_v14 = vor.u32 %v5659_v60, %v4905_v59  ;;  %v5581_v59 = vld [vmem:[#allocation3 + $0x84] sm:$0xf0] }
  0xc4   : > { %1257 = vmatpush.bf16.msrb.mxu1 %v4778_v9  ;;  %v5656_v9 = vld [vmem:[#allocation3 + $0x2e4] sm:$0xf] }
  0xc5   : > { %1285 = vmatpush.bf16.msrb.mxu3 %v4782_v13  ;;  %1272 = vmatpush.bf16.msrb.mxu2 %v4566_v23  ;;  %v4714_v13 = vor.u32 %v5611_v57, %v4713_v56  ;;  %v4910_v17 = vor.u32 %v5656_v9, %v4907_v10  ;;  %v4787_v9 = vld [vmem:[#allocation3 + $0x208] sm:$0xf0] }
  0xc8   : > { %1258 = vmatpush.bf16.msrb.mxu1 %v4754_v22  ;;  %v4690_v22 = vor.u32 %v5605_v16, %v4689_v15  ;;  %v5575_v15 = vld [vmem:[#allocation3 + $0x54] sm:$0xf0] }
  0xc9   : > { %1286 = vmatpush.bf16.msrb.mxu3 %v4758_v26  ;;  %1273 = vmatpush.bf16.msrb.mxu2 %v4542_v38  ;;  %v4670_v38 = vor.u32 %v5596_v29, %v4667_v30  ;;  %v4547_v29 = vld [vmem:[#allocation3 + $0x28] sm:$0xf0]  ;;  %v5614_v30 = vld [vmem:[#allocation3 + $0x194] sm:$0xf] }
  0xcc   : > { %1259 = vmatpush.bf16.msrb.mxu1 %v4730_v37  ;;  %v5593_v37 = vld [vmem:[#allocation3 + $0xe4] sm:$0xf0] }
  0xcd   : > { %1287 = vmatpush.bf16.msrb.mxu3 %v4734_v41  ;;  %v5641_v41 = vld [vmem:[#allocation3 + $0x264] sm:$0xf0] }
 0x117   : > { %v558_v27 = vpop.xlane.xlu1 %557 }
 0x118   : > { %v562_v28 = vmul.f32 %v558_v27, %v6300_v62 }
 0x11a   : > { %v564_v36 = vadd.f32 1e-05, %v562_v28  ;;  %v4857_v28 = vld [vmem:[#allocation3 + $0x280] sm:$0xf] }
 0x11b   : > { %v4858_v35 = vor.u32 %v5647_v0, %v4857_v28  ;;  %v5617_v28 = vld [vmem:[#allocation3 + $0x1a4] sm:$0xf0]  ;;  %v5566_v0 = vld [vmem:[#allocation3 + $0x14] sm:$0xf] }
 0x11c   : > { %5882 = vrsqrt.f32 %v564_v36  ;;  %vm572_vm2 = vweird.f32 %v564_v36 }
 0x11f   : > { %v561_v42 = vpop.xlane.xlu1 %560 }
 0x120   : > { %v563_v43 = vmul.f32 %v561_v42, %v6300_v62  ;;  %v5590_v42 = vld [vmem:[#allocation3 + $0xd4] sm:$0xf] }
 0x122   : > { %v5883_v3 = vpop.eup %5882  ;;  %v565_v44 = vadd.f32 1e-05, %v563_v43  ;;  %v4643_v43 = vld [vmem:[#allocation3 + $0xe8] sm:$0xf0] }
 0x123   : > { %v567_v45 = vmul.f32 %v5883_v3, %v564_v36  ;;  %vm573_vm1 = vweird.f32 %v5883_v3  ;;  %v4641_v36 = vld [vmem:[#allocation3 + $0xd0] sm:$0xf] }
 0x124   : > { %5884 = vrsqrt.f32 %v565_v44  ;;  %vm574_vm4 = vmor %vm572_vm2, %vm573_vm1  ;;  %vm582_vm5 = vweird.f32 %v565_v44  ;;  %vm2458_vm1 = vcmask 1045509   ;;  %vm2461_vm2 = vcmask 29698  }
 0x125   : > { %v568_v4 = vmul.f32 %v5883_v3, %v567_v45  ;;  %v4642_v45 = vor.u32 %v5593_v37, %v4641_v36  ;;  %v4742_v36 = vor.u32 %v5614_v30, %v4739_v1  ;;  %v6349_v37 = vld [vmem:[%s7351_s5] sm:$0x3f]  ;;  %v5689_v1 = vld [vmem:[#allocation5 + $0xe4] sm:$0xf0] }
 0x127   : > { %v569_v46 = vmul.f32 0.5, %v568_v4  ;;  %v4834_v4 = vor.u32 %v5641_v41, %v4833_v40 }
 0x129   : > { %v570_v48 = vsub.f32 1.5, %v569_v46  ;;  %v4617_v46 = vld [vmem:[#allocation3 + $0xa0] sm:$0xf] }
 0x12a   : > { %v5885_v47 = vpop.eup %5884 }
 0x12b   : > { %v577_v49 = vmul.f32 %v5885_v47, %v565_v44  ;;  %v571_v51 = vmul.f32 %v5883_v3, %v570_v48  ;;  %vm583_vm3 = vweird.f32 %v5885_v47  ;;  %v4835_v44 = vld [vmem:[#allocation3 + $0x268] sm:$0xf0]  ;;  %v4646_v48 = vor.u32 %v5590_v42, %v4643_v43 }
 0x12c   : > { %vm584_vm6 = vmor %vm582_vm5, %vm583_vm3  ;;  %v691_v43 = vperm.slane %v6349_v37, 1  ;;  %vm2869_vm3 = vcmask 1046534  }
 0x12d   : > { %v578_v50 = vmul.f32 %v5885_v47, %v577_v49  ;;  %v575_v54 = vsel %vm574_vm4, %v5883_v3, %v571_v51  ;;  %v5638_v3 = vld [vmem:[#allocation3 + $0x254] sm:$0xf]  ;;  %v5635_v51 = vld [vmem:[#allocation3 + $0x234] sm:$0xf0]  ;;  %vm2872_vm4 = vcmask 30723  }
 0x12e   : > { %v586_v63 = vmul.f32 %v575_v54, %v6304_v20  ;;  %v587_v2 = vmul.f32 %v575_v54, %v6307_v21  ;;  %v4881_v20 = vld [vmem:[#allocation3 + $0x2b0] sm:$0xf]  ;;  %v5602_v21 = vld [vmem:[#allocation3 + $0x134] sm:$0xf]  ;;  %v4838_v49 = vor.u32 %v5638_v3, %v4835_v44  ;;  %v5632_v54 = vld [vmem:[#allocation3 + $0x224] sm:$0xf] }
 0x12f   : > { %v579_v52 = vmul.f32 0.5, %v578_v50  ;;  %v4882_v23 = vor.u32 %v5653_v18, %v4881_v20  ;;  %v4809_v50 = vld [vmem:[#allocation3 + $0x220] sm:$0xf]  ;;  %v5623_v20 = vld [vmem:[#allocation3 + $0x1d4] sm:$0xf0] }
 0x130   : > { %v4810_v57 = vor.u32 %v5635_v51, %v4809_v50  ;;  %v5572_v18 = vld [vmem:[#allocation3 + $0x44] sm:$0xf] }
 0x131   : > { %v580_v53 = vsub.f32 1.5, %v579_v52  ;;  %v5584_v52 = vld [vmem:[#allocation3 + $0xa4] sm:$0xf] }
 0x133   : > { %v581_v55 = vmul.f32 %v5885_v47, %v580_v53  ;;  %v4619_v53 = vld [vmem:[#allocation3 + $0xb8] sm:$0xf0] }
 0x134   : > { %v4622_v60 = vor.u32 %v5584_v52, %v4619_v53  ;;  %v6371_v53 = vld [vmem:[%s7349_s3 + $0x4] sm:$0xf] }
 0x135   : > { %v585_v58 = vsel %vm584_vm6, %v5885_v47, %v581_v55  ;;  %v5587_v47 = vld [vmem:[#allocation3 + $0xb4] sm:$0xf0]  ;;  %v4811_v55 = vld [vmem:[#allocation3 + $0x238] sm:$0xf0] }
 0x136   : > { %v588_v5 = vmul.f32 %v585_v58, %v6315_v32  ;;  %v589_v6 = vmul.f32 %v585_v58, %v6318_v33  ;;  %v4691_v32 = vld [vmem:[#allocation3 + $0x148] sm:$0xf0]  ;;  %v5650_v33 = vld [vmem:[#allocation3 + $0x2b4] sm:$0xf]  ;;  %v4618_v56 = vor.u32 %v5587_v47, %v4617_v46  ;;  %v4593_v58 = vld [vmem:[#allocation3 + $0x70] sm:$0xf]  ;;  %v4814_v61 = vor.u32 %v5632_v54, %v4811_v55 }
 0x137   : > { %v4694_v26 = vor.u32 %v5602_v21, %v4691_v32  ;;  %v4886_v27 = vor.u32 %v5650_v33, %v4883_v19  ;;  %v4594_v10 = vor.u32 %v5581_v59, %v4593_v58  ;;  %v4571_v21 = vld [vmem:[#allocation3 + $0x58] sm:$0xf0]  ;;  %v5620_v32 = vld [vmem:[#allocation3 + $0x1c4] sm:$0xf]  ;;  %v7360_v55 = vperm.slane %v6349_v37, 2 }
 0x138   : > { %v6330_v11 = vpack.c.bf16 %v588_v5, %v586_v63  ;;  %v6332_v12 = vpack.c.bf16 %v589_v6, %v587_v2  ;;  %v4785_v63 = vld [vmem:[#allocation3 + $0x1f0] sm:$0xf]  ;;  %v5629_v2 = vld [vmem:[#allocation3 + $0x204] sm:$0xf0]  ;;  %v5578_v5 = vld [vmem:[#allocation3 + $0x74] sm:$0xf]  ;;  %v4574_v25 = vor.u32 %v5572_v18, %v4571_v21 }
 0x139   : > { %v4595_v6 = vld [vmem:[#allocation3 + $0x88] sm:$0xf0]  ;;  %v4763_v33 = vld [vmem:[#allocation3 + $0x1d8] sm:$0xf0] }
 0x13a   : > { %1190 = vmatmul.bf16.vlgmr.msra.gmra.mxu0 %v6330_v11  ;;  %1204 = vmatmul.bf16.vlgmr.msra.gmra.mxu1 %v6332_v12  ;;  %v4598_v16 = vor.u32 %v5578_v5, %v4595_v6  ;;  %v7361_v5 = vperm.slane %v6349_v37, 3  ;;  %v6383_v6 = vld [vmem:[%s7349_s3 + $0xc] sm:$0xf] }
 0x13b   : > { %1218 = vmatmul.bf16.vlgmr.msra.gmra.mxu2 %v6330_v11  ;;  %1232 = vmatmul.bf16.vlgmr.msra.gmra.mxu3 %v6332_v12 }
 0x13c   : > { %1294 = vmatpush.bf16.msra.mxu0 %v4714_v13  ;;  %1308 = vmatpush.bf16.msra.mxu1 %v4906_v14  ;;  %v4786_v13 = vor.u32 %v5629_v2, %v4785_v63  ;;  %v4569_v14 = vld [vmem:[#allocation3 + $0x40] sm:$0xf] }
 0x13d   : > { %1322 = vmatpush.bf16.msra.mxu2 %v4718_v7  ;;  %1336 = vmatpush.bf16.msra.mxu3 %v4910_v17  ;;  %v4790_v7 = vor.u32 %v5626_v8, %v4787_v9  ;;  %v4761_v17 = vld [vmem:[#allocation3 + $0x1c0] sm:$0xf]  ;;  %v4570_v19 = vor.u32 %v5575_v15, %v4569_v14 }
 0x140   : > { %1295 = vmatpush.bf16.msra.mxu0 %v4690_v22  ;;  %1309 = vmatpush.bf16.msra.mxu1 %v4882_v23  ;;  %v4762_v22 = vor.u32 %v5623_v20, %v4761_v17  ;;  %v4545_v23 = vld [vmem:[#allocation3 + $0x10] sm:$0xf]  ;;  %v6389_v20 = vld [vmem:[%s7349_s3 + $0x8] sm:$0xf] }
 0x141   : > { %1323 = vmatpush.bf16.msra.mxu2 %v4694_v26  ;;  %1337 = vmatpush.bf16.msra.mxu3 %v4886_v27  ;;  %v4766_v26 = vor.u32 %v5620_v32, %v4763_v33  ;;  %v4737_v27 = vld [vmem:[#allocation3 + $0x190] sm:$0xf]  ;;  %v4546_v31 = vor.u32 %v5569_v24, %v4545_v23 }
 0x144   : > { %1296 = vmatpush.bf16.msra.mxu0 %v4666_v34  ;;  %1310 = vmatpush.bf16.msra.mxu1 %v4858_v35  ;;  %v4738_v34 = vor.u32 %v5617_v28, %v4737_v27  ;;  %v4550_v35 = vor.u32 %v5566_v0, %v4547_v29  ;;  %v4963_v27 = vld [vmem:[#allocation5 + $0xe0] sm:$0xf] }
 0x145   : > { %1324 = vmatpush.bf16.msra.mxu2 %v4670_v38  ;;  %1338 = vmatpush.bf16.msra.mxu3 %v4862_v39  ;;  %v690_v38 = vperm.slane %v6349_v37, 0 }
 0x148   : > { %1297 = vmatpush.bf16.msra.mxu0 %v4642_v45  ;;  %1311 = vmatpush.bf16.msra.mxu1 %v4834_v4 }
 0x149   : > { %1325 = vmatpush.bf16.msra.mxu2 %v4646_v48  ;;  %1339 = vmatpush.bf16.msra.mxu3 %v4838_v49 }
 0x14a   : > { %1246 = vmatmul.bf16.vlgmr.msrb.gmra.mxu0 %v6330_v11  ;;  %1260 = vmatmul.bf16.vlgmr.msrb.gmra.mxu1 %v6332_v12 }
 0x14b   : > { %1274 = vmatmul.bf16.vlgmr.msrb.gmra.mxu2 %v6330_v11  ;;  %1288 = vmatmul.bf16.vlgmr.msrb.gmra.mxu3 %v6332_v12 }
 0x14c   : > { %1298 = vmatpush.bf16.msra.mxu0 %v4618_v56  ;;  %1312 = vmatpush.bf16.msra.mxu1 %v4810_v57  ;;  %v4971_v56 = vld [vmem:[#allocation5 + $0xf0] sm:$0xf]  ;;  %v5691_v57 = vld [vmem:[#allocation5 + $0xf4] sm:$0xf0] }
 0x14d   : > { %1326 = vmatpush.bf16.msra.mxu2 %v4622_v60  ;;  %1340 = vmatpush.bf16.msra.mxu3 %v4814_v61  ;;  %v6391_v21 = vor.u32 %v5691_v57, %v4971_v56  ;;  %v5687_v56 = vld [vmem:[#allocation5 + $0xd4] sm:$0xf0] }
 0x150   : > { %1299 = vmatpush.bf16.msra.mxu0 %v4594_v10  ;;  %1313 = vmatpush.bf16.msra.mxu1 %v4786_v13 }
 0x151   : > { %1327 = vmatpush.bf16.msra.mxu2 %v4598_v16  ;;  %1341 = vmatpush.bf16.msra.mxu3 %v4790_v7 }
 0x154   : > { %1300 = vmatpush.bf16.msra.mxu0 %v4570_v19  ;;  %1314 = vmatpush.bf16.msra.mxu1 %v4762_v22 }
 0x155   : > { %1328 = vmatpush.bf16.msra.mxu2 %v4574_v25  ;;  %1342 = vmatpush.bf16.msra.mxu3 %v4766_v26 }
 0x158   : > { %1301 = vmatpush.bf16.msra.mxu0 %v4546_v31  ;;  %1315 = vmatpush.bf16.msra.mxu1 %v4738_v34 }
 0x159   : > { %1329 = vmatpush.bf16.msra.mxu2 %v4550_v35  ;;  %1343 = vmatpush.bf16.msra.mxu3 %v4742_v36 }
 0x15b   : > { %1302 = vmatmul.bf16.vlgmr.msra.gmra.mxu0 %v6330_v11  ;;  %1316 = vmatmul.bf16.vlgmr.msra.gmra.mxu1 %v6332_v12 }
 0x15c   : > { %1330 = vmatmul.bf16.vlgmr.msra.gmra.mxu2 %v6330_v11  ;;  %1344 = vmatmul.bf16.vlgmr.msra.gmra.mxu3 %v6332_v12  ;;  %v6358_v11 = vld [vmem:[%s7349_s3] sm:$0xf] }
 0x1b7   : > { %v1191_v39 = vpop.f32.mrf.mxu0  ;;  %v1205_v40 = vpop.f32.mrf.mxu1 }
 0x1b8   : > { %v1192_v41 = vadd.f32 %v1191_v39, %v690_v38 }
 0x1ba   : > { %v6352_v42 = vadd.f32 %v1205_v40, %v1192_v41 }
 0x1bc   : > { %1953 = vst [vmem:[#allocation1] sm:$0xff] %v6352_v42  ;;  %v1388_v12 = vperm.slane %v6352_v42, 0  ;;  %v1385_v3 = vrot.slane %v6352_v42, 1  ;;  %v1387_v51 = vrot.slane %v6352_v42, 3  ;;  %v1386_v54 = vrot.slane %v6352_v42, 2 }
 0x1be   : > { %v1219_v44 = vpop.f32.mrf.mxu2  ;;  %v1233_v45 = vpop.f32.mrf.mxu3  ;;  %v1396_v4 = vmul.f32 %v1388_v12, %v6358_v11  ;;  %v1389_v50 = vperm.slane %v1385_v3, 0  ;;  %v1391_v8 = vperm.slane %v1387_v51, 0  ;;  %v1390_v14 = vperm.slane %v1386_v54, 0  ;;  %v4955_v54 = vld [vmem:[#allocation5 + $0xd0] sm:$0xf] }
 0x1bf   : > { %v1220_v46 = vadd.f32 %v1219_v44, %v691_v43  ;;  %v1193_v47 = vpop.f32.mrf.mxu0  ;;  %v1207_v48 = vpop.f32.mrf.mxu1  ;;  %v6413_v12 = vor.u32 %v5689_v1, %v4963_v27  ;;  %v694_v3 = vperm.slane %v6349_v37, 4  ;;  %v4947_v1 = vld [vmem:[#allocation5 + $0xc0] sm:$0xf] }
 0x1c0   : > { %v1401_v49 = vsel %vm1400_vm7, %v1396_v4, 0.0  ;;  %v1194_v58 = vadd.f32 %v1193_v47, %v690_v38  ;;  %v1397_v2 = vmul.f32 %v1389_v50, %v6371_v53  ;;  %v1399_v30 = vmul.f32 %v1391_v8, %v6383_v6  ;;  %v5035_v47 = vld [vmem:[#allocation5 + $0x70] sm:$0xf] }
 0x1c1   : > { %v6366_v52 = vadd.f32 %v1233_v45, %v1220_v46  ;;  %1402 = vadd.xlane.f32.xlu2 %v1401_v49  ;;  %v1398_v36 = vmul.f32 %v1390_v14, %v6389_v20 }
 0x1c2   : > { %v6394_v19 = vadd.f32 %v1207_v48, %v1194_v58  ;;  %v1404_v29 = vsel %vm1400_vm7, %v1397_v2, 0.0  ;;  %v1410_v46 = vsel %vm1400_vm7, %v1399_v30, 0.0  ;;  %v5675_v48 = vld [vmem:[#allocation5 + $0x74] sm:$0xf0] }
 0x1c3   : > { %v1572_v59 = vperm.slane %v6366_v52, 0  ;;  %v1569_v60 = vrot.slane %v6366_v52, 1  ;;  %v1570_v61 = vrot.slane %v6366_v52, 2  ;;  %v1955_v63 = vld [vmem:[#allocation1 + $0x4] ss:$9 sm:$0xff]  ;;  %v1571_v38 = vrot.slane %v6366_v52, 3 }
 0x1c4   : > { %v1962_v9 = vperm.slane %v1955_v63, 0  ;;  %v1957_v15 = vld [vmem:[#allocation1 + $0x5] ss:$9 sm:$0xff]  ;;  %7384 = vst [vmem:[#allocation15_spill] sm:$0xff] %v6394_v19  ;;  %v1961_v28 = vld [vmem:[#allocation1 + $0x7] ss:$9 sm:$0xff] }
 0x1c5   : > { %v1580_v10 = vmul.f32 %v1572_v59, %v6358_v11  ;;  %v1573_v13 = vperm.slane %v1569_v60, 0  ;;  %v1959_v16 = vld [vmem:[#allocation1 + $0x6] ss:$9 sm:$0xff]  ;;  %v1574_v18 = vperm.slane %v1570_v61, 0  ;;  %v1963_v33 = vperm.slane %v1957_v15, 0 }
 0x1c6   : > { %v1221_v7 = vpop.f32.mrf.mxu2  ;;  %v1235_v17 = vpop.f32.mrf.mxu3  ;;  %v1970_v32 = vmul.f32 %v1962_v9, %v6358_v11  ;;  %2138 = vst [vmem:[#allocation1] sm:$0xff] %v6366_v52  ;;  %v1965_v41 = vperm.slane %v1961_v28, 0  ;;  %v1964_v44 = vperm.slane %v1959_v16, 0  ;;  %v2387_v45 = vperm.slane %v6394_v19, 0  ;;  %v5673_v28 = vld [vmem:[#allocation5 + $0x64] sm:$0xf0] }
 0x1c7   : > { %v1222_v22 = vadd.f32 %v1221_v7, %v691_v43  ;;  %v1261_v23 = vpop.f32.mrf.mxu1  ;;  %v1584_v24 = vsel %vm1400_vm7, %v1580_v10, 0.0  ;;  %v1247_v25 = vpop.f32.mrf.mxu0  ;;  %v1581_v26 = vmul.f32 %v1573_v13, %v6371_v53  ;;  %v1582_v40 = vmul.f32 %v1574_v18, %v6389_v20 }
 0x1c8   : > { %1585 = vadd.xlane.f32.xlu0 %v1584_v24  ;;  %v1248_v0 = vadd.f32 %v1247_v25, %v7360_v55  ;;  %v6403_v31 = vsel %vm1400_vm7, %v1970_v32, 0.0  ;;  %v1971_v43 = vmul.f32 %v1963_v33, %v6371_v53  ;;  %v1973_v49 = vmul.f32 %v1965_v41, %v6383_v6 }
 0x1c9   : > { %v6406_v34 = vadd.f32 %v1235_v17, %v1222_v22  ;;  %v1587_v35 = vsel %vm1400_vm7, %v1581_v26, 0.0  ;;  %1405 = vadd.xlane.f32.xlu2 %v1404_v29  ;;  %v1407_v51 = vsel %vm1400_vm7, %v1398_v36, 0.0  ;;  %v1972_v57 = vmul.f32 %v1964_v44, %v6389_v20  ;;  %v5027_v22 = vld [vmem:[#allocation5 + $0x60] sm:$0xf]  ;;  %v5671_v44 = vld [vmem:[#allocation5 + $0x54] sm:$0xf0] }
 0x1ca   : > { %v1262_v39 = vadd.f32 %v1261_v23, %v1248_v0  ;;  %1588 = vadd.xlane.f32.xlu1 %v1587_v35  ;;  %v6422_v50 = vsel %vm1400_vm7, %v1971_v43, 0.0  ;;  %v2395_v58 = vmul.f32 %v2387_v45, %v6358_v11  ;;  %v1590_v63 = vsel %vm1400_vm7, %v1582_v40, 0.0  ;;  %v5685_v35 = vld [vmem:[#allocation5 + $0xc4] sm:$0xf0]  ;;  %v5019_v43 = vld [vmem:[#allocation5 + $0x50] sm:$0xf] }
 0x1cb   : > { %v2559_v59 = vrot.slane %v6406_v34, 1  ;;  %v1575_v2 = vperm.slane %v1571_v38, 0  ;;  %v6431_v8 = vsel %vm1400_vm7, %v1973_v49, 0.0  ;;  %v2386_v9 = vrot.slane %v6394_v19, 3  ;;  %v4939_v45 = vld [vmem:[#allocation5 + $0xb0] sm:$0xf] }
 0x1cc   : > { %v6417_v4 = vpack.c.bf16 %v1262_v39, %v1262_v39  ;;  %v6441_v15 = vor.u32 %v5675_v48, %v5035_v47  ;;  %v6444_v7 = vsel %vm1400_vm7, %v1972_v57, 0.0  ;;  %v6447_v18 = vsel %vm1400_vm7, %v2395_v58, 0.0  ;;  %v5683_v48 = vld [vmem:[#allocation5 + $0xb4] sm:$0xf0]  ;;  %v5011_v49 = vld [vmem:[#allocation5 + $0x40] sm:$0xf] }
 0x1cd   : > { %v2142_v16 = vld [vmem:[#allocation1 + $0x5] ss:$9 sm:$0xff]  ;;  %7385 = vst [vmem:[#allocation16_spill] sm:$0xff] %v6447_v18  ;;  %v6451_v32 = vpack.c.bf16 %v6352_v42, %v6352_v42  ;;  %v6453_v33 = vor.u32 %v5687_v56, %v4955_v54  ;;  %v2146_v25 = vld [vmem:[#allocation1 + $0x7] ss:$9 sm:$0xff]  ;;  %v2563_v30 = vperm.slane %v2559_v59, 0  ;;  %v1583_v41 = vmul.f32 %v1575_v2, %v6383_v6 }
 0x1ce   : > { %v1275_v60 = vpop.f32.mrf.mxu2  ;;  %v1289_v61 = vpop.f32.mrf.mxu3  ;;  %1437 = vmatpush.bf16.xpose.msrb.mxu0 %v6417_v4  ;;  %v2140_v17 = vld [vmem:[#allocation1 + $0x4] ss:$9 sm:$0xff]  ;;  %v2148_v23 = vperm.slane %v2142_v16, 0  ;;  %v2144_v26 = vld [vmem:[#allocation1 + $0x6] ss:$9 sm:$0xff]  ;;  %v2150_v0 = vperm.slane %v2146_v25, 0  ;;  %v6474_v57 = vor.u32 %v5673_v28, %v5027_v22  ;;  %v6476_v58 = vor.u32 %v5685_v35, %v4947_v1 }
 0x1cf   : > { %v1276_v10 = vadd.f32 %v1275_v60, %v7361_v5  ;;  %v6436_v13 = vpop.f32.mrf.mxu1  ;;  %v6438_v14 = vpop.f32.mrf.mxu0  ;;  %v2147_v24 = vperm.slane %v2140_v17, 0  ;;  %v2149_v29 = vperm.slane %v2144_v26, 0  ;;  %2783 = vst [vmem:[#allocation1] sm:$0xff] %v6394_v19  ;;  %v7364_v42 = vperm.slane %v6349_v37, 5  ;;  %v5669_v59 = vld [vmem:[#allocation5 + $0x44] sm:$0xf0] }
 0x1d0   : > { %1591 = vadd.xlane.f32.xlu0 %v1590_v63  ;;  %v2156_v36 = vmul.f32 %v2148_v23, %v6371_v53  ;;  %v2390_v39 = vperm.slane %v2386_v9, 0  ;;  %v2571_v56 = vmul.f32 %v2563_v30, %v6371_v53  ;;  %v4931_v60 = vld [vmem:[#allocation5 + $0xa0] sm:$0xf]  ;;  %v5681_v16 = vld [vmem:[#allocation5 + $0xa4] sm:$0xf0]  ;;  %v1593_v25 = vsel %vm1400_vm7, %v1583_v41, 0.0 }
 0x1d1   : > { %v1290_v27 = vadd.f32 %v1289_v61, %v1276_v10  ;;  %1408 = vadd.xlane.f32.xlu2 %v1407_v51  ;;  %v2155_v38 = vmul.f32 %v2147_v24, %v6358_v11  ;;  %v2157_v47 = vmul.f32 %v2149_v29, %v6389_v20  ;;  %v6489_v10 = vor.u32 %v5671_v44, %v5019_v43  ;;  %v5003_v17 = vld [vmem:[#allocation5 + $0x30] sm:$0xf]  ;;  %v5667_v26 = vld [vmem:[#allocation5 + $0x34] sm:$0xf0] }
 0x1d2   : > { %1411 = vadd.xlane.f32.xlu1 %v1410_v46  ;;  %v2158_v46 = vmul.f32 %v2150_v0, %v6383_v6  ;;  %v6466_v51 = vsel %vm1400_vm7, %v2156_v36, 0.0  ;;  %v6492_v22 = vsel %vm1400_vm7, %v2571_v56, 0.0  ;;  %v2398_v23 = vmul.f32 %v2390_v39, %v6383_v6  ;;  %v5679_v56 = vld [vmem:[#allocation5 + $0x94] sm:$0xf0] }
 0x1d3   : > { %v6459_v40 = vpack.c.bf16 %v1290_v27, %v1290_v27  ;;  %v6469_v54 = vsel %vm1400_vm7, %v2155_v38, 0.0  ;;  %v6482_v63 = vsel %vm1400_vm7, %v2157_v47, 0.0  ;;  %7386 = vst [vmem:[#allocation17_spill] sm:$0xff] %v6492_v22  ;;  %v2562_v24 = vperm.slane %v6406_v34, 0  ;;  %v4923_v38 = vld [vmem:[#allocation5 + $0x90] sm:$0xf] }
 0x1d4   : > { %v6479_v61 = vsel %vm1400_vm7, %v2158_v46, 0.0  ;;  %v2560_v27 = vrot.slane %v6406_v34, 2  ;;  %v2384_v28 = vrot.slane %v6394_v19, 1  ;;  %v2385_v0 = vrot.slane %v6394_v19, 2 }
 0x1d5   : > { %1615 = vmatpush.bf16.xpose.msrb.mxu2 %v6459_v40  ;;  %1438 = vmatmul.bf16.vlgmr.msrb.gmra.mxu0 %v6451_v32  ;;  %v6503_v1 = vpack.c.bf16 %v6366_v52, %v6366_v52  ;;  %v6505_v35 = vor.u32 %v5683_v48, %v4939_v45  ;;  %v6507_v36 = vor.u32 %v5669_v59, %v5011_v49  ;;  %v6517_v52 = vsel %vm1400_vm7, %v2398_v23, 0.0 }
 0x1d6   : > { %1819 = vmatpush.bf16.msra.mxu0 %v6391_v21  ;;  %v6484_v2 = vpop.f32.mrf.mxu2  ;;  %v6486_v9 = vpop.f32.mrf.mxu3  ;;  %v2787_v39 = vld [vmem:[#allocation1 + $0x5] ss:$9 sm:$0xff]  ;;  %v2791_v43 = vld [vmem:[#allocation1 + $0x7] ss:$9 sm:$0xff]  ;;  %v2570_v44 = vmul.f32 %v2562_v24, %v6358_v11  ;;  %v6514_v47 = vor.u32 %v5681_v16, %v4931_v60  ;;  %7387 = vst [vmem:[#allocation18_spill] sm:$0xff] %v6517_v52  ;;  %v2564_v45 = vperm.slane %v2560_v27, 0  ;;  %v6526_v60 = vor.u32 %v5667_v26, %v5003_v17 }
 0x1d7   : > { %v6509_v41 = vld [vmem:[#allocation1 + $0x6] ss:$9 sm:$0xff]  ;;  %v2785_v48 = vld [vmem:[#allocation1 + $0x4] ss:$9 sm:$0xff]  ;;  %v2388_v59 = vperm.slane %v2384_v28, 0  ;;  %v2389_v55 = vperm.slane %v2385_v0, 0  ;;  %v6532_v5 = vor.u32 %v5679_v56, %v4923_v38 }
 0x1d8   : > { %v1303_v29 = vpop.f32.mrf.mxu0  ;;  %v1317_v30 = vpop.f32.mrf.mxu1  ;;  %v6521_v49 = vsel %vm1400_vm7, %v2570_v44, 0.0  ;;  %v2561_v24 = vrot.slane %v6406_v34, 3  ;;  %2968 = vst [vmem:[#allocation1] sm:$0xff] %v6406_v34  ;;  %v2572_v16 = vmul.f32 %v2564_v45, %v6389_v20  ;;  %v2792_v23 = vperm.slane %v2785_v48, 0  ;;  %v4995_v26 = vld [vmem:[#allocation5 + $0x20] sm:$0xf] }
 0x1d9   : > { %v1304_v46 = vadd.f32 %v1303_v29, %v694_v3  ;;  %1594 = vadd.xlane.f32.xlu2 %v1593_v25  ;;  %7388 = vst [vmem:[#allocation19_spill] sm:$0xff] %v6521_v49  ;;  %v2396_v27 = vmul.f32 %v2388_v59, %v6371_v53  ;;  %v2397_v29 = vmul.f32 %v2389_v55, %v6389_v20  ;;  %v2795_v0 = vperm.slane %v2791_v43, 0 }
 0x1da   : > { %1820 = vmatpush.bf16.msra.mxu0 %v6413_v12  ;;  %v2565_v28 = vperm.slane %v2561_v24, 0  ;;  %7389 = vst [vmem:[#allocation20_spill] sm:$0xff] %v6532_v5  ;;  %v6535_v34 = vsel %vm1400_vm7, %v2572_v16, 0.0  ;;  %v2800_v17 = vmul.f32 %v2792_v23, %v6358_v11 }
 0x1db   : > { %v1318_v25 = vadd.f32 %v1317_v30, %v1304_v46  ;;  %7390 = vst [vmem:[#allocation21_spill] sm:$0xff] %v6535_v34  ;;  %v5665_v30 = vld [vmem:[#allocation5 + $0x24] sm:$0xf0]  ;;  %v6540_v46 = vsel %vm1400_vm7, %v2396_v27, 0.0  ;;  %v6543_v45 = vsel %vm1400_vm7, %v2397_v29, 0.0  ;;  %v2803_v38 = vmul.f32 %v2795_v0, %v6383_v6 }
 0x1dc   : > { %1616 = vmatmul.bf16.vlgmr.msrb.gmra.mxu2 %v6503_v1  ;;  %7391 = vst [vmem:[#allocation22_spill] sm:$0xff] %v6540_v46  ;;  %v2573_v55 = vmul.f32 %v2565_v28, %v6383_v6  ;;  %v6550_v24 = vsel %vm1400_vm7, %v2800_v17, 0.0  ;;  %v4915_v27 = vld [vmem:[#allocation5 + $0x80] sm:$0xf]  ;;  %v5677_v29 = vld [vmem:[#allocation5 + $0x84] sm:$0xf0]  ;;  %v6563_v62 = vor.u32 %v5665_v30, %v4995_v26 }
 0x1dd   : > { %1925 = vmatpush.bf16.msra.mxu2 %v6441_v15  ;;  %v1528_v44 = vpack.c.bf16 %v1318_v25, %v1318_v25  ;;  %7392 = vst [vmem:[#allocation23_spill] sm:$0xff] %v6543_v45  ;;  %v2793_v25 = vperm.slane %v2787_v39, 0  ;;  %v6558_v0 = vsel %vm1400_vm7, %v2803_v38, 0.0  ;;  %v5688_v46 = vld [vmem:[#allocation5 + $0xe4] sm:$0xf] }
 0x1de   : > { %1821 = vmatpush.bf16.msra.mxu0 %v6453_v33  ;;  %7393 = vst [vmem:[#allocation24_spill] sm:$0xff] %v6550_v24  ;;  %v6555_v28 = vsel %vm1400_vm7, %v2573_v55, 0.0 }
 0x1df   : > { %v1550_v43 = vsel %vm1548_vm8, %v1528_v44, 0  ;;  %v2117_v56 = vrot.slane %v1528_v44, 2  ;;  %v1331_v48 = vpop.f32.mrf.mxu2  ;;  %v1345_v59 = vpop.f32.mrf.mxu3  ;;  %7394 = vst [vmem:[#allocation25_spill] sm:$0xff] %v6555_v28  ;;  %v2794_v44 = vperm.slane %v6509_v41, 0  ;;  %v2976_v19 = vld [vmem:[#allocation1 + $0x7] ss:$9 sm:$0xff] }
 0x1e0   : > { %v1332_v16 = vadd.f32 %v1331_v48, %v7364_v42  ;;  %v1305_v23 = vpop.f32.mrf.mxu0  ;;  %1559 = vmatpush.bf16.msrb.mxu1 %v1550_v43  ;;  %7395 = vst [vmem:[#allocation26_spill] sm:$0xff] %v6558_v0  ;;  %v2972_v48 = vld [vmem:[#allocation1 + $0x5] ss:$9 sm:$0xff]  ;;  %v2801_v43 = vmul.f32 %v2793_v25, %v6371_v53  ;;  %v1319_v55 = vpop.f32.mrf.mxu1  ;;  %v2980_v30 = vperm.slane %v2976_v19, 0 }
 0x1e1   : > { %1926 = vmatpush.bf16.msra.mxu2 %v6474_v57  ;;  %v1306_v17 = vadd.f32 %v1305_v23, %v694_v3  ;;  %v6566_v39 = vsel %vm1548_vm8, %v2117_v56, 0  ;;  %v2970_v42 = vld [vmem:[#allocation1 + $0x4] ss:$9 sm:$0xff]  ;;  %v2978_v38 = vperm.slane %v2972_v48, 0  ;;  %v2802_v0 = vmul.f32 %v2794_v44, %v6389_v20  ;;  %v2974_v28 = vld [vmem:[#allocation1 + $0x6] ss:$9 sm:$0xff] }
 0x1e2   : > { %1822 = vmatpush.bf16.msra.mxu0 %v6476_v58  ;;  %v1346_v24 = vadd.f32 %v1345_v59, %v1332_v16  ;;  %v2977_v41 = vperm.slane %v2970_v42, 0  ;;  %v6573_v26 = vsel %vm1400_vm7, %v2801_v43, 0.0  ;;  %v2979_v56 = vperm.slane %v2974_v28, 0  ;;  %v4987_v19 = vld [vmem:[#allocation5 + $0x10] sm:$0xf] }
 0x1e3   : > { %v1320_v3 = vadd.f32 %v1319_v55, %v1306_v17  ;;  %7396 = vst [vmem:[#allocation27_spill] sm:$0xff] %v6573_v26  ;;  %v2986_v59 = vmul.f32 %v2978_v38, %v6371_v53  ;;  %v6577_v16 = vsel %vm1400_vm7, %v2802_v0, 0.0  ;;  %v6580_v42 = vor.u32 %v5677_v29, %v4915_v27 }
 0x1e4   : > { %v1703_v25 = vpack.c.bf16 %v1346_v24, %v1346_v24  ;;  %7397 = vst [vmem:[#allocation28_spill] sm:$0xff] %v6577_v16  ;;  %v2985_v23 = vmul.f32 %v2977_v41, %v6358_v11  ;;  %v2988_v17 = vmul.f32 %v2980_v30, %v6383_v6  ;;  %v2987_v48 = vmul.f32 %v2979_v56, %v6389_v20  ;;  %v5663_v6 = vld [vmem:[#allocation5 + $0x14] sm:$0xf0] }
 0x1e5   : > { %1927 = vmatpush.bf16.msra.mxu2 %v6489_v10  ;;  %v2520_v44 = vpack.c.bf16 %v1320_v3, %v1320_v3  ;;  %7398 = vst [vmem:[#allocation29_spill] sm:$0xff] %v6580_v42  ;;  %v6587_v53 = vsel %vm1400_vm7, %v2986_v59, 0.0  ;;  %v7404_v0 = vperm.slane %v6349_v37, 5  ;;  %v1990_v56 = vrot.slane %v6417_v4, 2 }
 0x1e6   : > { %1823 = vmatpush.bf16.msra.mxu0 %v6505_v35  ;;  %v1723_v43 = vsel %vm1548_vm8, %v1703_v25, 0  ;;  %v2300_v55 = vrot.slane %v1703_v25, 2  ;;  %7399 = vst [vmem:[#allocation30_spill] sm:$0xff] %v6587_v53  ;;  %v6590_v24 = vsel %vm1400_vm7, %v2985_v23, 0.0  ;;  %v6597_v27 = vsel %vm1400_vm7, %v2988_v17, 0.0 }
 0x1e7   : > { %7400 = vst [vmem:[#allocation31_spill] sm:$0xff] %v6590_v24  ;;  %v2947_v11 = vrot.slane %v2520_v44, 2  ;;  %v1333_v28 = vpop.f32.mrf.mxu2  ;;  %1732 = vmatpush.bf16.msrb.mxu3 %v1723_v43  ;;  %v6594_v20 = vsel %vm1548_vm8, %v2520_v44, 0  ;;  %v6600_v29 = vsel %vm1400_vm7, %v2987_v48, 0.0  ;;  %v1347_v3 = vpop.f32.mrf.mxu3  ;;  %v6612_v59 = vor.u32 %v5663_v6, %v4987_v19  ;;  %v4979_v23 = vld [vmem:[#allocation5] sm:$0xf] }
 0x1e8   : > { %7401 = vst [vmem:[#allocation32_spill] sm:$0xff] %v6594_v20  ;;  %v1334_v38 = vadd.f32 %v1333_v28, %v7404_v0  ;;  %v6605_v41 = vsel %vm1548_vm8, %v2300_v55, 0  ;;  %v5661_v44 = vld [vmem:[#allocation5 + $0x4] sm:$0xf0]  ;;  %v2175_v19 = vrot.slane %v6459_v40, 2  ;;  %v1417_v0 = vlaneseq }
 0x1e9   : > { %1928 = vmatpush.bf16.msra.mxu2 %v6507_v36  ;;  %7402 = vst [vmem:[#allocation33_spill] sm:$0xff] %v6597_v27  ;;  %v6608_v30 = vsel %vm1548_vm8, %v2947_v11, 0  ;;  %v6616_v43 = vor.u32 %v5661_v44, %v4979_v23 }
 0x1ea   : > { %1824 = vmatpush.bf16.msra.mxu0 %v6514_v47  ;;  %7403 = vst [vmem:[#allocation34_spill] sm:$0xff] %v6600_v29  ;;  %v1348_v25 = vadd.f32 %v1347_v3, %v1334_v38  ;;  %v6626_v38 = vand.u32 127, %v1417_v0 }
 0x1eb   : > { %7405 = vst [vmem:[#allocation35_spill] sm:$0xff] %v6608_v30 }
 0x1ec   : > { %v2693_v17 = vpack.c.bf16 %v1348_v25, %v1348_v25  ;;  %7408 = vst [vmem:[#allocation38_spill] sm:$0xff] %v6626_v38 }
 0x1ed   : > { %1929 = vmatpush.bf16.msra.mxu2 %v6526_v60 }
 0x1ee   : > { %1825 = vmatpush.bf16.msra.mxu0 %v6532_v5  ;;  %v3130_v48 = vrot.slane %v2693_v17, 2  ;;  %v6619_v55 = vsel %vm1548_vm8, %v2693_v17, 0 }
 0x1ef   : > { %7406 = vst [vmem:[#allocation36_spill] sm:$0xff] %v6619_v55 }
 0x1f0   : > { %v6622_v4 = vsel %vm1548_vm8, %v3130_v48, 0 }
 0x1f1   : > { %1930 = vmatpush.bf16.msra.mxu2 %v6563_v62  ;;  %7407 = vst [vmem:[#allocation37_spill] sm:$0xff] %v6622_v4  ;;  %v6639_v4 = vld [vmem:[%s507_s28] sm:$0xf] }
 0x1f2   : > { %1826 = vmatpush.bf16.msra.mxu0 %v6580_v42  ;;  %vm524_vm12 = vcmp.gt.f32.partialorder %v6639_v4, 0.5 }
 0x1f5   : > { %1931 = vmatpush.bf16.msra.mxu2 %v6612_v59 }
 0x1f6   : > { %2011 = vmatpush.bf16.xpose.msrb.mxu0 %v1990_v56 }
 0x1f9   : > { %1932 = vmatpush.bf16.msra.mxu2 %v6616_v43 }
 0x1fd   : > { %2196 = vmatpush.bf16.xpose.msrb.mxu2 %v2175_v19 }
 0x234   : > { %v1403_v11 = vpop.xlane.xlu2 %1402 }
 0x235   : > { %v1419_v44 = vperm.slane %v1403_v11, %v6626_v38 }
 0x23b   : > { %v1586_v40 = vpop.xlane.xlu0 %1585 }
 0x23c   : > { %v1406_v28 = vpop.xlane.xlu2 %1405  ;;  %v1600_v24 = vperm.slane %v1586_v40, %v6626_v38 }
 0x23d   : > { %v1589_v6 = vpop.xlane.xlu1 %1588  ;;  %v1420_v56 = vperm.slane %v1406_v28, %v6626_v38 }
 0x23f   : > { %v1424_v17 = vsel %vm1423_vm9, %v1420_v56, %v1419_v44 }
 0x243   : > { %v1592_v30 = vpop.xlane.xlu0 %1591 }
 0x244   : > { %v1409_v3 = vpop.xlane.xlu2 %1408 }
 0x245   : > { %v1412_v25 = vpop.xlane.xlu1 %1411  ;;  %v1421_v23 = vperm.slane %v1409_v3, %v6626_v38 }
 0x246   : > { %v1422_v48 = vperm.slane %v1412_v25, %v6626_v38 }
 0x247   : > { %v1426_v19 = vsel %vm1425_vm10, %v1421_v23, %v1424_v17  ;;  %v1601_v23 = vperm.slane %v1589_v6, %v6626_v38 }
 0x248   : > { %v1428_v28 = vsel %vm1427_vm11, %v1422_v48, %v1426_v19 }
 0x24c   : > { %v1595_v29 = vpop.xlane.xlu2 %1594 }
 0x24d   : > { %v1603_v16 = vperm.slane %v1595_v29, %v6626_v38 }
 0x252   : > { %v1439_v0 = vpop.f32.mrf.mxu0 }
 0x253   : > { %v1440_v3 = vadd.f32 %v1439_v0, %v1428_v28  ;;  %v1602_v28 = vperm.slane %v1592_v30, %v6626_v38 }
 0x255   : > { %v1443_v11 = vmul.f32 0.088388346, %v1440_v3 }
 0x257   : > { %v1447_v56 = vrot.slane %v1443_v11, 1  ;;  %v1448_v44 = vrot.slane %v1443_v11, 2  ;;  %v1449_v25 = vrot.slane %v1443_v11, 3  ;;  %v1454_v6 = vsel %vm524_vm12, -1e+30, %v1443_v11 }
 0x259   : > { %v1455_v17 = vsel %vm524_vm12, -1e+30, %v1447_v56  ;;  %v1456_v48 = vsel %vm524_vm12, -1e+30, %v1448_v44  ;;  %v1457_v19 = vsel %vm524_vm12, -1e+30, %v1449_v25  ;;  %v1604_v44 = vsel %vm1423_vm9, %v1601_v23, %v1600_v24 }
 0x25a   : > { %v1441_v0 = vpop.f32.mrf.mxu0  ;;  %v1462_v3 = vrot.slane %v1455_v17, 7  ;;  %v1464_v27 = vrot.slane %v1456_v48, 6  ;;  %v1466_v26 = vrot.slane %v1457_v19, 5  ;;  %v1605_v30 = vsel %vm1425_vm10, %v1602_v28, %v1604_v44 }
 0x25b   : > { %v1606_v53 = vsel %vm1427_vm11, %v1603_v16, %v1605_v30 }
 0x25c   : > { %v1463_v56 = vsel %vm1423_vm9, %v1462_v3, %v1454_v6 }
 0x25d   : > { %v1465_v25 = vsel %vm1425_vm10, %v1464_v27, %v1463_v56 }
 0x25e   : > { %v1467_v0 = vsel %vm1427_vm11, %v1466_v26, %v1465_v25 }
 0x25f   : > { %v1617_v40 = vpop.f32.mrf.mxu2  ;;  %v1470_v29 = vsel %vm1469_vm13, %v1467_v0, -inf }
 0x260   : > { %v1618_v20 = vadd.f32 %v1617_v40, %v1606_v53  ;;  %1471 = vmax.xlane.f32.xlu0 %v1470_v29 }
 0x262   : > { %v1621_v11 = vmul.f32 0.088388346, %v1618_v20 }
 0x264   : > { %v1623_v55 = vrot.slane %v1621_v11, 1  ;;  %v1624_v3 = vrot.slane %v1621_v11, 2  ;;  %v1625_v45 = vrot.slane %v1621_v11, 3  ;;  %v1630_v53 = vsel %vm524_vm12, -1e+30, %v1621_v11 }
 0x266   : > { %v1631_v24 = vsel %vm524_vm12, -1e+30, %v1623_v55  ;;  %v1632_v27 = vsel %vm524_vm12, -1e+30, %v1624_v3  ;;  %v1633_v26 = vsel %vm524_vm12, -1e+30, %v1625_v45 }
 0x267   : > { %v1619_v23 = vpop.f32.mrf.mxu2  ;;  %v1638_v16 = vrot.slane %v1631_v24, 7  ;;  %v1640_v28 = vrot.slane %v1632_v27, 6  ;;  %v1642_v56 = vrot.slane %v1633_v26, 5 }
 0x269   : > { %v1639_v20 = vsel %vm1423_vm9, %v1638_v16, %v1630_v53 }
 0x26a   : > { %v1641_v44 = vsel %vm1425_vm10, %v1640_v28, %v1639_v20 }
 0x26b   : > { %v1643_v25 = vsel %vm1427_vm11, %v1642_v56, %v1641_v44 }
 0x26c   : > { %v1645_v55 = vsel %vm1469_vm13, %v1643_v25, -inf }
 0x26d   : > { %1646 = vmax.xlane.f32.xlu1 %v1645_v55 }
 0x275   : > { %1975 = vadd.xlane.f32.xlu1 %v6403_v31 }
 0x27d   : > { %2163 = vadd.xlane.f32.xlu1 %v6466_v51 }
 0x285   : > { %1984 = vadd.xlane.f32.xlu1 %v6431_v8 }
 0x2d3   : > { %v1472_v45 = vpop.xlane.xlu0 %1471 }
 0x2d4   : > { %v1474_v30 = vrot.slane %v1472_v45, 1  ;;  %v1475_v0 = vrot.slane %v1472_v45, 2  ;;  %v1476_v40 = vrot.slane %v1472_v45, 3  ;;  %v1481_v29 = vsub.f32 %v1454_v6, %v1472_v45 }
 0x2d6   : > { %v1482_v11 = vsub.f32 %v1455_v17, %v1474_v30  ;;  %v1483_v3 = vsub.f32 %v1456_v48, %v1475_v0  ;;  %v1484_v23 = vsub.f32 %v1457_v19, %v1476_v40  ;;  %v1485_v56 = vmul.f32 1.442695, %v1481_v29 }
 0x2d8   : > { %v1487_v16 = vmul.f32 1.442695, %v1482_v11  ;;  %v1489_v28 = vmul.f32 1.442695, %v1483_v3  ;;  %v1491_v20 = vmul.f32 1.442695, %v1484_v23 }
 0x2d9   : > { %v5690_v23 = vld [vmem:[#allocation5 + $0xf4] sm:$0xf] }
 0x2da   : > { %5886 = vpow2.f32 %v1487_v16  ;;  %v4973_v16 = vld [vmem:[#allocation5 + $0xf8] sm:$0xf0] }
 0x2db   : > { %5888 = vpow2.f32 %v1489_v28 }
 0x2dc   : > { %5890 = vpow2.f32 %v1491_v20 }
 0x2dd   : > { %5892 = vpow2.f32 %v1485_v56 }
 0x2e0   : > { %v6676_v31 = vpop.eup %5886  ;;  %v1647_v51 = vpop.xlane.xlu1 %1646 }
 0x2e1   : > { %v6678_v8 = vpop.eup %5888  ;;  %v1649_v44 = vrot.slane %v1647_v51, 1  ;;  %v1650_v25 = vrot.slane %v1647_v51, 2  ;;  %v1651_v55 = vrot.slane %v1647_v51, 3  ;;  %v1656_v6 = vsub.f32 %v1630_v53, %v1647_v51 }
 0x2e2   : > { %v6680_v17 = vpop.eup %5890  ;;  %v1497_v48 = vrot.slane %v6676_v31, 7  ;;  %v1499_v19 = vrot.slane %v6678_v8, 6  ;;  %v6690_v51 = vor.u32 %v5690_v23, %v4973_v16  ;;  %v4957_v23 = vld [vmem:[#allocation5 + $0xd8] sm:$0xf0]  ;;  %v5684_v16 = vld [vmem:[#allocation5 + $0xc4] sm:$0xf] }
 0x2e3   : > { %v6684_v45 = vpop.eup %5892  ;;  %v1657_v30 = vsub.f32 %v1631_v24, %v1649_v44  ;;  %v1658_v0 = vsub.f32 %v1632_v27, %v1650_v25  ;;  %v1659_v40 = vsub.f32 %v1633_v26, %v1651_v55  ;;  %v1660_v29 = vmul.f32 1.442695, %v1656_v6  ;;  %v4965_v24 = vld [vmem:[#allocation5 + $0xe8] sm:$0xf0] }
 0x2e4   : > { %v1498_v11 = vsel %vm1423_vm9, %v1497_v48, %v6684_v45  ;;  %v1501_v3 = vrot.slane %v6680_v17, 5  ;;  %1832 = vmatpush.bf16.msra.mxu1 %v6690_v51  ;;  %v6695_v44 = vor.u32 %v5688_v46, %v4965_v24 }
 0x2e5   : > { %v1662_v53 = vmul.f32 1.442695, %v1657_v30  ;;  %v1664_v28 = vmul.f32 1.442695, %v1658_v0  ;;  %v1666_v20 = vmul.f32 1.442695, %v1659_v40  ;;  %5894 = vpow2.f32 %v1660_v29 }
 0x2e6   : > { %v1500_v56 = vsel %vm1425_vm10, %v1499_v19, %v1498_v11 }
 0x2e7   : > { %5896 = vpow2.f32 %v1662_v53  ;;  %v1502_v27 = vsel %vm1427_vm11, %v1501_v3, %v1500_v56  ;;  %v5686_v3 = vld [vmem:[#allocation5 + $0xd4] sm:$0xf] }
 0x2e8   : > { %5898 = vpow2.f32 %v1664_v28  ;;  %v1504_v26 = vsel %vm1469_vm13, %v1502_v27, 0.0  ;;  %1833 = vmatpush.bf16.msra.mxu1 %v6695_v44  ;;  %v6719_v53 = vor.u32 %v5686_v3, %v4957_v23  ;;  %v5674_v28 = vld [vmem:[#allocation5 + $0x74] sm:$0xf]  ;;  %v5029_v27 = vld [vmem:[#allocation5 + $0x68] sm:$0xf0] }
 0x2e9   : > { %5900 = vpow2.f32 %v1666_v20  ;;  %1505 = vadd.xlane.f32.xlu2 %v1504_v26  ;;  %v5037_v20 = vld [vmem:[#allocation5 + $0x78] sm:$0xf0]  ;;  %v5680_v26 = vld [vmem:[#allocation5 + $0xa4] sm:$0xf] }
 0x2ea   : > { %v6721_v56 = vor.u32 %v5674_v28, %v5037_v20  ;;  %v4925_v3 = vld [vmem:[#allocation5 + $0x98] sm:$0xf0]  ;;  %v5668_v23 = vld [vmem:[#allocation5 + $0x44] sm:$0xf] }
 0x2eb   : > { %v6697_v25 = vpop.eup %5894  ;;  %v5676_v20 = vld [vmem:[#allocation5 + $0x84] sm:$0xf] }
 0x2ec   : > { %1834 = vmatpush.bf16.msra.mxu1 %v6719_v53  ;;  %1938 = vmatpush.bf16.msra.mxu3 %v6721_v56 }
 0x2ed   : > { %v6700_v55 = vpop.eup %5896 }
 0x2ee   : > { %v6702_v6 = vpop.eup %5898  ;;  %v1672_v48 = vrot.slane %v6700_v55, 7 }
 0x2ef   : > { %v6705_v19 = vpop.eup %5900  ;;  %v1674_v30 = vrot.slane %v6702_v6, 6 }
 0x2f0   : > { %v1673_v46 = vsel %vm1423_vm9, %v1672_v48, %v6697_v25  ;;  %v1676_v0 = vrot.slane %v6705_v19, 5  ;;  %v4933_v48 = vld [vmem:[#allocation5 + $0xa8] sm:$0xf0] }
 0x2f1   : > { %1978 = vadd.xlane.f32.xlu2 %v6422_v50  ;;  %v1675_v40 = vsel %vm1425_vm10, %v1674_v30, %v1673_v46  ;;  %v4949_v50 = vld [vmem:[#allocation5 + $0xc8] sm:$0xf0]  ;;  %v5670_v46 = vld [vmem:[#allocation5 + $0x54] sm:$0xf] }
 0x2f2   : > { %v1677_v29 = vsel %vm1427_vm11, %v1676_v0, %v1675_v40  ;;  %v6724_v24 = vor.u32 %v5684_v16, %v4949_v50  ;;  %v5021_v0 = vld [vmem:[#allocation5 + $0x58] sm:$0xf0]  ;;  %v6733_v40 = vor.u32 %v5680_v26, %v4933_v48  ;;  %v5013_v50 = vld [vmem:[#allocation5 + $0x48] sm:$0xf0]  ;;  %v5664_v48 = vld [vmem:[#allocation5 + $0x24] sm:$0xf] }
 0x2f3   : > { %v1679_v11 = vsel %vm1469_vm13, %v1677_v29, 0.0  ;;  %v6736_v29 = vor.u32 %v5670_v46, %v5021_v0  ;;  %v6742_v28 = vor.u32 %v5668_v23, %v5013_v50  ;;  %v4997_v46 = vld [vmem:[#allocation5 + $0x28] sm:$0xf0] }
 0x2f4   : > { %1680 = vadd.xlane.f32.xlu0 %v1679_v11  ;;  %1835 = vmatpush.bf16.msra.mxu1 %v6724_v24  ;;  %v5678_v11 = vld [vmem:[#allocation5 + $0x94] sm:$0xf]  ;;  %v6752_v0 = vor.u32 %v5664_v48, %v4997_v46 }
 0x2f5   : > { %v6739_v16 = vor.u32 %v5678_v11, %v4925_v3  ;;  %v5662_v11 = vld [vmem:[#allocation5 + $0x14] sm:$0xf]  ;;  %v4989_v3 = vld [vmem:[#allocation5 + $0x18] sm:$0xf0] }
 0x2f6   : > { %v6755_v23 = vor.u32 %v5662_v11, %v4989_v3 }
 0x2f7   : > { %7409 = vst [vmem:[#allocation39_spill] sm:$0xff] %v6739_v16 }
 0x2f9   : > { %1981 = vadd.xlane.f32.xlu2 %v6444_v7  ;;  %v5682_v7 = vld [vmem:[#allocation5 + $0xb4] sm:$0xf] }
 0x2fc   : > { %2160 = vadd.xlane.f32.xlu0 %v6469_v54  ;;  %v4941_v54 = vld [vmem:[#allocation5 + $0xb8] sm:$0xf0] }
 0x301   : > { %2169 = vadd.xlane.f32.xlu2 %v6479_v61  ;;  %v5672_v61 = vld [vmem:[#allocation5 + $0x64] sm:$0xf] }
 0x302   : > { %v6730_v30 = vor.u32 %v5672_v61, %v5029_v27  ;;  %v5005_v27 = vld [vmem:[#allocation5 + $0x38] sm:$0xf0] }
 0x304   : > { %2166 = vadd.xlane.f32.xlu0 %v6482_v63  ;;  %v6728_v63 = vor.u32 %v5682_v7, %v4941_v54  ;;  %1939 = vmatpush.bf16.msra.mxu3 %v6730_v30  ;;  %v4917_v7 = vld [vmem:[#allocation5 + $0x88] sm:$0xf0]  ;;  %v5666_v54 = vld [vmem:[#allocation5 + $0x34] sm:$0xf] }
 0x305   : > { %v6746_v61 = vor.u32 %v5676_v20, %v4917_v7  ;;  %v6748_v26 = vor.u32 %v5666_v54, %v5005_v27  ;;  %v5660_v20 = vld [vmem:[#allocation5 + $0x4] sm:$0xf]  ;;  %v4981_v7 = vld [vmem:[#allocation5 + $0x8] sm:$0xf0] }
 0x306   : > { %1836 = vmatpush.bf16.msra.mxu1 %v6728_v63  ;;  %v6758_v54 = vor.u32 %v5660_v20, %v4981_v7 }
 0x307   : > { %7410 = vst [vmem:[#allocation40_spill] sm:$0xff] %v6746_v61 }
 0x308   : > { %1940 = vmatpush.bf16.msra.mxu3 %v6736_v29 }
 0x30a   : > { %1837 = vmatpush.bf16.msra.mxu1 %v6733_v40 }
 0x30c   : > { %1941 = vmatpush.bf16.msra.mxu3 %v6742_v28 }
 0x30e   : > { %1838 = vmatpush.bf16.msra.mxu1 %v6739_v16 }
 0x310   : > { %1942 = vmatpush.bf16.msra.mxu3 %v6748_v26 }
 0x312   : > { %1839 = vmatpush.bf16.msra.mxu1 %v6746_v61 }
 0x314   : > { %1943 = vmatpush.bf16.msra.mxu3 %v6752_v0 }
 0x318   : > { %1944 = vmatpush.bf16.msra.mxu3 %v6755_v23 }
 0x31c   : > { %1945 = vmatpush.bf16.msra.mxu3 %v6758_v54 }
 0x35c   : > { %v1506_v50 = vpop.xlane.xlu2 %1505 }
 0x35d   : > { %5902 = vrcp.f32 %v1506_v50 }
 0x363   : > { %v5903_v27 = vpop.eup %5902 }
 0x364   : > { %v1509_v34 = vrot.slane %v5903_v27, 1  ;;  %v1510_v48 = vrot.slane %v5903_v27, 2  ;;  %v1511_v46 = vrot.slane %v5903_v27, 3  ;;  %v1516_v49 = vmul.f32 %v5903_v27, %v6684_v45 }
 0x366   : > { %v1517_v52 = vmul.f32 %v6676_v31, %v1509_v34  ;;  %v1518_v11 = vmul.f32 %v6678_v8, %v1510_v48  ;;  %v1519_v3 = vmul.f32 %v6680_v17, %v1511_v46  ;;  %v1520_v50 = vsel %vm524_vm12, 0.0, %v1516_v49 }
 0x367   : > { %v1681_v22 = vpop.xlane.xlu0 %1680  ;;  %v1524_v27 = vpack.c.bf16 %v1520_v50, %v1520_v50 }
 0x368   : > { %5904 = vrcp.f32 %v1681_v22  ;;  %v1521_v20 = vsel %vm524_vm12, 0.0, %v1517_v52  ;;  %v1522_v7 = vsel %vm524_vm12, 0.0, %v1518_v11  ;;  %v1523_v45 = vsel %vm524_vm12, 0.0, %v1519_v3 }
 0x369   : > { %v1525_v34 = vpack.c.bf16 %v1521_v20, %v1521_v20  ;;  %v1526_v31 = vpack.c.bf16 %v1522_v7, %v1522_v7  ;;  %v1527_v8 = vpack.c.bf16 %v1523_v45, %v1523_v45  ;;  %v1533_v18 = vunpack.c.l.b16 %v1524_v27 }
 0x36b   : > { %v1534_v48 = vunpack.c.l.b16 %v1525_v34  ;;  %v1535_v17 = vunpack.c.l.b16 %v1526_v31  ;;  %v1536_v46 = vunpack.c.l.b16 %v1527_v8 }
 0x36d   : > { %v1537_v49 = vrot.slane %v1534_v48, 7  ;;  %v1539_v38 = vrot.slane %v1535_v17, 6  ;;  %v1541_v61 = vrot.slane %v1536_v46, 5 }
 0x36e   : > { %v5905_v22 = vpop.eup %5904 }
 0x36f   : > { %v1538_v52 = vsel %vm1423_vm9, %v1537_v49, %v1533_v18  ;;  %v1684_v42 = vrot.slane %v5905_v22, 1  ;;  %v1685_v16 = vrot.slane %v5905_v22, 2  ;;  %v1686_v11 = vrot.slane %v5905_v22, 3 }
 0x370   : > { %v1540_v5 = vsel %vm1425_vm10, %v1539_v38, %v1538_v52  ;;  %v1691_v3 = vmul.f32 %v5905_v22, %v6697_v25 }
 0x371   : > { %v1542_v50 = vsel %vm1427_vm11, %v1541_v61, %v1540_v5  ;;  %v1692_v20 = vmul.f32 %v6700_v55, %v1684_v42  ;;  %v1693_v7 = vmul.f32 %v6702_v6, %v1685_v16  ;;  %v1694_v45 = vmul.f32 %v6705_v19, %v1686_v11 }
 0x372   : > { %v1543_v27 = vpack.c.b16 %v1542_v50, %v1542_v50  ;;  %v1695_v18 = vsel %vm524_vm12, 0.0, %v1691_v3  ;;  %v2172_v50 = vrot.slane %v6503_v1, 2 }
 0x373   : > { %v1696_v34 = vsel %vm524_vm12, 0.0, %v1692_v20  ;;  %v1697_v38 = vsel %vm524_vm12, 0.0, %v1693_v7  ;;  %v1698_v25 = vsel %vm524_vm12, 0.0, %v1694_v45  ;;  %v1699_v5 = vpack.c.bf16 %v1695_v18, %v1695_v18 }
 0x374   : > { %4911 = vmatmul.msk.bf16.vlgmr.msrb.gmra.mxu1 %vm1544_vm14, %v1543_v27  ;;  %v1700_v42 = vpack.c.bf16 %v1696_v34, %v1696_v34  ;;  %v1701_v55 = vpack.c.bf16 %v1697_v38, %v1697_v38  ;;  %v1702_v6 = vpack.c.bf16 %v1698_v25, %v1698_v25  ;;  %v7411_v7 = vperm.slane %v6349_v37, 3  ;;  %v7414_v25 = vld [vmem:[#allocation39_spill] sm:$0xff] }
 0x375   : > { %2131 = vmatpush.bf16.msrb.mxu1 %v6566_v39  ;;  %v1708_v31 = vunpack.c.l.b16 %v1699_v5  ;;  %v1987_v18 = vrot.slane %v6451_v32, 2  ;;  %v7413_v32 = vld [vmem:[#allocation20_spill] sm:$0xff] }
 0x376   : > { %v1709_v19 = vunpack.c.l.b16 %v1700_v42  ;;  %v1710_v16 = vunpack.c.l.b16 %v1701_v55  ;;  %v1711_v61 = vunpack.c.l.b16 %v1702_v6  ;;  %v1278_v45 = vadd.f32 %v6484_v2, %v7411_v7  ;;  %v7415_v42 = vld [vmem:[#allocation29_spill] sm:$0xff]  ;;  %v7416_v55 = vld [vmem:[#allocation40_spill] sm:$0xff]  ;;  %v1976_v6 = vpop.xlane.xlu1 %1975 }
 0x378   : > { %v1712_v8 = vrot.slane %v1709_v19, 7  ;;  %v1714_v48 = vrot.slane %v1710_v16, 6  ;;  %v1716_v46 = vrot.slane %v1711_v61, 5  ;;  %v1292_v27 = vadd.f32 %v6486_v9, %v1278_v45 }
 0x379   : > { %v7412_v9 = vperm.slane %v6349_v37, 2  ;;  %v1979_v37 = vpop.xlane.xlu2 %1978 }
 0x37a   : > { %v1713_v17 = vsel %vm1423_vm9, %v1712_v8, %v1708_v31  ;;  %v6820_v2 = vpack.c.bf16 %v1292_v27, %v1292_v27  ;;  %v7417_v8 = vld [vmem:[#allocation38_spill] sm:$0xff] }
 0x37b   : > { %v1715_v49 = vsel %vm1425_vm10, %v1714_v48, %v1713_v17  ;;  %v1250_v34 = vadd.f32 %v6438_v14, %v7412_v9  ;;  %v2161_v14 = vpop.xlane.xlu0 %2160 }
 0x37c   : > { %v1717_v22 = vsel %vm1427_vm11, %v1716_v46, %v1715_v49  ;;  %v2181_v48 = vperm.slane %v2161_v14, %v7417_v8  ;;  %v1996_v14 = vperm.slane %v1976_v6, %v7417_v8 }
 0x37d   : > { %v1718_v52 = vpack.c.b16 %v1717_v22, %v1717_v22  ;;  %v1264_v38 = vadd.f32 %v6436_v13, %v1250_v34 }
 0x37e   : > { %v2164_v13 = vpop.xlane.xlu1 %2163 }
 0x37f   : > { %4912 = vmatmul.msk.bf16.vlgmr.msrb.gmra.mxu3 %vm1544_vm14, %v1718_v52  ;;  %v6838_v5 = vpack.c.bf16 %v1264_v38, %v1264_v38  ;;  %v2182_v22 = vperm.slane %v2164_v13, %v7417_v8 }
 0x380   : > { %2314 = vmatpush.bf16.msrb.mxu3 %v6605_v41 }
 0x381   : > { %v1982_v61 = vpop.xlane.xlu2 %1981 }
 0x382   : > { %v1998_v9 = vperm.slane %v1982_v61, %v7417_v8 }
 0x383   : > { %v2167_v31 = vpop.xlane.xlu0 %2166 }
 0x384   : > { %v2183_v49 = vperm.slane %v2167_v31, %v7417_v8 }
 0x389   : > { %v2170_v52 = vpop.xlane.xlu2 %2169 }
 0x38a   : > { %v2184_v7 = vperm.slane %v2170_v52, %v7417_v8 }
 0x3f1   : > { %v1561_v11 = vpop.f32.mrf.mxu1 }
 0x3f2   : > { %v1565_v39 = vpack.c.bf16 %v1561_v11, %v1561_v11 }
 0x3f4   : > { %1933 = vmatmul.bf16.vlgmr.msra.gmra.mxu2 %v1565_v39  ;;  %1946 = vmatmul.bf16.vlgmr.msra.gmra.mxu3 %v1565_v39  ;;  %v2185_v39 = vsel %vm1423_vm9, %v2182_v22, %v2181_v48 }
 0x3f5   : > { %2347 = vmatpush.bf16.msra.mxu2 %v6441_v15  ;;  %2360 = vmatpush.bf16.msra.mxu3 %v6721_v56 }
 0x3f9   : > { %2348 = vmatpush.bf16.msra.mxu2 %v6474_v57  ;;  %v1563_v3 = vpop.f32.mrf.mxu1  ;;  %2361 = vmatpush.bf16.msra.mxu3 %v6730_v30 }
 0x3fd   : > { %2349 = vmatpush.bf16.msra.mxu2 %v6489_v10  ;;  %2362 = vmatpush.bf16.msra.mxu3 %v6736_v29 }
 0x401   : > { %2350 = vmatpush.bf16.msra.mxu2 %v6507_v36  ;;  %2363 = vmatpush.bf16.msra.mxu3 %v6742_v28 }
 0x402   : > { %v1734_v41 = vpop.f32.mrf.mxu3 }
 0x403   : > { %v1738_v20 = vpack.c.bf16 %v1734_v41, %v1734_v41 }
 0x404   : > { %2197 = vmatmul.bf16.vlgmr.msrb.gmra.mxu2 %v2172_v50 }
 0x405   : > { %2351 = vmatpush.bf16.msra.mxu2 %v6526_v60  ;;  %1827 = vmatmul.bf16.vlgmr.msra.gmra.mxu0 %v1738_v20 }
 0x406   : > { %1840 = vmatmul.bf16.vlgmr.msra.gmra.mxu1 %v1738_v20  ;;  %2321 = vmatpush.bf16.msra.mxu0 %v6391_v21  ;;  %v2186_v20 = vsel %vm1425_vm10, %v2183_v49, %v2185_v39 }
 0x407   : > { %2334 = vmatpush.bf16.msra.mxu1 %v6690_v51  ;;  %2364 = vmatpush.bf16.msra.mxu3 %v6748_v26  ;;  %v2187_v45 = vsel %vm1427_vm11, %v2184_v7, %v2186_v20 }
 0x409   : > { %2352 = vmatpush.bf16.msra.mxu2 %v6563_v62 }
 0x40a   : > { %2322 = vmatpush.bf16.msra.mxu0 %v6413_v12  ;;  %v1736_v1 = vpop.f32.mrf.mxu3 }
 0x40b   : > { %2335 = vmatpush.bf16.msra.mxu1 %v6695_v44  ;;  %2365 = vmatpush.bf16.msra.mxu3 %v6752_v0 }
 0x40d   : > { %2353 = vmatpush.bf16.msra.mxu2 %v6612_v59 }
 0x40e   : > { %2323 = vmatpush.bf16.msra.mxu0 %v6453_v33 }
 0x40f   : > { %2336 = vmatpush.bf16.msra.mxu1 %v6719_v53  ;;  %2366 = vmatpush.bf16.msra.mxu3 %v6755_v23 }
 0x411   : > { %2354 = vmatpush.bf16.msra.mxu2 %v6616_v43 }
 0x412   : > { %2324 = vmatpush.bf16.msra.mxu0 %v6476_v58 }
 0x413   : > { %2337 = vmatpush.bf16.msra.mxu1 %v6724_v24  ;;  %2367 = vmatpush.bf16.msra.mxu3 %v6758_v54 }
 0x415   : > { %2605 = vmatpush.bf16.xpose.msrb.mxu2 %v6820_v2  ;;  %2012 = vmatmul.bf16.vlgmr.msrb.gmra.mxu0 %v1987_v18  ;;  %v1997_v18 = vperm.slane %v1979_v37, %v7417_v8 }
 0x416   : > { %2325 = vmatpush.bf16.msra.mxu0 %v6505_v35 }
 0x417   : > { %2338 = vmatpush.bf16.msra.mxu1 %v6728_v63 }
 0x41a   : > { %2326 = vmatpush.bf16.msra.mxu0 %v6514_v47 }
 0x41b   : > { %2339 = vmatpush.bf16.msra.mxu1 %v6733_v40 }
 0x41e   : > { %2327 = vmatpush.bf16.msra.mxu0 %v7413_v32 }
 0x41f   : > { %2340 = vmatpush.bf16.msra.mxu1 %v7414_v25 }
 0x422   : > { %2328 = vmatpush.bf16.msra.mxu0 %v7415_v42 }
 0x423   : > { %2341 = vmatpush.bf16.msra.mxu1 %v7416_v55 }
 0x426   : > { %2430 = vmatpush.bf16.xpose.msrb.mxu0 %v6838_v5 }
 0x477   : > { %v1934_v19 = vpop.f32.mrf.mxu2  ;;  %v1947_v16 = vpop.f32.mrf.mxu3 }
 0x47f   : > { %v1936_v17 = vpop.f32.mrf.mxu2  ;;  %v1949_v46 = vpop.f32.mrf.mxu3 }
 0x480   : > { %v1985_v17 = vpop.xlane.xlu1 %1984  ;;  %v2000_v46 = vsel %vm1423_vm9, %v1997_v18, %v1996_v14 }
 0x481   : > { %v2001_v22 = vsel %vm1425_vm10, %v1998_v9, %v2000_v46 }
 0x482   : > { %v1828_v11 = vpop.f32.mrf.mxu0 }
 0x483   : > { %v1935_v3 = vadd.f32 %v1934_v19, %v1828_v11  ;;  %v1841_v41 = vpop.f32.mrf.mxu1 }
 0x484   : > { %v1948_v50 = vadd.f32 %v1947_v16, %v1841_v41  ;;  %v1999_v41 = vperm.slane %v1985_v17, %v7417_v8 }
 0x485   : > { %1951 = vst [vmem:[#allocation2 + $0x10] sm:$0xf] %v1935_v3 }
 0x486   : > { %1952 = vst [vmem:[#allocation2] sm:$0xf] %v1948_v50  ;;  %v2002_v20 = vsel %vm1427_vm11, %v1999_v41, %v2001_v22  ;;  %v7419_v41 = vld [vmem:[#allocation17_spill] sm:$0xff] }
 0x487   : > { %v2198_v1 = vpop.f32.mrf.mxu2 }
 0x488   : > { %v2199_v27 = vadd.f32 %v2198_v1, %v2187_v45 }
 0x48a   : > { %v2202_v34 = vmul.f32 0.088388346, %v2199_v27  ;;  %v1830_v38 = vpop.f32.mrf.mxu0 }
 0x48b   : > { %v1843_v19 = vpop.f32.mrf.mxu1 }
 0x48c   : > { %v2204_v16 = vrot.slane %v2202_v34, 7  ;;  %v2205_v31 = vrot.slane %v2202_v34, 1  ;;  %v2212_v13 = vsel %vm524_vm12, -1e+30, %v2202_v34  ;;  %v2206_v48 = vrot.slane %v2202_v34, 2 }
 0x48d   : > { %v2219_v49 = vrot.slane %v2212_v13, 7 }
 0x48e   : > { %v2211_v37 = vsel %vm524_vm12, -1e+30, %v2204_v16  ;;  %v2213_v61 = vsel %vm524_vm12, -1e+30, %v2205_v31  ;;  %v2214_v6 = vsel %vm524_vm12, -1e+30, %v2206_v48 }
 0x48f   : > { %v2200_v52 = vpop.f32.mrf.mxu2  ;;  %v2220_v11 = vsel %vm1425_vm10, %v2219_v49, %v2211_v37  ;;  %v2221_v39 = vrot.slane %v2213_v61, 6  ;;  %v2223_v3 = vrot.slane %v2214_v6, 5 }
 0x490   : > { %v7418_v52 = vld [vmem:[#allocation16_spill] sm:$0xff] }
 0x491   : > { %v2222_v50 = vsel %vm1427_vm11, %v2221_v39, %v2220_v11 }
 0x492   : > { %v2013_v7 = vpop.f32.mrf.mxu0  ;;  %v2224_v45 = vsel %vm2039_vm15, %v2223_v3, %v2222_v50  ;;  %v7420_v50 = vld [vmem:[#allocation18_spill] sm:$0xff] }
 0x493   : > { %v2014_v1 = vadd.f32 %v2013_v7, %v2002_v20  ;;  %v2226_v27 = vsel %vm2042_vm0, %v2224_v45, -inf }
 0x494   : > { %2227 = vmax.xlane.f32.xlu1 %v2226_v27 }
 0x495   : > { %v2017_v18 = vmul.f32 0.088388346, %v2014_v1 }
 0x497   : > { %v2019_v9 = vrot.slane %v2017_v18, 7  ;;  %v2020_v34 = vrot.slane %v2017_v18, 1  ;;  %v2027_v38 = vsel %vm524_vm12, -1e+30, %v2017_v18  ;;  %v2021_v14 = vrot.slane %v2017_v18, 2 }
 0x498   : > { %v2034_v19 = vrot.slane %v2027_v38, 7 }
 0x499   : > { %v2026_v16 = vsel %vm524_vm12, -1e+30, %v2019_v9  ;;  %v2028_v31 = vsel %vm524_vm12, -1e+30, %v2020_v34  ;;  %v2029_v48 = vsel %vm524_vm12, -1e+30, %v2021_v14 }
 0x49a   : > { %v2015_v17 = vpop.f32.mrf.mxu0  ;;  %v2035_v46 = vsel %vm1425_vm10, %v2034_v19, %v2026_v16  ;;  %v2036_v49 = vrot.slane %v2028_v31, 6  ;;  %v2038_v22 = vrot.slane %v2029_v48, 5 }
 0x49c   : > { %2400 = vadd.xlane.f32.xlu1 %v7418_v52  ;;  %v2037_v11 = vsel %vm1427_vm11, %v2036_v49, %v2035_v46 }
 0x49d   : > { %v2040_v39 = vsel %vm2039_vm15, %v2038_v22, %v2037_v11 }
 0x49e   : > { %v2043_v3 = vsel %vm2042_vm0, %v2040_v39, -inf }
 0x49f   : > { %2044 = vmax.xlane.f32.xlu0 %v2043_v3 }
 0x4a4   : > { %2578 = vadd.xlane.f32.xlu1 %v7419_v41 }
 0x4ac   : > { %2409 = vadd.xlane.f32.xlu1 %v7420_v50 }
 0x507   : > { %v2228_v20 = vpop.xlane.xlu1 %2227 }
 0x508   : > { %v2230_v7 = vrot.slane %v2228_v20, 1  ;;  %v2231_v45 = vrot.slane %v2228_v20, 2  ;;  %v2232_v1 = vrot.slane %v2228_v20, 3  ;;  %v2237_v27 = vsub.f32 %v2211_v37, %v2228_v20 }
 0x50a   : > { %v2238_v18 = vsub.f32 %v2212_v13, %v2230_v7  ;;  %v2239_v9 = vsub.f32 %v2213_v61, %v2231_v45  ;;  %v2240_v34 = vsub.f32 %v2214_v6, %v2232_v1  ;;  %v2241_v46 = vmul.f32 1.442695, %v2237_v27 }
 0x50c   : > { %v2243_v14 = vmul.f32 1.442695, %v2238_v18  ;;  %v2245_v19 = vmul.f32 1.442695, %v2239_v9  ;;  %v2247_v17 = vmul.f32 1.442695, %v2240_v34 }
 0x50e   : > { %5906 = vpow2.f32 %v2243_v14 }
 0x50f   : > { %5908 = vpow2.f32 %v2245_v19 }
 0x510   : > { %5910 = vpow2.f32 %v2247_v17 }
 0x511   : > { %5912 = vpow2.f32 %v2241_v46 }
 0x512   : > { %v2045_v49 = vpop.xlane.xlu0 %2044 }
 0x513   : > { %v2047_v22 = vrot.slane %v2045_v49, 1  ;;  %v2048_v52 = vrot.slane %v2045_v49, 2  ;;  %v2049_v11 = vrot.slane %v2045_v49, 3  ;;  %v2054_v39 = vsub.f32 %v2026_v16, %v2045_v49 }
 0x514   : > { %v5907_v3 = vpop.eup %5906 }
 0x515   : > { %v5909_v41 = vpop.eup %5908  ;;  %v2055_v50 = vsub.f32 %v2027_v38, %v2047_v22  ;;  %v2056_v37 = vsub.f32 %v2028_v31, %v2048_v52  ;;  %v2057_v13 = vsub.f32 %v2029_v48, %v2049_v11  ;;  %v2058_v61 = vmul.f32 1.442695, %v2054_v39  ;;  %v7421_v39 = vld [vmem:[#allocation19_spill] sm:$0xff] }
 0x516   : > { %v5911_v6 = vpop.eup %5910  ;;  %v2253_v20 = vrot.slane %v5907_v3, 7  ;;  %v2255_v7 = vrot.slane %v5909_v41, 6 }
 0x517   : > { %v5913_v45 = vpop.eup %5912  ;;  %v2060_v1 = vmul.f32 1.442695, %v2055_v50  ;;  %v2062_v27 = vmul.f32 1.442695, %v2056_v37  ;;  %v2064_v18 = vmul.f32 1.442695, %v2057_v13  ;;  %5914 = vpow2.f32 %v2058_v61 }
 0x518   : > { %v2254_v9 = vsel %vm1425_vm10, %v2253_v20, %v5913_v45  ;;  %v2257_v34 = vrot.slane %v5911_v6, 5  ;;  %v7422_v13 = vld [vmem:[#allocation21_spill] sm:$0xff]  ;;  %v7423_v61 = vld [vmem:[#allocation22_spill] sm:$0xff]  ;;  %v7424_v20 = vld [vmem:[#allocation23_spill] sm:$0xff] }
 0x519   : > { %5916 = vpow2.f32 %v2060_v1  ;;  %v2256_v16 = vsel %vm1427_vm11, %v2255_v7, %v2254_v9  ;;  %v7425_v7 = vld [vmem:[#allocation25_spill] sm:$0xff] }
 0x51a   : > { %5918 = vpow2.f32 %v2062_v27  ;;  %v2258_v38 = vsel %vm2039_vm15, %v2257_v34, %v2256_v16 }
 0x51b   : > { %5920 = vpow2.f32 %v2064_v18  ;;  %v2260_v31 = vsel %vm2042_vm0, %v2258_v38, 0.0 }
 0x51c   : > { %2261 = vadd.xlane.f32.xlu0 %v2260_v31 }
 0x51d   : > { %v5915_v48 = vpop.eup %5914 }
 0x51f   : > { %v5917_v14 = vpop.eup %5916 }
 0x520   : > { %v5919_v19 = vpop.eup %5918  ;;  %v2070_v17 = vrot.slane %v5917_v14, 7 }
 0x521   : > { %v5921_v46 = vpop.eup %5920  ;;  %v2072_v49 = vrot.slane %v5919_v19, 6 }
 0x522   : > { %v2071_v22 = vsel %vm1425_vm10, %v2070_v17, %v5915_v48  ;;  %v2074_v52 = vrot.slane %v5921_v46, 5 }
 0x523   : > { %v2073_v11 = vsel %vm1427_vm11, %v2072_v49, %v2071_v22 }
 0x524   : > { %2575 = vadd.xlane.f32.xlu0 %v7421_v39  ;;  %v2075_v50 = vsel %vm2039_vm15, %v2074_v52, %v2073_v11 }
 0x525   : > { %v2077_v37 = vsel %vm2042_vm0, %v2075_v50, 0.0 }
 0x526   : > { %2078 = vadd.xlane.f32.xlu2 %v2077_v37 }
 0x52c   : > { %2581 = vadd.xlane.f32.xlu0 %v7422_v13 }
 0x52e   : > { %2403 = vadd.xlane.f32.xlu2 %v7423_v61 }
 0x536   : > { %2406 = vadd.xlane.f32.xlu2 %v7424_v20 }
 0x53e   : > { %2584 = vadd.xlane.f32.xlu2 %v7425_v7 }
 0x58f   : > { %v2262_v1 = vpop.xlane.xlu0 %2261 }
 0x590   : > { %5922 = vrcp.f32 %v2262_v1 }
 0x596   : > { %v5923_v27 = vpop.eup %5922 }
 0x597   : > { %v2265_v18 = vrot.slane %v5923_v27, 1  ;;  %v2266_v9 = vrot.slane %v5923_v27, 2  ;;  %v2267_v34 = vrot.slane %v5923_v27, 3  ;;  %v2272_v16 = vmul.f32 %v5923_v27, %v5913_v45 }
 0x599   : > { %v2079_v38 = vpop.xlane.xlu2 %2078  ;;  %v2273_v31 = vmul.f32 %v5907_v3, %v2265_v18  ;;  %v2274_v17 = vmul.f32 %v5909_v41, %v2266_v9  ;;  %v2275_v49 = vmul.f32 %v5911_v6, %v2267_v34  ;;  %v2276_v22 = vsel %vm524_vm12, 0.0, %v2272_v16 }
 0x59a   : > { %5924 = vrcp.f32 %v2079_v38  ;;  %v2280_v52 = vpack.c.bf16 %v2276_v22, %v2276_v22 }
 0x59b   : > { %v2277_v11 = vsel %vm524_vm12, 0.0, %v2273_v31  ;;  %v2278_v39 = vsel %vm524_vm12, 0.0, %v2274_v17  ;;  %v2279_v50 = vsel %vm524_vm12, 0.0, %v2275_v49 }
 0x59c   : > { %v2281_v37 = vpack.c.bf16 %v2277_v11, %v2277_v11  ;;  %v2282_v45 = vpack.c.bf16 %v2278_v39, %v2278_v39  ;;  %v2283_v13 = vpack.c.bf16 %v2279_v50, %v2279_v50  ;;  %v2288_v3 = vunpack.c.l.b16 %v2280_v52 }
 0x59e   : > { %v2289_v41 = vunpack.c.l.b16 %v2281_v37  ;;  %v2290_v6 = vunpack.c.l.b16 %v2282_v45  ;;  %v2291_v61 = vunpack.c.l.b16 %v2283_v13  ;;  %v2292_v20 = vrot.slane %v2288_v3, 1 }
 0x5a0   : > { %v5925_v7 = vpop.eup %5924  ;;  %v2293_v1 = vsel %vm1423_vm9, %v2289_v41, %v2292_v20  ;;  %v2294_v27 = vrot.slane %v2290_v6, 7  ;;  %v2296_v18 = vrot.slane %v2291_v61, 6 }
 0x5a1   : > { %v2082_v9 = vrot.slane %v5925_v7, 1  ;;  %v2083_v34 = vrot.slane %v5925_v7, 2  ;;  %v2084_v16 = vrot.slane %v5925_v7, 3  ;;  %v2089_v38 = vmul.f32 %v5925_v7, %v5915_v48 }
 0x5a2   : > { %v2295_v31 = vsel %vm1425_vm10, %v2294_v27, %v2293_v1 }
 0x5a3   : > { %v2297_v17 = vsel %vm1427_vm11, %v2296_v18, %v2295_v31  ;;  %v2090_v49 = vmul.f32 %v5917_v14, %v2082_v9  ;;  %v2091_v22 = vmul.f32 %v5919_v19, %v2083_v34  ;;  %v2092_v52 = vmul.f32 %v5921_v46, %v2084_v16  ;;  %v7426_v46 = vld [vmem:[#allocation36_spill] sm:$0xff] }
 0x5a4   : > { %v2298_v11 = vpack.c.b16 %v2297_v17, %v2297_v17  ;;  %v2093_v39 = vsel %vm524_vm12, 0.0, %v2089_v38  ;;  %v7427_v16 = vld [vmem:[#allocation32_spill] sm:$0xff] }
 0x5a5   : > { %v2094_v50 = vsel %vm524_vm12, 0.0, %v2090_v49  ;;  %v2095_v37 = vsel %vm524_vm12, 0.0, %v2091_v22  ;;  %v2096_v48 = vsel %vm524_vm12, 0.0, %v2092_v52  ;;  %v2097_v45 = vpack.c.bf16 %v2093_v39, %v2093_v39 }
 0x5a6   : > { %5042 = vmatmul.msk.bf16.vlgmr.msrb.gmra.mxu3 %vm1544_vm14, %v2298_v11  ;;  %v2098_v13 = vpack.c.bf16 %v2094_v50, %v2094_v50  ;;  %v2099_v14 = vpack.c.bf16 %v2095_v37, %v2095_v37  ;;  %v2100_v19 = vpack.c.bf16 %v2096_v48, %v2096_v48  ;;  %v7428_v11 = vld [vmem:[#allocation15_spill] sm:$0xff]  ;;  %v5986_v50 = vld [vmem:[#allocation1] sm:$0xff]  ;;  %v2820_v48 = vrot.slane %v6838_v5, 2 }
 0x5a7   : > { %2722 = vmatpush.bf16.msrb.mxu3 %v7426_v46  ;;  %v2105_v3 = vunpack.c.l.b16 %v2097_v45  ;;  %v6937_v39 = vpack.c.bf16 %v7428_v11, %v7428_v11  ;;  %v6944_v37 = vpack.c.bf16 %v5986_v50, %v5986_v50  ;;  %v3005_v45 = vrot.slane %v6820_v2, 2 }
 0x5a8   : > { %v2106_v41 = vunpack.c.l.b16 %v2098_v13  ;;  %v2107_v6 = vunpack.c.l.b16 %v2099_v14  ;;  %v2108_v61 = vunpack.c.l.b16 %v2100_v19  ;;  %v2401_v13 = vpop.xlane.xlu1 %2400  ;;  %v2404_v14 = vpop.xlane.xlu2 %2403 }
 0x5a9   : > { %v2109_v20 = vrot.slane %v2105_v3, 1  ;;  %v2415_v2 = vperm.slane %v2401_v13, %v7417_v8 }
 0x5aa   : > { %v2111_v7 = vrot.slane %v2107_v6, 7  ;;  %v2113_v1 = vrot.slane %v2108_v61, 6  ;;  %v2416_v6 = vperm.slane %v2404_v14, %v7417_v8 }
 0x5ab   : > { %v2110_v27 = vsel %vm1423_vm9, %v2106_v41, %v2109_v20  ;;  %v2576_v41 = vpop.xlane.xlu0 %2575 }
 0x5ac   : > { %v2112_v18 = vsel %vm1425_vm10, %v2111_v7, %v2110_v27 }
 0x5ad   : > { %v2114_v9 = vsel %vm1427_vm11, %v2113_v1, %v2112_v18 }
 0x5ae   : > { %v2115_v34 = vpack.c.b16 %v2114_v9, %v2114_v9 }
 0x5b0   : > { %5041 = vmatmul.msk.bf16.vlgmr.msrb.gmra.mxu1 %vm1544_vm14, %v2115_v34  ;;  %v2579_v46 = vpop.xlane.xlu1 %2578  ;;  %v2407_v3 = vpop.xlane.xlu2 %2406 }
 0x5b1   : > { %2549 = vmatpush.bf16.msrb.mxu1 %v7427_v16  ;;  %v2417_v7 = vperm.slane %v2407_v3, %v7417_v8  ;;  %v2419_v16 = vsel %vm1423_vm9, %v2416_v6, %v2415_v2 }
 0x5b3   : > { %v2582_v11 = vpop.xlane.xlu0 %2581 }
 0x5b8   : > { %v2410_v18 = vpop.xlane.xlu1 %2409  ;;  %v2585_v13 = vpop.xlane.xlu2 %2584 }
 0x629   : > { %v2316_v38 = vpop.f32.mrf.mxu3 }
 0x62a   : > { %v2320_v31 = vpack.c.bf16 %v2316_v38, %v2316_v38 }
 0x62c   : > { %2329 = vmatmul.bf16.vlgmr.msra.gmra.mxu0 %v2320_v31  ;;  %2342 = vmatmul.bf16.vlgmr.msra.gmra.mxu1 %v2320_v31 }
 0x62d   : > { %2729 = vmatpush.bf16.msra.mxu0 %v6391_v21  ;;  %v2133_v17 = vpop.f32.mrf.mxu1  ;;  %2742 = vmatpush.bf16.msra.mxu1 %v6690_v51 }
 0x62e   : > { %v2137_v49 = vpack.c.bf16 %v2133_v17, %v2133_v17  ;;  %v2420_v17 = vsel %vm1425_vm10, %v2417_v7, %v2419_v16  ;;  %v2593_v7 = vperm.slane %v2585_v13, %v7417_v8 }
 0x630   : > { %2355 = vmatmul.bf16.vlgmr.msra.gmra.mxu2 %v2137_v49  ;;  %2368 = vmatmul.bf16.vlgmr.msra.gmra.mxu3 %v2137_v49  ;;  %v2418_v49 = vperm.slane %v2410_v18, %v7417_v8 }
 0x631   : > { %2730 = vmatpush.bf16.msra.mxu0 %v6413_v12  ;;  %v2318_v22 = vpop.f32.mrf.mxu3  ;;  %2755 = vmatpush.bf16.msra.mxu2 %v6441_v15 }
 0x632   : > { %2743 = vmatpush.bf16.msra.mxu1 %v6695_v44  ;;  %2768 = vmatpush.bf16.msra.mxu3 %v6721_v56  ;;  %v2421_v22 = vsel %vm1427_vm11, %v2418_v49, %v2420_v17 }
 0x635   : > { %2731 = vmatpush.bf16.msra.mxu0 %v6453_v33  ;;  %2756 = vmatpush.bf16.msra.mxu2 %v6474_v57  ;;  %v2135_v52 = vpop.f32.mrf.mxu1 }
 0x636   : > { %2744 = vmatpush.bf16.msra.mxu1 %v6719_v53  ;;  %2769 = vmatpush.bf16.msra.mxu3 %v6730_v30 }
 0x639   : > { %2732 = vmatpush.bf16.msra.mxu0 %v6476_v58  ;;  %2757 = vmatpush.bf16.msra.mxu2 %v6489_v10 }
 0x63a   : > { %2745 = vmatpush.bf16.msra.mxu1 %v6724_v24  ;;  %2770 = vmatpush.bf16.msra.mxu3 %v6736_v29 }
 0x63c   : > { %2431 = vmatmul.bf16.vlgmr.msrb.gmra.mxu0 %v6937_v39 }
 0x63d   : > { %2733 = vmatpush.bf16.msra.mxu0 %v6505_v35  ;;  %2758 = vmatpush.bf16.msra.mxu2 %v6507_v36 }
 0x63e   : > { %2746 = vmatpush.bf16.msra.mxu1 %v6728_v63  ;;  %2771 = vmatpush.bf16.msra.mxu3 %v6742_v28 }
 0x640   : > { %2606 = vmatmul.bf16.vlgmr.msrb.gmra.mxu2 %v6944_v37 }
 0x641   : > { %2734 = vmatpush.bf16.msra.mxu0 %v6514_v47  ;;  %2759 = vmatpush.bf16.msra.mxu2 %v6526_v60 }
 0x642   : > { %2747 = vmatpush.bf16.msra.mxu1 %v6733_v40  ;;  %2772 = vmatpush.bf16.msra.mxu3 %v6748_v26 }
 0x645   : > { %2735 = vmatpush.bf16.msra.mxu0 %v7413_v32  ;;  %2760 = vmatpush.bf16.msra.mxu2 %v6563_v62 }
 0x646   : > { %2748 = vmatpush.bf16.msra.mxu1 %v7414_v25  ;;  %2773 = vmatpush.bf16.msra.mxu3 %v6752_v0 }
 0x649   : > { %2736 = vmatpush.bf16.msra.mxu0 %v7415_v42  ;;  %2761 = vmatpush.bf16.msra.mxu2 %v6612_v59 }
 0x64a   : > { %2749 = vmatpush.bf16.msra.mxu1 %v7416_v55  ;;  %2774 = vmatpush.bf16.msra.mxu3 %v6755_v23 }
 0x64d   : > { %2841 = vmatpush.bf16.xpose.msrb.mxu0 %v2820_v48  ;;  %2762 = vmatpush.bf16.msra.mxu2 %v6616_v43 }
 0x64e   : > { %2775 = vmatpush.bf16.msra.mxu3 %v6758_v54 }
 0x651   : > { %3026 = vmatpush.bf16.xpose.msrb.mxu2 %v3005_v45 }
 0x6a9   : > { %v2330_v19 = vpop.f32.mrf.mxu0  ;;  %v2343_v5 = vpop.f32.mrf.mxu1 }
 0x6b1   : > { %v2332_v61 = vpop.f32.mrf.mxu0  ;;  %v2345_v20 = vpop.f32.mrf.mxu1 }
 0x6b2   : > { %v2591_v20 = vperm.slane %v2579_v46, %v7417_v8 }
 0x6b3   : > { %v2356_v1 = vpop.f32.mrf.mxu2  ;;  %v2369_v27 = vpop.f32.mrf.mxu3 }
 0x6b4   : > { %v2357_v9 = vadd.f32 %v2356_v1, %v2330_v19  ;;  %v2370_v34 = vadd.f32 %v2369_v27, %v2343_v5  ;;  %v2590_v19 = vperm.slane %v2576_v41, %v7417_v8  ;;  %v2592_v5 = vperm.slane %v2582_v11, %v7417_v8 }
 0x6b6   : > { %v2375_v38 = vrot.slane %v2357_v9, 4  ;;  %v2376_v31 = vrot.slane %v2370_v34, 4  ;;  %v2594_v41 = vsel %vm1423_vm9, %v2591_v20, %v2590_v19 }
 0x6b7   : > { %v2595_v34 = vsel %vm1425_vm10, %v2592_v5, %v2594_v41 }
 0x6b8   : > { %2379 = vst [vmem:[#allocation2 + $0x10] sm:$0xf0] %v2375_v38  ;;  %v2596_v38 = vsel %vm1427_vm11, %v2593_v7, %v2595_v34 }
 0x6b9   : > { %2380 = vst [vmem:[#allocation2] sm:$0xf0] %v2376_v31  ;;  %v2432_v52 = vpop.f32.mrf.mxu0 }
 0x6ba   : > { %v2433_v50 = vadd.f32 %v2432_v52, %v2421_v22 }
 0x6bb   : > { %v2358_v48 = vpop.f32.mrf.mxu2  ;;  %v2371_v45 = vpop.f32.mrf.mxu3 }
 0x6bc   : > { %v2436_v14 = vmul.f32 0.088388346, %v2433_v50 }
 0x6be   : > { %v2438_v3 = vrot.slane %v2436_v14, 6  ;;  %v2439_v6 = vrot.slane %v2436_v14, 7  ;;  %v2440_v61 = vrot.slane %v2436_v14, 1  ;;  %v2447_v2 = vsel %vm524_vm12, -1e+30, %v2436_v14 }
 0x6bf   : > { %v2455_v16 = vrot.slane %v2447_v2, 6 }
 0x6c0   : > { %v2446_v1 = vsel %vm524_vm12, -1e+30, %v2439_v6  ;;  %v2448_v27 = vsel %vm524_vm12, -1e+30, %v2440_v61  ;;  %v2445_v46 = vsel %vm524_vm12, -1e+30, %v2438_v3 }
 0x6c1   : > { %v2434_v18 = vpop.f32.mrf.mxu0  ;;  %v2453_v9 = vrot.slane %v2446_v1, 7  ;;  %v2457_v49 = vrot.slane %v2448_v27, 5 }
 0x6c3   : > { %v2607_v31 = vpop.f32.mrf.mxu2  ;;  %v2454_v17 = vsel %vm1427_vm11, %v2453_v9, %v2445_v46 }
 0x6c4   : > { %v2608_v22 = vadd.f32 %v2607_v31, %v2596_v38  ;;  %v2456_v52 = vsel %vm2039_vm15, %v2455_v16, %v2454_v17  ;;  %v7429_v38 = vld [vmem:[#allocation24_spill] sm:$0xff]  ;;  %v7430_v31 = vld [vmem:[#allocation30_spill] sm:$0xff] }
 0x6c5   : > { %v2459_v11 = vsel %vm2458_vm1, %v2457_v49, %v2456_v52  ;;  %v7431_v17 = vld [vmem:[#allocation26_spill] sm:$0xff] }
 0x6c6   : > { %v2611_v50 = vmul.f32 0.088388346, %v2608_v22  ;;  %v2462_v48 = vsel %vm2461_vm2, %v2459_v11, -inf }
 0x6c7   : > { %2463 = vmax.xlane.f32.xlu0 %v2462_v48 }
 0x6c8   : > { %v2613_v45 = vrot.slane %v2611_v50, 6  ;;  %v2614_v13 = vrot.slane %v2611_v50, 7  ;;  %v2615_v14 = vrot.slane %v2611_v50, 1  ;;  %v2622_v19 = vsel %vm524_vm12, -1e+30, %v2611_v50 }
 0x6c9   : > { %v2630_v7 = vrot.slane %v2622_v19, 6 }
 0x6ca   : > { %v2621_v5 = vsel %vm524_vm12, -1e+30, %v2614_v13  ;;  %v2623_v3 = vsel %vm524_vm12, -1e+30, %v2615_v14  ;;  %v2620_v20 = vsel %vm524_vm12, -1e+30, %v2613_v45 }
 0x6cb   : > { %v2609_v6 = vpop.f32.mrf.mxu2  ;;  %v2628_v61 = vrot.slane %v2621_v5, 7  ;;  %v2632_v18 = vrot.slane %v2623_v3, 5 }
 0x6cd   : > { %v2629_v41 = vsel %vm1427_vm11, %v2628_v61, %v2620_v20 }
 0x6ce   : > { %v2631_v9 = vsel %vm2039_vm15, %v2630_v7, %v2629_v41 }
 0x6cf   : > { %v2633_v34 = vsel %vm2458_vm1, %v2632_v18, %v2631_v9 }
 0x6d0   : > { %v2635_v16 = vsel %vm2461_vm2, %v2633_v34, -inf }
 0x6d1   : > { %2636 = vmax.xlane.f32.xlu1 %v2635_v16 }
 0x6d9   : > { %2805 = vadd.xlane.f32.xlu1 %v7429_v38 }
 0x6e1   : > { %2993 = vadd.xlane.f32.xlu1 %v7430_v31 }
 0x6e9   : > { %2814 = vadd.xlane.f32.xlu1 %v7431_v17 }
 0x73a   : > { %v2464_v49 = vpop.xlane.xlu0 %2463 }
 0x73b   : > { %v2466_v22 = vrot.slane %v2464_v49, 1  ;;  %v2467_v52 = vrot.slane %v2464_v49, 2  ;;  %v2468_v11 = vrot.slane %v2464_v49, 3  ;;  %v2473_v50 = vsub.f32 %v2445_v46, %v2464_v49 }
 0x73d   : > { %v2474_v48 = vsub.f32 %v2446_v1, %v2466_v22  ;;  %v2475_v45 = vsub.f32 %v2447_v2, %v2467_v52  ;;  %v2476_v13 = vsub.f32 %v2448_v27, %v2468_v11  ;;  %v2477_v14 = vmul.f32 1.442695, %v2473_v50 }
 0x73f   : > { %v2479_v6 = vmul.f32 1.442695, %v2474_v48  ;;  %v2481_v61 = vmul.f32 1.442695, %v2475_v45  ;;  %v2483_v7 = vmul.f32 1.442695, %v2476_v13  ;;  %5926 = vpow2.f32 %v2477_v14 }
 0x741   : > { %5928 = vpow2.f32 %v2479_v6 }
 0x742   : > { %5930 = vpow2.f32 %v2481_v61 }
 0x743   : > { %5932 = vpow2.f32 %v2483_v7 }
 0x744   : > { %v2637_v41 = vpop.xlane.xlu1 %2636 }
 0x745   : > { %v2639_v18 = vrot.slane %v2637_v41, 1  ;;  %v2640_v9 = vrot.slane %v2637_v41, 2  ;;  %v2641_v34 = vrot.slane %v2637_v41, 3  ;;  %v2646_v16 = vsub.f32 %v2620_v20, %v2637_v41  ;;  %v5927_v38 = vpop.eup %5926 }
 0x747   : > { %v5929_v31 = vpop.eup %5928  ;;  %v2647_v17 = vsub.f32 %v2621_v5, %v2639_v18  ;;  %v2648_v46 = vsub.f32 %v2622_v19, %v2640_v9  ;;  %v2649_v1 = vsub.f32 %v2623_v3, %v2641_v34  ;;  %v2650_v2 = vmul.f32 1.442695, %v2646_v16 }
 0x748   : > { %v5931_v27 = vpop.eup %5930  ;;  %v2489_v49 = vrot.slane %v5929_v31, 7 }
 0x749   : > { %v5933_v22 = vpop.eup %5932  ;;  %v2652_v52 = vmul.f32 1.442695, %v2647_v17  ;;  %v2654_v11 = vmul.f32 1.442695, %v2648_v46  ;;  %v2656_v50 = vmul.f32 1.442695, %v2649_v1  ;;  %5934 = vpow2.f32 %v2650_v2 }
 0x74a   : > { %v2490_v48 = vsel %vm1427_vm11, %v2489_v49, %v5927_v38  ;;  %v2491_v45 = vrot.slane %v5931_v27, 6  ;;  %v2493_v13 = vrot.slane %v5933_v22, 5  ;;  %v7432_v17 = vld [vmem:[#allocation27_spill] sm:$0xff]  ;;  %v7433_v1 = vld [vmem:[#allocation28_spill] sm:$0xff]  ;;  %v7435_v49 = vld [vmem:[#allocation33_spill] sm:$0xff] }
 0x74b   : > { %5936 = vpow2.f32 %v2652_v52  ;;  %v7434_v2 = vld [vmem:[#allocation31_spill] sm:$0xff]  ;;  %v7436_v52 = vld [vmem:[#allocation34_spill] sm:$0xff] }
 0x74c   : > { %5938 = vpow2.f32 %v2654_v11  ;;  %v2492_v20 = vsel %vm2039_vm15, %v2491_v45, %v2490_v48 }
 0x74d   : > { %5940 = vpow2.f32 %v2656_v50  ;;  %v2494_v19 = vsel %vm2458_vm1, %v2493_v13, %v2492_v20 }
 0x74e   : > { %v2496_v5 = vsel %vm2461_vm2, %v2494_v19, 0.0 }
 0x74f   : > { %2497 = vadd.xlane.f32.xlu2 %v2496_v5  ;;  %v5935_v3 = vpop.eup %5934 }
 0x751   : > { %v5937_v14 = vpop.eup %5936 }
 0x752   : > { %v5939_v6 = vpop.eup %5938  ;;  %v2662_v61 = vrot.slane %v5937_v14, 7 }
 0x753   : > { %v5941_v7 = vpop.eup %5940  ;;  %v2664_v41 = vrot.slane %v5939_v6, 6 }
 0x754   : > { %v2663_v18 = vsel %vm1427_vm11, %v2662_v61, %v5935_v3  ;;  %v2666_v9 = vrot.slane %v5941_v7, 5 }
 0x755   : > { %v2665_v34 = vsel %vm2039_vm15, %v2664_v41, %v2663_v18 }
 0x756   : > { %v2667_v16 = vsel %vm2458_vm1, %v2666_v9, %v2665_v34 }
 0x757   : > { %2808 = vadd.xlane.f32.xlu2 %v7432_v17  ;;  %v2669_v46 = vsel %vm2461_vm2, %v2667_v16, 0.0 }
 0x758   : > { %2670 = vadd.xlane.f32.xlu0 %v2669_v46 }
 0x75f   : > { %2811 = vadd.xlane.f32.xlu2 %v7433_v1 }
 0x760   : > { %2990 = vadd.xlane.f32.xlu0 %v7434_v2 }
 0x767   : > { %2999 = vadd.xlane.f32.xlu2 %v7435_v49 }
 0x768   : > { %2996 = vadd.xlane.f32.xlu0 %v7436_v52 }
 0x7c2   : > { %v2498_v11 = vpop.xlane.xlu2 %2497 }
 0x7c3   : > { %5942 = vrcp.f32 %v2498_v11 }
 0x7c9   : > { %v5943_v50 = vpop.eup %5942 }
 0x7ca   : > { %v2501_v48 = vrot.slane %v5943_v50, 1  ;;  %v2502_v45 = vrot.slane %v5943_v50, 2  ;;  %v2503_v13 = vrot.slane %v5943_v50, 3  ;;  %v2508_v20 = vmul.f32 %v5943_v50, %v5927_v38 }
 0x7cb   : > { %v2671_v19 = vpop.xlane.xlu0 %2670 }
 0x7cc   : > { %5944 = vrcp.f32 %v2671_v19  ;;  %v2509_v5 = vmul.f32 %v5929_v31, %v2501_v48  ;;  %v2510_v61 = vmul.f32 %v5931_v27, %v2502_v45  ;;  %v2511_v41 = vmul.f32 %v5933_v22, %v2503_v13 }
 0x7cd   : > { %v2512_v18 = vsel %vm524_vm12, 0.0, %v2508_v20 }
 0x7ce   : > { %v2513_v9 = vsel %vm524_vm12, 0.0, %v2509_v5  ;;  %v2514_v34 = vsel %vm524_vm12, 0.0, %v2510_v61  ;;  %v2515_v16 = vsel %vm524_vm12, 0.0, %v2511_v41  ;;  %v2516_v17 = vpack.c.bf16 %v2512_v18, %v2512_v18 }
 0x7cf   : > { %v2517_v46 = vpack.c.bf16 %v2513_v9, %v2513_v9  ;;  %v2519_v38 = vpack.c.bf16 %v2515_v16, %v2515_v16  ;;  %v2518_v1 = vpack.c.bf16 %v2514_v34, %v2514_v34 }
 0x7d0   : > { %v2525_v2 = vunpack.c.l.b16 %v2516_v17 }
 0x7d1   : > { %v2526_v31 = vunpack.c.l.b16 %v2517_v46  ;;  %v2528_v27 = vunpack.c.l.b16 %v2519_v38  ;;  %v2527_v50 = vunpack.c.l.b16 %v2518_v1 }
 0x7d2   : > { %v5945_v22 = vpop.eup %5944  ;;  %v2529_v49 = vrot.slane %v2525_v2, 2  ;;  %v7437_v2 = vld [vmem:[#allocation35_spill] sm:$0xff] }
 0x7d3   : > { %v2530_v52 = vrot.slane %v2526_v31, 1  ;;  %v2674_v11 = vrot.slane %v5945_v22, 1  ;;  %v2675_v48 = vrot.slane %v5945_v22, 2  ;;  %v2676_v45 = vrot.slane %v5945_v22, 3 }
 0x7d4   : > { %v2681_v13 = vmul.f32 %v5945_v22, %v5935_v3  ;;  %v2533_v19 = vrot.slane %v2528_v27, 7 }
 0x7d5   : > { %v2531_v20 = vsel %vm1423_vm9, %v2530_v52, %v2529_v49  ;;  %v2682_v5 = vmul.f32 %v5937_v14, %v2674_v11  ;;  %v2683_v41 = vmul.f32 %v5939_v6, %v2675_v48  ;;  %v2684_v18 = vmul.f32 %v5941_v7, %v2676_v45 }
 0x7d6   : > { %v2532_v61 = vsel %vm1425_vm10, %v2527_v50, %v2531_v20  ;;  %v2685_v34 = vsel %vm524_vm12, 0.0, %v2681_v13  ;;  %v7438_v20 = vld [vmem:[#allocation37_spill] sm:$0xff] }
 0x7d7   : > { %v2534_v9 = vsel %vm1427_vm11, %v2533_v19, %v2532_v61  ;;  %v2686_v16 = vsel %vm524_vm12, 0.0, %v2682_v5  ;;  %v2687_v3 = vsel %vm524_vm12, 0.0, %v2683_v41  ;;  %v2688_v46 = vsel %vm524_vm12, 0.0, %v2684_v18 }
 0x7d8   : > { %v2535_v17 = vpack.c.b16 %v2534_v9, %v2534_v9  ;;  %v2689_v14 = vpack.c.bf16 %v2685_v34, %v2685_v34  ;;  %v2690_v38 = vpack.c.bf16 %v2686_v16, %v2686_v16  ;;  %v2692_v1 = vpack.c.bf16 %v2688_v46, %v2688_v46 }
 0x7d9   : > { %v2691_v6 = vpack.c.bf16 %v2687_v3, %v2687_v3  ;;  %v3002_v9 = vrot.slane %v6944_v37, 2 }
 0x7da   : > { %5043 = vmatmul.msk.bf16.vlgmr.msrb.gmra.mxu1 %vm1544_vm14, %v2535_v17  ;;  %v2698_v7 = vunpack.c.l.b16 %v2689_v14  ;;  %v2699_v31 = vunpack.c.l.b16 %v2690_v38  ;;  %v2701_v27 = vunpack.c.l.b16 %v2692_v1 }
 0x7db   : > { %2961 = vmatpush.bf16.msrb.mxu1 %v7437_v2  ;;  %v2700_v52 = vunpack.c.l.b16 %v2691_v6 }
 0x7dc   : > { %v2702_v22 = vrot.slane %v2698_v7, 2  ;;  %v2703_v49 = vrot.slane %v2699_v31, 1  ;;  %v2706_v50 = vrot.slane %v2701_v27, 7 }
 0x7de   : > { %v2704_v11 = vsel %vm1423_vm9, %v2703_v49, %v2702_v22 }
 0x7df   : > { %v2705_v48 = vsel %vm1425_vm10, %v2700_v52, %v2704_v11 }
 0x7e0   : > { %v2707_v45 = vsel %vm1427_vm11, %v2706_v50, %v2705_v48 }
 0x7e1   : > { %v2708_v13 = vpack.c.b16 %v2707_v45, %v2707_v45 }
 0x7e3   : > { %5044 = vmatmul.msk.bf16.vlgmr.msrb.gmra.mxu3 %vm1544_vm14, %v2708_v13 }
 0x7e4   : > { %3144 = vmatpush.bf16.msrb.mxu3 %v7438_v20 }
 0x857   : > { %v2551_v19 = vpop.f32.mrf.mxu1 }
 0x858   : > { %v2555_v5 = vpack.c.bf16 %v2551_v19, %v2551_v19 }
 0x85a   : > { %2763 = vmatmul.bf16.vlgmr.msra.gmra.mxu2 %v2555_v5  ;;  %2776 = vmatmul.bf16.vlgmr.msra.gmra.mxu3 %v2555_v5 }
 0x85b   : > { %3177 = vmatpush.bf16.msra.mxu2 %v6441_v15  ;;  %3190 = vmatpush.bf16.msra.mxu3 %v6721_v56 }
 0x85f   : > { %v2553_v61 = vpop.f32.mrf.mxu1  ;;  %3178 = vmatpush.bf16.msra.mxu2 %v6474_v57  ;;  %3191 = vmatpush.bf16.msra.mxu3 %v6730_v30 }
 0x863   : > { %3179 = vmatpush.bf16.msra.mxu2 %v6489_v10  ;;  %3192 = vmatpush.bf16.msra.mxu3 %v6736_v29 }
 0x866   : > { %v2724_v41 = vpop.f32.mrf.mxu3 }
 0x867   : > { %3180 = vmatpush.bf16.msra.mxu2 %v6507_v36  ;;  %3193 = vmatpush.bf16.msra.mxu3 %v6742_v28  ;;  %v2728_v18 = vpack.c.bf16 %v2724_v41, %v2724_v41 }
 0x869   : > { %2737 = vmatmul.bf16.vlgmr.msra.gmra.mxu0 %v2728_v18  ;;  %2750 = vmatmul.bf16.vlgmr.msra.gmra.mxu1 %v2728_v18 }
 0x86a   : > { %3027 = vmatmul.bf16.vlgmr.msrb.gmra.mxu2 %v3002_v9  ;;  %3151 = vmatpush.bf16.msra.mxu0 %v6391_v21  ;;  %v2817_v21 = vrot.slane %v6937_v39, 2 }
 0x86b   : > { %3164 = vmatpush.bf16.msra.mxu1 %v6690_v51  ;;  %3181 = vmatpush.bf16.msra.mxu2 %v6526_v60  ;;  %v6142_v51 = vmov 0  }
 0x86c   : > { %3194 = vmatpush.bf16.msra.mxu3 %v6748_v26  ;;  %5877 = vset.pattern.permute.xlu1 %v6142_v51 }
 0x86d   : > { %5878 = vset.pattern.permute.xlu2 %v6142_v51  ;;  %5879 = vset.pattern.permute.xlu0 %v6142_v51 }
 0x86e   : > { %v2726_v15 = vpop.f32.mrf.mxu3  ;;  %3152 = vmatpush.bf16.msra.mxu0 %v6413_v12  ;;  %v2991_v12 = vpop.xlane.xlu0 %2990 }
 0x86f   : > { %3165 = vmatpush.bf16.msra.mxu1 %v6695_v44  ;;  %3182 = vmatpush.bf16.msra.mxu2 %v6563_v62  ;;  %v2809_v62 = vpop.xlane.xlu2 %2808 }
 0x870   : > { %3195 = vmatpush.bf16.msra.mxu3 %v6752_v0 }
 0x872   : > { %3153 = vmatpush.bf16.msra.mxu0 %v6453_v33  ;;  %v2806_v33 = vpop.xlane.xlu1 %2805 }
 0x873   : > { %3166 = vmatpush.bf16.msra.mxu1 %v6719_v53  ;;  %3183 = vmatpush.bf16.msra.mxu2 %v6612_v59  ;;  %v2826_v39 = vperm.slane %v2806_v33, %v7417_v8 }
 0x874   : > { %3196 = vmatpush.bf16.msra.mxu3 %v6755_v23 }
 0x876   : > { %3154 = vmatpush.bf16.msra.mxu0 %v6476_v58 }
 0x877   : > { %3167 = vmatpush.bf16.msra.mxu1 %v6724_v24  ;;  %3184 = vmatpush.bf16.msra.mxu2 %v6616_v43  ;;  %v2812_v10 = vpop.xlane.xlu2 %2811 }
 0x878   : > { %3197 = vmatpush.bf16.msra.mxu3 %v6758_v54  ;;  %v2827_v54 = vperm.slane %v2809_v62, %v7417_v8 }
 0x879   : > { %2842 = vmatmul.bf16.vlgmr.msrb.gmra.mxu0 %v2817_v21 }
 0x87a   : > { %3155 = vmatpush.bf16.msra.mxu0 %v6505_v35  ;;  %v2997_v35 = vpop.xlane.xlu0 %2996  ;;  %v2994_v36 = vpop.xlane.xlu1 %2993  ;;  %v2830_v3 = vsel %vm1423_vm9, %v2827_v54, %v2826_v39 }
 0x87b   : > { %3168 = vmatpush.bf16.msra.mxu1 %v6728_v63  ;;  %v3013_v43 = vperm.slane %v2997_v35, %v7417_v8  ;;  %v3012_v44 = vperm.slane %v2994_v36, %v7417_v8  ;;  %v525_v35 = vld [vmem:[%s7124_s13] sm:$0xff] }
 0x87c   : > { %vm527_vm5 = vcmp.gt.f32.partialorder %v525_v35, 0.5 }
 0x87d   : > { %v3225_v36 = vsel %vm527_vm5, 1, %v6142_v51 }
 0x87e   : > { %3156 = vmatpush.bf16.msra.mxu0 %v6514_v47  ;;  %v3011_v47 = vperm.slane %v2991_v12, %v7417_v8 }
 0x87f   : > { %3169 = vmatpush.bf16.msra.mxu1 %v6733_v40  ;;  %v3000_v56 = vpop.xlane.xlu2 %2999 }
 0x880   : > { %v3015_v30 = vsel %vm1423_vm9, %v3012_v44, %v3011_v47  ;;  %v3014_v28 = vperm.slane %v3000_v56, %v7417_v8 }
 0x881   : > { %v3016_v29 = vsel %vm1425_vm10, %v3013_v43, %v3015_v30 }
 0x882   : > { %3157 = vmatpush.bf16.msra.mxu0 %v7413_v32  ;;  %v3017_v26 = vsel %vm1427_vm11, %v3014_v28, %v3016_v29  ;;  %v2815_v37 = vpop.xlane.xlu1 %2814 }
 0x883   : > { %3170 = vmatpush.bf16.msra.mxu1 %v7414_v25  ;;  %v2828_v25 = vperm.slane %v2812_v10, %v7417_v8  ;;  %v2829_v6 = vperm.slane %v2815_v37, %v7417_v8 }
 0x885   : > { %v2831_v14 = vsel %vm1425_vm10, %v2828_v25, %v2830_v3 }
 0x886   : > { %3158 = vmatpush.bf16.msra.mxu0 %v7415_v42  ;;  %v2832_v22 = vsel %vm1427_vm11, %v2829_v6, %v2831_v14 }
 0x887   : > { %3171 = vmatpush.bf16.msra.mxu1 %v7416_v55 }
 0x8dd   : > { %v2764_v57 = vpop.f32.mrf.mxu2  ;;  %v2777_v58 = vpop.f32.mrf.mxu3 }
 0x8e5   : > { %v2766_v60 = vpop.f32.mrf.mxu2  ;;  %v2779_v59 = vpop.f32.mrf.mxu3 }
 0x8e6   : > { %v2738_v53 = vpop.f32.mrf.mxu0  ;;  %v2751_v63 = vpop.f32.mrf.mxu1 }
 0x8e7   : > { %v2765_v24 = vadd.f32 %v2764_v57, %v2738_v53  ;;  %v2778_v40 = vadd.f32 %v2777_v58, %v2751_v63 }
 0x8e9   : > { %2781 = vst [vmem:[#allocation2 + $0x18] sm:$0xf] %v2765_v24 }
 0x8ea   : > { %2782 = vst [vmem:[#allocation2 + $0x8] sm:$0xf] %v2778_v40 }
 0x8ed   : > { %v3028_v0 = vpop.f32.mrf.mxu2 }
 0x8ee   : > { %v3029_v23 = vadd.f32 %v3028_v0, %v3017_v26  ;;  %v2740_v32 = vpop.f32.mrf.mxu0  ;;  %v2753_v55 = vpop.f32.mrf.mxu1 }
 0x8f0   : > { %v3032_v42 = vmul.f32 0.088388346, %v3029_v23 }
 0x8f2   : > { %v3034_v34 = vrot.slane %v3032_v42, 5  ;;  %v3035_v16 = vrot.slane %v3032_v42, 6  ;;  %v3036_v17 = vrot.slane %v3032_v42, 7  ;;  %v3044_v1 = vsel %vm524_vm12, -1e+30, %v3032_v42 }
 0x8f3   : > { %v3053_v11 = vrot.slane %v3044_v1, 5 }
 0x8f4   : > { %v3042_v46 = vsel %vm524_vm12, -1e+30, %v3035_v16  ;;  %v3043_v38 = vsel %vm524_vm12, -1e+30, %v3036_v17  ;;  %v3041_v27 = vsel %vm524_vm12, -1e+30, %v3034_v34 }
 0x8f5   : > { %v3030_v7 = vpop.f32.mrf.mxu2  ;;  %v3049_v2 = vrot.slane %v3042_v46, 7  ;;  %v3051_v31 = vrot.slane %v3043_v38, 6 }
 0x8f6   : > { %v2843_v49 = vpop.f32.mrf.mxu0  ;;  %v7132_v7 = vld [vmem:[%s7353_s7] sm:$0x3] }
 0x8f7   : > { %v3050_v52 = vsel %vm2039_vm15, %v3049_v2, %v3041_v27  ;;  %v2844_v50 = vadd.f32 %v2843_v49, %v2832_v22  ;;  %v3217_v22 = vperm.slane %v7132_v7, 0  ;;  %v3218_v49 = vperm.slane %v7132_v7, 1 }
 0x8f8   : > { %v3052_v48 = vsel %vm2458_vm1, %v3051_v31, %v3050_v52  ;;  %v3211_v52 = vld [vmem:[#allocation2 + $0x10] sm:$0xff] }
 0x8f9   : > { %v3054_v45 = vsel %vm2869_vm3, %v3053_v11, %v3052_v48  ;;  %v2847_v8 = vmul.f32 0.088388346, %v2844_v50  ;;  %v3212_v11 = vld [vmem:[#allocation2] sm:$0xff] }
 0x8fa   : > { %v3056_v13 = vsel %vm2872_vm4, %v3054_v45, -inf }
 0x8fb   : > { %3057 = vmax.xlane.f32.xlu1 %v3056_v13  ;;  %v2849_v20 = vrot.slane %v2847_v8, 5  ;;  %v2850_v19 = vrot.slane %v2847_v8, 6  ;;  %v2851_v5 = vrot.slane %v2847_v8, 7  ;;  %v2859_v18 = vsel %vm524_vm12, -1e+30, %v2847_v8 }
 0x8fc   : > { %v2868_v33 = vrot.slane %v2859_v18, 5  ;;  %v3221_v8 = vadd.f32 %v3217_v22, %v3211_v52  ;;  %v3222_v13 = vadd.f32 %v3218_v49, %v3212_v11 }
 0x8fd   : > { %v2857_v61 = vsel %vm524_vm12, -1e+30, %v2850_v19  ;;  %v2858_v41 = vsel %vm524_vm12, -1e+30, %v2851_v5  ;;  %v2856_v62 = vsel %vm524_vm12, -1e+30, %v2849_v20 }
 0x8fe   : > { %v2845_v9 = vpop.f32.mrf.mxu0  ;;  %v2864_v15 = vrot.slane %v2857_v61, 7  ;;  %v2866_v21 = vrot.slane %v2858_v41, 6 }
 0x900   : > { %v2865_v12 = vsel %vm2039_vm15, %v2864_v15, %v2856_v62 }
 0x901   : > { %v2867_v57 = vsel %vm2458_vm1, %v2866_v21, %v2865_v12  ;;  %v5987_v21 = vld [vmem:[%s6275_s26] sm:$0xff]  ;;  %v5988_v12 = vld [vmem:[%s6275_s26 + $0x8] sm:$0xff] }
 0x902   : > { %v2870_v58 = vsel %vm2869_vm3, %v2868_v33, %v2867_v57 }
 0x903   : > { %v2873_v10 = vsel %vm2872_vm4, %v2870_v58, -inf }
 0x904   : > { %2874 = vmax.xlane.f32.xlu0 %v2873_v10 }
 0x914   : > { %3228 = vperm.xlu1 %5877, %v3225_v36  }
 0x96e   : > { %v3058_v47 = vpop.xlane.xlu1 %3057 }
 0x96f   : > { %v3060_v60 = vrot.slane %v3058_v47, 1  ;;  %v3061_v59 = vrot.slane %v3058_v47, 2  ;;  %v3062_v43 = vrot.slane %v3058_v47, 3  ;;  %v3067_v44 = vsub.f32 %v3041_v27, %v3058_v47 }
 0x971   : > { %v3068_v53 = vsub.f32 %v3042_v46, %v3060_v60  ;;  %v3069_v56 = vsub.f32 %v3043_v38, %v3061_v59  ;;  %v3070_v24 = vsub.f32 %v3044_v1, %v3062_v43  ;;  %v3071_v63 = vmul.f32 1.442695, %v3067_v44 }
 0x973   : > { %v3073_v30 = vmul.f32 1.442695, %v3068_v53  ;;  %v3075_v40 = vmul.f32 1.442695, %v3069_v56  ;;  %v3077_v29 = vmul.f32 1.442695, %v3070_v24  ;;  %5946 = vpow2.f32 %v3071_v63 }
 0x975   : > { %5948 = vpow2.f32 %v3073_v30 }
 0x976   : > { %5950 = vpow2.f32 %v3075_v40 }
 0x977   : > { %5952 = vpow2.f32 %v3077_v29  ;;  %v2875_v28 = vpop.xlane.xlu0 %2874 }
 0x978   : > { %v2877_v26 = vrot.slane %v2875_v28, 1  ;;  %v2878_v0 = vrot.slane %v2875_v28, 2  ;;  %v2879_v23 = vrot.slane %v2875_v28, 3  ;;  %v2884_v54 = vsub.f32 %v2856_v62, %v2875_v28 }
 0x979   : > { %v5947_v32 = vpop.eup %5946 }
 0x97a   : > { %v2885_v42 = vsub.f32 %v2857_v61, %v2877_v26  ;;  %v2886_v55 = vsub.f32 %v2858_v41, %v2878_v0  ;;  %v2887_v39 = vsub.f32 %v2859_v18, %v2879_v23  ;;  %v2888_v37 = vmul.f32 1.442695, %v2884_v54 }
 0x97b   : > { %v5949_v25 = vpop.eup %5948 }
 0x97c   : > { %v5951_v34 = vpop.eup %5950  ;;  %v3083_v16 = vrot.slane %v5949_v25, 7  ;;  %v2890_v3 = vmul.f32 1.442695, %v2885_v42  ;;  %v2892_v46 = vmul.f32 1.442695, %v2886_v55  ;;  %5954 = vpow2.f32 %v2888_v37 }
 0x97d   : > { %v5953_v17 = vpop.eup %5952  ;;  %v2894_v14 = vmul.f32 1.442695, %v2887_v39  ;;  %v3085_v1 = vrot.slane %v5951_v34, 6 }
 0x97e   : > { %v3084_v38 = vsel %vm2039_vm15, %v3083_v16, %v5947_v32  ;;  %5956 = vpow2.f32 %v2890_v3  ;;  %v3087_v6 = vrot.slane %v5953_v17, 5 }
 0x97f   : > { %5958 = vpow2.f32 %v2892_v46  ;;  %v3086_v2 = vsel %vm2458_vm1, %v3085_v1, %v3084_v38 }
 0x980   : > { %5960 = vpow2.f32 %v2894_v14  ;;  %v3088_v31 = vsel %vm2869_vm3, %v3087_v6, %v3086_v2 }
 0x981   : > { %v3090_v27 = vsel %vm2872_vm4, %v3088_v31, 0.0 }
 0x982   : > { %3091 = vadd.xlane.f32.xlu0 %v3090_v27  ;;  %v5955_v50 = vpop.eup %5954 }
 0x984   : > { %v5957_v48 = vpop.eup %5956 }
 0x985   : > { %v5959_v45 = vpop.eup %5958  ;;  %v2900_v19 = vrot.slane %v5957_v48, 7 }
 0x986   : > { %v3229_v20 = vpop.permute.xlu1 %3228  ;;  %v5961_v5 = vpop.eup %5960  ;;  %v2902_v61 = vrot.slane %v5959_v45, 6 }
 0x987   : > { %vm3233_vm6 = vcmp.eq.s32.totalorder %v3229_v20, 1  ;;  %v2901_v9 = vsel %vm2039_vm15, %v2900_v19, %v5955_v50  ;;  %v2904_v15 = vrot.slane %v5961_v5, 5 }
 0x988   : > { %v3235_v41 = vsel %vm3233_vm6, 0.0, %v3221_v8  ;;  %v3236_v18 = vsel %vm3233_vm6, 0.0, %v3222_v13  ;;  %v2903_v57 = vsel %vm2458_vm1, %v2902_v61, %v2901_v9 }
 0x989   : > { %v7145_v62 = vadd.f32 %v5987_v21, %v3235_v41  ;;  %v7148_v33 = vadd.f32 %v5988_v12, %v3236_v18  ;;  %v2905_v58 = vsel %vm2869_vm3, %v2904_v15, %v2903_v57 }
 0x98a   : > { %v2907_v35 = vsel %vm2872_vm4, %v2905_v58, 0.0 }
 0x98b   : > { %v3373_v10 = vadd.f32 %v7148_v33, %v7145_v62  ;;  %2908 = vadd.xlane.f32.xlu2 %v2907_v35 }
 0x98d   : > { %3374 = vadd.xlane.f32.xlu0 %v3373_v10  ;;  %v526_v10 = vld [vmem:[%s7124_s13 + $0x8] sm:$0xff] }
 0x98e   : > { %vm528_vm7 = vcmp.gt.f32.partialorder %v526_v10, 0.5  ;;  %v5748_v10 = vld [vmem:[#allocation7 + $0x1c4] sm:$0xf] }
 0x98f   : > { %v3226_v35 = vsel %vm528_vm7, 1, %v6142_v51 }
 0x9a3   : > { %3231 = vperm.xlu2 %5878, %v3226_v35  }
 0x9f5   : > { %v3092_v36 = vpop.xlane.xlu0 %3091 }
 0x9f6   : > { %5962 = vrcp.f32 %v3092_v36 }
 0x9fc   : > { %v5963_v47 = vpop.eup %5962 }
 0x9fd   : > { %v3095_v60 = vrot.slane %v5963_v47, 1  ;;  %v3096_v59 = vrot.slane %v5963_v47, 2  ;;  %v3097_v43 = vrot.slane %v5963_v47, 3  ;;  %v3102_v44 = vmul.f32 %v5963_v47, %v5947_v32 }
 0x9fe   : > { %v2909_v53 = vpop.xlane.xlu2 %2908 }
 0x9ff   : > { %5964 = vrcp.f32 %v2909_v53  ;;  %v3103_v56 = vmul.f32 %v5949_v25, %v3095_v60  ;;  %v3104_v24 = vmul.f32 %v5951_v34, %v3096_v59  ;;  %v3105_v63 = vmul.f32 %v5953_v17, %v3097_v43 }
 0xa00   : > { %v3106_v30 = vsel %vm524_vm12, 0.0, %v3102_v44 }
 0xa01   : > { %v3107_v40 = vsel %vm524_vm12, 0.0, %v3103_v56  ;;  %v3108_v29 = vsel %vm524_vm12, 0.0, %v3104_v24  ;;  %v3109_v28 = vsel %vm524_vm12, 0.0, %v3105_v63  ;;  %v3110_v26 = vpack.c.bf16 %v3106_v30, %v3106_v30 }
 0xa02   : > { %v3111_v0 = vpack.c.bf16 %v3107_v40, %v3107_v40  ;;  %v3112_v23 = vpack.c.bf16 %v3108_v29, %v3108_v29  ;;  %v3113_v32 = vpack.c.bf16 %v3109_v28, %v3109_v28 }
 0xa03   : > { %v3118_v54 = vunpack.c.l.b16 %v3110_v26 }
 0xa04   : > { %v3119_v25 = vunpack.c.l.b16 %v3111_v0  ;;  %v3120_v42 = vunpack.c.l.b16 %v3112_v23  ;;  %v3121_v14 = vunpack.c.l.b16 %v3113_v32  ;;  %v3375_v32 = vpop.xlane.xlu0 %3374 }
 0xa05   : > { %v5965_v55 = vpop.eup %5964  ;;  %v3122_v39 = vrot.slane %v3118_v54, 3 }
 0xa06   : > { %v3123_v37 = vrot.slane %v3119_v25, 2  ;;  %v3125_v34 = vrot.slane %v3120_v42, 1  ;;  %v2912_v16 = vrot.slane %v5965_v55, 1  ;;  %v2913_v17 = vrot.slane %v5965_v55, 2  ;;  %v3232_v54 = vpop.permute.xlu2 %3231 }
 0xa07   : > { %v2914_v3 = vrot.slane %v5965_v55, 3  ;;  %v2919_v46 = vmul.f32 %v5965_v55, %v5955_v50  ;;  %vm3234_vm8 = vcmp.eq.s32.totalorder %v3232_v54, 1  ;;  %v5710_v54 = vld [vmem:[#allocation7 + $0x8c] sm:$0xf0] }
 0xa08   : > { %v3124_v38 = vsel %vm1423_vm9, %v3123_v37, %v3122_v39  ;;  %v2920_v1 = vmul.f32 %v5957_v48, %v2912_v16  ;;  %v2921_v6 = vmul.f32 %v5959_v45, %v2913_v17  ;;  %v7439_v37 = vld [vmem:[#allocation14_spill] sm:$0xff] }
 0xa09   : > { %v3126_v2 = vsel %vm1425_vm10, %v3125_v34, %v3124_v38  ;;  %v2922_v31 = vmul.f32 %v5961_v5, %v2914_v3  ;;  %v2923_v27 = vsel %vm524_vm12, 0.0, %v2919_v46  ;;  %v3379_v34 = vmul.f32 %v3375_v32, %v7439_v37  ;;  %v5989_v3 = vld [vmem:[%s6275_s26 + $0x10] sm:$0xff]  ;;  %v5241_v32 = vld [vmem:[#allocation7 + $0x180] sm:$0xf] }
 0xa0a   : > { %v3127_v52 = vsel %vm1427_vm11, %v3121_v14, %v3126_v2  ;;  %v2924_v11 = vsel %vm524_vm12, 0.0, %v2920_v1  ;;  %v2925_v8 = vsel %vm524_vm12, 0.0, %v2921_v6  ;;  %v2927_v50 = vpack.c.bf16 %v2923_v27, %v2923_v27  ;;  %v5990_v14 = vld [vmem:[%s6275_s26 + $0x18] sm:$0xff] }
 0xa0b   : > { %v3128_v13 = vpack.c.b16 %v3127_v52, %v3127_v52  ;;  %v2926_v48 = vsel %vm524_vm12, 0.0, %v2922_v31  ;;  %v2928_v45 = vpack.c.bf16 %v2924_v11, %v2924_v11  ;;  %v2929_v20 = vpack.c.bf16 %v2925_v8, %v2925_v8  ;;  %v5161_v31 = vld [vmem:[#allocation7 + $0xe0] sm:$0xf]  ;;  %v5722_v27 = vld [vmem:[#allocation7 + $0xec] sm:$0xf0] }
 0xa0c   : > { %v2935_v19 = vunpack.c.l.b16 %v2927_v50  ;;  %v2930_v5 = vpack.c.bf16 %v2926_v48, %v2926_v48  ;;  %v7193_v1 = vsub.f32 %v7145_v62, %v3379_v34  ;;  %v7196_v6 = vsub.f32 %v7148_v33, %v3379_v34  ;;  %v5289_v52 = vld [vmem:[#allocation7 + $0x1e0] sm:$0xf]  ;;  %v5754_v8 = vld [vmem:[#allocation7 + $0x1ec] sm:$0xf0]  ;;  %v5720_v50 = vld [vmem:[#allocation7 + $0xe4] sm:$0xf] }
 0xa0d   : > { %5046 = vmatmul.msk.bf16.vlgmr.msrb.gmra.mxu3 %vm1544_vm14, %v3128_v13  ;;  %v2936_v61 = vunpack.c.l.b16 %v2928_v45  ;;  %v2937_v41 = vunpack.c.l.b16 %v2929_v20  ;;  %v5162_v11 = vor.u32 %v5722_v27, %v5161_v31  ;;  %v5163_v13 = vld [vmem:[#allocation7 + $0xf0] sm:$0xf0]  ;;  %v5290_v45 = vor.u32 %v5754_v8, %v5289_v52  ;;  %v5738_v27 = vld [vmem:[#allocation7 + $0x16c] sm:$0xf0]  ;;  %v5704_v52 = vld [vmem:[#allocation7 + $0x64] sm:$0xf] }
 0xa0e   : > { %v2939_v18 = vrot.slane %v2935_v19, 3  ;;  %v2938_v21 = vunpack.c.l.b16 %v2930_v5  ;;  %v5166_v20 = vor.u32 %v5720_v50, %v5163_v13  ;;  %v5752_v19 = vld [vmem:[#allocation7 + $0x1e4] sm:$0xf]  ;;  %v5291_v5 = vld [vmem:[#allocation7 + $0x1f0] sm:$0xf0] }
 0xa0f   : > { %v2940_v9 = vrot.slane %v2936_v61, 2  ;;  %v2942_v15 = vrot.slane %v2937_v41, 1  ;;  %v5145_v61 = vld [vmem:[#allocation7 + $0xc0] sm:$0xf]  ;;  %3754 = vmatpush.bf16.msrb.mxu0 %v5162_v11  ;;  %v5115_v34 = vld [vmem:[#allocation7 + $0x90] sm:$0xf0] }
 0xa10   : > { %3782 = vmatpush.bf16.msrb.mxu2 %v5166_v20  ;;  %v5099_v11 = vld [vmem:[#allocation7 + $0x70] sm:$0xf0]  ;;  %v5736_v8 = vld [vmem:[#allocation7 + $0x164] sm:$0xf] }
 0xa11   : > { %v2941_v12 = vsel %vm1423_vm9, %v2940_v9, %v2939_v18  ;;  %v5294_v18 = vor.u32 %v5752_v19, %v5291_v5  ;;  %v5718_v9 = vld [vmem:[#allocation7 + $0xcc] sm:$0xf0]  ;;  %v5227_v50 = vld [vmem:[#allocation7 + $0x170] sm:$0xf0] }
 0xa12   : > { %v2943_v57 = vsel %vm1425_vm10, %v2942_v15, %v2941_v12  ;;  %v5273_v15 = vld [vmem:[#allocation7 + $0x1c0] sm:$0xf]  ;;  %v5146_v12 = vor.u32 %v5718_v9, %v5145_v61  ;;  %v5230_v20 = vor.u32 %v5736_v8, %v5227_v50 }
 0xa13   : > { %v2944_v4 = vsel %vm1427_vm11, %v2938_v21, %v2943_v57  ;;  %v5750_v21 = vld [vmem:[#allocation7 + $0x1cc] sm:$0xf0]  ;;  %3796 = vmatpush.bf16.msrb.mxu3 %v5294_v18  ;;  %v5209_v9 = vld [vmem:[#allocation7 + $0x140] sm:$0xf] }
 0xa14   : > { %v2945_v58 = vpack.c.b16 %v2944_v4, %v2944_v4  ;;  %v5274_v57 = vor.u32 %v5750_v21, %v5273_v15  ;;  %v5716_v4 = vld [vmem:[#allocation7 + $0xc4] sm:$0xf]  ;;  %3755 = vmatpush.bf16.msrb.mxu0 %v5146_v12  ;;  %v5702_v18 = vld [vmem:[#allocation7 + $0x4c] sm:$0xf0] }
 0xa15   : > { %v5734_v21 = vld [vmem:[#allocation7 + $0x14c] sm:$0xf0]  ;;  %v5700_v12 = vld [vmem:[#allocation7 + $0x44] sm:$0xf] }
 0xa16   : > { %5045 = vmatmul.msk.bf16.vlgmr.msrb.gmra.mxu1 %vm1544_vm14, %v2945_v58  ;;  %v5147_v58 = vld [vmem:[#allocation7 + $0xd0] sm:$0xf0] }
 0xa17   : > { %3768 = vmatpush.bf16.msrb.mxu1 %v5290_v45  ;;  %v5102_v45 = vor.u32 %v5704_v52, %v5099_v11  ;;  %v5171_v52 = vld [vmem:[#allocation7 + $0xf8] sm:$0xf0] }
 0xa1b   : > { %3769 = vmatpush.bf16.msrb.mxu1 %v5274_v57  ;;  %v5083_v57 = vld [vmem:[#allocation7 + $0x50] sm:$0xf0] }
 0xa90   : > { %v3146_v36 = vpop.f32.mrf.mxu3 }
 0xa91   : > { %v3150_v47 = vpack.c.bf16 %v3146_v36, %v3146_v36 }
 0xa93   : > { %3159 = vmatmul.bf16.vlgmr.msra.gmra.mxu0 %v3150_v47  ;;  %3172 = vmatmul.bf16.vlgmr.msra.gmra.mxu1 %v3150_v47  ;;  %v2963_v60 = vpop.f32.mrf.mxu1  ;;  %v5150_v47 = vor.u32 %v5716_v4, %v5147_v58  ;;  %v5210_v4 = vor.u32 %v5734_v21, %v5209_v9  ;;  %v5086_v58 = vor.u32 %v5700_v12, %v5083_v57  ;;  %v5717_v9 = vld [vmem:[#allocation7 + $0xcc] sm:$0xf] }
 0xa94   : > { %v2967_v59 = vpack.c.bf16 %v2963_v60, %v2963_v60  ;;  %v5275_v60 = vld [vmem:[#allocation7 + $0x1d0] sm:$0xf0]  ;;  %v5749_v21 = vld [vmem:[#allocation7 + $0x1cc] sm:$0xf] }
 0xa95   : > { %3783 = vmatpush.bf16.msrb.mxu2 %v5150_v47  ;;  %v5211_v47 = vld [vmem:[#allocation7 + $0x150] sm:$0xf0] }
 0xa96   : > { %3185 = vmatmul.bf16.vlgmr.msra.gmra.mxu2 %v2967_v59  ;;  %3198 = vmatmul.bf16.vlgmr.msra.gmra.mxu3 %v2967_v59  ;;  %v5129_v59 = vld [vmem:[#allocation7 + $0xa0] sm:$0xf] }
 0xa98   : > { %v3148_v43 = vpop.f32.mrf.mxu3 }
 0xa99   : > { %v5714_v43 = vld [vmem:[#allocation7 + $0xac] sm:$0xf0] }
 0xa9b   : > { %v2965_v44 = vpop.f32.mrf.mxu1 }
 0xa9c   : > { %v5278_v44 = vor.u32 %v5748_v10, %v5275_v60  ;;  %v5732_v10 = vld [vmem:[#allocation7 + $0x144] sm:$0xf]  ;;  %v5065_v60 = vld [vmem:[#allocation7 + $0x20] sm:$0xf] }
 0xa9e   : > { %3797 = vmatpush.bf16.msrb.mxu3 %v5278_v44  ;;  %v5193_v44 = vld [vmem:[#allocation7 + $0x120] sm:$0xf] }
 0xb10   : > { %v3160_v53 = vpop.f32.mrf.mxu0  ;;  %v3173_v56 = vpop.f32.mrf.mxu1 }
 0xb18   : > { %v3162_v24 = vpop.f32.mrf.mxu0  ;;  %v3175_v63 = vpop.f32.mrf.mxu1 }
 0xb19   : > { %v3186_v30 = vpop.f32.mrf.mxu2  ;;  %v3199_v40 = vpop.f32.mrf.mxu3  ;;  %v5712_v24 = vld [vmem:[#allocation7 + $0xa4] sm:$0xf] }
 0xb1a   : > { %v3187_v29 = vadd.f32 %v3186_v30, %v3160_v53  ;;  %v3200_v28 = vadd.f32 %v3199_v40, %v3173_v56  ;;  %v5257_v53 = vld [vmem:[#allocation7 + $0x1a0] sm:$0xf]  ;;  %v5746_v56 = vld [vmem:[#allocation7 + $0x1ac] sm:$0xf0]  ;;  %v5130_v40 = vor.u32 %v5714_v43, %v5129_v59  ;;  %v5214_v59 = vor.u32 %v5732_v10, %v5211_v47  ;;  %v5137_v47 = vld [vmem:[#allocation7 + $0xa8] sm:$0xf] }
 0xb1b   : > { %v5698_v43 = vld [vmem:[#allocation7 + $0x2c] sm:$0xf0] }
 0xb1c   : > { %v3205_v51 = vrot.slane %v3187_v29, 4  ;;  %v3206_v26 = vrot.slane %v3200_v28, 4  ;;  %v5131_v29 = vld [vmem:[#allocation7 + $0xb0] sm:$0xf0]  ;;  %v5744_v28 = vld [vmem:[#allocation7 + $0x1a4] sm:$0xf]  ;;  %3756 = vmatpush.bf16.msrb.mxu0 %v5130_v40 }
 0xb1d   : > { %v5728_v40 = vld [vmem:[#allocation7 + $0x124] sm:$0xf] }
 0xb1e   : > { %3209 = vst [vmem:[#allocation2 + $0x18] sm:$0xf0] %v3205_v51  ;;  %v5259_v51 = vld [vmem:[#allocation7 + $0x1b0] sm:$0xf0] }
 0xb1f   : > { %3210 = vst [vmem:[#allocation2 + $0x8] sm:$0xf0] %v3206_v26  ;;  %v5258_v26 = vor.u32 %v5746_v56, %v5257_v53  ;;  %v5730_v53 = vld [vmem:[#allocation7 + $0x12c] sm:$0xf0]  ;;  %v5066_v56 = vor.u32 %v5698_v43, %v5065_v60  ;;  %v5715_v60 = vld [vmem:[#allocation7 + $0xb4] sm:$0xf0] }
 0xb21   : > { %v3188_v0 = vpop.f32.mrf.mxu2  ;;  %v3201_v23 = vpop.f32.mrf.mxu3  ;;  %3770 = vmatpush.bf16.msrb.mxu1 %v5258_v26  ;;  %v5694_v26 = vld [vmem:[#allocation7 + $0xc] sm:$0xf0] }
 0xb22   : > { %v5134_v0 = vor.u32 %v5712_v24, %v5131_v29  ;;  %v5113_v23 = vld [vmem:[#allocation7 + $0x80] sm:$0xf]  ;;  %v5194_v24 = vor.u32 %v5730_v53, %v5193_v44  ;;  %v5747_v44 = vld [vmem:[#allocation7 + $0x1b4] sm:$0xf0]  ;;  %v5713_v53 = vld [vmem:[#allocation7 + $0xac] sm:$0xf] }
 0xb24   : > { %3784 = vmatpush.bf16.msrb.mxu2 %v5134_v0 }
 0xb25   : > { %v3213_v25 = vld [vmem:[#allocation2 + $0x18] sm:$0xff] }
 0xb26   : > { %v3214_v42 = vld [vmem:[#allocation2 + $0x8] sm:$0xff]  ;;  %v3223_v55 = vadd.f32 %v3217_v22, %v3213_v25  ;;  %v3385_v22 = vmul.f32 %v7193_v1, %v7193_v1 }
 0xb27   : > { %v3224_v39 = vadd.f32 %v3218_v49, %v3214_v42  ;;  %v3386_v49 = vmul.f32 %v7196_v6, %v7196_v6  ;;  %v5262_v42 = vor.u32 %v5744_v28, %v5259_v51  ;;  %v5195_v28 = vld [vmem:[#allocation7 + $0x130] sm:$0xf0]  ;;  %v5049_v51 = vld [vmem:[#allocation7] sm:$0xf] }
 0xb28   : > { %v3237_v16 = vsel %vm3234_vm8, 0.0, %v3223_v55  ;;  %v5742_v55 = vld [vmem:[#allocation7 + $0x18c] sm:$0xf0] }
 0xb29   : > { %v3238_v17 = vsel %vm3234_vm8, 0.0, %v3224_v39  ;;  %v7187_v46 = vadd.f32 %v5989_v3, %v3237_v16  ;;  %v3389_v2 = vadd.f32 %v3386_v49, %v3385_v22  ;;  %v5708_v39 = vld [vmem:[#allocation7 + $0x84] sm:$0xf]  ;;  %v5114_v3 = vor.u32 %v5710_v54, %v5113_v23  ;;  %v5097_v22 = vld [vmem:[#allocation7 + $0x60] sm:$0xf]  ;;  %3798 = vmatpush.bf16.msrb.mxu3 %v5262_v42 }
 0xb2a   : > { %v7190_v38 = vadd.f32 %v5990_v14, %v3238_v17  ;;  %v5740_v16 = vld [vmem:[#allocation7 + $0x184] sm:$0xf]  ;;  %v5243_v17 = vld [vmem:[#allocation7 + $0x190] sm:$0xf0]  ;;  %v5242_v14 = vor.u32 %v5742_v55, %v5241_v32  ;;  %v5706_v49 = vld [vmem:[#allocation7 + $0x6c] sm:$0xf0]  ;;  %v5198_v23 = vor.u32 %v5728_v40, %v5195_v28  ;;  %v5050_v42 = vor.u32 %v5694_v26, %v5049_v51 }
 0xb2b   : > { %v5246_v31 = vor.u32 %v5740_v16, %v5243_v17  ;;  %3757 = vmatpush.bf16.msrb.mxu0 %v5114_v3  ;;  %v5098_v13 = vor.u32 %v5706_v49, %v5097_v22  ;;  %v5177_v54 = vld [vmem:[#allocation7 + $0x100] sm:$0xf]  ;;  %v5726_v32 = vld [vmem:[#allocation7 + $0x10c] sm:$0xf0]  ;;  %v5051_v55 = vld [vmem:[#allocation7 + $0x10] sm:$0xf0]  ;;  %v5138_v40 = vor.u32 %v5715_v60, %v5137_v47 }
 0xb2c   : > { %v3376_v7 = vadd.f32 %v7190_v38, %v7187_v46  ;;  %3771 = vmatpush.bf16.msrb.mxu1 %v5242_v14  ;;  %v5178_v16 = vor.u32 %v5726_v32, %v5177_v54  ;;  %v5169_v3 = vld [vmem:[#allocation7 + $0xe8] sm:$0xf]  ;;  %v5723_v14 = vld [vmem:[#allocation7 + $0xf4] sm:$0xf0] }
 0xb2d   : > { %3799 = vmatpush.bf16.msrb.mxu3 %v5246_v31  ;;  %v5755_v31 = vld [vmem:[#allocation7 + $0x1f4] sm:$0xf0]  ;;  %v5121_v51 = vld [vmem:[#allocation7 + $0x88] sm:$0xf] }
 0xb2e   : > { %3377 = vadd.xlane.f32.xlu0 %v3376_v7  ;;  %v5118_v7 = vor.u32 %v5708_v39, %v5115_v34  ;;  %v5724_v39 = vld [vmem:[#allocation7 + $0x104] sm:$0xf]  ;;  %v5179_v34 = vld [vmem:[#allocation7 + $0x110] sm:$0xf0]  ;;  %v5711_v26 = vld [vmem:[#allocation7 + $0x94] sm:$0xf0] }
 0xb2f   : > { %3758 = vmatpush.bf16.msrb.mxu0 %v5098_v13  ;;  %v5182_v49 = vor.u32 %v5724_v39, %v5179_v34  ;;  %v5753_v13 = vld [vmem:[#allocation7 + $0x1ec] sm:$0xf]  ;;  %v5743_v32 = vld [vmem:[#allocation7 + $0x194] sm:$0xf0]  ;;  %v5251_v39 = vld [vmem:[#allocation7 + $0x198] sm:$0xf0] }
 0xb30   : > { %3785 = vmatpush.bf16.msrb.mxu2 %v5118_v7  ;;  %v5297_v7 = vld [vmem:[#allocation7 + $0x1e8] sm:$0xf] }
 0xb31   : > { %3800 = vmatpush.bf16.msrb.mxu3 %v5230_v20  ;;  %v5298_v8 = vor.u32 %v5755_v31, %v5297_v7 }
 0xb34   : > { %3786 = vmatpush.bf16.msrb.mxu2 %v5102_v45  ;;  %v5153_v45 = vld [vmem:[#allocation7 + $0xc8] sm:$0xf] }
 0xb35   : > { %3801 = vmatpush.bf16.msrb.mxu3 %v5214_v59  ;;  %v5265_v59 = vld [vmem:[#allocation7 + $0x1a8] sm:$0xf] }
 0xb36   : > { %3390 = vadd.xlane.f32.xlu0 %v3389_v2  ;;  %v5225_v2 = vld [vmem:[#allocation7 + $0x160] sm:$0xf] }
 0xb38   : > { %3787 = vmatpush.bf16.msrb.mxu2 %v5086_v58  ;;  %v5283_v58 = vld [vmem:[#allocation7 + $0x1d8] sm:$0xf0] }
 0xb39   : > { %3802 = vmatpush.bf16.msrb.mxu3 %v5198_v23  ;;  %v5286_v43 = vor.u32 %v5749_v21, %v5283_v58  ;;  %v5249_v23 = vld [vmem:[#allocation7 + $0x188] sm:$0xf]  ;;  %v5735_v21 = vld [vmem:[#allocation7 + $0x154] sm:$0xf0] }
 0xb3d   : > { %3803 = vmatpush.bf16.msrb.mxu3 %v5182_v49  ;;  %v5707_v49 = vld [vmem:[#allocation7 + $0x74] sm:$0xf0] }
 0xba1   : > { %v3378_v48 = vpop.xlane.xlu0 %3377 }
 0xba2   : > { %v3380_v41 = vmul.f32 %v3378_v48, %v7439_v37  ;;  %v5226_v48 = vor.u32 %v5738_v27, %v5225_v2  ;;  %v5170_v2 = vor.u32 %v5723_v14, %v5169_v3  ;;  %v5721_v27 = vld [vmem:[#allocation7 + $0xec] sm:$0xf]  ;;  %v5250_v14 = vor.u32 %v5743_v32, %v5249_v23  ;;  %v5203_v23 = vld [vmem:[#allocation7 + $0x138] sm:$0xf0] }
 0xba3   : > { %v5174_v50 = vor.u32 %v5721_v27, %v5171_v52  ;;  %v5739_v27 = vld [vmem:[#allocation7 + $0x174] sm:$0xf0]  ;;  %v5705_v52 = vld [vmem:[#allocation7 + $0x6c] sm:$0xf] }
 0xba4   : > { %v7206_v35 = vsub.f32 %v7187_v46, %v3380_v41  ;;  %v7209_v36 = vsub.f32 %v7190_v38, %v3380_v41  ;;  %3772 = vmatpush.bf16.msrb.mxu1 %v5226_v48  ;;  %v5081_v41 = vld [vmem:[#allocation7 + $0x40] sm:$0xf]  ;;  %v5299_v48 = vld [vmem:[#allocation7 + $0x1f8] sm:$0xf0] }
 0xba5   : > { %v5082_v15 = vor.u32 %v5702_v18, %v5081_v41  ;;  %v5281_v41 = vld [vmem:[#allocation7 + $0x1c8] sm:$0xf]  ;;  %v5751_v18 = vld [vmem:[#allocation7 + $0x1d4] sm:$0xf0] }
 0xba6   : > { %v3387_v63 = vmul.f32 %v7206_v35, %v7206_v35  ;;  %v3388_v30 = vmul.f32 %v7209_v36, %v7209_v36 }
 0xba7   : > { %3759 = vmatpush.bf16.msrb.mxu0 %v5082_v15  ;;  %v5155_v15 = vld [vmem:[#allocation7 + $0xd8] sm:$0xf0] }
 0xba8   : > { %v3392_v25 = vadd.f32 %v3388_v30, %v3387_v63  ;;  %3773 = vmatpush.bf16.msrb.mxu1 %v5210_v4  ;;  %v5696_v63 = vld [vmem:[#allocation7 + $0x24] sm:$0xf]  ;;  %v5067_v30 = vld [vmem:[#allocation7 + $0x30] sm:$0xf0]  ;;  %v5158_v10 = vor.u32 %v5717_v9, %v5155_v15  ;;  %v5217_v9 = vld [vmem:[#allocation7 + $0x148] sm:$0xf] }
 0xba9   : > { %v3391_v19 = vpop.xlane.xlu0 %3390  ;;  %v5070_v29 = vor.u32 %v5696_v63, %v5067_v30  ;;  %v5267_v63 = vld [vmem:[#allocation7 + $0x1b8] sm:$0xf0] }
 0xbaa   : > { %3393 = vadd.xlane.f32.xlu2 %v3392_v25  ;;  %v3395_v5 = vmul.f32 %v3391_v19, %v7439_v37  ;;  %v5692_v25 = vld [vmem:[#allocation7 + $0x4] sm:$0xf]  ;;  %v5302_v19 = vor.u32 %v5753_v13, %v5299_v48  ;;  %v5235_v13 = vld [vmem:[#allocation7 + $0x178] sm:$0xf0] }
 0xbab   : > { %3760 = vmatpush.bf16.msrb.mxu0 %v5066_v56  ;;  %3788 = vmatpush.bf16.msrb.mxu2 %v5070_v29  ;;  %v5054_v17 = vor.u32 %v5692_v25, %v5051_v55  ;;  %v5139_v56 = vld [vmem:[#allocation7 + $0xb8] sm:$0xf0]  ;;  %v5266_v29 = vor.u32 %v5747_v44, %v5265_v59  ;;  %v5709_v25 = vld [vmem:[#allocation7 + $0x8c] sm:$0xf] }
 0xbac   : > { %v7216_v61 = vadd.f32 1e-05, %v3395_v5  ;;  %3774 = vmatpush.bf16.msrb.mxu1 %v5194_v24  ;;  %v5719_v5 = vld [vmem:[#allocation7 + $0xd4] sm:$0xf0]  ;;  %3852 = vmatpush.bf16.msra.mxu3 %v5302_v19  ;;  %v5745_v24 = vld [vmem:[#allocation7 + $0x1ac] sm:$0xf]  ;;  %v5142_v28 = vor.u32 %v5713_v53, %v5139_v56 }
 0xbad   : > { %v5154_v4 = vor.u32 %v5719_v5, %v5153_v45  ;;  %v5270_v54 = vor.u32 %v5745_v24, %v5267_v63  ;;  %v5741_v55 = vld [vmem:[#allocation7 + $0x18c] sm:$0xf]  ;;  %v5073_v53 = vld [vmem:[#allocation7 + $0x28] sm:$0xf]  ;;  %v5699_v56 = vld [vmem:[#allocation7 + $0x34] sm:$0xf0] }
 0xbae   : > { %5966 = vrsqrt.f32 %v7216_v61  ;;  %v5254_v31 = vor.u32 %v5741_v55, %v5251_v39  ;;  %vm3405_vm10 = vweird.f32 %v7216_v61  ;;  %v5201_v63 = vld [vmem:[#allocation7 + $0x128] sm:$0xf]  ;;  %v5695_v39 = vld [vmem:[#allocation7 + $0x14] sm:$0xf0] }
 0xbaf   : > { %3761 = vmatpush.bf16.msrb.mxu0 %v5050_v42  ;;  %3789 = vmatpush.bf16.msrb.mxu2 %v5054_v17  ;;  %v5123_v42 = vld [vmem:[#allocation7 + $0x98] sm:$0xf0]  ;;  %v5122_v17 = vor.u32 %v5711_v26, %v5121_v51  ;;  %v5729_v26 = vld [vmem:[#allocation7 + $0x12c] sm:$0xf]  ;;  %v5057_v55 = vld [vmem:[#allocation7 + $0x8] sm:$0xf] }
 0xbb0   : > { %3775 = vmatpush.bf16.msrb.mxu1 %v5178_v16  ;;  %3853 = vmatpush.bf16.msra.mxu3 %v5286_v43  ;;  %v5126_v7 = vor.u32 %v5709_v25, %v5123_v42  ;;  %v5075_v51 = vld [vmem:[#allocation7 + $0x38] sm:$0xf0]  ;;  %v5074_v25 = vor.u32 %v5699_v56, %v5073_v53  ;;  %v5781_v53 = vld [vmem:[#allocation8 + $0xc4] sm:$0xf0] }
 0xbb3   : > { %3810 = vmatpush.bf16.msra.mxu0 %v5170_v2  ;;  %3838 = vmatpush.bf16.msra.mxu2 %v5174_v50  ;;  %v5233_v2 = vld [vmem:[#allocation7 + $0x168] sm:$0xf]  ;;  %v5737_v50 = vld [vmem:[#allocation7 + $0x16c] sm:$0xf] }
 0xbb4   : > { %v7219_v0 = vpop.eup %5966  ;;  %3824 = vmatpush.bf16.msra.mxu1 %v5298_v8  ;;  %3854 = vmatpush.bf16.msra.mxu3 %v5270_v54  ;;  %v5234_v5 = vor.u32 %v5739_v27, %v5233_v2  ;;  %v5238_v15 = vor.u32 %v5737_v50, %v5235_v13  ;;  %v5058_v2 = vor.u32 %v5695_v39, %v5057_v55  ;;  %v5353_v50 = vld [vmem:[#allocation8 + $0x60] sm:$0xf]  ;;  %v5769_v13 = vld [vmem:[#allocation8 + $0x64] sm:$0xf0]  ;;  %v5553_v55 = vld [vmem:[#allocation8 + $0x1f0] sm:$0xf] }
 0xbb5   : > { %v3400_v22 = vmul.f32 %v7219_v0, %v7216_v61  ;;  %vm3406_vm9 = vweird.f32 %v7219_v0  ;;  %v5218_v61 = vor.u32 %v5735_v21, %v5217_v9  ;;  %v5765_v9 = vld [vmem:[#allocation8 + $0x44] sm:$0xf0]  ;;  %v5819_v39 = vld [vmem:[#allocation8 + $0x1f4] sm:$0xf0] }
 0xbb6   : > { %vm3407_vm11 = vmor %vm3405_vm10, %vm3406_vm9 }
 0xbb7   : > { %v3401_v12 = vmul.f32 %v7219_v0, %v3400_v22  ;;  %3811 = vmatpush.bf16.msra.mxu0 %v5154_v4  ;;  %3839 = vmatpush.bf16.msra.mxu2 %v5158_v10  ;;  %v5105_v22 = vld [vmem:[#allocation7 + $0x68] sm:$0xf]  ;;  %v5091_v4 = vld [vmem:[#allocation7 + $0x58] sm:$0xf0] }
 0xbb8   : > { %v5106_v45 = vor.u32 %v5707_v49, %v5105_v22  ;;  %3855 = vmatpush.bf16.msra.mxu3 %v5254_v31  ;;  %v5219_v10 = vld [vmem:[#allocation7 + $0x158] sm:$0xf0]  ;;  %v5425_v22 = vld [vmem:[#allocation8 + $0xf0] sm:$0xf]  ;;  %v5787_v49 = vld [vmem:[#allocation8 + $0xf4] sm:$0xf0] }
 0xbb9   : > { %v3402_v30 = vmul.f32 0.5, %v3401_v12  ;;  %v5701_v12 = vld [vmem:[#allocation7 + $0x4c] sm:$0xf] }
 0xbba   : > { %v5094_v43 = vor.u32 %v5701_v12, %v5091_v4  ;;  %v7243_v12 = vld [vmem:[%s7355_s9] sm:$0xf] }
 0xbbb   : > { %v3403_v16 = vsub.f32 1.5, %v3402_v30  ;;  %3812 = vmatpush.bf16.msra.mxu0 %v5138_v40  ;;  %3840 = vmatpush.bf16.msra.mxu2 %v5142_v28  ;;  %v5731_v30 = vld [vmem:[#allocation7 + $0x134] sm:$0xf0]  ;;  %v5697_v40 = vld [vmem:[#allocation7 + $0x2c] sm:$0xf]  ;;  %v3426_v4 = vperm.slane %v7243_v12, 0 }
 0xbbc   : > { %3856 = vmatpush.bf16.msra.mxu3 %v5238_v15  ;;  %v5202_v42 = vor.u32 %v5731_v30, %v5201_v63 }
 0xbbd   : > { %v3404_v48 = vmul.f32 %v7219_v0, %v3403_v16  ;;  %v5727_v16 = vld [vmem:[#allocation7 + $0x114] sm:$0xf0] }
 0xbbf   : > { %3813 = vmatpush.bf16.msra.mxu0 %v5122_v17  ;;  %3841 = vmatpush.bf16.msra.mxu2 %v5126_v7  ;;  %v3408_v47 = vsel %vm3407_vm11, %v7219_v0, %v3404_v48  ;;  %v5059_v17 = vld [vmem:[#allocation7 + $0x18] sm:$0xf0]  ;;  %v5771_v7 = vld [vmem:[#allocation8 + $0x74] sm:$0xf0]  ;;  %v5354_v48 = vor.u32 %v5769_v13, %v5353_v50  ;;  %v5545_v50 = vld [vmem:[#allocation8 + $0x1e0] sm:$0xf] }
 0xbc0   : > { %v3419_v0 = vmul.f32 %v3408_v47, %v7193_v1  ;;  %v3420_v28 = vmul.f32 %v3408_v47, %v7196_v6  ;;  %v5185_v1 = vld [vmem:[#allocation7 + $0x108] sm:$0xf]  ;;  %v5693_v6 = vld [vmem:[#allocation7 + $0xc] sm:$0xf]  ;;  %v5329_v47 = vld [vmem:[#allocation8 + $0x30] sm:$0xf] }
 0xbc1   : > { %v5186_v31 = vor.u32 %v5727_v16, %v5185_v1  ;;  %v5062_v27 = vor.u32 %v5693_v6, %v5059_v17  ;;  %v5554_v6 = vor.u32 %v5819_v39, %v5553_v55  ;;  %v5313_v17 = vld [vmem:[#allocation8 + $0x10] sm:$0xf]  ;;  %v5817_v13 = vld [vmem:[#allocation8 + $0x1e4] sm:$0xf0]  ;;  %v5768_v55 = vld [vmem:[#allocation8 + $0x64] sm:$0xf] }
 0xbc2   : > { %v5355_v39 = vld [vmem:[#allocation8 + $0x68] sm:$0xf0] }
 0xbc3   : > { %3814 = vmatpush.bf16.msra.mxu0 %v5106_v45  ;;  %v5345_v45 = vld [vmem:[#allocation8 + $0x50] sm:$0xf] }
 0xc1d   : > { %v3394_v11 = vpop.xlane.xlu2 %3393 }
 0xc1e   : > { %v3396_v20 = vmul.f32 %v3394_v11, %v7439_v37  ;;  %v5282_v37 = vor.u32 %v5751_v18, %v5281_v41  ;;  %v5107_v11 = vld [vmem:[#allocation7 + $0x78] sm:$0xf0]  ;;  %v5703_v18 = vld [vmem:[#allocation7 + $0x54] sm:$0xf0] }
 0xc1f   : > { %v5110_v41 = vor.u32 %v5705_v52, %v5107_v11 }
 0xc20   : > { %v7225_v57 = vadd.f32 1e-05, %v3396_v20  ;;  %3825 = vmatpush.bf16.msra.mxu1 %v5282_v37  ;;  %v5089_v20 = vld [vmem:[#allocation7 + $0x48] sm:$0xf]  ;;  %v5733_v37 = vld [vmem:[#allocation7 + $0x14c] sm:$0xf] }
 0xc21   : > { %v5090_v60 = vor.u32 %v5703_v18, %v5089_v20  ;;  %3842 = vmatpush.bf16.msra.mxu2 %v5110_v41  ;;  %v5222_v44 = vor.u32 %v5733_v37, %v5219_v10  ;;  %v5767_v20 = vld [vmem:[#allocation8 + $0x54] sm:$0xf0]  ;;  %v5785_v41 = vld [vmem:[#allocation8 + $0xe4] sm:$0xf0]  ;;  %v5337_v18 = vld [vmem:[#allocation8 + $0x40] sm:$0xf] }
 0xc22   : > { %5968 = vrsqrt.f32 %v7225_v57  ;;  %vm3415_vm13 = vweird.f32 %v7225_v57  ;;  %v5338_v21 = vor.u32 %v5765_v9, %v5337_v18  ;;  %v5783_v37 = vld [vmem:[#allocation8 + $0xd4] sm:$0xf0]  ;;  %v5797_v18 = vld [vmem:[#allocation8 + $0x144] sm:$0xf0] }
 0xc23   : > { %3815 = vmatpush.bf16.msra.mxu0 %v5090_v60  ;;  %3857 = vmatpush.bf16.msra.mxu3 %v5222_v44  ;;  %v5763_v60 = vld [vmem:[#allocation8 + $0x34] sm:$0xf0]  ;;  %v5401_v44 = vld [vmem:[#allocation8 + $0xc0] sm:$0xf] }
 0xc24   : > { %3826 = vmatpush.bf16.msra.mxu1 %v5266_v29  ;;  %v5402_v30 = vor.u32 %v5781_v53, %v5401_v44  ;;  %v5377_v44 = vld [vmem:[#allocation8 + $0x90] sm:$0xf]  ;;  %v5775_v53 = vld [vmem:[#allocation8 + $0x94] sm:$0xf0] }
 0xc25   : > { %3843 = vmatpush.bf16.msra.mxu2 %v5094_v43  ;;  %v5803_v43 = vld [vmem:[#allocation8 + $0x174] sm:$0xf0] }
 0xc27   : > { %3816 = vmatpush.bf16.msra.mxu0 %v5074_v25  ;;  %v5393_v25 = vld [vmem:[#allocation8 + $0xb0] sm:$0xf] }
 0xc28   : > { %v5969_v34 = vpop.eup %5968  ;;  %3827 = vmatpush.bf16.msra.mxu1 %v5250_v14  ;;  %v5361_v14 = vld [vmem:[#allocation8 + $0x70] sm:$0xf] }
 0xc29   : > { %v3410_v3 = vmul.f32 %v5969_v34, %v7225_v57  ;;  %vm3416_vm12 = vweird.f32 %v5969_v34  ;;  %v5362_v11 = vor.u32 %v5771_v7, %v5361_v14 }
 0xc2a   : > { %vm3417_vm14 = vmor %vm3415_vm13, %vm3416_vm12 }
 0xc2b   : > { %v3411_v8 = vmul.f32 %v5969_v34, %v3410_v3  ;;  %v5187_v3 = vld [vmem:[#allocation7 + $0x118] sm:$0xf0]  ;;  %3817 = vmatpush.bf16.msra.mxu0 %v5058_v2  ;;  %v5799_v2 = vld [vmem:[#allocation8 + $0x154] sm:$0xf0] }
 0xc2c   : > { %3828 = vmatpush.bf16.msra.mxu1 %v5234_v5  ;;  %v5346_v5 = vor.u32 %v5767_v20, %v5345_v45 }
 0xc2d   : > { %v3412_v19 = vmul.f32 0.5, %v3411_v8  ;;  %v5426_v8 = vor.u32 %v5787_v49, %v5425_v22 }
 0xc2f   : > { %v3413_v58 = vsub.f32 1.5, %v3412_v19  ;;  %v5417_v19 = vld [vmem:[#allocation8 + $0xe0] sm:$0xf] }
 0xc30   : > { %3829 = vmatpush.bf16.msra.mxu1 %v5218_v61  ;;  %v5418_v15 = vor.u32 %v5785_v41, %v5417_v19  ;;  %v5330_v61 = vor.u32 %v5763_v60, %v5329_v47  ;;  %v5546_v19 = vor.u32 %v5817_v13, %v5545_v50  ;;  %v5465_v41 = vld [vmem:[#allocation8 + $0x140] sm:$0xf]  ;;  %v5347_v50 = vld [vmem:[#allocation8 + $0x58] sm:$0xf0] }
 0xc31   : > { %v3414_v59 = vmul.f32 %v5969_v34, %v3413_v58  ;;  %v5409_v58 = vld [vmem:[#allocation8 + $0xd0] sm:$0xf] }
 0xc32   : > { %v5410_v10 = vor.u32 %v5783_v37, %v5409_v58  ;;  %v5770_v58 = vld [vmem:[#allocation8 + $0x74] sm:$0xf]  ;;  %v5363_v37 = vld [vmem:[#allocation8 + $0x78] sm:$0xf0] }
 0xc33   : > { %v3418_v24 = vsel %vm3417_vm14, %v5969_v34, %v3414_v59  ;;  %v5078_v34 = vor.u32 %v5697_v40, %v5075_v51  ;;  %v5489_v59 = vld [vmem:[#allocation8 + $0x170] sm:$0xf]  ;;  %v5321_v40 = vld [vmem:[#allocation8 + $0x20] sm:$0xf]  ;;  %v5801_v51 = vld [vmem:[#allocation8 + $0x164] sm:$0xf0]  ;;  %v5366_v47 = vor.u32 %v5770_v58, %v5363_v37 }
 0xc34   : > { %v3421_v29 = vmul.f32 %v3418_v24, %v7206_v35  ;;  %v3422_v57 = vmul.f32 %v3418_v24, %v7209_v36  ;;  %v5206_v35 = vor.u32 %v5729_v26, %v5203_v23  ;;  %v5725_v36 = vld [vmem:[#allocation7 + $0x10c] sm:$0xf]  ;;  %3830 = vmatpush.bf16.msra.mxu1 %v5202_v42  ;;  %v5490_v63 = vor.u32 %v5803_v43, %v5489_v59  ;;  %v5779_v42 = vld [vmem:[#allocation8 + $0xb4] sm:$0xf0] }
 0xc35   : > { %3844 = vmatpush.bf16.msra.mxu2 %v5078_v34  ;;  %v5190_v52 = vor.u32 %v5725_v36, %v5187_v3  ;;  %v5394_v16 = vor.u32 %v5779_v42, %v5393_v25  ;;  %v5759_v36 = vld [vmem:[#allocation8 + $0x14] sm:$0xf0]  ;;  %v5473_v3 = vld [vmem:[#allocation8 + $0x150] sm:$0xf] }
 0xc36   : > { %v3423_v54 = vpack.c.bf16 %v3421_v29, %v3419_v0  ;;  %v3424_v32 = vpack.c.bf16 %v3422_v57, %v3420_v28  ;;  %3858 = vmatpush.bf16.msra.mxu3 %v5206_v35  ;;  %v5761_v0 = vld [vmem:[#allocation8 + $0x24] sm:$0xf0]  ;;  %v5481_v29 = vld [vmem:[#allocation8 + $0x160] sm:$0xf]  ;;  %v5314_v49 = vor.u32 %v5759_v36, %v5313_v17  ;;  %v5811_v58 = vld [vmem:[#allocation8 + $0x1b4] sm:$0xf0] }
 0xc37   : > { %v5322_v57 = vor.u32 %v5761_v0, %v5321_v40  ;;  %v5482_v26 = vor.u32 %v5801_v51, %v5481_v29  ;;  %v5378_v40 = vor.u32 %v5775_v53, %v5377_v44  ;;  %v5815_v0 = vld [vmem:[#allocation8 + $0x1d4] sm:$0xf0]  ;;  %v5457_v29 = vld [vmem:[#allocation8 + $0x130] sm:$0xf]  ;;  %v5529_v17 = vld [vmem:[#allocation8 + $0x1c0] sm:$0xf] }
 0xc38   : > { %3762 = vmatmul.bf16.vlgmr.msrb.gmra.mxu0 %v3423_v54  ;;  %3776 = vmatmul.bf16.vlgmr.msrb.gmra.mxu1 %v3424_v32  ;;  %v5813_v36 = vld [vmem:[#allocation8 + $0x1c4] sm:$0xf0]  ;;  %v5419_v44 = vld [vmem:[#allocation8 + $0xe8] sm:$0xf0] }
 0xc39   : > { %3790 = vmatmul.bf16.vlgmr.msrb.gmra.mxu2 %v3423_v54  ;;  %3804 = vmatmul.bf16.vlgmr.msrb.gmra.mxu3 %v3424_v32 }
 0xc3a   : > { %3831 = vmatpush.bf16.msra.mxu1 %v5186_v31  ;;  %3845 = vmatpush.bf16.msra.mxu2 %v5062_v27  ;;  %v5385_v31 = vld [vmem:[#allocation8 + $0xa0] sm:$0xf]  ;;  %v5777_v27 = vld [vmem:[#allocation8 + $0xa4] sm:$0xf0] }
 0xc3b   : > { %3859 = vmatpush.bf16.msra.mxu3 %v5190_v52  ;;  %4267 = vmatpush.bf16.msrb.mxu0 %v5362_v11  ;;  %v5386_v20 = vor.u32 %v5777_v27, %v5385_v31 }
 0xc3e   : > { %4281 = vmatpush.bf16.msrb.mxu1 %v5426_v8  ;;  %4295 = vmatpush.bf16.msrb.mxu2 %v5490_v63  ;;  %v5474_v8 = vor.u32 %v5799_v2, %v5473_v3  ;;  %v5449_v2 = vld [vmem:[#allocation8 + $0x120] sm:$0xf] }
 0xc3f   : > { %4268 = vmatpush.bf16.msrb.mxu0 %v5354_v48  ;;  %4309 = vmatpush.bf16.msrb.mxu3 %v5554_v6  ;;  %v5305_v48 = vld [vmem:[#allocation8] sm:$0xf]  ;;  %v5773_v6 = vld [vmem:[#allocation8 + $0x84] sm:$0xf0] }
 0xc42   : > { %4282 = vmatpush.bf16.msrb.mxu1 %v5418_v15  ;;  %4296 = vmatpush.bf16.msrb.mxu2 %v5482_v26 }
 0xc43   : > { %4269 = vmatpush.bf16.msrb.mxu0 %v5346_v5  ;;  %v5757_v5 = vld [vmem:[#allocation8 + $0x4] sm:$0xf0]  ;;  %4310 = vmatpush.bf16.msrb.mxu3 %v5546_v19 }
 0xc46   : > { %4283 = vmatpush.bf16.msrb.mxu1 %v5410_v10  ;;  %4297 = vmatpush.bf16.msrb.mxu2 %v5474_v8  ;;  %v5766_v8 = vld [vmem:[#allocation8 + $0x54] sm:$0xf] }
 0xc47   : > { %4270 = vmatpush.bf16.msrb.mxu0 %v5338_v21  ;;  %v5306_v21 = vor.u32 %v5757_v5, %v5305_v48 }
 0xc48   : > { %3818 = vmatmul.bf16.vlgmr.msra.gmra.mxu0 %v3423_v54  ;;  %3832 = vmatmul.bf16.vlgmr.msra.gmra.mxu1 %v3424_v32 }
 0xc49   : > { %3846 = vmatmul.bf16.vlgmr.msra.gmra.mxu2 %v3423_v54  ;;  %3860 = vmatmul.bf16.vlgmr.msra.gmra.mxu3 %v3424_v32  ;;  %v3427_v54 = vperm.slane %v7243_v12, 1 }
 0xc4a   : > { %4284 = vmatpush.bf16.msrb.mxu1 %v5402_v30 }
 0xc4b   : > { %4271 = vmatpush.bf16.msrb.mxu0 %v5330_v61  ;;  %v3428_v61 = vperm.slane %v7243_v12, 2 }
 0xc4e   : > { %4285 = vmatpush.bf16.msrb.mxu1 %v5394_v16  ;;  %v5358_v16 = vor.u32 %v5768_v55, %v5355_v39 }
 0xc4f   : > { %4272 = vmatpush.bf16.msrb.mxu0 %v5322_v57 }
 0xc52   : > { %4286 = vmatpush.bf16.msrb.mxu1 %v5386_v20  ;;  %v3429_v20 = vperm.slane %v7243_v12, 3 }
 0xc53   : > { %4273 = vmatpush.bf16.msrb.mxu0 %v5314_v49  ;;  %v5427_v49 = vld [vmem:[#allocation8 + $0xf8] sm:$0xf0] }
 0xc56   : > { %4287 = vmatpush.bf16.msrb.mxu1 %v5378_v40  ;;  %v5764_v40 = vld [vmem:[#allocation8 + $0x44] sm:$0xf] }
 0xc57   : > { %4274 = vmatpush.bf16.msrb.mxu0 %v5306_v21 }
 0xc5b   : > { %4323 = vmatpush.bf16.msra.mxu0 %v5366_v47 }
 0xc5f   : > { %4324 = vmatpush.bf16.msra.mxu0 %v5358_v16  ;;  %v5789_v16 = vld [vmem:[#allocation8 + $0x104] sm:$0xf0] }
 0xcb5   : > { %v3763_v56 = vpop.f32.mrf.mxu0  ;;  %v3777_v24 = vpop.f32.mrf.mxu1 }
 0xcb6   : > { %v3764_v28 = vadd.f32 %v3763_v56, %v3426_v4  ;;  %v5537_v56 = vld [vmem:[#allocation8 + $0x1d0] sm:$0xf] }
 0xcb7   : > { %v5538_v25 = vor.u32 %v5815_v0, %v5537_v56  ;;  %v5339_v0 = vld [vmem:[#allocation8 + $0x48] sm:$0xf0] }
 0xcb8   : > { %v7246_v23 = vadd.f32 %v3777_v24, %v3764_v28  ;;  %v5795_v28 = vld [vmem:[#allocation8 + $0x134] sm:$0xf0] }
 0xcb9   : > { %v5458_v42 = vor.u32 %v5795_v28, %v5457_v29  ;;  %4311 = vmatpush.bf16.msrb.mxu3 %v5538_v25  ;;  %v5782_v25 = vld [vmem:[#allocation8 + $0xd4] sm:$0xf] }
 0xcba   : > { %v3874_v32 = vmul.f32 0.044715, %v7246_v23 }
 0xcbc   : > { %v3882_v1 = vmul.f32 %v3874_v32, %v7246_v23  ;;  %v3791_v34 = vpop.f32.mrf.mxu2  ;;  %v3805_v35 = vpop.f32.mrf.mxu3 }
 0xcbd   : > { %v3792_v14 = vadd.f32 %v3791_v34, %v3427_v54  ;;  %v3765_v7 = vpop.f32.mrf.mxu0  ;;  %v3779_v22 = vpop.f32.mrf.mxu1 }
 0xcbe   : > { %v3890_v52 = vmul.f32 %v3882_v1, %v7246_v23  ;;  %v3766_v11 = vadd.f32 %v3765_v7, %v3426_v4  ;;  %v5466_v4 = vor.u32 %v5797_v18, %v5465_v41  ;;  %v5369_v1 = vld [vmem:[#allocation8 + $0x80] sm:$0xf]  ;;  %v5530_v7 = vor.u32 %v5813_v36, %v5529_v17 }
 0xcbf   : > { %v7254_v45 = vadd.f32 %v3805_v35, %v3792_v14  ;;  %v5370_v14 = vor.u32 %v5773_v6, %v5369_v1  ;;  %v5350_v18 = vor.u32 %v5766_v8, %v5347_v50 }
 0xcc0   : > { %v3898_v9 = vadd.f32 %v3890_v52, %v7246_v23  ;;  %v7257_v15 = vadd.f32 %v3779_v22, %v3766_v11  ;;  %4298 = vmatpush.bf16.msrb.mxu2 %v5466_v4  ;;  %v5786_v22 = vld [vmem:[#allocation8 + $0xf4] sm:$0xf]  ;;  %v5793_v11 = vld [vmem:[#allocation8 + $0x124] sm:$0xf0]  ;;  %4312 = vmatpush.bf16.msrb.mxu3 %v5530_v7  ;;  %v5521_v4 = vld [vmem:[#allocation8 + $0x1b0] sm:$0xf] }
 0xcc1   : > { %v3875_v10 = vmul.f32 0.044715, %v7254_v45  ;;  %v5430_v52 = vor.u32 %v5786_v22, %v5427_v49  ;;  %v5450_v19 = vor.u32 %v5793_v11, %v5449_v2  ;;  %4288 = vmatpush.bf16.msrb.mxu1 %v5370_v14  ;;  %4325 = vmatpush.bf16.msra.mxu0 %v5350_v18  ;;  %v5331_v14 = vld [vmem:[#allocation8 + $0x38] sm:$0xf0]  ;;  %v5505_v18 = vld [vmem:[#allocation8 + $0x190] sm:$0xf] }
 0xcc2   : > { %v3906_v60 = vmul.f32 0.7978846, %v3898_v9  ;;  %v3878_v59 = vmul.f32 0.044715, %v7257_v15  ;;  %v7280_v9 = vmul.f32 0.5, %v7246_v23  ;;  %v3870_v8 = vmul.f32 0.5, %v7257_v15 }
 0xcc3   : > { %v3883_v43 = vmul.f32 %v3875_v10, %v7254_v45  ;;  %v5441_v23 = vld [vmem:[#allocation8 + $0x110] sm:$0xf] }
 0xcc4   : > { %v3886_v24 = vmul.f32 %v3878_v59, %v7257_v15  ;;  %v3793_v63 = vpop.f32.mrf.mxu2  ;;  %v3807_v30 = vpop.f32.mrf.mxu3  ;;  %5970 = vtanh.f32 %v3906_v60  ;;  %4299 = vmatpush.bf16.msrb.mxu2 %v5458_v42  ;;  %v5522_v59 = vor.u32 %v5811_v58, %v5521_v4 }
 0xcc5   : > { %v3891_v57 = vmul.f32 %v3883_v43, %v7254_v45  ;;  %v3794_v51 = vadd.f32 %v3793_v63, %v3427_v54  ;;  %v3819_v26 = vpop.f32.mrf.mxu0  ;;  %v3833_v32 = vpop.f32.mrf.mxu1  ;;  %4337 = vmatpush.bf16.msra.mxu1 %v5430_v52  ;;  %v5784_v43 = vld [vmem:[#allocation8 + $0xe4] sm:$0xf] }
 0xcc6   : > { %v3894_v34 = vmul.f32 %v3886_v24, %v7257_v15  ;;  %v3820_v35 = vadd.f32 %v3819_v26, %v3428_v61  ;;  %v5422_v63 = vor.u32 %v5784_v43, %v5419_v44  ;;  %v5513_v26 = vld [vmem:[#allocation8 + $0x1a0] sm:$0xf]  ;;  %4313 = vmatpush.bf16.msrb.mxu3 %v5522_v59 }
 0xcc7   : > { %v3899_v54 = vadd.f32 %v3891_v57, %v7254_v45  ;;  %v7271_v3 = vadd.f32 %v3807_v30, %v3794_v51  ;;  %v5791_v30 = vld [vmem:[#allocation8 + $0x114] sm:$0xf0]  ;;  %v5342_v51 = vor.u32 %v5764_v40, %v5339_v0  ;;  %v5483_v40 = vld [vmem:[#allocation8 + $0x168] sm:$0xf0]  ;;  %v5497_v0 = vld [vmem:[#allocation8 + $0x180] sm:$0xf] }
 0xcc8   : > { %v3902_v31 = vadd.f32 %v3894_v34, %v7257_v15  ;;  %v7274_v27 = vadd.f32 %v3833_v32, %v3820_v35  ;;  %4300 = vmatpush.bf16.msrb.mxu2 %v5450_v19  ;;  %v5442_v57 = vor.u32 %v5791_v30, %v5441_v23  ;;  %v5809_v32 = vld [vmem:[#allocation8 + $0x1a4] sm:$0xf0]  ;;  %v5411_v34 = vld [vmem:[#allocation8 + $0xd8] sm:$0xf0]  ;;  %v5433_v35 = vld [vmem:[#allocation8 + $0x100] sm:$0xf] }
 0xcc9   : > { %v3907_v13 = vmul.f32 0.7978846, %v3899_v54  ;;  %v3879_v48 = vmul.f32 0.044715, %v7271_v3  ;;  %4338 = vmatpush.bf16.msra.mxu1 %v5422_v63  ;;  %v5514_v1 = vor.u32 %v5809_v32, %v5513_v26  ;;  %4326 = vmatpush.bf16.msra.mxu0 %v5342_v51  ;;  %v5414_v36 = vor.u32 %v5782_v25, %v5411_v34  ;;  %v5762_v54 = vld [vmem:[#allocation8 + $0x34] sm:$0xf] }
 0xcca   : > { %v3910_v5 = vmul.f32 0.7978846, %v3902_v31  ;;  %v3876_v41 = vmul.f32 0.044715, %v7274_v27  ;;  %v5971_v37 = vpop.eup %5970  ;;  %v5434_v2 = vor.u32 %v5789_v16, %v5433_v35  ;;  %v5802_v31 = vld [vmem:[#allocation8 + $0x174] sm:$0xf] }
 0xccb   : > { %5972 = vtanh.f32 %v3907_v13  ;;  %v3887_v21 = vmul.f32 %v3879_v48, %v7271_v3  ;;  %v3922_v6 = vadd.f32 1.0, %v5971_v37  ;;  %4314 = vmatpush.bf16.msrb.mxu3 %v5514_v1  ;;  %v5807_v15 = vld [vmem:[#allocation8 + $0x194] sm:$0xf0]  ;;  %v5760_v23 = vld [vmem:[#allocation8 + $0x24] sm:$0xf] }
 0xccc   : > { %5974 = vtanh.f32 %v3910_v5  ;;  %v3884_v10 = vmul.f32 %v3876_v41, %v7274_v27  ;;  %v3847_v47 = vpop.f32.mrf.mxu2  ;;  %v3861_v60 = vpop.f32.mrf.mxu3  ;;  %4301 = vmatpush.bf16.msrb.mxu2 %v5442_v57  ;;  %v5334_v5 = vor.u32 %v5762_v54, %v5331_v14  ;;  %v5491_v41 = vld [vmem:[#allocation8 + $0x178] sm:$0xf0]  ;;  %v5506_v44 = vor.u32 %v5807_v15, %v5505_v18  ;;  %v5778_v51 = vld [vmem:[#allocation8 + $0xb4] sm:$0xf] }
 0xccd   : > { %v3895_v53 = vmul.f32 %v3887_v21, %v7271_v3  ;;  %v3848_v56 = vadd.f32 %v3847_v47, %v3429_v20  ;;  %v3821_v24 = vpop.f32.mrf.mxu0  ;;  %v3835_v39 = vpop.f32.mrf.mxu1  ;;  %4339 = vmatpush.bf16.msra.mxu1 %v5414_v36  ;;  %v3930_v58 = vmul.f32 %v3922_v6, %v7280_v9  ;;  %v5494_v37 = vor.u32 %v5802_v31, %v5491_v41  ;;  %v5403_v47 = vld [vmem:[#allocation8 + $0xc8] sm:$0xf0]  ;;  %v5395_v26 = vld [vmem:[#allocation8 + $0xb8] sm:$0xf0]  ;;  %v5818_v32 = vld [vmem:[#allocation8 + $0x1f4] sm:$0xf] }
 0xcce   : > { %v3892_v29 = vmul.f32 %v3884_v10, %v7274_v27  ;;  %v3822_v28 = vadd.f32 %v3821_v24, %v3428_v61  ;;  %v5780_v10 = vld [vmem:[#allocation8 + $0xc4] sm:$0xf]  ;;  %4327 = vmatpush.bf16.msra.mxu0 %v5334_v5  ;;  %v5555_v1 = vld [vmem:[#allocation8 + $0x1f8] sm:$0xf0]  ;;  %v5758_v34 = vld [vmem:[#allocation8 + $0x14] sm:$0xf] }
 0xccf   : > { %v3903_v42 = vadd.f32 %v3895_v53, %v7271_v3  ;;  %v7291_v55 = vadd.f32 %v3861_v60, %v3848_v56  ;;  %v5323_v53 = vld [vmem:[#allocation8 + $0x28] sm:$0xf0]  ;;  %v5800_v56 = vld [vmem:[#allocation8 + $0x164] sm:$0xf]  ;;  %v5406_v63 = vor.u32 %v5780_v10, %v5403_v47  ;;  %4315 = vmatpush.bf16.msrb.mxu3 %v5506_v44  ;;  %v5315_v35 = vld [vmem:[#allocation8 + $0x18] sm:$0xf0]  ;;  %v5558_v36 = vor.u32 %v5818_v32, %v5555_v1 }
 0xcd0   : > { %v3900_v17 = vadd.f32 %v3892_v29, %v7274_v27  ;;  %v7294_v61 = vadd.f32 %v3835_v39, %v3822_v28  ;;  %4302 = vmatpush.bf16.msrb.mxu2 %v5434_v2  ;;  %v5326_v30 = vor.u32 %v5760_v23, %v5323_v53  ;;  %v5805_v29 = vld [vmem:[#allocation8 + $0x184] sm:$0xf0]  ;;  %v5486_v57 = vor.u32 %v5800_v56, %v5483_v40  ;;  %v5547_v5 = vld [vmem:[#allocation8 + $0x1e8] sm:$0xf0]  ;;  %v5774_v47 = vld [vmem:[#allocation8 + $0x94] sm:$0xf] }
 0xcd1   : > { %v5973_v7 = vpop.eup %5972  ;;  %v3911_v22 = vmul.f32 0.7978846, %v3903_v42  ;;  %v3877_v49 = vmul.f32 0.044715, %v7291_v55  ;;  %4340 = vmatpush.bf16.msra.mxu1 %v5406_v63  ;;  %v5498_v42 = vor.u32 %v5805_v29, %v5497_v0  ;;  %v5398_v39 = vor.u32 %v5778_v51, %v5395_v26  ;;  %v5814_v44 = vld [vmem:[#allocation8 + $0x1d4] sm:$0xf] }
 0xcd2   : > { %v5975_v52 = vpop.eup %5974  ;;  %v7297_v11 = vadd.f32 1.0, %v5973_v7  ;;  %v3908_v50 = vmul.f32 0.7978846, %v3900_v17  ;;  %v3880_v13 = vmul.f32 0.044715, %v7294_v61  ;;  %v3867_v6 = vmul.f32 0.5, %v7254_v45  ;;  %4328 = vmatpush.bf16.msra.mxu0 %v5326_v30 }
 0xcd3   : > { %v3926_v48 = vadd.f32 1.0, %v5975_v52  ;;  %5976 = vtanh.f32 %v3911_v22  ;;  %v3885_v19 = vmul.f32 %v3877_v49, %v7291_v55  ;;  %v3871_v54 = vmul.f32 0.5, %v7271_v3  ;;  %v5798_v49 = vld [vmem:[#allocation8 + $0x154] sm:$0xf]  ;;  %4316 = vmatpush.bf16.msrb.mxu3 %v5498_v42  ;;  %v5475_v52 = vld [vmem:[#allocation8 + $0x158] sm:$0xf0] }
 0xcd4   : > { %v3888_v21 = vmul.f32 %v3880_v13, %v7294_v61  ;;  %v3849_v4 = vpop.f32.mrf.mxu2  ;;  %5978 = vtanh.f32 %v3908_v50  ;;  %v3863_v9 = vpop.f32.mrf.mxu3  ;;  %4351 = vmatpush.bf16.msra.mxu2 %v5494_v37  ;;  %v5318_v22 = vor.u32 %v5758_v34, %v5315_v35  ;;  %v3931_v50 = vmul.f32 %v7297_v11, %v3867_v6  ;;  %v5796_v37 = vld [vmem:[#allocation8 + $0x144] sm:$0xf]  ;;  %v5467_v11 = vld [vmem:[#allocation8 + $0x148] sm:$0xf0]  ;;  %v5539_v23 = vld [vmem:[#allocation8 + $0x1d8] sm:$0xf0] }
 0xcd5   : > { %v3893_v60 = vmul.f32 %v3885_v19, %v7291_v55  ;;  %v3850_v59 = vadd.f32 %v3849_v4, %v3429_v20  ;;  %v3934_v43 = vmul.f32 %v3926_v48, %v3870_v8  ;;  %v5776_v8 = vld [vmem:[#allocation8 + $0xa4] sm:$0xf]  ;;  %4341 = vmatpush.bf16.msra.mxu1 %v5398_v39  ;;  %v5478_v3 = vor.u32 %v5798_v49, %v5475_v52  ;;  %v5387_v48 = vld [vmem:[#allocation8 + $0xa8] sm:$0xf0]  ;;  %v5794_v53 = vld [vmem:[#allocation8 + $0x134] sm:$0xf] }
 0xcd6   : > { %v3896_v24 = vmul.f32 %v3888_v21, %v7294_v61  ;;  %v5816_v19 = vld [vmem:[#allocation8 + $0x1e4] sm:$0xf]  ;;  %v5390_v18 = vor.u32 %v5776_v8, %v5387_v48  ;;  %4329 = vmatpush.bf16.msra.mxu0 %v5318_v22  ;;  %v5531_v0 = vld [vmem:[#allocation8 + $0x1c8] sm:$0xf0]  ;;  %v3872_v32 = vmul.f32 0.5, %v7294_v61 }
 0xcd7   : > { %v3901_v28 = vadd.f32 %v3893_v60, %v7291_v55  ;;  %v7309_v12 = vadd.f32 %v3863_v9, %v3850_v59  ;;  %v7311_v20 = vpack.c.bf16 %v3934_v43, %v3930_v58  ;;  %4365 = vmatpush.bf16.msra.mxu3 %v5558_v36  ;;  %v5550_v21 = vor.u32 %v5816_v19, %v5547_v5  ;;  %v5756_v4 = vld [vmem:[#allocation8 + $0x4] sm:$0xf]  ;;  %v5307_v58 = vld [vmem:[#allocation8 + $0x8] sm:$0xf0]  ;;  %v5379_v60 = vld [vmem:[#allocation8 + $0x98] sm:$0xf0] }
 0xcd8   : > { %v3904_v25 = vadd.f32 %v3896_v24, %v7294_v61  ;;  %4352 = vmatpush.bf16.msra.mxu2 %v5486_v57  ;;  %v5310_v10 = vor.u32 %v5756_v4, %v5307_v58  ;;  %v5470_v43 = vor.u32 %v5796_v37, %v5467_v11  ;;  %v5542_v24 = vor.u32 %v5814_v44, %v5539_v23  ;;  %v5459_v9 = vld [vmem:[#allocation8 + $0x138] sm:$0xf0]  ;;  %v5812_v40 = vld [vmem:[#allocation8 + $0x1c4] sm:$0xf]  ;;  %v5371_v26 = vld [vmem:[#allocation8 + $0x88] sm:$0xf0] }
 0xcd9   : > { %v5977_v16 = vpop.eup %5976  ;;  %v3881_v17 = vmul.f32 0.044715, %v7309_v12  ;;  %4275 = vmatmul.bf16.vlgmr.msrb.gmra.mxu0 %v7311_v20  ;;  %v3909_v2 = vmul.f32 0.7978846, %v3901_v28  ;;  %4342 = vmatpush.bf16.msra.mxu1 %v5390_v18  ;;  %v5382_v30 = vor.u32 %v5774_v47, %v5379_v60  ;;  %v3868_v28 = vmul.f32 0.5, %v7274_v27 }
 0xcda   : > { %v3927_v14 = vadd.f32 1.0, %v5977_v16  ;;  %v3912_v7 = vmul.f32 0.7978846, %v3904_v25  ;;  %v5979_v45 = vpop.eup %5978  ;;  %4330 = vmatpush.bf16.msra.mxu0 %v5310_v10  ;;  %v5462_v57 = vor.u32 %v5794_v53, %v5459_v9  ;;  %v5772_v51 = vld [vmem:[#allocation8 + $0x84] sm:$0xf]  ;;  %v5534_v1 = vor.u32 %v5812_v40, %v5531_v0 }
 0xcdb   : > { %v3889_v31 = vmul.f32 %v3881_v17, %v7309_v12  ;;  %v3924_v56 = vadd.f32 1.0, %v5979_v45  ;;  %4366 = vmatpush.bf16.msra.mxu3 %v5550_v21  ;;  %v5792_v42 = vld [vmem:[#allocation8 + $0x124] sm:$0xf]  ;;  %v5451_v39 = vld [vmem:[#allocation8 + $0x128] sm:$0xf0]  ;;  %v5374_v27 = vor.u32 %v5772_v51, %v5371_v26 }
 0xcdc   : > { %5980 = vtanh.f32 %v3912_v7  ;;  %v3935_v13 = vmul.f32 %v3927_v14, %v3871_v54  ;;  %4353 = vmatpush.bf16.msra.mxu2 %v5478_v3  ;;  %v5810_v6 = vld [vmem:[#allocation8 + $0x1b4] sm:$0xf]  ;;  %v5523_v17 = vld [vmem:[#allocation8 + $0x1b8] sm:$0xf0]  ;;  %v5454_v36 = vor.u32 %v5792_v42, %v5451_v39  ;;  %v5808_v45 = vld [vmem:[#allocation8 + $0x1a4] sm:$0xf] }
 0xcdd   : > { %v3897_v41 = vmul.f32 %v3889_v31, %v7309_v12  ;;  %5982 = vtanh.f32 %v3909_v2  ;;  %4343 = vmatpush.bf16.msra.mxu1 %v5382_v30  ;;  %v3932_v35 = vmul.f32 %v3924_v56, %v3868_v28  ;;  %v5790_v14 = vld [vmem:[#allocation8 + $0x114] sm:$0xf]  ;;  %v5443_v7 = vld [vmem:[#allocation8 + $0x118] sm:$0xf0]  ;;  %v5526_v61 = vor.u32 %v5810_v6, %v5523_v17  ;;  %v5435_v3 = vld [vmem:[#allocation8 + $0x108] sm:$0xf0] }
 0xcde   : > { %v7321_v15 = vpack.c.bf16 %v3935_v13, %v3931_v50  ;;  %v3869_v2 = vmul.f32 0.5, %v7291_v55  ;;  %v3873_v31 = vmul.f32 0.5, %v7309_v12  ;;  %v5446_v8 = vor.u32 %v5790_v14, %v5443_v7  ;;  %v5515_v50 = vld [vmem:[#allocation8 + $0x1a8] sm:$0xf0]  ;;  %v5788_v13 = vld [vmem:[#allocation8 + $0x104] sm:$0xf] }
 0xcdf   : > { %v3905_v59 = vadd.f32 %v3897_v41, %v7309_v12  ;;  %4367 = vmatpush.bf16.msra.mxu3 %v5542_v24  ;;  %v5518_v5 = vor.u32 %v5808_v45, %v5515_v50  ;;  %v5438_v55 = vor.u32 %v5788_v13, %v5435_v3  ;;  %v5806_v18 = vld [vmem:[#allocation8 + $0x194] sm:$0xf]  ;;  %v5507_v21 = vld [vmem:[#allocation8 + $0x198] sm:$0xf0]  ;;  %v5499_v4 = vld [vmem:[#allocation8 + $0x188] sm:$0xf0] }
 0xce0   : > { %4289 = vmatmul.bf16.vlgmr.msrb.gmra.mxu1 %v7321_v15  ;;  %4354 = vmatpush.bf16.msra.mxu2 %v5470_v43  ;;  %v5510_v12 = vor.u32 %v5806_v18, %v5507_v21  ;;  %v3372_v10 = vld [vmem:[%s7357_s11] sm:$0x3] }
 0xce1   : > { %v3913_v63 = vmul.f32 0.7978846, %v3905_v59  ;;  %4344 = vmatpush.bf16.msra.mxu1 %v5374_v27  ;;  %v3943_v47 = vperm.slane %v3372_v10, 0  ;;  %v3944_v0 = vperm.slane %v3372_v10, 1 }
 0xce2   : > { %v5981_v29 = vpop.eup %5980 }
 0xce3   : > { %v3928_v25 = vadd.f32 1.0, %v5981_v29  ;;  %5984 = vtanh.f32 %v3913_v63  ;;  %v5983_v34 = vpop.eup %5982  ;;  %4368 = vmatpush.bf16.msra.mxu3 %v5534_v1 }
 0xce4   : > { %4355 = vmatpush.bf16.msra.mxu2 %v5462_v57  ;;  %v3925_v22 = vadd.f32 1.0, %v5983_v34 }
 0xce5   : > { %v3936_v16 = vmul.f32 %v3928_v25, %v3872_v32 }
 0xce6   : > { %v3933_v48 = vmul.f32 %v3925_v22, %v3869_v2 }
 0xce7   : > { %v3940_v54 = vpack.c.bf16 %v3936_v16, %v3932_v35  ;;  %4369 = vmatpush.bf16.msra.mxu3 %v5526_v61 }
 0xce8   : > { %4356 = vmatpush.bf16.msra.mxu2 %v5454_v36 }
 0xce9   : > { %v5985_v49 = vpop.eup %5984  ;;  %4303 = vmatmul.bf16.vlgmr.msrb.gmra.mxu2 %v3940_v54  ;;  %4331 = vmatmul.bf16.vlgmr.msra.gmra.mxu0 %v7311_v20  ;;  %v5804_v20 = vld [vmem:[#allocation8 + $0x184] sm:$0xf] }
 0xcea   : > { %v3929_v52 = vadd.f32 1.0, %v5985_v49  ;;  %v5502_v58 = vor.u32 %v5804_v20, %v5499_v4 }
 0xceb   : > { %4370 = vmatpush.bf16.msra.mxu3 %v5518_v5 }
 0xcec   : > { %v3937_v19 = vmul.f32 %v3929_v52, %v3873_v31  ;;  %4357 = vmatpush.bf16.msra.mxu2 %v5446_v8 }
 0xcee   : > { %v3941_v41 = vpack.c.bf16 %v3937_v19, %v3933_v48 }
 0xcef   : > { %4371 = vmatpush.bf16.msra.mxu3 %v5510_v12 }
 0xcf0   : > { %4317 = vmatmul.bf16.vlgmr.msrb.gmra.mxu3 %v3941_v41  ;;  %4345 = vmatmul.bf16.vlgmr.msra.gmra.mxu1 %v7321_v15 }
 0xcf1   : > { %4358 = vmatpush.bf16.msra.mxu2 %v5438_v55 }
 0xcf3   : > { %4372 = vmatpush.bf16.msra.mxu3 %v5502_v58 }
 0xcf9   : > { %4359 = vmatmul.bf16.vlgmr.msra.gmra.mxu2 %v3940_v54 }
 0xd00   : > { %4373 = vmatmul.bf16.vlgmr.msra.gmra.mxu3 %v3941_v41 }
 0xd56   : > { %v4276_v37 = vpop.f32.mrf.mxu0 }
 0xd57   : > { %v4277_v15 = vadd.f32 %v4276_v37, %v3943_v47 }
 0xd5d   : > { %v4290_v11 = vpop.f32.mrf.mxu1 }
 0xd5e   : > { %v4278_v59 = vpop.f32.mrf.mxu0  ;;  %v4291_v43 = vadd.f32 %v4290_v11, %v4277_v15 }
 0xd5f   : > { %v4279_v9 = vadd.f32 %v4278_v59, %v3943_v47 }
 0xd65   : > { %v4292_v44 = vpop.f32.mrf.mxu1 }
 0xd66   : > { %v4293_v30 = vadd.f32 %v4292_v44, %v4279_v9  ;;  %v4332_v40 = vpop.f32.mrf.mxu0 }
 0xd67   : > { %v4333_v32 = vadd.f32 %v4332_v40, %v3944_v0 }
 0xd6c   : > { %v4304_v60 = vpop.f32.mrf.mxu2 }
 0xd6d   : > { %v4305_v23 = vadd.f32 %v4304_v60, %v4291_v43  ;;  %v4346_v28 = vpop.f32.mrf.mxu1 }
 0xd6e   : > { %v4347_v42 = vadd.f32 %v4346_v28, %v4333_v32  ;;  %v4334_v1 = vpop.f32.mrf.mxu0 }
 0xd73   : > { %v4318_v53 = vpop.f32.mrf.mxu3 }
 0xd74   : > { %v4319_v56 = vadd.f32 %v4318_v53, %v4305_v23  ;;  %v4306_v24 = vpop.f32.mrf.mxu2 }
 0xd75   : > { %v4307_v29 = vadd.f32 %v4306_v24, %v4293_v30  ;;  %v4348_v16 = vpop.f32.mrf.mxu1 }
 0xd76   : > { %v4379_v63 = vadd.f32 %v4319_v56, %v7145_v62  ;;  %v4335_v62 = vadd.f32 %v4334_v1, %v3944_v0 }
 0xd78   : > { %4383 = vst [vmem:[%s517_s27] sm:$0xff] %v4379_v63  ;;  %v4349_v27 = vadd.f32 %v4348_v16, %v4335_v62 }
 0xd7b   : > { %v4320_v57 = vpop.f32.mrf.mxu3 }
 0xd7c   : > { %v4321_v51 = vadd.f32 %v4320_v57, %v4307_v29  ;;  %v4360_v26 = vpop.f32.mrf.mxu2 }
 0xd7d   : > { %v4361_v39 = vadd.f32 %v4360_v26, %v4347_v42 }
 0xd7e   : > { %v4381_v25 = vadd.f32 %v4321_v51, %v7187_v46 }
 0xd80   : > { %4385 = vst [vmem:[%s517_s27 + $0x10] sm:$0xff] %v4381_v25 }
 0xd83   : > { %v4374_v34 = vpop.f32.mrf.mxu3 }
 0xd84   : > { %v4375_v35 = vadd.f32 %v4374_v34, %v4361_v39  ;;  %v4362_v17 = vpop.f32.mrf.mxu2 }
 0xd85   : > { %v4363_v36 = vadd.f32 %v4362_v17, %v4349_v27 }
 0xd86   : > { %v4380_v6 = vadd.f32 %v4375_v35, %v7148_v33 }
 0xd88   : > { %4384 = vst [vmem:[%s517_s27 + $0x8] sm:$0xff] %v4380_v6 }
 0xd8b   : > { %v4376_v54 = vpop.f32.mrf.mxu3 }
 0xd8c   : > { %v4377_v14 = vadd.f32 %v4376_v54, %v4363_v36 }
 0xd8e   : > { %v4382_v7 = vadd.f32 %v4377_v14, %v7190_v38 }
 0xd90   : > { %4386 = vst [vmem:[%s517_s27 + $0x18] sm:$0xff] %v4382_v7 }
 0xd91 PF: > { %s7440_s25 = sld [smem:[#allocation13_spill]] }
 0xd97   : > { %s25_s21 = sadd.s32 1, %s7440_s25  }
 0xd98   : > { %p22_p7 = scmp.ge.s32.totalorder %s25_s21, 4  }
 0xd9a   :  { %24 = sbr.rel (!%p22_p7) target bundleno = 6 (0x6), region = 137 }
 0xd9f   :  { %4408 = vsyncpa [#allocation4], 1 }
 0xda0   :  { %4410 = vsyncpa [#allocation4 + $0x1], 1 }
 0xda1   :  { %4411 = vsyncpa [#allocation6], 1 }
 0xda2   :  { %4412 = vsyncpa [#allocation9], 1 }

</bundles_post_ra>
